<compile_context>
chip_gen: v7x
topology: tpu7x:2x2x1
jax: 0.10.0
libtpu: 0.0.40
codegen_flags: <defaults>
</compile_context>

<pallas_src>
import functools

import numpy as np
import jax
import jax.numpy as jnp
from jax.experimental import pallas as pl
from jax.experimental.pallas import tpu as pltpu

EPS = 1e-5  # SwitchNorm2d default eps


# --------------------------------------------------------------------------- #
# Kernels
# --------------------------------------------------------------------------- #
def _pw_conv_stats_kernel(*refs, pre_affine):
    """1x1 conv (row-tile matmul) + per-(n,c) sum/sumsq accumulation.

    pre_affine=True additionally applies the folded SwitchNorm of the previous
    stage (y*scale + bias) fused with its ReLU before the matmul.
    Grid: (sample n ['parallel'], row tile t ['arbitrary', stats accumulation]).
    """
    if pre_affine:
        scale_ref, bias_ref, x_ref, w_ref, y_ref, stats_ref = refs
    else:
        x_ref, w_ref, y_ref, stats_ref = refs
        scale_ref = bias_ref = None

    f32, bf16 = jnp.float32, jnp.bfloat16
    t = pl.program_id(1)

    x = x_ref[0].astype(f32)                                     # (thw, cin)
    if pre_affine:
        x = jnp.maximum(x * scale_ref[0] + bias_ref[0], 0.0)     # prev SN + ReLU
    y = jnp.dot(x.astype(bf16), w_ref[...], preferred_element_type=f32)
    yb = y.astype(bf16)
    y_ref[0] = yb                                                # bf16 HBM storage

    # Stats over exactly the values that get stored (bf16-rounded), in f32.
    # TODO(synk): single-pass E[x^2]-E[x]^2 is cancellation-prone for |mean|>>std;
    # switch to a shifted / two-pass form for production scales.
    yf = yb.astype(f32)
    part = jnp.concatenate(
        [jnp.sum(yf, axis=0, keepdims=True),
         jnp.sum(yf * yf, axis=0, keepdims=True)], axis=0)       # (2, cout)

    @pl.when(t == 0)
    def _():
        stats_ref[0] = part

    @pl.when(t != 0)
    def _():
        stats_ref[0] = stats_ref[0] + part


def _conv3x3_stats_kernel(scale_ref, bias_ref, h1_ref, w2_ref, masks_ref,
                          y_ref, stats_ref, *, h, w):
    """sn1+relu -> 3x3 conv (stride 1, pad 1) as ONE im2col matmul, per sample."""
    f32, bf16 = jnp.float32, jnp.bfloat16
    hw = h * w

    a = h1_ref[0].astype(f32)                                    # (hw, p)
    a = jnp.maximum(a * scale_ref[0] + bias_ref[0], 0.0)         # sn1 + relu (folded)
    ab = a.astype(bf16)
    masks = masks_ref[...]                                       # (hw, 8) f32

    # Each tap is the flattened activation rolled by the (kh, kw) offset; the zero
    # padding of the conv is a precomputed multiplicative border mask (no runtime
    # integer div/mod).  Per-sample tiles mean no cross-sample wrap exists.
    # TODO(synk): bf16 sublane rolls with odd shifts are not reliably lowered by
    # Mosaic, so the roll stays f32; mask + single bf16 cast per tap follow.
    taps = []
    j = 0
    for kh in range(3):
        for kw in range(3):
            if kh == 1 and kw == 1:
                taps.append(ab)                                  # reuse pre-cast center
                continue
            shift = ((1 - kh) * w + (1 - kw)) % hw
            rolled = pltpu.roll(a, shift, axis=0)
            taps.append((rolled * masks[:, j:j + 1]).astype(bf16))
            j += 1
    patches = jnp.concatenate(taps, axis=-1)                     # (hw, 9p) bf16
    y = jnp.dot(patches, w2_ref[...], preferred_element_type=f32)
    yb = y.astype(bf16)
    y_ref[0] = yb

    yf = yb.astype(f32)
    stats_ref[0] = jnp.concatenate(
        [jnp.sum(yf, axis=0, keepdims=True),
         jnp.sum(yf * yf, axis=0, keepdims=True)], axis=0)


def _residual_kernel(scale_ref, bias_ref, h3_ref, x_ref, out_ref):
    """sn3 (folded scale/bias) + identity residual + ReLU (f32 add in-kernel)."""
    f32 = jnp.float32
    y = h3_ref[0].astype(f32) * scale_ref[0] + bias_ref[0]
    out = jnp.maximum(y + x_ref[0].astype(f32), 0.0)
    out_ref[0] = out.astype(out_ref.dtype)


# --------------------------------------------------------------------------- #
# Helpers
# --------------------------------------------------------------------------- #
def _row_tile(hw, max_rows):
    """Largest divisor of hw that is a multiple of 8 and <= max_rows (else hw)."""
    if hw <= max_rows:
        return hw
    start = max_rows - (max_rows % 8)
    for t in range(start, 7, -8):
        if hw % t == 0:
            return t
    return hw


def _vmem_limit_bytes():
    # v5e/v6e: 128 MiB VMEM per TensorCore, v7x: 64 MiB.  Leave headroom for the
    # compiler's own scratch; fall back to a value safe on every generation.
    try:
        cap = int(pltpu.get_tpu_info().vmem_capacity_bytes)
    except Exception:
        cap = 64 * 1024 * 1024
    return int(max(32 * 1024 * 1024, min(cap - 16 * 1024 * 1024, 96 * 1024 * 1024)))


def _border_masks(h, w):
    """(h*w, 8) f32 validity masks for the 8 non-center 3x3 taps (trace-time)."""
    ri, ci = np.mgrid[0:h, 0:w]
    ri = ri.reshape(-1)
    ci = ci.reshape(-1)
    cols = []
    for kh in range(3):
        for kw in range(3):
            if kh == 1 and kw == 1:
                continue
            sr, sc = ri + (kh - 1), ci + (kw - 1)
            cols.append((sr >= 0) & (sr < h) & (sc >= 0) & (sc < w))
    return np.stack(cols, axis=1).astype(np.float32)


def _sn_scale_bias(stats, snp, hw):
    """Fold SwitchNorm2d (training-mode batch stats) into per-(n,c) scale/bias.

    stats: (n, 2, c) f32 with [:,0,:]=sum over HW, [:,1,:]=sum of squares over HW.
    Returns scale, bias of shape (n, 1, c) so that sn(y) == y*scale + bias.
    """
    f32 = jnp.float32
    hwf = float(hw)
    s1 = stats[:, 0, :]
    s2 = stats[:, 1, :]
    mean_in = s1 / hwf                                            # (n, c)
    var_in = (s2 / hwf - mean_in * mean_in) * (hwf / (hwf - 1.0))  # torch .var() unbiased
    temp = var_in + mean_in * mean_in
    mean_ln = jnp.mean(mean_in, axis=1, keepdims=True)            # (n, 1)
    var_ln = jnp.mean(temp, axis=1, keepdims=True) - mean_ln * mean_ln
    mean_bn = jnp.mean(mean_in, axis=0, keepdims=True)            # (1, c)
    var_bn = jnp.mean(temp, axis=0, keepdims=True) - mean_bn * mean_bn
    mw = jax.nn.softmax(snp["mean_w"].astype(f32))
    vw = jax.nn.softmax(snp["var_w"].astype(f32))
    mean = mw[0] * mean_in + mw[1] * mean_ln + mw[2] * mean_bn
    var = vw[0] * var_in + vw[1] * var_ln + vw[2] * var_bn
    scale = snp["gamma"].reshape(1, -1).astype(f32) * jax.lax.rsqrt(var + EPS)
    bias = snp["beta"].reshape(1, -1).astype(f32) - mean * scale
    n, c = mean_in.shape
    return scale.reshape(n, 1, c), bias.reshape(n, 1, c)


# --------------------------------------------------------------------------- #
# Forward
# --------------------------------------------------------------------------- #
def bottleneck_forward(x_nhwc, params, *, max_rows_per_tile=2048):
    """Bottleneck forward (stride=1, downsample=None).  x_nhwc: (N, H, W, C).
    Activations cross HBM in bf16; accumulation / stats / residual add in f32."""
    f32, bf16 = jnp.float32, jnp.bfloat16
    n, h, w, cin = x_nhwc.shape
    hw = h * w
    assert hw > 1, "SwitchNorm unbiased IN variance needs H*W > 1"

    w1 = params["w1"].astype(bf16)                                        # (cin, p)
    w2 = params["w2"].reshape(-1, params["w2"].shape[-1]).astype(bf16)    # (9p, p)
    w3 = params["w3"].astype(bf16)                                        # (p, cout)
    p, cout = w1.shape[1], w3.shape[1]
    assert cin == cout, "identity residual requires inplanes == planes * 4"

    x = x_nhwc.astype(bf16).reshape(n, hw, cin)
    masks = jnp.asarray(_border_masks(h, w))                              # (hw, 8)

    thw = _row_tile(hw, max_rows_per_tile)
    nt = hw // thw
    vmem_limit = _vmem_limit_bytes()

    # ---- stage 1: conv1 (1x1) + h1 stats ------------------------------------
    h1, stats1 = pl.pallas_call(
        functools.partial(_pw_conv_stats_kernel, pre_affine=False),
        out_shape=(jax.ShapeDtypeStruct((n, hw, p), bf16),
                   jax.ShapeDtypeStruct((n, 2, p), f32)),
        grid=(n, nt),
        in_specs=[
            pl.BlockSpec((1, thw, cin), lambda i, t: (i, t, 0)),
            pl.BlockSpec((cin, p), lambda i, t: (0, 0)),
        ],
        out_specs=(
            pl.BlockSpec((1, thw, p), lambda i, t: (i, t, 0)),
            pl.BlockSpec((1, 2, p), lambda i, t: (i, 0, 0)),
        ),
        compiler_params=pltpu.CompilerParams(
            dimension_semantics=("parallel", "arbitrary"),
            vmem_limit_bytes=vmem_limit),
        cost_estimate=pl.CostEstimate(
            flops=2 * n * hw * cin * p, transcendentals=0,
            bytes_accessed=2 * n * hw * (cin + p) + 2 * cin * p + 8 * n * p),
    )(x, w1)
    scale1, bias1 = _sn_scale_bias(stats1, params["sn1"], hw)

    # ---- stage 2: sn1+relu, conv2 (3x3) + h2 stats (per sample) -------------
    h2, stats2 = pl.pallas_call(
        functools.partial(_conv3x3_stats_kernel, h=h, w=w),
        out_shape=(jax.ShapeDtypeStruct((n, hw, p), bf16),
                   jax.ShapeDtypeStruct((n, 2, p), f32)),
        grid=(n,),
        in_specs=[
            pl.BlockSpec((1, 1, p), lambda i: (i, 0, 0)),       # scale1
            pl.BlockSpec((1, 1, p), lambda i: (i, 0, 0)),       # bias1
            pl.BlockSpec((1, hw, p), lambda i: (i, 0, 0)),      # h1
            pl.BlockSpec((9 * p, p), lambda i: (0, 0)),         # w2 (im2col layout)
            pl.BlockSpec((hw, 8), lambda i: (0, 0)),            # border masks
        ],
        out_specs=(
            pl.BlockSpec((1, hw, p), lambda i: (i, 0, 0)),
            pl.BlockSpec((1, 2, p), lambda i: (i, 0, 0)),
        ),
        compiler_params=pltpu.CompilerParams(
            dimension_semantics=("parallel",),
            vmem_limit_bytes=vmem_limit),
        cost_estimate=pl.CostEstimate(
            flops=2 * n * hw * 9 * p * p, transcendentals=0,
            bytes_accessed=4 * n * hw * p + 18 * p * p + 8 * n * p),
    )(scale1, bias1, h1, w2, masks)
    scale2, bias2 = _sn_scale_bias(stats2, params["sn2"], hw)

    # ---- stage 3: sn2+relu, conv3 (1x1) + h3 stats ---------------------------
    h3, stats3 = pl.pallas_call(
        functools.partial(_pw_conv_stats_kernel, pre_affine=True),
        out_shape=(jax.ShapeDtypeStruct((n, hw, cout), bf16),
                   jax.ShapeDtypeStruct((n, 2, cout), f32)),
        grid=(n, nt),
        in_specs=[
            pl.BlockSpec((1, 1, p), lambda i, t: (i, 0, 0)),     # scale2
            pl.BlockSpec((1, 1, p), lambda i, t: (i, 0, 0)),     # bias2
            pl.BlockSpec((1, thw, p), lambda i, t: (i, t, 0)),   # h2
            pl.BlockSpec((p, cout), lambda i, t: (0, 0)),        # w3
        ],
        out_specs=(
            pl.BlockSpec((1, thw, cout), lambda i, t: (i, t, 0)),
            pl.BlockSpec((1, 2, cout), lambda i, t: (i, 0, 0)),
        ),
        compiler_params=pltpu.CompilerParams(
            dimension_semantics=("parallel", "arbitrary"),
            vmem_limit_bytes=vmem_limit),
        cost_estimate=pl.CostEstimate(
            flops=2 * n * hw * p * cout, transcendentals=0,
            bytes_accessed=2 * n * hw * (p + cout) + 2 * p * cout + 8 * n * cout),
    )(scale2, bias2, h2, w3)
    scale3, bias3 = _sn_scale_bias(stats3, params["sn3"], hw)

    # ---- stage 4: sn3 + identity residual + relu -----------------------------
    out = pl.pallas_call(
        _residual_kernel,
        out_shape=jax.ShapeDtypeStruct((n, hw, cout), bf16),
        grid=(n, nt),
        in_specs=[
            pl.BlockSpec((1, 1, cout), lambda i, t: (i, 0, 0)),   # scale3
            pl.BlockSpec((1, 1, cout), lambda i, t: (i, 0, 0)),   # bias3
            pl.BlockSpec((1, thw, cout), lambda i, t: (i, t, 0)),  # h3
            pl.BlockSpec((1, thw, cout), lambda i, t: (i, t, 0)),  # x (residual)
        ],
        out_specs=pl.BlockSpec((1, thw, cout), lambda i, t: (i, t, 0)),
        compiler_params=pltpu.CompilerParams(
            dimension_semantics=("parallel", "parallel"),
            vmem_limit_bytes=vmem_limit),
        cost_estimate=pl.CostEstimate(
            flops=4 * n * hw * cout, transcendentals=0,
            bytes_accessed=6 * n * hw * cout),
    )(scale3, bias3, h3, x)

    return out.reshape(n, h, w, cout)


def bottleneck_forward_nchw(x_nchw, params):
    """PyTorch-layout convenience wrapper (NHWC entry point avoids the transposes)."""
    x = jnp.transpose(x_nchw, (0, 2, 3, 1))
    return jnp.transpose(bottleneck_forward(x, params), (0, 3, 1, 2))


# --------------------------------------------------------------------------- #
# Reference & init
# --------------------------------------------------------------------------- #
def bottleneck_reference(x_nhwc, params):
    """Pure-JAX reference mirroring the kernel's storage precision (bf16 matmul
    operands and bf16 HBM round-trips of conv outputs, f32 accumulation, f32
    SwitchNorm with torch-style two-pass unbiased variance), so the pipeline's
    math (im2col, single-pass stats, folded scale/bias) is validated tightly."""
    f32, bf16 = jnp.float32, jnp.bfloat16
    x = x_nhwc.astype(f32)
    n, hh, ww, _ = x.shape
    hw = float(hh * ww)

    def sn(y, snp):
        c = y.shape[-1]
        y3 = y.reshape(n, hh * ww, c)
        mean_in = jnp.mean(y3, axis=1, keepdims=True)
        var_in = jnp.mean((y3 - mean_in) ** 2, axis=1, keepdims=True) * (hw / (hw - 1.0))
        temp = var_in + mean_in ** 2
        mean_ln = jnp.mean(mean_in, axis=2, keepdims=True)
        var_ln = jnp.mean(temp, axis=2, keepdims=True) - mean_ln ** 2
        mean_bn = jnp.mean(mean_in, axis=0, keepdims=True)
        var_bn = jnp.mean(temp, axis=0, keepdims=True) - mean_bn ** 2
        mw = jax.nn.softmax(snp["mean_w"])
        vw = jax.nn.softmax(snp["var_w"])
        mean = mw[0] * mean_in + mw[1] * mean_ln + mw[2] * mean_bn
        var = vw[0] * var_in + vw[1] * var_ln + vw[2] * var_bn
        xhat = (y3 - mean) / jnp.sqrt(var + EPS)
        out = xhat * snp["gamma"].reshape(1, 1, c) + snp["beta"].reshape(1, 1, c)
        return out.reshape(n, hh, ww, c)

    def mm(a, wmat):
        c = a.shape[-1]
        out = jnp.dot(a.reshape(-1, c).astype(bf16), wmat.astype(bf16),
                      preferred_element_type=f32)
        return out.reshape(a.shape[:-1] + (wmat.shape[-1],))

    def store(a):  # mirror the kernels' bf16 HBM storage of conv outputs
        return a.astype(bf16).astype(f32)

    h1 = store(mm(x, params["w1"]))
    a1 = jax.nn.relu(sn(h1, params["sn1"]))
    h2 = store(jax.lax.conv_general_dilated(
        a1.astype(bf16), params["w2"].astype(bf16), window_strides=(1, 1),
        padding=((1, 1), (1, 1)), dimension_numbers=("NHWC", "HWIO", "NHWC"),
        preferred_element_type=f32))
    a2 = jax.nn.relu(sn(h2, params["sn2"]))
    h3 = store(mm(a2, params["w3"]))
    out = jax.nn.relu(sn(h3, params["sn3"]) + x)
    return out.astype(bf16)


def init_params(key, inplanes, planes):
    cout = planes * 4
    ks = jax.random.split(key, 6)
    # PyTorch layouts: conv1 (planes, inplanes, 1, 1), conv2 (planes, planes, 3, 3),
    # conv3 (cout, planes, 1, 1); converted to channels-last matmul layouts below.
    conv1_t = jax.random.normal(ks[0], (planes, inplanes, 1, 1), jnp.float32) / (inplanes ** 0.5)
    conv2_t = jax.random.normal(ks[1], (planes, planes, 3, 3), jnp.float32) / ((9 * planes) ** 0.5)
    conv3_t = jax.random.normal(ks[2], (cout, planes, 1, 1), jnp.float32) / (planes ** 0.5)

    def sn_init(k, c):
        k1, k2, k3, k4 = jax.random.split(k, 4)
        return dict(gamma=1.0 + 0.1 * jax.random.normal(k1, (c,), jnp.float32),
                    beta=0.1 * jax.random.normal(k2, (c,), jnp.float32),
                    mean_w=jax.random.normal(k3, (3,), jnp.float32),
                    var_w=jax.random.normal(k4, (3,), jnp.float32))

    # TODO(synk): last_gamma=True would init sn3.gamma to 0, and training updates the
    # SwitchNorm running_mean/var buffers; neither changes this single forward output,
    # and gamma is randomised here so the test is non-trivial.
    return dict(
        w1=jnp.transpose(conv1_t[:, :, 0, 0], (1, 0)),   # (inplanes, planes)
        w2=jnp.transpose(conv2_t, (2, 3, 1, 0)),         # (3, 3, in, out) == HWIO
        w3=jnp.transpose(conv3_t[:, :, 0, 0], (1, 0)),   # (planes, 4*planes)
        sn1=sn_init(ks[3], planes),
        sn2=sn_init(ks[4], planes),
        sn3=sn_init(ks[5], cout),
    )


if __name__ == "__main__":
    key = jax.random.PRNGKey(0)
    N, H, W = 2, 16, 16
    planes = 128                      # lane-dense channel counts (p=128, cout=512)
    inplanes = planes * 4             # downsample=None, stride=1 -> identity residual
    params = init_params(key, inplanes, planes)

    x = jax.random.normal(jax.random.fold_in(key, 99), (N, H, W, inplanes), jnp.float32)
    x = x.astype(jnp.bfloat16)        # bf16 boundary I/O (review item)

    # max_rows_per_tile=128 so the demo exercises the multi-tile stats-accumulation
    # path (HW=256 -> 2 row tiles per sample); real shapes should use the default.
    fwd = jax.jit(functools.partial(bottleneck_forward, max_rows_per_tile=128))
    out = jax.block_until_ready(fwd(x, params))
    ref = jax.block_until_ready(bottleneck_reference(x, params))

    assert out.shape == (N, H, W, inplanes), out.shape
    out_f = out.astype(jnp.float32)
    ref_f = ref.astype(jnp.float32)
    max_err = float(jnp.max(jnp.abs(out_f - ref_f)))
    if not bool(jnp.allclose(out_f, ref_f, atol=2e-2, rtol=2e-2)):
        raise AssertionError(f"Pallas kernel mismatch vs reference, max abs err = {max_err}")
    print("KERNEL_OK")
</pallas_src>

<mosaic_0001>
module attributes {stable_mosaic.version = 11 : i64} {
  func.func @_pw_conv_stats_kernel(%arg0: i32, %arg1: i32, %arg2: memref<1x128x512xbf16, #tpu.memory_space<vmem>>, %arg3: memref<512x128xbf16, #tpu.memory_space<vmem>>, %arg4: memref<1x128x128xbf16, #tpu.memory_space<vmem>>, %arg5: memref<1x2x128xf32, #tpu.memory_space<vmem>>) attributes {dimension_semantics = [#tpu.dimension_semantics<parallel>, #tpu.dimension_semantics<arbitrary>], iteration_bounds = array<i64: 2, 2>, scalar_prefetch = 0 : i64, scratch_operands = 0 : i64, tpu.core_type = #tpu.core_type<tc>, window_params = [{transform_indices = @transform_0, window_bounds = array<i64: 1, 128, 512>}, {pipeline_mode = #tpu.pipeline_mode<synchronous>, transform_indices = @transform_1, window_bounds = array<i64: 512, 128>}, {transform_indices = @transform_2, window_bounds = array<i64: 1, 128, 128>}, {transform_indices = @transform_3, window_bounds = array<i64: 1, 2, 128>}]} {
    %c0 = arith.constant 0 : index
    %c0_0 = arith.constant 0 : index
    %c0_1 = arith.constant 0 : index
    %0 = vector.load %arg2[%c0, %c0_0, %c0_1] : memref<1x128x512xbf16, #tpu.memory_space<vmem>>, vector<1x128x512xbf16>
    %1 = vector.shape_cast %0 : vector<1x128x512xbf16> to vector<128x512xbf16>
    %2 = arith.extf %1 : vector<128x512xbf16> to vector<128x512xf32>
    %3 = arith.truncf %2 : vector<128x512xf32> to vector<128x512xbf16>
    %c0_2 = arith.constant 0 : index
    %c0_3 = arith.constant 0 : index
    %4 = vector.load %arg3[%c0_2, %c0_3] : memref<512x128xbf16, #tpu.memory_space<vmem>>, vector<512x128xbf16>
    %cst = arith.constant dense<0.000000e+00> : vector<128x128xf32>
    %5 = tpu.matmul %3, %4, %cst {dimension_numbers = #tpu.dot_dimension_numbers<[1], [0], [0], [1], [0, 0, 1, 1], [], []>} : vector<128x512xbf16>, vector<512x128xbf16>, vector<128x128xf32> -> vector<128x128xf32>
    %6 = arith.truncf %5 : vector<128x128xf32> to vector<128x128xbf16>
    %c0_4 = arith.constant 0 : index
    %c0_5 = arith.constant 0 : index
    %c0_6 = arith.constant 0 : index
    %7 = vector.load %arg4[%c0_4, %c0_5, %c0_6] : memref<1x128x128xbf16, #tpu.memory_space<vmem>>, vector<1x128x128xbf16>
    %8 = vector.shape_cast %7 : vector<1x128x128xbf16> to vector<128x128xbf16>
    %9 = vector.shape_cast %6 : vector<128x128xbf16> to vector<1x128x128xbf16>
    tpu.vector_store %arg4[%c0_4, %c0_5, %c0_6], %9 {strides = array<i32>} : memref<1x128x128xbf16, #tpu.memory_space<vmem>>, vector<1x128x128xbf16>,
    %10 = arith.extf %6 : vector<128x128xbf16> to vector<128x128xf32>
    %cst_7 = arith.constant dense<0.000000e+00> : vector<128xf32>
    %11 = vector.multi_reduction <add>, %10, %cst_7 [0] : vector<128x128xf32> to vector<128xf32>
    %12 = vector.shape_cast %11 : vector<128xf32> to vector<1x128xf32>
    %13 = arith.mulf %10, %10 : vector<128x128xf32>
    %cst_8 = arith.constant dense<0.000000e+00> : vector<128xf32>
    %14 = vector.multi_reduction <add>, %13, %cst_8 [0] : vector<128x128xf32> to vector<128xf32>
    %15 = vector.shape_cast %14 : vector<128xf32> to vector<1x128xf32>
    %16 = tpu.concatenate %12, %15 in 0 : vector<1x128xf32>, vector<1x128xf32> -> vector<2x128xf32>
    %c0_i32 = arith.constant 0 : i32
    %17 = arith.cmpi eq, %arg1, %c0_i32 : i32
    %18 = arith.extui %17 : i1 to i32
    %c0_i32_9 = arith.constant 0 : i32
    %19 = arith.cmpi ne, %18, %c0_i32_9 : i32
    scf.if %19 {
      %c0_12 = arith.constant 0 : index
      %c0_13 = arith.constant 0 : index
      %c0_14 = arith.constant 0 : index
      %23 = vector.load %arg5[%c0_12, %c0_13, %c0_14] : memref<1x2x128xf32, #tpu.memory_space<vmem>>, vector<1x2x128xf32>
      %24 = vector.shape_cast %23 : vector<1x2x128xf32> to vector<2x128xf32>
      %25 = vector.shape_cast %16 : vector<2x128xf32> to vector<1x2x128xf32>
      tpu.vector_store %arg5[%c0_12, %c0_13, %c0_14], %25 {strides = array<i32>} : memref<1x2x128xf32, #tpu.memory_space<vmem>>, vector<1x2x128xf32>,
    } else {
    }
    %c0_i32_10 = arith.constant 0 : i32
    %20 = arith.cmpi ne, %arg1, %c0_i32_10 : i32
    %21 = arith.extui %20 : i1 to i32
    %c0_i32_11 = arith.constant 0 : i32
    %22 = arith.cmpi ne, %21, %c0_i32_11 : i32
    scf.if %22 {
      %c0_12 = arith.constant 0 : index
      %c0_13 = arith.constant 0 : index
      %c0_14 = arith.constant 0 : index
      %23 = vector.load %arg5[%c0_12, %c0_13, %c0_14] : memref<1x2x128xf32, #tpu.memory_space<vmem>>, vector<1x2x128xf32>
      %24 = vector.shape_cast %23 : vector<1x2x128xf32> to vector<2x128xf32>
      %25 = arith.addf %24, %16 : vector<2x128xf32>
      %c0_15 = arith.constant 0 : index
      %c0_16 = arith.constant 0 : index
      %c0_17 = arith.constant 0 : index
      %26 = vector.load %arg5[%c0_15, %c0_16, %c0_17] : memref<1x2x128xf32, #tpu.memory_space<vmem>>, vector<1x2x128xf32>
      %27 = vector.shape_cast %26 : vector<1x2x128xf32> to vector<2x128xf32>
      %28 = vector.shape_cast %25 : vector<2x128xf32> to vector<1x2x128xf32>
      tpu.vector_store %arg5[%c0_15, %c0_16, %c0_17], %28 {strides = array<i32>} : memref<1x2x128xf32, #tpu.memory_space<vmem>>, vector<1x2x128xf32>,
    } else {
    }
    return
  }
  func.func @transform_0(%arg0: i32, %arg1: i32) -> (i32, i32, i32) {
    %c0_i32 = arith.constant 0 : i32
    %c0_i32_0 = arith.constant 0 : i32
    return %arg0, %arg1, %c0_i32 : i32, i32, i32
  }
  func.func @transform_1(%arg0: i32, %arg1: i32) -> (i32, i32) {
    %c0_i32 = arith.constant 0 : i32
    %c0_i32_0 = arith.constant 0 : i32
    %c0_i32_1 = arith.constant 0 : i32
    return %c0_i32, %c0_i32_0 : i32, i32
  }
  func.func @transform_2(%arg0: i32, %arg1: i32) -> (i32, i32, i32) {
    %c0_i32 = arith.constant 0 : i32
    %c0_i32_0 = arith.constant 0 : i32
    return %arg0, %arg1, %c0_i32 : i32, i32, i32
  }
  func.func @transform_3(%arg0: i32, %arg1: i32) -> (i32, i32, i32) {
    %c0_i32 = arith.constant 0 : i32
    %c0_i32_0 = arith.constant 0 : i32
    %c0_i32_1 = arith.constant 0 : i32
    return %arg0, %c0_i32, %c0_i32_0 : i32, i32, i32
  }
}

module attributes {stable_mosaic.version = 11 : i64} {
  func.func @_conv3x3_stats_kernel(%arg0: i32, %arg1: memref<1x1x128xf32, #tpu.memory_space<vmem>>, %arg2: memref<1x1x128xf32, #tpu.memory_space<vmem>>, %arg3: memref<1x256x128xbf16, #tpu.memory_space<vmem>>, %arg4: memref<1152x128xbf16, #tpu.memory_space<vmem>>, %arg5: memref<256x8xf32, #tpu.memory_space<vmem>>, %arg6: memref<1x256x128xbf16, #tpu.memory_space<vmem>>, %arg7: memref<1x2x128xf32, #tpu.memory_space<vmem>>) attributes {dimension_semantics = [#tpu.dimension_semantics<parallel>], iteration_bounds = array<i64: 2>, scalar_prefetch = 0 : i64, scratch_operands = 0 : i64, tpu.core_type = #tpu.core_type<tc>, window_params = [{transform_indices = @transform_0, window_bounds = array<i64: 1, 1, 128>}, {transform_indices = @transform_1, window_bounds = array<i64: 1, 1, 128>}, {transform_indices = @transform_2, window_bounds = array<i64: 1, 256, 128>}, {pipeline_mode = #tpu.pipeline_mode<synchronous>, transform_indices = @transform_3, window_bounds = array<i64: 1152, 128>}, {pipeline_mode = #tpu.pipeline_mode<synchronous>, transform_indices = @transform_4, window_bounds = array<i64: 256, 8>}, {transform_indices = @transform_5, window_bounds = array<i64: 1, 256, 128>}, {transform_indices = @transform_6, window_bounds = array<i64: 1, 2, 128>}]} {
    %c0 = arith.constant 0 : index
    %c0_0 = arith.constant 0 : index
    %c0_1 = arith.constant 0 : index
    %0 = vector.load %arg3[%c0, %c0_0, %c0_1] : memref<1x256x128xbf16, #tpu.memory_space<vmem>>, vector<1x256x128xbf16>
    %1 = vector.shape_cast %0 : vector<1x256x128xbf16> to vector<256x128xbf16>
    %2 = arith.extf %1 : vector<256x128xbf16> to vector<256x128xf32>
    %c0_2 = arith.constant 0 : index
    %c0_3 = arith.constant 0 : index
    %c0_4 = arith.constant 0 : index
    %3 = vector.load %arg1[%c0_2, %c0_3, %c0_4] : memref<1x1x128xf32, #tpu.memory_space<vmem>>, vector<1x1x128xf32>
    %4 = vector.shape_cast %3 : vector<1x1x128xf32> to vector<1x128xf32>
    %5 = vector.broadcast %4 : vector<1x128xf32> to vector<256x128xf32>
    %6 = arith.mulf %2, %5 : vector<256x128xf32>
    %c0_5 = arith.constant 0 : index
    %c0_6 = arith.constant 0 : index
    %c0_7 = arith.constant 0 : index
    %7 = vector.load %arg2[%c0_5, %c0_6, %c0_7] : memref<1x1x128xf32, #tpu.memory_space<vmem>>, vector<1x1x128xf32>
    %8 = vector.shape_cast %7 : vector<1x1x128xf32> to vector<1x128xf32>
    %9 = vector.broadcast %8 : vector<1x128xf32> to vector<256x128xf32>
    %10 = arith.addf %6, %9 : vector<256x128xf32>
    %cst = arith.constant 0.000000e+00 : f32
    %11 = vector.broadcast %cst : f32 to vector<256x128xf32>
    %12 = arith.maximumf %10, %11 : vector<256x128xf32>
    %13 = arith.truncf %12 : vector<256x128xf32> to vector<256x128xbf16>
    %c0_8 = arith.constant 0 : index
    %c0_9 = arith.constant 0 : index
    %14 = vector.load %arg5[%c0_8, %c0_9] : memref<256x8xf32, #tpu.memory_space<vmem>>, vector<256x8xf32>
    %c17_i32 = arith.constant 17 : i32
    %15 = tpu.dynamic_rotate %12 by %c17_i32 dim 0 : vector<256x128xf32>, i32 -> vector<256x128xf32>
    %16 = vector.extract_strided_slice %14 {offsets = [0, 0], sizes = [256, 1], strides = [1, 1]} : vector<256x8xf32> to vector<256x1xf32>
    %17 = vector.broadcast %16 : vector<256x1xf32> to vector<256x128xf32>
    %18 = arith.mulf %15, %17 : vector<256x128xf32>
    %19 = arith.truncf %18 : vector<256x128xf32> to vector<256x128xbf16>
    %c16_i32 = arith.constant 16 : i32
    %20 = tpu.dynamic_rotate %12 by %c16_i32 dim 0 : vector<256x128xf32>, i32 -> vector<256x128xf32>
    %21 = vector.extract_strided_slice %14 {offsets = [0, 1], sizes = [256, 1], strides = [1, 1]} : vector<256x8xf32> to vector<256x1xf32>
    %22 = vector.broadcast %21 : vector<256x1xf32> to vector<256x128xf32>
    %23 = arith.mulf %20, %22 : vector<256x128xf32>
    %24 = arith.truncf %23 : vector<256x128xf32> to vector<256x128xbf16>
    %c15_i32 = arith.constant 15 : i32
    %25 = tpu.dynamic_rotate %12 by %c15_i32 dim 0 : vector<256x128xf32>, i32 -> vector<256x128xf32>
    %26 = vector.extract_strided_slice %14 {offsets = [0, 2], sizes = [256, 1], strides = [1, 1]} : vector<256x8xf32> to vector<256x1xf32>
    %27 = vector.broadcast %26 : vector<256x1xf32> to vector<256x128xf32>
    %28 = arith.mulf %25, %27 : vector<256x128xf32>
    %29 = arith.truncf %28 : vector<256x128xf32> to vector<256x128xbf16>
    %c1_i32 = arith.constant 1 : i32
    %30 = tpu.dynamic_rotate %12 by %c1_i32 dim 0 : vector<256x128xf32>, i32 -> vector<256x128xf32>
    %31 = vector.extract_strided_slice %14 {offsets = [0, 3], sizes = [256, 1], strides = [1, 1]} : vector<256x8xf32> to vector<256x1xf32>
    %32 = vector.broadcast %31 : vector<256x1xf32> to vector<256x128xf32>
    %33 = arith.mulf %30, %32 : vector<256x128xf32>
    %34 = arith.truncf %33 : vector<256x128xf32> to vector<256x128xbf16>
    %c255_i32 = arith.constant 255 : i32
    %35 = tpu.dynamic_rotate %12 by %c255_i32 dim 0 : vector<256x128xf32>, i32 -> vector<256x128xf32>
    %36 = vector.extract_strided_slice %14 {offsets = [0, 4], sizes = [256, 1], strides = [1, 1]} : vector<256x8xf32> to vector<256x1xf32>
    %37 = vector.broadcast %36 : vector<256x1xf32> to vector<256x128xf32>
    %38 = arith.mulf %35, %37 : vector<256x128xf32>
    %39 = arith.truncf %38 : vector<256x128xf32> to vector<256x128xbf16>
    %c241_i32 = arith.constant 241 : i32
    %40 = tpu.dynamic_rotate %12 by %c241_i32 dim 0 : vector<256x128xf32>, i32 -> vector<256x128xf32>
    %41 = vector.extract_strided_slice %14 {offsets = [0, 5], sizes = [256, 1], strides = [1, 1]} : vector<256x8xf32> to vector<256x1xf32>
    %42 = vector.broadcast %41 : vector<256x1xf32> to vector<256x128xf32>
    %43 = arith.mulf %40, %42 : vector<256x128xf32>
    %44 = arith.truncf %43 : vector<256x128xf32> to vector<256x128xbf16>
    %c240_i32 = arith.constant 240 : i32
    %45 = tpu.dynamic_rotate %12 by %c240_i32 dim 0 : vector<256x128xf32>, i32 -> vector<256x128xf32>
    %46 = vector.extract_strided_slice %14 {offsets = [0, 6], sizes = [256, 1], strides = [1, 1]} : vector<256x8xf32> to vector<256x1xf32>
    %47 = vector.broadcast %46 : vector<256x1xf32> to vector<256x128xf32>
    %48 = arith.mulf %45, %47 : vector<256x128xf32>
    %49 = arith.truncf %48 : vector<256x128xf32> to vector<256x128xbf16>
    %c239_i32 = arith.constant 239 : i32
    %50 = tpu.dynamic_rotate %12 by %c239_i32 dim 0 : vector<256x128xf32>, i32 -> vector<256x128xf32>
    %51 = vector.extract_strided_slice %14 {offsets = [0, 7], sizes = [256, 1], strides = [1, 1]} : vector<256x8xf32> to vector<256x1xf32>
    %52 = vector.broadcast %51 : vector<256x1xf32> to vector<256x128xf32>
    %53 = arith.mulf %50, %52 : vector<256x128xf32>
    %54 = arith.truncf %53 : vector<256x128xf32> to vector<256x128xbf16>
    %55 = tpu.concatenate %19, %24, %29, %34, %13, %39, %44, %49, %54 in 1 : vector<256x128xbf16>, vector<256x128xbf16>, vector<256x128xbf16>, vector<256x128xbf16>, vector<256x128xbf16>, vector<256x128xbf16>, vector<256x128xbf16>, vector<256x128xbf16>, vector<256x128xbf16> -> vector<256x1152xbf16>
    %c0_10 = arith.constant 0 : index
    %c0_11 = arith.constant 0 : index
    %56 = vector.load %arg4[%c0_10, %c0_11] : memref<1152x128xbf16, #tpu.memory_space<vmem>>, vector<1152x128xbf16>
    %cst_12 = arith.constant dense<0.000000e+00> : vector<256x128xf32>
    %57 = tpu.matmul %55, %56, %cst_12 {dimension_numbers = #tpu.dot_dimension_numbers<[1], [0], [0], [1], [0, 0, 1, 1], [], []>} : vector<256x1152xbf16>, vector<1152x128xbf16>, vector<256x128xf32> -> vector<256x128xf32>
    %58 = arith.truncf %57 : vector<256x128xf32> to vector<256x128xbf16>
    %c0_13 = arith.constant 0 : index
    %c0_14 = arith.constant 0 : index
    %c0_15 = arith.constant 0 : index
    %59 = vector.load %arg6[%c0_13, %c0_14, %c0_15] : memref<1x256x128xbf16, #tpu.memory_space<vmem>>, vector<1x256x128xbf16>
    %60 = vector.shape_cast %59 : vector<1x256x128xbf16> to vector<256x128xbf16>
    %61 = vector.shape_cast %58 : vector<256x128xbf16> to vector<1x256x128xbf16>
    tpu.vector_store %arg6[%c0_13, %c0_14, %c0_15], %61 {strides = array<i32>} : memref<1x256x128xbf16, #tpu.memory_space<vmem>>, vector<1x256x128xbf16>,
    %62 = arith.extf %58 : vector<256x128xbf16> to vector<256x128xf32>
    %cst_16 = arith.constant dense<0.000000e+00> : vector<128xf32>
    %63 = vector.multi_reduction <add>, %62, %cst_16 [0] : vector<256x128xf32> to vector<128xf32>
    %64 = vector.shape_cast %63 : vector<128xf32> to vector<1x128xf32>
    %65 = arith.mulf %62, %62 : vector<256x128xf32>
    %cst_17 = arith.constant dense<0.000000e+00> : vector<128xf32>
    %66 = vector.multi_reduction <add>, %65, %cst_17 [0] : vector<256x128xf32> to vector<128xf32>
    %67 = vector.shape_cast %66 : vector<128xf32> to vector<1x128xf32>
    %68 = tpu.concatenate %64, %67 in 0 : vector<1x128xf32>, vector<1x128xf32> -> vector<2x128xf32>
    %c0_18 = arith.constant 0 : index
    %c0_19 = arith.constant 0 : index
    %c0_20 = arith.constant 0 : index
    %69 = vector.load %arg7[%c0_18, %c0_19, %c0_20] : memref<1x2x128xf32, #tpu.memory_space<vmem>>, vector<1x2x128xf32>
    %70 = vector.shape_cast %69 : vector<1x2x128xf32> to vector<2x128xf32>
    %71 = vector.shape_cast %68 : vector<2x128xf32> to vector<1x2x128xf32>
    tpu.vector_store %arg7[%c0_18, %c0_19, %c0_20], %71 {strides = array<i32>} : memref<1x2x128xf32, #tpu.memory_space<vmem>>, vector<1x2x128xf32>,
    return
  }
  func.func @transform_0(%arg0: i32) -> (i32, i32, i32) {
    %c0_i32 = arith.constant 0 : i32
    %c0_i32_0 = arith.constant 0 : i32
    %c0_i32_1 = arith.constant 0 : i32
    return %arg0, %c0_i32, %c0_i32_0 : i32, i32, i32
  }
  func.func @transform_1(%arg0: i32) -> (i32, i32, i32) {
    %c0_i32 = arith.constant 0 : i32
    %c0_i32_0 = arith.constant 0 : i32
    %c0_i32_1 = arith.constant 0 : i32
    return %arg0, %c0_i32, %c0_i32_0 : i32, i32, i32
  }
  func.func @transform_2(%arg0: i32) -> (i32, i32, i32) {
    %c0_i32 = arith.constant 0 : i32
    %c0_i32_0 = arith.constant 0 : i32
    %c0_i32_1 = arith.constant 0 : i32
    return %arg0, %c0_i32, %c0_i32_0 : i32, i32, i32
  }
  func.func @transform_3(%arg0: i32) -> (i32, i32) {
    %c0_i32 = arith.constant 0 : i32
    %c0_i32_0 = arith.constant 0 : i32
    %c0_i32_1 = arith.constant 0 : i32
    return %c0_i32, %c0_i32_0 : i32, i32
  }
  func.func @transform_4(%arg0: i32) -> (i32, i32) {
    %c0_i32 = arith.constant 0 : i32
    %c0_i32_0 = arith.constant 0 : i32
    %c0_i32_1 = arith.constant 0 : i32
    return %c0_i32, %c0_i32_0 : i32, i32
  }
  func.func @transform_5(%arg0: i32) -> (i32, i32, i32) {
    %c0_i32 = arith.constant 0 : i32
    %c0_i32_0 = arith.constant 0 : i32
    %c0_i32_1 = arith.constant 0 : i32
    return %arg0, %c0_i32, %c0_i32_0 : i32, i32, i32
  }
  func.func @transform_6(%arg0: i32) -> (i32, i32, i32) {
    %c0_i32 = arith.constant 0 : i32
    %c0_i32_0 = arith.constant 0 : i32
    %c0_i32_1 = arith.constant 0 : i32
    return %arg0, %c0_i32, %c0_i32_0 : i32, i32, i32
  }
}

module attributes {stable_mosaic.version = 11 : i64} {
  func.func @_pw_conv_stats_kernel(%arg0: i32, %arg1: i32, %arg2: memref<1x1x128xf32, #tpu.memory_space<vmem>>, %arg3: memref<1x1x128xf32, #tpu.memory_space<vmem>>, %arg4: memref<1x128x128xbf16, #tpu.memory_space<vmem>>, %arg5: memref<128x512xbf16, #tpu.memory_space<vmem>>, %arg6: memref<1x128x512xbf16, #tpu.memory_space<vmem>>, %arg7: memref<1x2x512xf32, #tpu.memory_space<vmem>>) attributes {dimension_semantics = [#tpu.dimension_semantics<parallel>, #tpu.dimension_semantics<arbitrary>], iteration_bounds = array<i64: 2, 2>, scalar_prefetch = 0 : i64, scratch_operands = 0 : i64, tpu.core_type = #tpu.core_type<tc>, window_params = [{transform_indices = @transform_0, window_bounds = array<i64: 1, 1, 128>}, {transform_indices = @transform_1, window_bounds = array<i64: 1, 1, 128>}, {transform_indices = @transform_2, window_bounds = array<i64: 1, 128, 128>}, {pipeline_mode = #tpu.pipeline_mode<synchronous>, transform_indices = @transform_3, window_bounds = array<i64: 128, 512>}, {transform_indices = @transform_4, window_bounds = array<i64: 1, 128, 512>}, {transform_indices = @transform_5, window_bounds = array<i64: 1, 2, 512>}]} {
    %c0 = arith.constant 0 : index
    %c0_0 = arith.constant 0 : index
    %c0_1 = arith.constant 0 : index
    %0 = vector.load %arg4[%c0, %c0_0, %c0_1] : memref<1x128x128xbf16, #tpu.memory_space<vmem>>, vector<1x128x128xbf16>
    %1 = vector.shape_cast %0 : vector<1x128x128xbf16> to vector<128x128xbf16>
    %2 = arith.extf %1 : vector<128x128xbf16> to vector<128x128xf32>
    %c0_2 = arith.constant 0 : index
    %c0_3 = arith.constant 0 : index
    %c0_4 = arith.constant 0 : index
    %3 = vector.load %arg2[%c0_2, %c0_3, %c0_4] : memref<1x1x128xf32, #tpu.memory_space<vmem>>, vector<1x1x128xf32>
    %4 = vector.shape_cast %3 : vector<1x1x128xf32> to vector<1x128xf32>
    %5 = vector.broadcast %4 : vector<1x128xf32> to vector<128x128xf32>
    %6 = arith.mulf %2, %5 : vector<128x128xf32>
    %c0_5 = arith.constant 0 : index
    %c0_6 = arith.constant 0 : index
    %c0_7 = arith.constant 0 : index
    %7 = vector.load %arg3[%c0_5, %c0_6, %c0_7] : memref<1x1x128xf32, #tpu.memory_space<vmem>>, vector<1x1x128xf32>
    %8 = vector.shape_cast %7 : vector<1x1x128xf32> to vector<1x128xf32>
    %9 = vector.broadcast %8 : vector<1x128xf32> to vector<128x128xf32>
    %10 = arith.addf %6, %9 : vector<128x128xf32>
    %cst = arith.constant 0.000000e+00 : f32
    %11 = vector.broadcast %cst : f32 to vector<128x128xf32>
    %12 = arith.maximumf %10, %11 : vector<128x128xf32>
    %13 = arith.truncf %12 : vector<128x128xf32> to vector<128x128xbf16>
    %c0_8 = arith.constant 0 : index
    %c0_9 = arith.constant 0 : index
    %14 = vector.load %arg5[%c0_8, %c0_9] : memref<128x512xbf16, #tpu.memory_space<vmem>>, vector<128x512xbf16>
    %cst_10 = arith.constant dense<0.000000e+00> : vector<128x512xf32>
    %15 = tpu.matmul %13, %14, %cst_10 {dimension_numbers = #tpu.dot_dimension_numbers<[1], [0], [0], [1], [0, 0, 1, 1], [], []>} : vector<128x128xbf16>, vector<128x512xbf16>, vector<128x512xf32> -> vector<128x512xf32>
    %16 = arith.truncf %15 : vector<128x512xf32> to vector<128x512xbf16>
    %c0_11 = arith.constant 0 : index
    %c0_12 = arith.constant 0 : index
    %c0_13 = arith.constant 0 : index
    %17 = vector.load %arg6[%c0_11, %c0_12, %c0_13] : memref<1x128x512xbf16, #tpu.memory_space<vmem>>, vector<1x128x512xbf16>
    %18 = vector.shape_cast %17 : vector<1x128x512xbf16> to vector<128x512xbf16>
    %19 = vector.shape_cast %16 : vector<128x512xbf16> to vector<1x128x512xbf16>
    tpu.vector_store %arg6[%c0_11, %c0_12, %c0_13], %19 {strides = array<i32>} : memref<1x128x512xbf16, #tpu.memory_space<vmem>>, vector<1x128x512xbf16>,
    %20 = arith.extf %16 : vector<128x512xbf16> to vector<128x512xf32>
    %cst_14 = arith.constant dense<0.000000e+00> : vector<512xf32>
    %21 = vector.multi_reduction <add>, %20, %cst_14 [0] : vector<128x512xf32> to vector<512xf32>
    %22 = vector.shape_cast %21 : vector<512xf32> to vector<1x512xf32>
    %23 = arith.mulf %20, %20 : vector<128x512xf32>
    %cst_15 = arith.constant dense<0.000000e+00> : vector<512xf32>
    %24 = vector.multi_reduction <add>, %23, %cst_15 [0] : vector<128x512xf32> to vector<512xf32>
    %25 = vector.shape_cast %24 : vector<512xf32> to vector<1x512xf32>
    %26 = tpu.concatenate %22, %25 in 0 : vector<1x512xf32>, vector<1x512xf32> -> vector<2x512xf32>
    %c0_i32 = arith.constant 0 : i32
    %27 = arith.cmpi eq, %arg1, %c0_i32 : i32
    %28 = arith.extui %27 : i1 to i32
    %c0_i32_16 = arith.constant 0 : i32
    %29 = arith.cmpi ne, %28, %c0_i32_16 : i32
    scf.if %29 {
      %c0_19 = arith.constant 0 : index
      %c0_20 = arith.constant 0 : index
      %c0_21 = arith.constant 0 : index
      %33 = vector.load %arg7[%c0_19, %c0_20, %c0_21] : memref<1x2x512xf32, #tpu.memory_space<vmem>>, vector<1x2x512xf32>
      %34 = vector.shape_cast %33 : vector<1x2x512xf32> to vector<2x512xf32>
      %35 = vector.shape_cast %26 : vector<2x512xf32> to vector<1x2x512xf32>
      tpu.vector_store %arg7[%c0_19, %c0_20, %c0_21], %35 {strides = array<i32>} : memref<1x2x512xf32, #tpu.memory_space<vmem>>, vector<1x2x512xf32>,
    } else {
    }
    %c0_i32_17 = arith.constant 0 : i32
    %30 = arith.cmpi ne, %arg1, %c0_i32_17 : i32
    %31 = arith.extui %30 : i1 to i32
    %c0_i32_18 = arith.constant 0 : i32
    %32 = arith.cmpi ne, %31, %c0_i32_18 : i32
    scf.if %32 {
      %c0_19 = arith.constant 0 : index
      %c0_20 = arith.constant 0 : index
      %c0_21 = arith.constant 0 : index
      %33 = vector.load %arg7[%c0_19, %c0_20, %c0_21] : memref<1x2x512xf32, #tpu.memory_space<vmem>>, vector<1x2x512xf32>
      %34 = vector.shape_cast %33 : vector<1x2x512xf32> to vector<2x512xf32>
      %35 = arith.addf %34, %26 : vector<2x512xf32>
      %c0_22 = arith.constant 0 : index
      %c0_23 = arith.constant 0 : index
      %c0_24 = arith.constant 0 : index
      %36 = vector.load %arg7[%c0_22, %c0_23, %c0_24] : memref<1x2x512xf32, #tpu.memory_space<vmem>>, vector<1x2x512xf32>
      %37 = vector.shape_cast %36 : vector<1x2x512xf32> to vector<2x512xf32>
      %38 = vector.shape_cast %35 : vector<2x512xf32> to vector<1x2x512xf32>
      tpu.vector_store %arg7[%c0_22, %c0_23, %c0_24], %38 {strides = array<i32>} : memref<1x2x512xf32, #tpu.memory_space<vmem>>, vector<1x2x512xf32>,
    } else {
    }
    return
  }
  func.func @transform_0(%arg0: i32, %arg1: i32) -> (i32, i32, i32) {
    %c0_i32 = arith.constant 0 : i32
    %c0_i32_0 = arith.constant 0 : i32
    %c0_i32_1 = arith.constant 0 : i32
    return %arg0, %c0_i32, %c0_i32_0 : i32, i32, i32
  }
  func.func @transform_1(%arg0: i32, %arg1: i32) -> (i32, i32, i32) {
    %c0_i32 = arith.constant 0 : i32
    %c0_i32_0 = arith.constant 0 : i32
    %c0_i32_1 = arith.constant 0 : i32
    return %arg0, %c0_i32, %c0_i32_0 : i32, i32, i32
  }
  func.func @transform_2(%arg0: i32, %arg1: i32) -> (i32, i32, i32) {
    %c0_i32 = arith.constant 0 : i32
    %c0_i32_0 = arith.constant 0 : i32
    return %arg0, %arg1, %c0_i32 : i32, i32, i32
  }
  func.func @transform_3(%arg0: i32, %arg1: i32) -> (i32, i32) {
    %c0_i32 = arith.constant 0 : i32
    %c0_i32_0 = arith.constant 0 : i32
    %c0_i32_1 = arith.constant 0 : i32
    return %c0_i32, %c0_i32_0 : i32, i32
  }
  func.func @transform_4(%arg0: i32, %arg1: i32) -> (i32, i32, i32) {
    %c0_i32 = arith.constant 0 : i32
    %c0_i32_0 = arith.constant 0 : i32
    return %arg0, %arg1, %c0_i32 : i32, i32, i32
  }
  func.func @transform_5(%arg0: i32, %arg1: i32) -> (i32, i32, i32) {
    %c0_i32 = arith.constant 0 : i32
    %c0_i32_0 = arith.constant 0 : i32
    %c0_i32_1 = arith.constant 0 : i32
    return %arg0, %c0_i32, %c0_i32_0 : i32, i32, i32
  }
}

module attributes {stable_mosaic.version = 11 : i64} {
  func.func @_residual_kernel(%arg0: i32, %arg1: i32, %arg2: memref<1x1x512xf32, #tpu.memory_space<vmem>>, %arg3: memref<1x1x512xf32, #tpu.memory_space<vmem>>, %arg4: memref<1x128x512xbf16, #tpu.memory_space<vmem>>, %arg5: memref<1x128x512xbf16, #tpu.memory_space<vmem>>, %arg6: memref<1x128x512xbf16, #tpu.memory_space<vmem>>) attributes {dimension_semantics = [#tpu.dimension_semantics<parallel>, #tpu.dimension_semantics<parallel>], iteration_bounds = array<i64: 2, 2>, scalar_prefetch = 0 : i64, scratch_operands = 0 : i64, tpu.core_type = #tpu.core_type<tc>, window_params = [{transform_indices = @transform_0, window_bounds = array<i64: 1, 1, 512>}, {transform_indices = @transform_1, window_bounds = array<i64: 1, 1, 512>}, {transform_indices = @transform_2, window_bounds = array<i64: 1, 128, 512>}, {transform_indices = @transform_3, window_bounds = array<i64: 1, 128, 512>}, {transform_indices = @transform_4, window_bounds = array<i64: 1, 128, 512>}]} {
    %c0 = arith.constant 0 : index
    %c0_0 = arith.constant 0 : index
    %c0_1 = arith.constant 0 : index
    %0 = vector.load %arg4[%c0, %c0_0, %c0_1] : memref<1x128x512xbf16, #tpu.memory_space<vmem>>, vector<1x128x512xbf16>
    %1 = vector.shape_cast %0 : vector<1x128x512xbf16> to vector<128x512xbf16>
    %2 = arith.extf %1 : vector<128x512xbf16> to vector<128x512xf32>
    %c0_2 = arith.constant 0 : index
    %c0_3 = arith.constant 0 : index
    %c0_4 = arith.constant 0 : index
    %3 = vector.load %arg2[%c0_2, %c0_3, %c0_4] : memref<1x1x512xf32, #tpu.memory_space<vmem>>, vector<1x1x512xf32>
    %4 = vector.shape_cast %3 : vector<1x1x512xf32> to vector<1x512xf32>
    %5 = vector.broadcast %4 : vector<1x512xf32> to vector<128x512xf32>
    %6 = arith.mulf %2, %5 : vector<128x512xf32>
    %c0_5 = arith.constant 0 : index
    %c0_6 = arith.constant 0 : index
    %c0_7 = arith.constant 0 : index
    %7 = vector.load %arg3[%c0_5, %c0_6, %c0_7] : memref<1x1x512xf32, #tpu.memory_space<vmem>>, vector<1x1x512xf32>
    %8 = vector.shape_cast %7 : vector<1x1x512xf32> to vector<1x512xf32>
    %9 = vector.broadcast %8 : vector<1x512xf32> to vector<128x512xf32>
    %10 = arith.addf %6, %9 : vector<128x512xf32>
    %c0_8 = arith.constant 0 : index
    %c0_9 = arith.constant 0 : index
    %c0_10 = arith.constant 0 : index
    %11 = vector.load %arg5[%c0_8, %c0_9, %c0_10] : memref<1x128x512xbf16, #tpu.memory_space<vmem>>, vector<1x128x512xbf16>
    %12 = vector.shape_cast %11 : vector<1x128x512xbf16> to vector<128x512xbf16>
    %13 = arith.extf %12 : vector<128x512xbf16> to vector<128x512xf32>
    %14 = arith.addf %10, %13 : vector<128x512xf32>
    %cst = arith.constant 0.000000e+00 : f32
    %15 = vector.broadcast %cst : f32 to vector<128x512xf32>
    %16 = arith.maximumf %14, %15 : vector<128x512xf32>
    %17 = arith.truncf %16 : vector<128x512xf32> to vector<128x512xbf16>
    %c0_11 = arith.constant 0 : index
    %c0_12 = arith.constant 0 : index
    %c0_13 = arith.constant 0 : index
    %18 = vector.load %arg6[%c0_11, %c0_12, %c0_13] : memref<1x128x512xbf16, #tpu.memory_space<vmem>>, vector<1x128x512xbf16>
    %19 = vector.shape_cast %18 : vector<1x128x512xbf16> to vector<128x512xbf16>
    %20 = vector.shape_cast %17 : vector<128x512xbf16> to vector<1x128x512xbf16>
    tpu.vector_store %arg6[%c0_11, %c0_12, %c0_13], %20 {strides = array<i32>} : memref<1x128x512xbf16, #tpu.memory_space<vmem>>, vector<1x128x512xbf16>,
    return
  }
  func.func @transform_0(%arg0: i32, %arg1: i32) -> (i32, i32, i32) {
    %c0_i32 = arith.constant 0 : i32
    %c0_i32_0 = arith.constant 0 : i32
    %c0_i32_1 = arith.constant 0 : i32
    return %arg0, %c0_i32, %c0_i32_0 : i32, i32, i32
  }
  func.func @transform_1(%arg0: i32, %arg1: i32) -> (i32, i32, i32) {
    %c0_i32 = arith.constant 0 : i32
    %c0_i32_0 = arith.constant 0 : i32
    %c0_i32_1 = arith.constant 0 : i32
    return %arg0, %c0_i32, %c0_i32_0 : i32, i32, i32
  }
  func.func @transform_2(%arg0: i32, %arg1: i32) -> (i32, i32, i32) {
    %c0_i32 = arith.constant 0 : i32
    %c0_i32_0 = arith.constant 0 : i32
    return %arg0, %arg1, %c0_i32 : i32, i32, i32
  }
  func.func @transform_3(%arg0: i32, %arg1: i32) -> (i32, i32, i32) {
    %c0_i32 = arith.constant 0 : i32
    %c0_i32_0 = arith.constant 0 : i32
    return %arg0, %arg1, %c0_i32 : i32, i32, i32
  }
  func.func @transform_4(%arg0: i32, %arg1: i32) -> (i32, i32, i32) {
    %c0_i32 = arith.constant 0 : i32
    %c0_i32_0 = arith.constant 0 : i32
    return %arg0, %arg1, %c0_i32 : i32, i32, i32
  }
}

</mosaic_0001>

<bundles_post_ra>
// kernel: mul.22
= control target key start
LH: loop header
LB: loop body
LE: loop exit
PB: predicated region body
PF: predicated region fallthrough
CT: control target
= control target key end

     0   :  { %s56_s0 = inlined_call_operand.vmem [shape: f32[2,1,128], index: 0, kind: input, shape index: {}, may-alias: {0,1}]   ;;  %s57_s1 = inlined_call_operand.vmem [shape: f32[2,1,128], index: 1, kind: input, shape index: {}, may-alias: {0,1}]   ;;  %s58_s2 = inlined_call_operand.vmem [shape: f32[2,1,128], index: 2, kind: output, shape index: {}]  }
   0x1   :  { %v3_v0 = vld [vmem:[%s56_s0] sm:$0x1]  ;;  %v20_v2 = vld [vmem:[%s56_s0 + $0x1] sm:$0x1] }
   0x2   :  { %v4_v1 = vld [vmem:[%s57_s1] sm:$0x1]  ;;  %v21_v4 = vld [vmem:[%s57_s1 + $0x1] sm:$0x1] }
   0x3   :  { %v7_v3 = vmul.f32 %v4_v1, %v3_v0  ;;  %v16_v5 = vmul.f32 %v21_v4, %v20_v2 }
   0x5   :  { %9 = vst [vmem:[%s58_s2] sm:$0x1] %v7_v3  ;;  %22 = vst [vmem:[%s58_s2 + $0x1] sm:$0x1] %v16_v5 }

// kernel: bottleneck_forward.4
= control target key start
LH: loop header
LB: loop body
LE: loop exit
PB: predicated region body
PF: predicated region fallthrough
CT: control target
= control target key end

     0   :  { %s1627_s12 = smov 0   ;;  %s1629_s13 = smov 0   ;;  %s1840_s0 = inlined_call_operand.vmem [shape: bf16[2,256,512], index: 0, kind: input, shape index: {}]   ;;  %s1841_s1 = inlined_call_operand.vmem [shape: bf16[512,128], index: 1, kind: input, shape index: {}]   ;;  %s1842_s2 = inlined_call_operand.vmem [shape: bf16[2,256,128], index: 2, kind: output, shape index: {0}]   ;;  %s1843_s3 = inlined_call_operand.vmem [shape: f32[2,2,128], index: 3, kind: output, shape index: {1}]  }
   0x1   :  { %s1631_s14 = smov 0   ;;  %s1633_s15 = smov 0  }
   0x2   :  { %s1635_s16 = smov 0  }
   0x3 LB: > { %s23_s17 = sadd.s32 1, %s1597_s14  ;;  %s26_s18 = sadd.s32 1, %s1601_s15  ;;  %s1605_s16 = sphi %s1635_s16, %s14_s16   ;;  %s1601_s15 = sphi %s1633_s15, %s1847_s15   ;;  %s1597_s14 = sphi %s1631_s14, %s1846_s14   ;;  %s1593_s13 = sphi %s1629_s13, %s1845_s13   ;;  %s1589_s12 = sphi %s1627_s12, %s1844_s12  }
   0x4   : > { %p24_p0 = scmp.ge.s32.totalorder %s23_s17, 2  ;;  %p1163_p1 = scmp.ge.s32.totalorder %s1605_s16, 1 }
   0x5   : > { %p162_p2 = scmp.lt.s32.totalorder %s1605_s16, 5 }
   0x6   : > { %s1849_s17 = smov (%p24_p0, %s23_s17), 0  ;;  %s1851_s18 = smov (!%p24_p0, %s26_s18), %s1601_s15 }
   0x7   : > { %p163_p3 = pnand %p1163_p1, %p162_p2  ;;  %p28_p4 = scmp.ge.s32.totalorder %s1851_s18, 2 }
   0x8   : > { %v1487_v0 = vld [vmem:[%s1841_s1 + $0x40] sm:$0xff] (!%p163_p3)   ;;  %p200_p5 = scmp.lt.s32.totalorder (!%p163_p3), %s1593_s13, 1  ;;  %v1491_v4 = vld [vmem:[%s1841_s1 + $0x48] sm:$0xff] (!%p163_p3)   ;;  %v1495_v8 = vld [vmem:[%s1841_s1 + $0x50] sm:$0xff] (!%p163_p3)   ;;  %s1164_s23 = sshll.u32 (!%p163_p3), %s1589_s12, 4  ;;  %vm1021_vm0 = vcmask (!%p163_p3), 1040384  }
   0x9   : > { %s1853_s18 = smov (%p28_p4, %s1851_s18), 0  ;;  %166 = sbr.rel (%p163_p3) target bundleno = 353 (0x161), region = 28 }
   0xa   : > { %v1488_v1 = vld [vmem:[%s1841_s1 + $0xc0] sm:$0xff] (!%p163_p3)   ;;  %1319 = vmatprep.subr.bf16.mxu0 (!%p163_p3), %v1487_v0  ;;  %v1492_v5 = vld [vmem:[%s1841_s1 + $0xc8] sm:$0xff] (!%p163_p3)   ;;  %v1496_v9 = vld [vmem:[%s1841_s1 + $0xd0] sm:$0xff] (!%p163_p3)   ;;  %p202_p6 = scmp.lt.s32.totalorder (!%p163_p3), %s1164_s23, 31  ;;  %p1252_p7 = scmp.ne.s32.totalorder (!%p163_p3), %s1589_s12, 0 }
   0xb   : > { %v1489_v2 = vld [vmem:[%s1841_s1] sm:$0xff] (!%p163_p3)   ;;  %1383 = vmatprep.subr.bf16.mxu1 (!%p163_p3), %v1488_v1  ;;  %v1493_v6 = vld [vmem:[%s1841_s1 + $0x8] sm:$0xff] (!%p163_p3)   ;;  %v1497_v10 = vld [vmem:[%s1841_s1 + $0x10] sm:$0xff] (!%p163_p3)  }
   0xc   : > { %v1490_v3 = vld [vmem:[%s1841_s1 + $0x80] sm:$0xff] (!%p163_p3)   ;;  %1320 = vmatpush3.bf16.msra.mxu0 (!%p163_p3), %v1489_v2  ;;  %v1494_v7 = vld [vmem:[%s1841_s1 + $0x88] sm:$0xff] (!%p163_p3)   ;;  %v1498_v11 = vld [vmem:[%s1841_s1 + $0x90] sm:$0xff] (!%p163_p3)  }
   0xd   : > { %1384 = vmatpush3.bf16.msra.mxu1 (!%p163_p3), %v1490_v3  ;;  %1321 = vmatprep.subr.bf16.mxu0 (!%p163_p3), %v1491_v4  ;;  %v1499_v12 = vld [vmem:[%s1841_s1 + $0x58] sm:$0xff] (!%p163_p3)   ;;  %v1503_v16 = vld [vmem:[%s1841_s1 + $0x60] sm:$0xff] (!%p163_p3)   ;;  %v1507_v20 = vld [vmem:[%s1841_s1 + $0x68] sm:$0xff] (!%p163_p3)  }
   0xe   : > { %1385 = vmatprep.subr.bf16.mxu1 (!%p163_p3), %v1492_v5  ;;  %v1500_v13 = vld [vmem:[%s1841_s1 + $0xd8] sm:$0xff] (!%p163_p3)   ;;  %v1504_v17 = vld [vmem:[%s1841_s1 + $0xe0] sm:$0xff] (!%p163_p3)   ;;  %v1508_v21 = vld [vmem:[%s1841_s1 + $0xe8] sm:$0xff] (!%p163_p3)  }
   0xf   : > { %v1501_v14 = vld [vmem:[%s1841_s1 + $0x18] sm:$0xff] (!%p163_p3)   ;;  %v1505_v18 = vld [vmem:[%s1841_s1 + $0x20] sm:$0xff] (!%p163_p3)   ;;  %v1509_v22 = vld [vmem:[%s1841_s1 + $0x28] sm:$0xff] (!%p163_p3)  }
  0x10   : > { %s1855_s13 = smov (!%p200_p5, %s1593_s13), 1  ;;  %1322 = vmatpush3.bf16.msra.mxu0 %v1493_v6  ;;  %v1502_v15 = vld [vmem:[%s1841_s1 + $0x98] sm:$0xff]   ;;  %s1857_s23 = smov (!%p202_p6, %s1164_s23), 31  ;;  %v1506_v19 = vld [vmem:[%s1841_s1 + $0xa0] sm:$0xff]   ;;  %v1510_v23 = vld [vmem:[%s1841_s1 + $0xa8] sm:$0xff]  }
  0x11   : > { %s1171_s8 = sshll.u32 %s1855_s13, 1  ;;  %1386 = vmatpush3.bf16.msra.mxu1 %v1494_v7  ;;  %1323 = vmatprep.subr.bf16.mxu0 %v1495_v8  ;;  %s1166_s26 = sshll.u32 %s1855_s13, 7  ;;  %v1511_v24 = vld [vmem:[%s1841_s1 + $0x70] sm:$0xff]   ;;  %v1515_v28 = vld [vmem:[%s1841_s1 + $0x78] sm:$0xff]  }
  0x12   : > { %s1692_s20 = scalar_lea.vmem %s1843_s3, %s1171_s8  ;;  %1387 = vmatprep.subr.bf16.mxu1 %v1496_v9  ;;  %s1165_s29 = sshll.u32 %s1857_s23, 2  ;;  %v1512_v25 = vld [vmem:[%s1841_s1 + $0xf0] sm:$0xff]   ;;  %v1516_v29 = vld [vmem:[%s1841_s1 + $0xf8] sm:$0xff]  }
  0x13   : > { %s206_s9 = sadd.s32 %s1166_s26, %s1165_s29  ;;  %v1513_v26 = vld [vmem:[%s1841_s1 + $0x30] sm:$0xff]   ;;  %v1517_v30 = vld [vmem:[%s1841_s1 + $0x38] sm:$0xff]   ;;  %s1169_s19 = sshll.u32 %s1855_s13, 5 }
  0x14   : > { %1324 = vmatpush3.bf16.msra.mxu0 %v1497_v10  ;;  %s1167_s25 = sshll.u32 %s206_s9, 2  ;;  %v1514_v27 = vld [vmem:[%s1841_s1 + $0xb0] sm:$0xff]   ;;  %v1518_v31 = vld [vmem:[%s1841_s1 + $0xb8] sm:$0xff]   ;;  %s216_s21 = sadd.s32 %s1169_s19, %s1857_s23 }
  0x15   : > { %1388 = vmatpush3.bf16.msra.mxu1 %v1498_v11  ;;  %1325 = vmatprep.subr.bf16.mxu0 %v1499_v12  ;;  %s1765_s7 = scalar_lea.vmem %s1840_s0, %s1167_s25  ;;  %s1170_s22 = sshll.u32 %s216_s21, 2 }
  0x16   : > { %1389 = vmatprep.subr.bf16.mxu1 %v1500_v13  ;;  %v1519_v32 = vld [vmem:[%s1765_s7] ss:$16 sps:$4 sm:$0xff]   ;;  %v1521_v33 = vld [vmem:[%s1765_s7 + $0x4] ss:$16 sps:$4 sm:$0xff]   ;;  %v1522_v34 = vld [vmem:[%s1765_s7 + $0x8] ss:$16 sps:$4 sm:$0xff]   ;;  %s1810_s13 = scalar_lea.vmem %s1842_s2, %s1170_s22 }
  0x17   : > { %v1524_v35 = vld [vmem:[%s1765_s7 + $0xc] ss:$16 sps:$4 sm:$0xff]   ;;  %705 = vmatprep.mubr.bf16.mxu0 %v1521_v33  ;;  %v1525_v36 = vld [vmem:[%s1765_s7 + $0x24] ss:$16 sps:$4 sm:$0xff]   ;;  %v1529_v38 = vld [vmem:[%s1765_s7 + $0x20] ss:$16 sps:$4 sm:$0xff]  }
  0x18   : > { %1326 = vmatpush3.bf16.msra.mxu0 %v1501_v14  ;;  %802 = vmatprep.mubr.bf16.mxu1 %v1524_v35  ;;  %v1527_v37 = vld [vmem:[%s1765_s7 + $0x2c] ss:$16 sps:$4 sm:$0xff]   ;;  %v1530_v39 = vld [vmem:[%s1765_s7 + $0x28] ss:$16 sps:$4 sm:$0xff]   ;;  %v1531_v40 = vld [vmem:[%s1765_s7 + $0x44] ss:$16 sps:$4 sm:$0xff]  }
  0x19   : > { %1390 = vmatpush3.bf16.msra.mxu1 %v1502_v15  ;;  %1327 = vmatprep.subr.bf16.mxu0 %v1503_v16  ;;  %v1533_v41 = vld [vmem:[%s1765_s7 + $0x4c] ss:$16 sps:$4 sm:$0xff]   ;;  %v1535_v42 = vld [vmem:[%s1765_s7 + $0x40] ss:$16 sps:$4 sm:$0xff]   ;;  %v1536_v43 = vld [vmem:[%s1765_s7 + $0x48] ss:$16 sps:$4 sm:$0xff]  }
  0x1a   : > { %1391 = vmatprep.subr.bf16.mxu1 %v1504_v17  ;;  %v1537_v44 = vld [vmem:[%s1765_s7 + $0x64] ss:$16 sps:$4 sm:$0xff]   ;;  %v1539_v45 = vld [vmem:[%s1765_s7 + $0x6c] ss:$16 sps:$4 sm:$0xff]   ;;  %v1541_v46 = vld [vmem:[%s1765_s7 + $0x60] ss:$16 sps:$4 sm:$0xff]  }
  0x1b   : > { %v1542_v47 = vld [vmem:[%s1765_s7 + $0x68] ss:$16 sps:$4 sm:$0xff]   ;;  %v1543_v48 = vld [vmem:[%s1765_s7 + $0x84] ss:$16 sps:$4 sm:$0xff]   ;;  %v1545_v49 = vld [vmem:[%s1765_s7 + $0x8c] ss:$16 sps:$4 sm:$0xff]  }
  0x1c   : > { %1328 = vmatpush3.bf16.msra.mxu0 %v1505_v18  ;;  %v1547_v50 = vld [vmem:[%s1765_s7 + $0x80] ss:$16 sps:$4 sm:$0xff]   ;;  %v1548_v51 = vld [vmem:[%s1765_s7 + $0x88] ss:$16 sps:$4 sm:$0xff]   ;;  %v1549_v52 = vld [vmem:[%s1765_s7 + $0xa4] ss:$16 sps:$4 sm:$0xff]  }
  0x1d   : > { %1392 = vmatpush3.bf16.msra.mxu1 %v1506_v19  ;;  %1329 = vmatprep.subr.bf16.mxu0 %v1507_v20  ;;  %v1551_v53 = vld [vmem:[%s1765_s7 + $0xac] ss:$16 sps:$4 sm:$0xff]   ;;  %v1553_v54 = vld [vmem:[%s1765_s7 + $0xa0] ss:$16 sps:$4 sm:$0xff]   ;;  %v1554_v55 = vld [vmem:[%s1765_s7 + $0xa8] ss:$16 sps:$4 sm:$0xff]  }
  0x1e   : > { %1393 = vmatprep.subr.bf16.mxu1 %v1508_v21  ;;  %v1555_v56 = vld [vmem:[%s1765_s7 + $0xc4] ss:$16 sps:$4 sm:$0xff]   ;;  %v1557_v57 = vld [vmem:[%s1765_s7 + $0xcc] ss:$16 sps:$4 sm:$0xff]   ;;  %v1559_v58 = vld [vmem:[%s1765_s7 + $0xc0] ss:$16 sps:$4 sm:$0xff]  }
  0x1f   : > { %v1560_v59 = vld [vmem:[%s1765_s7 + $0xc8] ss:$16 sps:$4 sm:$0xff]   ;;  %v1561_v60 = vld [vmem:[%s1765_s7 + $0xe4] ss:$16 sps:$4 sm:$0xff]   ;;  %v1563_v61 = vld [vmem:[%s1765_s7 + $0xec] ss:$16 sps:$4 sm:$0xff]  }
  0x20   : > { %1330 = vmatpush3.bf16.msra.mxu0 %v1509_v22  ;;  %v1565_v62 = vld [vmem:[%s1765_s7 + $0xe0] ss:$16 sps:$4 sm:$0xff]   ;;  %v1566_v63 = vld [vmem:[%s1765_s7 + $0xe8] ss:$16 sps:$4 sm:$0xff]  }
  0x21   : > { %1394 = vmatpush3.bf16.msra.mxu1 %v1510_v23  ;;  %1331 = vmatprep.subr.bf16.mxu0 %v1511_v24 }
  0x22   : > { %1395 = vmatprep.subr.bf16.mxu1 %v1512_v25 }
  0x24   : > { %1332 = vmatpush3.bf16.msra.mxu0 %v1513_v26 }
  0x25   : > { %1396 = vmatpush3.bf16.msra.mxu1 %v1514_v27  ;;  %1333 = vmatprep.subr.bf16.mxu0 %v1515_v28 }
  0x26   : > { %1397 = vmatprep.subr.bf16.mxu1 %v1516_v29 }
  0x28   : > { %1334 = vmatpush3.bf16.msra.mxu0 %v1517_v30 }
  0x29   : > { %1398 = vmatpush3.bf16.msra.mxu1 %v1518_v31 }
  0x2b   : > { %706 = vmatmul.mubr.bf16.vlgmr.msra.gmra.mrb[0].mxu0 %v1519_v32 }
  0x2c   : > { %803 = vmatmul.mubr.bf16.vlgmr.msra.gmra.mrb[0].mxu1 %v1522_v34  ;;  %713 = vmatprep.mubr.bf16.mxu0 %v1525_v36 }
  0x2d   : > { %810 = vmatprep.mubr.bf16.mxu1 %v1527_v37 }
  0x33   : > { %714 = vmatmul.mubr.bf16.gmra.mrb[4].mxu0 %v1529_v38 }
  0x34   : > { %811 = vmatmul.mubr.bf16.gmra.mrb[4].mxu1 %v1530_v39  ;;  %721 = vmatprep.mubr.bf16.mxu0 %v1531_v40 }
  0x35   : > { %818 = vmatprep.mubr.bf16.mxu1 %v1533_v41 }
  0x3b   : > { %722 = vmatmul.mubr.bf16.gmra.mrb[8].mxu0 %v1535_v42 }
  0x3c   : > { %819 = vmatmul.mubr.bf16.gmra.mrb[8].mxu1 %v1536_v43  ;;  %729 = vmatprep.mubr.bf16.mxu0 %v1537_v44 }
  0x3d   : > { %826 = vmatprep.mubr.bf16.mxu1 %v1539_v45 }
  0x43   : > { %730 = vmatmul.mubr.bf16.gmra.mrb[12].mxu0 %v1541_v46 }
  0x44   : > { %827 = vmatmul.mubr.bf16.gmra.mrb[12].mxu1 %v1542_v47  ;;  %737 = vmatprep.mubr.bf16.mxu0 %v1543_v48 }
  0x45   : > { %834 = vmatprep.mubr.bf16.mxu1 %v1545_v49 }
  0x4b   : > { %738 = vmatmul.mubr.bf16.gmra.mrb[16].mxu0 %v1547_v50 }
  0x4c   : > { %835 = vmatmul.mubr.bf16.gmra.mrb[16].mxu1 %v1548_v51  ;;  %745 = vmatprep.mubr.bf16.mxu0 %v1549_v52 }
  0x4d   : > { %842 = vmatprep.mubr.bf16.mxu1 %v1551_v53 }
  0x53   : > { %746 = vmatmul.mubr.bf16.gmra.mrb[20].mxu0 %v1553_v54 }
  0x54   : > { %843 = vmatmul.mubr.bf16.gmra.mrb[20].mxu1 %v1554_v55  ;;  %753 = vmatprep.mubr.bf16.mxu0 %v1555_v56 }
  0x55   : > { %850 = vmatprep.mubr.bf16.mxu1 %v1557_v57 }
  0x5b   : > { %754 = vmatmul.mubr.bf16.gmra.mrb[24].mxu0 %v1559_v58 }
  0x5c   : > { %851 = vmatmul.mubr.bf16.gmra.mrb[24].mxu1 %v1560_v59  ;;  %761 = vmatprep.mubr.bf16.mxu0 %v1561_v60 }
  0x5d   : > { %858 = vmatprep.mubr.bf16.mxu1 %v1563_v61 }
  0x63   : > { %762 = vmatmul.mubr.bf16.gmra.mrb[28].mxu0 %v1565_v62 }
  0x64   : > { %859 = vmatmul.mubr.bf16.gmra.mrb[28].mxu1 %v1566_v63 }
  0xfe   : > { %v1335_v0 = vpop.f32.mrb[0].mxu0 }
  0xff   : > { %v1399_v1 = vpop.f32.mrb[0].mxu1  ;;  %v1336_v2 = vpop.f32.mrb[1].mxu0 }
 0x100   : > { %v1337_v3 = vadd.f32 %v1336_v2, %v1335_v0  ;;  %v1400_v4 = vpop.f32.mrb[1].mxu1  ;;  %v1338_v5 = vpop.f32.mrb[2].mxu0 }
 0x101   : > { %v1401_v6 = vadd.f32 %v1400_v4, %v1399_v1  ;;  %v1402_v7 = vpop.f32.mrb[2].mxu1  ;;  %v1339_v8 = vpop.f32.mrb[3].mxu0 }
 0x102   : > { %v1340_v9 = vadd.f32 %v1339_v8, %v1338_v5  ;;  %v1403_v10 = vpop.f32.mrb[3].mxu1 }
 0x103   : > { %v805_v11 = vadd.f32 %v1401_v6, %v1337_v3  ;;  %v1404_v12 = vadd.f32 %v1403_v10, %v1402_v7 }
 0x105   : > { %v808_v13 = vadd.f32 %v1404_v12, %v1340_v9 }
 0x106   : > { %v1341_v14 = vpop.f32.mrb[4].mxu0 }
 0x107   : > { %v867_v15 = vpack.c.bf16 %v808_v13, %v805_v11  ;;  %v1405_v16 = vpop.f32.mrb[4].mxu1  ;;  %v1342_v17 = vpop.f32.mrb[5].mxu0 }
 0x108   : > { %v1343_v18 = vadd.f32 %v1342_v17, %v1341_v14  ;;  %v1406_v19 = vpop.f32.mrb[5].mxu1  ;;  %v1344_v20 = vpop.f32.mrb[6].mxu0 }
 0x109   : > { %1276 = vst [vmem:[%s1810_s13] sm:$0xff] %v867_v15   ;;  %v1407_v21 = vadd.f32 %v1406_v19, %v1405_v16  ;;  %v1408_v22 = vpop.f32.mrb[6].mxu1  ;;  %v1345_v23 = vpop.f32.mrb[7].mxu0  ;;  %v947_v27 = vunpack.c.l.bf16 %v867_v15  ;;  %v948_v28 = vunpack.c.h.bf16 %v867_v15 }
 0x10a   : > { %v1346_v24 = vadd.f32 %v1345_v23, %v1344_v20  ;;  %v1409_v25 = vpop.f32.mrb[7].mxu1 }
 0x10b   : > { %v813_v26 = vadd.f32 %v1407_v21, %v1343_v18  ;;  %v1410_v29 = vadd.f32 %v1409_v25, %v1408_v22  ;;  %v984_v34 = vmul.f32 %v947_v27, %v947_v27  ;;  %v985_v35 = vmul.f32 %v948_v28, %v948_v28 }
 0x10c   : > { %v963_v43 = vadd.f32 %v948_v28, %v947_v27 }
 0x10d   : > { %v816_v30 = vadd.f32 %v1410_v29, %v1346_v24  ;;  %v1000_v50 = vadd.f32 %v985_v35, %v984_v34 }
 0x10e   : > { %v1347_v31 = vpop.f32.mrb[8].mxu0 }
 0x10f   : > { %v1411_v32 = vpop.f32.mrb[8].mxu1  ;;  %v1348_v33 = vpop.f32.mrb[9].mxu0  ;;  %v868_v36 = vpack.c.bf16 %v816_v30, %v813_v26 }
 0x110   : > { %v1349_v37 = vadd.f32 %v1348_v33, %v1347_v31  ;;  %v1412_v38 = vpop.f32.mrb[9].mxu1  ;;  %v1350_v39 = vpop.f32.mrb[10].mxu0 }
 0x111   : > { %v1413_v40 = vadd.f32 %v1412_v38, %v1411_v32  ;;  %v1414_v41 = vpop.f32.mrb[10].mxu1  ;;  %v1351_v42 = vpop.f32.mrb[11].mxu0  ;;  %1312 = vst [vmem:[%s1810_s13 + $0x8] sm:$0xff] %v868_v36   ;;  %v949_v44 = vunpack.c.l.bf16 %v868_v36  ;;  %v950_v45 = vunpack.c.h.bf16 %v868_v36 }
 0x112   : > { %v1352_v46 = vadd.f32 %v1351_v42, %v1350_v39  ;;  %v1415_v47 = vpop.f32.mrb[11].mxu1 }
 0x113   : > { %v821_v48 = vadd.f32 %v1413_v40, %v1349_v37  ;;  %v1416_v49 = vadd.f32 %v1415_v47, %v1414_v41  ;;  %v964_v51 = vadd.f32 %v963_v43, %v949_v44  ;;  %v986_v52 = vmul.f32 %v949_v44, %v949_v44 }
 0x114   : > { %v987_v55 = vmul.f32 %v950_v45, %v950_v45 }
 0x115   : > { %v824_v53 = vadd.f32 %v1416_v49, %v1352_v46  ;;  %v965_v54 = vadd.f32 %v964_v51, %v950_v45  ;;  %v1001_v56 = vadd.f32 %v1000_v50, %v986_v52 }
 0x116   : > { %v1353_v57 = vpop.f32.mrb[12].mxu0 }
 0x117   : > { %v869_v58 = vpack.c.bf16 %v824_v53, %v821_v48  ;;  %v1417_v59 = vpop.f32.mrb[12].mxu1  ;;  %v1354_v60 = vpop.f32.mrb[13].mxu0  ;;  %v1002_v61 = vadd.f32 %v1001_v56, %v987_v55 }
 0x118   : > { %v1355_v62 = vadd.f32 %v1354_v60, %v1353_v57  ;;  %v1418_v63 = vpop.f32.mrb[13].mxu1  ;;  %v1356_v0 = vpop.f32.mrb[14].mxu0 }
 0x119   : > { %1313 = vst [vmem:[%s1810_s13 + $0x10] sm:$0xff] %v869_v58   ;;  %v951_v1 = vunpack.c.l.bf16 %v869_v58  ;;  %v952_v2 = vunpack.c.h.bf16 %v869_v58  ;;  %v1419_v3 = vadd.f32 %v1418_v63, %v1417_v59  ;;  %v1420_v4 = vpop.f32.mrb[14].mxu1  ;;  %v1357_v5 = vpop.f32.mrb[15].mxu0 }
 0x11a   : > { %v1358_v6 = vadd.f32 %v1357_v5, %v1356_v0  ;;  %v1421_v7 = vpop.f32.mrb[15].mxu1 }
 0x11b   : > { %v966_v8 = vadd.f32 %v965_v54, %v951_v1  ;;  %v988_v9 = vmul.f32 %v951_v1, %v951_v1  ;;  %v829_v10 = vadd.f32 %v1419_v3, %v1355_v62  ;;  %v1422_v11 = vadd.f32 %v1421_v7, %v1420_v4 }
 0x11c   : > { %v989_v13 = vmul.f32 %v952_v2, %v952_v2 }
 0x11d   : > { %v967_v12 = vadd.f32 %v966_v8, %v952_v2  ;;  %v1003_v14 = vadd.f32 %v1002_v61, %v988_v9  ;;  %v832_v15 = vadd.f32 %v1422_v11, %v1358_v6 }
 0x11e   : > { %v1359_v16 = vpop.f32.mrb[16].mxu0 }
 0x11f   : > { %v1004_v17 = vadd.f32 %v1003_v14, %v989_v13  ;;  %v1423_v18 = vpop.f32.mrb[16].mxu1  ;;  %v1360_v19 = vpop.f32.mrb[17].mxu0  ;;  %v870_v20 = vpack.c.bf16 %v832_v15, %v829_v10 }
 0x120   : > { %v1361_v21 = vadd.f32 %v1360_v19, %v1359_v16  ;;  %v1424_v22 = vpop.f32.mrb[17].mxu1  ;;  %v1362_v23 = vpop.f32.mrb[18].mxu0 }
 0x121   : > { %v1425_v24 = vadd.f32 %v1424_v22, %v1423_v18  ;;  %v1426_v25 = vpop.f32.mrb[18].mxu1  ;;  %v1363_v26 = vpop.f32.mrb[19].mxu0  ;;  %1314 = vst [vmem:[%s1810_s13 + $0x18] sm:$0xff] %v870_v20   ;;  %v953_v27 = vunpack.c.l.bf16 %v870_v20  ;;  %v954_v28 = vunpack.c.h.bf16 %v870_v20 }
 0x122   : > { %v1364_v29 = vadd.f32 %v1363_v26, %v1362_v23  ;;  %v1427_v30 = vpop.f32.mrb[19].mxu1 }
 0x123   : > { %v837_v31 = vadd.f32 %v1425_v24, %v1361_v21  ;;  %v1428_v32 = vadd.f32 %v1427_v30, %v1426_v25  ;;  %v968_v33 = vadd.f32 %v967_v12, %v953_v27  ;;  %v990_v34 = vmul.f32 %v953_v27, %v953_v27 }
 0x124   : > { %v991_v37 = vmul.f32 %v954_v28, %v954_v28 }
 0x125   : > { %v840_v35 = vadd.f32 %v1428_v32, %v1364_v29  ;;  %v969_v36 = vadd.f32 %v968_v33, %v954_v28  ;;  %v1005_v38 = vadd.f32 %v1004_v17, %v990_v34 }
 0x126   : > { %v1365_v39 = vpop.f32.mrb[20].mxu0 }
 0x127   : > { %v871_v40 = vpack.c.bf16 %v840_v35, %v837_v31  ;;  %v1429_v41 = vpop.f32.mrb[20].mxu1  ;;  %v1366_v42 = vpop.f32.mrb[21].mxu0  ;;  %v1006_v43 = vadd.f32 %v1005_v38, %v991_v37 }
 0x128   : > { %v1367_v44 = vadd.f32 %v1366_v42, %v1365_v39  ;;  %v1430_v45 = vpop.f32.mrb[21].mxu1  ;;  %v1368_v46 = vpop.f32.mrb[22].mxu0 }
 0x129   : > { %1315 = vst [vmem:[%s1810_s13 + $0x20] sm:$0xff] %v871_v40   ;;  %v955_v47 = vunpack.c.l.bf16 %v871_v40  ;;  %v956_v48 = vunpack.c.h.bf16 %v871_v40  ;;  %v1431_v49 = vadd.f32 %v1430_v45, %v1429_v41  ;;  %v1432_v50 = vpop.f32.mrb[22].mxu1  ;;  %v1369_v51 = vpop.f32.mrb[23].mxu0 }
 0x12a   : > { %v1370_v52 = vadd.f32 %v1369_v51, %v1368_v46  ;;  %v1433_v53 = vpop.f32.mrb[23].mxu1 }
 0x12b   : > { %v970_v54 = vadd.f32 %v969_v36, %v955_v47  ;;  %v992_v55 = vmul.f32 %v955_v47, %v955_v47  ;;  %v845_v56 = vadd.f32 %v1431_v49, %v1367_v44  ;;  %v1434_v57 = vadd.f32 %v1433_v53, %v1432_v50 }
 0x12c   : > { %v993_v59 = vmul.f32 %v956_v48, %v956_v48 }
 0x12d   : > { %v971_v58 = vadd.f32 %v970_v54, %v956_v48  ;;  %v1007_v60 = vadd.f32 %v1006_v43, %v992_v55  ;;  %v848_v61 = vadd.f32 %v1434_v57, %v1370_v52 }
 0x12e   : > { %v1371_v62 = vpop.f32.mrb[24].mxu0 }
 0x12f   : > { %v1008_v63 = vadd.f32 %v1007_v60, %v993_v59  ;;  %v1435_v0 = vpop.f32.mrb[24].mxu1  ;;  %v1372_v1 = vpop.f32.mrb[25].mxu0  ;;  %v872_v2 = vpack.c.bf16 %v848_v61, %v845_v56 }
 0x130   : > { %v1373_v3 = vadd.f32 %v1372_v1, %v1371_v62  ;;  %v1436_v4 = vpop.f32.mrb[25].mxu1  ;;  %v1374_v5 = vpop.f32.mrb[26].mxu0 }
 0x131   : > { %v1437_v6 = vadd.f32 %v1436_v4, %v1435_v0  ;;  %v1438_v7 = vpop.f32.mrb[26].mxu1  ;;  %v1375_v8 = vpop.f32.mrb[27].mxu0  ;;  %1316 = vst [vmem:[%s1810_s13 + $0x28] sm:$0xff] %v872_v2   ;;  %v957_v9 = vunpack.c.l.bf16 %v872_v2  ;;  %v958_v10 = vunpack.c.h.bf16 %v872_v2 }
 0x132   : > { %v1376_v11 = vadd.f32 %v1375_v8, %v1374_v5  ;;  %v1439_v12 = vpop.f32.mrb[27].mxu1 }
 0x133   : > { %v853_v13 = vadd.f32 %v1437_v6, %v1373_v3  ;;  %v1440_v14 = vadd.f32 %v1439_v12, %v1438_v7  ;;  %v972_v15 = vadd.f32 %v971_v58, %v957_v9  ;;  %v994_v16 = vmul.f32 %v957_v9, %v957_v9 }
 0x134   : > { %v995_v19 = vmul.f32 %v958_v10, %v958_v10 }
 0x135   : > { %v856_v17 = vadd.f32 %v1440_v14, %v1376_v11  ;;  %v973_v18 = vadd.f32 %v972_v15, %v958_v10  ;;  %v1009_v20 = vadd.f32 %v1008_v63, %v994_v16 }
 0x136   : > { %v1377_v21 = vpop.f32.mrb[28].mxu0 }
 0x137   : > { %v873_v22 = vpack.c.bf16 %v856_v17, %v853_v13  ;;  %v1441_v23 = vpop.f32.mrb[28].mxu1  ;;  %v1378_v24 = vpop.f32.mrb[29].mxu0  ;;  %v1010_v25 = vadd.f32 %v1009_v20, %v995_v19 }
 0x138   : > { %v1379_v26 = vadd.f32 %v1378_v24, %v1377_v21  ;;  %v1442_v27 = vpop.f32.mrb[29].mxu1  ;;  %v1380_v28 = vpop.f32.mrb[30].mxu0 }
 0x139   : > { %1317 = vst [vmem:[%s1810_s13 + $0x30] sm:$0xff] %v873_v22   ;;  %v959_v29 = vunpack.c.l.bf16 %v873_v22  ;;  %v960_v30 = vunpack.c.h.bf16 %v873_v22  ;;  %v1443_v31 = vadd.f32 %v1442_v27, %v1441_v23  ;;  %v1444_v32 = vpop.f32.mrb[30].mxu1  ;;  %v1381_v33 = vpop.f32.mrb[31].mxu0 }
 0x13a   : > { %v1382_v34 = vadd.f32 %v1381_v33, %v1380_v28  ;;  %v1445_v35 = vpop.f32.mrb[31].mxu1 }
 0x13b   : > { %v974_v36 = vadd.f32 %v973_v18, %v959_v29  ;;  %v996_v37 = vmul.f32 %v959_v29, %v959_v29  ;;  %v861_v38 = vadd.f32 %v1443_v31, %v1379_v26  ;;  %v1446_v39 = vadd.f32 %v1445_v35, %v1444_v32 }
 0x13c   : > { %v997_v41 = vmul.f32 %v960_v30, %v960_v30 }
 0x13d   : > { %v975_v40 = vadd.f32 %v974_v36, %v960_v30  ;;  %v1011_v42 = vadd.f32 %v1010_v25, %v996_v37  ;;  %v864_v43 = vadd.f32 %v1446_v39, %v1382_v34 }
 0x13f   : > { %v1012_v44 = vadd.f32 %v1011_v42, %v997_v41  ;;  %v874_v45 = vpack.c.bf16 %v864_v43, %v861_v38 }
 0x141   : > { %1318 = vst [vmem:[%s1810_s13 + $0x38] sm:$0xff] %v874_v45   ;;  %v961_v46 = vunpack.c.l.bf16 %v874_v45  ;;  %v962_v47 = vunpack.c.h.bf16 %v874_v45 }
 0x143   : > { %v976_v48 = vadd.f32 %v975_v40, %v961_v46  ;;  %v998_v49 = vmul.f32 %v961_v46, %v961_v46  ;;  %v999_v51 = vmul.f32 %v962_v47, %v962_v47 }
 0x145   : > { %v977_v50 = vadd.f32 %v976_v48, %v962_v47  ;;  %v1013_v52 = vadd.f32 %v1012_v44, %v998_v49 }
 0x147   : > { %v978_v53 = vrot.slane %v977_v50, 4  ;;  %v1014_v54 = vadd.f32 %v1013_v52, %v999_v51 }
 0x149   : > { %v979_v55 = vadd.f32 %v978_v53, %v977_v50  ;;  %v1015_v56 = vrot.slane %v1014_v54, 4 }
 0x14b   : > { %v980_v57 = vrot.slane %v979_v55, 2  ;;  %v1016_v58 = vadd.f32 %v1015_v56, %v1014_v54 }
 0x14d   : > { %v981_v59 = vadd.f32 %v980_v57, %v979_v55  ;;  %v1017_v60 = vrot.slane %v1016_v58, 2 }
 0x14f   : > { %v982_v61 = vrot.slane %v981_v59, 1  ;;  %v1018_v62 = vadd.f32 %v1017_v60, %v1016_v58  ;;  %1026 = sbr.rel (%p1252_p7) target bundleno = 343 (0x157), region = 32 }
 0x151   : > { %v1019_v63 = vrot.slane %v1018_v62, 1  ;;  %v983_v0 = vadd.f32 %v982_v61, %v981_v59 }
 0x153   : > { %v1020_v1 = vadd.f32 %v1019_v63, %v1018_v62 }
 0x155   : > { %v1022_v2 = vsel %vm1021_vm0, %v983_v0, %v1020_v1 }
 0x156   : > { %1027 = vst [vmem:[%s1692_s20] sm:$0x3] %v1022_v2 }
 0x157 PF: > { %p1253_p8 = scmp.eq.s32.totalorder %s1589_s12, 0 }
 0x159   : > { %1031 = sbr.rel (%p1253_p8) target bundleno = 353 (0x161), region = 36 }
 0x15d   : > { %v1032_v3 = vld [vmem:[%s1692_s20] sm:$0x3] (!%p1253_p8) }
 0x15e   : > { %v1033_v4 = vadd.f32 (!%p1253_p8), %v1032_v3, %v1022_v2 }
 0x160   : > { %1034 = vst [vmem:[%s1692_s20] sm:$0x3] %v1033_v4 }
 0x161 PF: > { %s14_s16 = sadd.s32 1, %s1605_s16   ;;  %s1844_s12 = smov %s1597_s14 }
 0x162   : > { %p11_p9 = scmp.ge.s32.totalorder %s14_s16, 6   ;;  %s1845_s13 = smov %s1601_s15 }
 0x163   : > { %s1846_s14 = smov %s1849_s17  ;;  %s1847_s15 = smov %s1853_s18 }
 0x164   :  { %13 = sbr.rel (!%p11_p9) target bundleno = 3 (0x3), region = 78 }

// kernel: bottleneck_forward.6
= control target key start
LH: loop header
LB: loop body
LE: loop exit
PB: predicated region body
PF: predicated region fallthrough
CT: control target
= control target key end

     0   :  { %s1876_s18 = smov 0   ;;  %s1878_s19 = smov 0   ;;  %s2225_s0 = inlined_call_operand.vmem [shape: f32[2,1,128], index: 0, kind: input, shape index: {}]   ;;  %s2226_s1 = inlined_call_operand.vmem [shape: f32[2,1,128], index: 1, kind: input, shape index: {}]   ;;  %s2227_s2 = inlined_call_operand.vmem [shape: bf16[2,256,128], index: 2, kind: input, shape index: {}]   ;;  %s2228_s3 = inlined_call_operand.vmem [shape: bf16[128,512], index: 3, kind: input, shape index: {}]   ;;  %s2229_s4 = inlined_call_operand.vmem [shape: bf16[2,256,512], index: 4, kind: output, shape index: {0}]   ;;  %s2230_s5 = inlined_call_operand.vmem [shape: f32[2,2,512], index: 5, kind: output, shape index: {1}]  }
   0x1   :  { %s1880_s20 = smov 0   ;;  %s1882_s21 = smov 0  }
   0x2   :  { %s1884_s22 = smov 0  }
   0x3 LB: > { %s25_s23 = sadd.s32 1, %s1833_s20  ;;  %s28_s24 = sadd.s32 1, %s1837_s21  ;;  %s1841_s22 = sphi %s1884_s22, %s16_s22   ;;  %s1837_s21 = sphi %s1882_s21, %s2234_s21   ;;  %s1833_s20 = sphi %s1880_s20, %s2233_s20   ;;  %s1829_s19 = sphi %s1878_s19, %s2232_s19   ;;  %s1825_s18 = sphi %s1876_s18, %s2231_s18  }
   0x4   : > { %p26_p0 = scmp.ge.s32.totalorder %s25_s23, 2  ;;  %p1560_p1 = scmp.ge.s32.totalorder %s1841_s22, 1 }
   0x5   : > { %p227_p2 = scmp.lt.s32.totalorder %s1841_s22, 5 }
   0x6   : > { %s2236_s23 = smov (%p26_p0, %s25_s23), 0  ;;  %s2238_s24 = smov (!%p26_p0, %s28_s24), %s1837_s21 }
   0x7   : > { %p228_p3 = pnand %p1560_p1, %p227_p2  ;;  %p30_p4 = scmp.ge.s32.totalorder %s2238_s24, 2 }
   0x8   : > { %v1755_v0 = vld [vmem:[%s2228_s3 + $0x4] ss:$16 sps:$4 sm:$0xff] (!%p228_p3)   ;;  %p275_p5 = scmp.lt.s32.totalorder (!%p228_p3), %s1829_s19, 1  ;;  %v1757_v1 = vld [vmem:[%s2228_s3 + $0xc] ss:$16 sps:$4 sm:$0xff] (!%p228_p3)   ;;  %v1843_v2 = vmov (!%p228_p3), 0  }
   0x9   : > { %s2240_s24 = smov (%p30_p4, %s2238_s24), 0  ;;  %231 = sbr.rel (%p228_p3) target bundleno = 377 (0x179), region = 36 }
   0xa   : > { %634 = vmatprep.mubr.bf16.mxu0 (!%p228_p3), %v1843_v2  ;;  %747 = vmatprep.mubr.bf16.mxu1 (!%p228_p3), %v1843_v2  ;;  %s1561_s29 = sshll.u32 (!%p228_p3), %s1825_s18, 4  ;;  %v1759_v3 = vld [vmem:[%s2228_s3] ss:$16 sps:$4 sm:$0xff] (!%p228_p3)   ;;  %v1760_v4 = vld [vmem:[%s2228_s3 + $0x8] ss:$16 sps:$4 sm:$0xff] (!%p228_p3)   ;;  %vm1348_vm0 = vcmask (!%p228_p3), 1040384  }
   0xb   : > { %602 = vmatprep.subr.bf16.mxu0 (!%p228_p3), %v1755_v0  ;;  %715 = vmatprep.subr.bf16.mxu1 (!%p228_p3), %v1757_v1  ;;  %v1761_v5 = vld [vmem:[%s2228_s3 + $0x24] ss:$16 sps:$4 sm:$0xff] (!%p228_p3)   ;;  %v1763_v6 = vld [vmem:[%s2228_s3 + $0x2c] ss:$16 sps:$4 sm:$0xff] (!%p228_p3)   ;;  %v1765_v7 = vld [vmem:[%s2228_s3 + $0x20] ss:$16 sps:$4 sm:$0xff] (!%p228_p3)  }
   0xc   : > { %603 = vmatpush1.bf16.msra.mxu0 (!%p228_p3), %v1759_v3  ;;  %716 = vmatpush1.bf16.msra.mxu1 (!%p228_p3), %v1760_v4  ;;  %p284_p6 = scmp.lt.s32.totalorder (!%p228_p3), %s1561_s29, 31  ;;  %v1766_v8 = vld [vmem:[%s2228_s3 + $0x28] ss:$16 sps:$4 sm:$0xff] (!%p228_p3)   ;;  %v1767_v9 = vld [vmem:[%s2228_s3 + $0x44] ss:$16 sps:$4 sm:$0xff] (!%p228_p3)   ;;  %p1636_p7 = scmp.ne.s32.totalorder (!%p228_p3), %s1825_s18, 0 }
   0xd   : > { %604 = vmatprep.subr.bf16.mxu0 (!%p228_p3), %v1761_v5  ;;  %717 = vmatprep.subr.bf16.mxu1 (!%p228_p3), %v1763_v6  ;;  %v1769_v10 = vld [vmem:[%s2228_s3 + $0x4c] ss:$16 sps:$4 sm:$0xff] (!%p228_p3)   ;;  %v1771_v11 = vld [vmem:[%s2228_s3 + $0x40] ss:$16 sps:$4 sm:$0xff] (!%p228_p3)   ;;  %v1772_v12 = vld [vmem:[%s2228_s3 + $0x48] ss:$16 sps:$4 sm:$0xff] (!%p228_p3)  }
   0xe   : > { %v1773_v13 = vld [vmem:[%s2228_s3 + $0x64] ss:$16 sps:$4 sm:$0xff] (!%p228_p3)   ;;  %v1775_v14 = vld [vmem:[%s2228_s3 + $0x6c] ss:$16 sps:$4 sm:$0xff] (!%p228_p3)   ;;  %v1777_v15 = vld [vmem:[%s2228_s3 + $0x60] ss:$16 sps:$4 sm:$0xff] (!%p228_p3)  }
   0xf   : > { %v1778_v16 = vld [vmem:[%s2228_s3 + $0x68] ss:$16 sps:$4 sm:$0xff] (!%p228_p3)   ;;  %v1779_v17 = vld [vmem:[%s2228_s3 + $0x84] ss:$16 sps:$4 sm:$0xff] (!%p228_p3)   ;;  %v1781_v18 = vld [vmem:[%s2228_s3 + $0x8c] ss:$16 sps:$4 sm:$0xff] (!%p228_p3)  }
  0x10   : > { %s2242_s19 = smov (!%p275_p5, %s1829_s19), 1  ;;  %605 = vmatpush1.bf16.msra.mxu0 %v1765_v7  ;;  %718 = vmatpush1.bf16.msra.mxu1 %v1766_v8  ;;  %s2244_s29 = smov (!%p284_p6, %s1561_s29), 31  ;;  %v1783_v19 = vld [vmem:[%s2228_s3 + $0x80] ss:$16 sps:$4 sm:$0xff]   ;;  %v1784_v20 = vld [vmem:[%s2228_s3 + $0x88] ss:$16 sps:$4 sm:$0xff]  }
  0x11   : > { %s1640_s26 = sshll.u32 %s2242_s19, 3  ;;  %606 = vmatprep.subr.bf16.mxu0 %v1767_v9  ;;  %719 = vmatprep.subr.bf16.mxu1 %v1769_v10  ;;  %s1562_s16 = sshll.u32 %s2242_s19, 5  ;;  %v1785_v21 = vld [vmem:[%s2228_s3 + $0xa4] ss:$16 sps:$4 sm:$0xff]   ;;  %v1787_v22 = vld [vmem:[%s2228_s3 + $0xac] ss:$16 sps:$4 sm:$0xff]  }
  0x12   : > { %s1953_s11 = scalar_lea.vmem %s2230_s5, %s1640_s26  ;;  %s287_s6 = sadd.s32 %s1562_s16, %s2244_s29  ;;  %v1789_v23 = vld [vmem:[%s2228_s3 + $0xa0] ss:$16 sps:$4 sm:$0xff]   ;;  %v1790_v24 = vld [vmem:[%s2228_s3 + $0xa8] ss:$16 sps:$4 sm:$0xff]   ;;  %v1791_v25 = vld [vmem:[%s2228_s3 + $0xc4] ss:$16 sps:$4 sm:$0xff]  }
  0x13   : > { %s1563_s14 = sshll.u32 %s287_s6, 2  ;;  %s277_s28 = scalar_lea.vmem %s2225_s0, %s2242_s19  ;;  %v1793_v26 = vld [vmem:[%s2228_s3 + $0xcc] ss:$16 sps:$4 sm:$0xff]   ;;  %v1795_v35 = vld [vmem:[%s2228_s3 + $0xc0] ss:$16 sps:$4 sm:$0xff]  }
  0x14   : > { %607 = vmatpush1.bf16.msra.mxu0 %v1771_v11  ;;  %720 = vmatpush1.bf16.msra.mxu1 %v1772_v12  ;;  %s1996_s6 = scalar_lea.vmem %s2227_s2, %s1563_s14  ;;  %s280_s14 = scalar_lea.vmem %s2226_s1, %s2242_s19  ;;  %v2015_v28 = vld [vmem:[%s277_s28] ss:$0 sm:$0xff]  ;;  %v1796_v36 = vld [vmem:[%s2228_s3 + $0xc8] ss:$16 sps:$4 sm:$0xff]   ;;  %v1797_v39 = vld [vmem:[%s2228_s3 + $0xe4] ss:$16 sps:$4 sm:$0xff]  }
  0x15   : > { %608 = vmatprep.subr.bf16.mxu0 %v1773_v13  ;;  %721 = vmatprep.subr.bf16.mxu1 %v1775_v14  ;;  %v1674_v27 = vld [vmem:[%s1996_s6] sm:$0xff]   ;;  %v1705_v31 = vld [vmem:[%s1996_s6 + $0x8] sm:$0xff]   ;;  %v1706_v45 = vld [vmem:[%s1996_s6 + $0x10] sm:$0xff]  }
  0x16   : > { %v1675_v29 = vunpack.c.l.bf16 %v1674_v27  ;;  %v1676_v30 = vunpack.c.h.bf16 %v1674_v27  ;;  %v2018_v32 = vld [vmem:[%s280_s14] ss:$0 sm:$0xff]  ;;  %v1679_v33 = vunpack.c.l.bf16 %v1705_v31  ;;  %v1680_v34 = vunpack.c.h.bf16 %v1705_v31  ;;  %v1799_v40 = vld [vmem:[%s2228_s3 + $0xec] ss:$16 sps:$4 sm:$0xff]   ;;  %v1802_v47 = vld [vmem:[%s2228_s3 + $0xe8] ss:$16 sps:$4 sm:$0xff]  }
  0x17   : > { %v1801_v46 = vld [vmem:[%s2228_s3 + $0xe0] ss:$16 sps:$4 sm:$0xff]   ;;  %v1683_v50 = vunpack.c.l.bf16 %v1706_v45  ;;  %v1684_v54 = vunpack.c.h.bf16 %v1706_v45  ;;  %v1707_v59 = vld [vmem:[%s1996_s6 + $0x18] sm:$0xff]   ;;  %s1566_s14 = sshll.u32 %s2242_s19, 7 }
  0x18   : > { %609 = vmatpush1.bf16.msra.mxu0 %v1777_v15  ;;  %722 = vmatpush1.bf16.msra.mxu1 %v1778_v16  ;;  %v347_v37 = vmul.f32 %v1675_v29, %v2015_v28  ;;  %v348_v38 = vmul.f32 %v1676_v30, %v2015_v28  ;;  %v349_v43 = vmul.f32 %v1679_v33, %v2015_v28  ;;  %v1687_v60 = vunpack.c.l.bf16 %v1707_v59  ;;  %v1708_v6 = vld [vmem:[%s1996_s6 + $0x20] sm:$0xff]   ;;  %v1709_v16 = vld [vmem:[%s1996_s6 + $0x28] sm:$0xff]  }
  0x19   : > { %610 = vmatprep.subr.bf16.mxu0 %v1779_v17  ;;  %723 = vmatprep.subr.bf16.mxu1 %v1781_v18  ;;  %v350_v44 = vmul.f32 %v1680_v34, %v2015_v28  ;;  %v351_v57 = vmul.f32 %v1683_v50, %v2015_v28  ;;  %v352_v58 = vmul.f32 %v1684_v54, %v2015_v28  ;;  %v1688_v0 = vunpack.c.h.bf16 %v1707_v59 }
  0x1a   : > { %v370_v41 = vadd.f32 %v2018_v32, %v347_v37  ;;  %v371_v42 = vadd.f32 %v2018_v32, %v348_v38  ;;  %v372_v52 = vadd.f32 %v2018_v32, %v349_v43  ;;  %v353_v4 = vmul.f32 %v1687_v60, %v2015_v28  ;;  %v1711_v38 = vld [vmem:[%s1996_s6 + $0x38] sm:$0xff]  }
  0x1b   : > { %v373_v53 = vadd.f32 %v2018_v32, %v350_v44  ;;  %v374_v62 = vadd.f32 %v2018_v32, %v351_v57  ;;  %v375_v63 = vadd.f32 %v2018_v32, %v352_v58  ;;  %v354_v5 = vmul.f32 %v1688_v0, %v2015_v28 }
  0x1c   : > { %611 = vmatpush1.bf16.msra.mxu0 %v1783_v19  ;;  %724 = vmatpush1.bf16.msra.mxu1 %v1784_v20  ;;  %v386_v48 = vmax.f32 %v370_v41, 0.0  ;;  %v387_v49 = vmax.f32 %v371_v42, 0.0  ;;  %v388_v55 = vmax.f32 %v372_v52, 0.0  ;;  %v1691_v7 = vunpack.c.l.bf16 %v1708_v6 }
  0x1d   : > { %612 = vmatprep.subr.bf16.mxu0 %v1785_v21  ;;  %725 = vmatprep.subr.bf16.mxu1 %v1787_v22  ;;  %v389_v56 = vmax.f32 %v373_v53, 0.0  ;;  %v390_v1 = vmax.f32 %v374_v62, 0.0  ;;  %v391_v3 = vmax.f32 %v375_v63, 0.0  ;;  %v376_v9 = vadd.f32 %v2018_v32, %v353_v4 }
  0x1e   : > { %v402_v51 = vpack.c.bf16 %v387_v49, %v386_v48  ;;  %v377_v10 = vadd.f32 %v2018_v32, %v354_v5  ;;  %v1692_v11 = vunpack.c.h.bf16 %v1708_v6  ;;  %v355_v14 = vmul.f32 %v1691_v7, %v2015_v28 }
  0x1f   : > { %v403_v61 = vpack.c.bf16 %v389_v56, %v388_v55  ;;  %v404_v8 = vpack.c.bf16 %v391_v3, %v390_v1  ;;  %v392_v12 = vmax.f32 %v376_v9, 0.0  ;;  %v1695_v17 = vunpack.c.l.bf16 %v1709_v16 }
  0x20   : > { %613 = vmatpush1.bf16.msra.mxu0 %v1789_v23  ;;  %726 = vmatpush1.bf16.msra.mxu1 %v1790_v24  ;;  %v393_v13 = vmax.f32 %v377_v10, 0.0  ;;  %v356_v15 = vmul.f32 %v1692_v11, %v2015_v28  ;;  %v378_v19 = vadd.f32 %v2018_v32, %v355_v14  ;;  %v1696_v21 = vunpack.c.h.bf16 %v1709_v16 }
  0x21   : > { %614 = vmatprep.subr.bf16.mxu0 %v1791_v25  ;;  %727 = vmatprep.subr.bf16.mxu1 %v1793_v26  ;;  %v357_v24 = vmul.f32 %v1695_v17, %v2015_v28  ;;  %v1710_v26 = vld [vmem:[%s1996_s6 + $0x30] sm:$0xff]   ;;  %v1704_v43 = vunpack.c.h.bf16 %v1711_v38  ;;  %s1565_s6 = sshll.u32 %s2244_s29, 2 }
  0x22   : > { %v405_v18 = vpack.c.bf16 %v393_v13, %v392_v12  ;;  %v379_v20 = vadd.f32 %v2018_v32, %v356_v15  ;;  %v394_v22 = vmax.f32 %v378_v19, 0.0  ;;  %v358_v25 = vmul.f32 %v1696_v21, %v2015_v28  ;;  %s298_s25 = sadd.s32 %s1566_s14, %s1565_s6 }
  0x23   : > { %v1699_v27 = vunpack.c.l.bf16 %v1710_v26  ;;  %v380_v30 = vadd.f32 %v2018_v32, %v357_v24  ;;  %v1700_v33 = vunpack.c.h.bf16 %v1710_v26  ;;  %s1567_s26 = sshll.u32 %s298_s25, 2 }
  0x24   : > { %615 = vmatpush1.bf16.msra.mxu0 %v1795_v35  ;;  %728 = vmatpush1.bf16.msra.mxu1 %v1796_v36  ;;  %v395_v23 = vmax.f32 %v379_v20, 0.0  ;;  %v381_v31 = vadd.f32 %v2018_v32, %v358_v25  ;;  %s2095_s7 = scalar_lea.vmem %s2229_s4, %s1567_s26 }
  0x25   : > { %616 = vmatprep.subr.bf16.mxu0 %v1797_v39  ;;  %729 = vmatprep.subr.bf16.mxu1 %v1799_v40  ;;  %v396_v34 = vmax.f32 %v380_v30, 0.0  ;;  %v359_v36 = vmul.f32 %v1699_v27, %v2015_v28  ;;  %v360_v37 = vmul.f32 %v1700_v33, %v2015_v28  ;;  %v1703_v39 = vunpack.c.l.bf16 %v1711_v38 }
  0x26   : > { %v406_v29 = vpack.c.bf16 %v395_v23, %v394_v22  ;;  %v397_v35 = vmax.f32 %v381_v31, 0.0 }
  0x27   : > { %v382_v41 = vadd.f32 %v2018_v32, %v359_v36  ;;  %v383_v42 = vadd.f32 %v2018_v32, %v360_v37 }
  0x28   : > { %617 = vmatpush1.bf16.msra.mxu0 %v1801_v46  ;;  %730 = vmatpush1.bf16.msra.mxu1 %v1802_v47  ;;  %v407_v40 = vpack.c.bf16 %v397_v35, %v396_v34  ;;  %v361_v46 = vmul.f32 %v1703_v39, %v2015_v28  ;;  %v362_v47 = vmul.f32 %v1704_v43, %v2015_v28 }
  0x29   : > { %v398_v44 = vmax.f32 %v382_v41, 0.0  ;;  %v399_v45 = vmax.f32 %v383_v42, 0.0 }
  0x2a   : > { %v384_v49 = vadd.f32 %v2018_v32, %v361_v46  ;;  %v385_v50 = vadd.f32 %v2018_v32, %v362_v47 }
  0x2b   : > { %635 = vmatmul.mubr.bf16.vlgmr.msra.gmra.mrb[0].mxu0 %v402_v51  ;;  %748 = vmatmul.mubr.bf16.vlgmr.msra.gmra.mrb[0].mxu1 %v402_v51  ;;  %v408_v48 = vpack.c.bf16 %v399_v45, %v398_v44 }
  0x2c   : > { %644 = vmatprep.mubr.bf16.mxu0 %v1843_v2  ;;  %757 = vmatprep.mubr.bf16.mxu1 %v1843_v2  ;;  %v400_v51 = vmax.f32 %v384_v49, 0.0  ;;  %v401_v52 = vmax.f32 %v385_v50, 0.0 }
  0x2e   : > { %v409_v53 = vpack.c.bf16 %v401_v52, %v400_v51 }
  0x33   : > { %645 = vmatmul.mubr.bf16.gmra.mrb[4].mxu0 %v403_v61  ;;  %758 = vmatmul.mubr.bf16.gmra.mrb[4].mxu1 %v403_v61 }
  0x34   : > { %654 = vmatprep.mubr.bf16.mxu0 %v1843_v2  ;;  %767 = vmatprep.mubr.bf16.mxu1 %v1843_v2 }
  0x3b   : > { %655 = vmatmul.mubr.bf16.gmra.mrb[8].mxu0 %v404_v8  ;;  %768 = vmatmul.mubr.bf16.gmra.mrb[8].mxu1 %v404_v8 }
  0x3c   : > { %664 = vmatprep.mubr.bf16.mxu0 %v1843_v2  ;;  %777 = vmatprep.mubr.bf16.mxu1 %v1843_v2 }
  0x43   : > { %665 = vmatmul.mubr.bf16.gmra.mrb[12].mxu0 %v405_v18  ;;  %778 = vmatmul.mubr.bf16.gmra.mrb[12].mxu1 %v405_v18 }
  0x44   : > { %674 = vmatprep.mubr.bf16.mxu0 %v1843_v2  ;;  %787 = vmatprep.mubr.bf16.mxu1 %v1843_v2 }
  0x4b   : > { %675 = vmatmul.mubr.bf16.gmra.mrb[16].mxu0 %v406_v29  ;;  %788 = vmatmul.mubr.bf16.gmra.mrb[16].mxu1 %v406_v29 }
  0x4c   : > { %684 = vmatprep.mubr.bf16.mxu0 %v1843_v2  ;;  %797 = vmatprep.mubr.bf16.mxu1 %v1843_v2 }
  0x53   : > { %685 = vmatmul.mubr.bf16.gmra.mrb[20].mxu0 %v407_v40  ;;  %798 = vmatmul.mubr.bf16.gmra.mrb[20].mxu1 %v407_v40 }
  0x54   : > { %694 = vmatprep.mubr.bf16.mxu0 %v1843_v2  ;;  %807 = vmatprep.mubr.bf16.mxu1 %v1843_v2 }
  0x5b   : > { %695 = vmatmul.mubr.bf16.gmra.mrb[24].mxu0 %v408_v48  ;;  %808 = vmatmul.mubr.bf16.gmra.mrb[24].mxu1 %v408_v48 }
  0x5c   : > { %704 = vmatprep.mubr.bf16.mxu0 %v1843_v2  ;;  %817 = vmatprep.mubr.bf16.mxu1 %v1843_v2 }
  0x63   : > { %705 = vmatmul.mubr.bf16.gmra.mrb[28].mxu0 %v409_v53  ;;  %818 = vmatmul.mubr.bf16.gmra.mrb[28].mxu1 %v409_v53 }
  0xfe   : > { %v636_v28 = vpop.f32.mrb[0].mxu0  ;;  %v749_v54 = vpop.f32.mrb[0].mxu1 }
  0xff   : > { %v638_v32 = vpop.f32.mrb[1].mxu0  ;;  %v751_v55 = vpop.f32.mrb[1].mxu1 }
 0x100   : > { %v1641_v56 = vpack.c.bf16 %v638_v32, %v636_v28  ;;  %v1642_v2 = vpack.c.bf16 %v751_v55, %v749_v54  ;;  %v640_v57 = vpop.f32.mrb[2].mxu0  ;;  %v753_v58 = vpop.f32.mrb[2].mxu1 }
 0x101   : > { %v828_v59 = vpack.c.bf16 %v640_v57, %v636_v28  ;;  %v830_v60 = vpack.c.bf16 %v753_v58, %v749_v54  ;;  %v642_v61 = vpop.f32.mrb[3].mxu0  ;;  %v755_v62 = vpop.f32.mrb[3].mxu1 }
 0x102   : > { %1020 = vst [vmem:[%s2095_s7] sm:$0xff] %v1641_v56  ;;  %1021 = vst [vmem:[%s2095_s7 + $0x8] sm:$0xff] %v1642_v2  ;;  %v829_v63 = vpack.c.bf16 %v642_v61, %v638_v32  ;;  %v1643_v0 = vpack.c.bf16 %v642_v61, %v640_v57  ;;  %v831_v1 = vpack.c.bf16 %v755_v62, %v751_v55 }
 0x103   : > { %v1644_v3 = vpack.c.bf16 %v755_v62, %v753_v58  ;;  %v1052_v4 = vunpack.c.l.bf16 %v828_v59  ;;  %v1056_v5 = vunpack.c.h.bf16 %v828_v59  ;;  %v1054_v6 = vunpack.c.l.bf16 %v830_v60 }
 0x104   : > { %v1058_v7 = vunpack.c.h.bf16 %v830_v60  ;;  %1022 = vst [vmem:[%s2095_s7 + $0x10] sm:$0xff] %v1643_v0  ;;  %v1053_v8 = vunpack.c.l.bf16 %v829_v63  ;;  %v1057_v9 = vunpack.c.h.bf16 %v829_v63  ;;  %v1055_v10 = vunpack.c.l.bf16 %v831_v1 }
 0x105   : > { %1023 = vst [vmem:[%s2095_s7 + $0x18] sm:$0xff] %v1644_v3  ;;  %v1059_v11 = vunpack.c.h.bf16 %v831_v1  ;;  %v1116_v12 = vadd.f32 %v1056_v5, %v1052_v4  ;;  %v1200_v13 = vmul.f32 %v1052_v4, %v1052_v4  ;;  %v1204_v14 = vmul.f32 %v1056_v5, %v1056_v5 }
 0x106   : > { %v1158_v15 = vadd.f32 %v1058_v7, %v1054_v6  ;;  %v1202_v16 = vmul.f32 %v1054_v6, %v1054_v6  ;;  %v1206_v17 = vmul.f32 %v1058_v7, %v1058_v7  ;;  %v1201_v18 = vmul.f32 %v1053_v8, %v1053_v8  ;;  %v646_v19 = vpop.f32.mrb[4].mxu0  ;;  %v759_v20 = vpop.f32.mrb[4].mxu1 }
 0x107   : > { %v1264_v21 = vadd.f32 %v1204_v14, %v1200_v13  ;;  %v1137_v22 = vadd.f32 %v1057_v9, %v1053_v8  ;;  %v1205_v23 = vmul.f32 %v1057_v9, %v1057_v9  ;;  %v1203_v24 = vmul.f32 %v1055_v10, %v1055_v10  ;;  %v648_v25 = vpop.f32.mrb[5].mxu0  ;;  %v761_v26 = vpop.f32.mrb[5].mxu1 }
 0x108   : > { %v1179_v27 = vadd.f32 %v1059_v11, %v1055_v10  ;;  %v1207_v29 = vmul.f32 %v1059_v11, %v1059_v11  ;;  %v1645_v30 = vpack.c.bf16 %v648_v25, %v646_v19  ;;  %v1646_v31 = vpack.c.bf16 %v761_v26, %v759_v20  ;;  %v650_v33 = vpop.f32.mrb[6].mxu0  ;;  %v763_v34 = vpop.f32.mrb[6].mxu1 }
 0x109   : > { %v1306_v35 = vadd.f32 %v1206_v17, %v1202_v16  ;;  %v1285_v36 = vadd.f32 %v1205_v23, %v1201_v18  ;;  %v832_v37 = vpack.c.bf16 %v650_v33, %v646_v19  ;;  %v834_v38 = vpack.c.bf16 %v763_v34, %v759_v20  ;;  %v652_v39 = vpop.f32.mrb[7].mxu0  ;;  %v765_v40 = vpop.f32.mrb[7].mxu1 }
 0x10a   : > { %v1327_v41 = vadd.f32 %v1207_v29, %v1203_v24  ;;  %1024 = vst [vmem:[%s2095_s7 + $0x20] sm:$0xff] %v1645_v30  ;;  %1025 = vst [vmem:[%s2095_s7 + $0x28] sm:$0xff] %v1646_v31  ;;  %v833_v42 = vpack.c.bf16 %v652_v39, %v648_v25  ;;  %v1647_v43 = vpack.c.bf16 %v652_v39, %v650_v33 }
 0x10b   : > { %v835_v44 = vpack.c.bf16 %v765_v40, %v761_v26  ;;  %v1060_v45 = vunpack.c.l.bf16 %v832_v37  ;;  %v1064_v46 = vunpack.c.h.bf16 %v832_v37  ;;  %v1062_v47 = vunpack.c.l.bf16 %v834_v38 }
 0x10c   : > { %v1066_v48 = vunpack.c.h.bf16 %v834_v38  ;;  %1026 = vst [vmem:[%s2095_s7 + $0x30] sm:$0xff] %v1647_v43  ;;  %v1061_v49 = vunpack.c.l.bf16 %v833_v42  ;;  %v1065_v50 = vunpack.c.h.bf16 %v833_v42  ;;  %v1648_v51 = vpack.c.bf16 %v765_v40, %v763_v34 }
 0x10d   : > { %v1063_v52 = vunpack.c.l.bf16 %v835_v44  ;;  %v1117_v53 = vadd.f32 %v1116_v12, %v1060_v45  ;;  %v1208_v28 = vmul.f32 %v1060_v45, %v1060_v45  ;;  %v1212_v54 = vmul.f32 %v1064_v46, %v1064_v46 }
 0x10e   : > { %v1159_v32 = vadd.f32 %v1158_v15, %v1062_v47  ;;  %v1210_v55 = vmul.f32 %v1062_v47, %v1062_v47  ;;  %v1214_v56 = vmul.f32 %v1066_v48, %v1066_v48  ;;  %v1138_v2 = vadd.f32 %v1137_v22, %v1061_v49  ;;  %1027 = vst [vmem:[%s2095_s7 + $0x38] sm:$0xff] %v1648_v51  ;;  %v656_v58 = vpop.f32.mrb[8].mxu0  ;;  %v769_v59 = vpop.f32.mrb[8].mxu1 }
 0x10f   : > { %v1209_v57 = vmul.f32 %v1061_v49, %v1061_v49  ;;  %v1118_v60 = vadd.f32 %v1117_v53, %v1064_v46  ;;  %v1265_v61 = vadd.f32 %v1264_v21, %v1208_v28  ;;  %v1213_v63 = vmul.f32 %v1065_v50, %v1065_v50  ;;  %v658_v0 = vpop.f32.mrb[9].mxu0  ;;  %v771_v1 = vpop.f32.mrb[9].mxu1 }
 0x110   : > { %v1160_v62 = vadd.f32 %v1159_v32, %v1066_v48  ;;  %v1307_v3 = vadd.f32 %v1306_v35, %v1210_v55  ;;  %v1139_v4 = vadd.f32 %v1138_v2, %v1065_v50  ;;  %v1067_v6 = vunpack.c.h.bf16 %v835_v44  ;;  %v660_v7 = vpop.f32.mrb[10].mxu0  ;;  %v773_v8 = vpop.f32.mrb[10].mxu1 }
 0x111   : > { %v1286_v5 = vadd.f32 %v1285_v36, %v1209_v57  ;;  %v1266_v9 = vadd.f32 %v1265_v61, %v1212_v54  ;;  %v1180_v10 = vadd.f32 %v1179_v27, %v1063_v52  ;;  %v1211_v11 = vmul.f32 %v1063_v52, %v1063_v52  ;;  %v662_v13 = vpop.f32.mrb[11].mxu0  ;;  %v775_v14 = vpop.f32.mrb[11].mxu1 }
 0x112   : > { %v1649_v12 = vpack.c.bf16 %v658_v0, %v656_v58  ;;  %v1308_v15 = vadd.f32 %v1307_v3, %v1214_v56  ;;  %v1215_v17 = vmul.f32 %v1067_v6, %v1067_v6  ;;  %v1650_v18 = vpack.c.bf16 %v771_v1, %v769_v59 }
 0x113   : > { %v1287_v16 = vadd.f32 %v1286_v5, %v1213_v63  ;;  %v1181_v19 = vadd.f32 %v1180_v10, %v1067_v6  ;;  %v1328_v20 = vadd.f32 %v1327_v41, %v1211_v11  ;;  %v836_v21 = vpack.c.bf16 %v660_v7, %v656_v58 }
 0x114   : > { %1028 = vst [vmem:[%s2095_s7 + $0x40] sm:$0xff] %v1649_v12  ;;  %v838_v22 = vpack.c.bf16 %v773_v8, %v769_v59  ;;  %1029 = vst [vmem:[%s2095_s7 + $0x48] sm:$0xff] %v1650_v18  ;;  %v837_v23 = vpack.c.bf16 %v662_v13, %v658_v0  ;;  %v1651_v24 = vpack.c.bf16 %v662_v13, %v660_v7 }
 0x115   : > { %v839_v25 = vpack.c.bf16 %v775_v14, %v771_v1  ;;  %v1652_v26 = vpack.c.bf16 %v775_v14, %v773_v8  ;;  %v1329_v27 = vadd.f32 %v1328_v20, %v1215_v17  ;;  %v1068_v29 = vunpack.c.l.bf16 %v836_v21 }
 0x116   : > { %v1072_v30 = vunpack.c.h.bf16 %v836_v21  ;;  %v1070_v31 = vunpack.c.l.bf16 %v838_v22  ;;  %v1074_v33 = vunpack.c.h.bf16 %v838_v22  ;;  %1030 = vst [vmem:[%s2095_s7 + $0x50] sm:$0xff] %v1651_v24  ;;  %v1069_v34 = vunpack.c.l.bf16 %v837_v23  ;;  %v666_v37 = vpop.f32.mrb[12].mxu0  ;;  %v779_v38 = vpop.f32.mrb[12].mxu1 }
 0x117   : > { %v1073_v35 = vunpack.c.h.bf16 %v837_v23  ;;  %1031 = vst [vmem:[%s2095_s7 + $0x58] sm:$0xff] %v1652_v26  ;;  %v1071_v36 = vunpack.c.l.bf16 %v839_v25  ;;  %v1119_v39 = vadd.f32 %v1118_v60, %v1068_v29  ;;  %v1216_v40 = vmul.f32 %v1068_v29, %v1068_v29  ;;  %v668_v43 = vpop.f32.mrb[13].mxu0  ;;  %v781_v44 = vpop.f32.mrb[13].mxu1 }
 0x118   : > { %v1220_v41 = vmul.f32 %v1072_v30, %v1072_v30  ;;  %v1161_v42 = vadd.f32 %v1160_v62, %v1070_v31  ;;  %v1218_v45 = vmul.f32 %v1070_v31, %v1070_v31  ;;  %v1222_v46 = vmul.f32 %v1074_v33, %v1074_v33  ;;  %v670_v49 = vpop.f32.mrb[14].mxu0  ;;  %v783_v50 = vpop.f32.mrb[14].mxu1 }
 0x119   : > { %v1140_v47 = vadd.f32 %v1139_v4, %v1069_v34  ;;  %v1217_v48 = vmul.f32 %v1069_v34, %v1069_v34  ;;  %v1120_v51 = vadd.f32 %v1119_v39, %v1072_v30  ;;  %v1267_v52 = vadd.f32 %v1266_v9, %v1216_v40  ;;  %v672_v54 = vpop.f32.mrb[15].mxu0  ;;  %v785_v32 = vpop.f32.mrb[15].mxu1 }
 0x11a   : > { %v1162_v53 = vadd.f32 %v1161_v42, %v1074_v33  ;;  %v1221_v28 = vmul.f32 %v1073_v35, %v1073_v35  ;;  %v1309_v55 = vadd.f32 %v1308_v15, %v1218_v45  ;;  %v1075_v57 = vunpack.c.h.bf16 %v839_v25 }
 0x11b   : > { %v1141_v56 = vadd.f32 %v1140_v47, %v1073_v35  ;;  %v1288_v2 = vadd.f32 %v1287_v16, %v1217_v48  ;;  %v1268_v58 = vadd.f32 %v1267_v52, %v1220_v41  ;;  %v1182_v59 = vadd.f32 %v1181_v19, %v1071_v36 }
 0x11c   : > { %v1219_v60 = vmul.f32 %v1071_v36, %v1071_v36  ;;  %v1653_v61 = vpack.c.bf16 %v668_v43, %v666_v37  ;;  %v1310_v62 = vadd.f32 %v1309_v55, %v1222_v46  ;;  %v1223_v0 = vmul.f32 %v1075_v57, %v1075_v57 }
 0x11d   : > { %v1289_v63 = vadd.f32 %v1288_v2, %v1221_v28  ;;  %v1654_v1 = vpack.c.bf16 %v781_v44, %v779_v38  ;;  %v1183_v3 = vadd.f32 %v1182_v59, %v1075_v57  ;;  %v840_v5 = vpack.c.bf16 %v670_v49, %v666_v37 }
 0x11e   : > { %v1330_v4 = vadd.f32 %v1329_v27, %v1219_v60  ;;  %1032 = vst [vmem:[%s2095_s7 + $0x60] sm:$0xff] %v1653_v61  ;;  %v842_v6 = vpack.c.bf16 %v783_v50, %v779_v38  ;;  %v841_v7 = vpack.c.bf16 %v672_v54, %v668_v43  ;;  %v1655_v8 = vpack.c.bf16 %v672_v54, %v670_v49  ;;  %v676_v11 = vpop.f32.mrb[16].mxu0  ;;  %v789_v12 = vpop.f32.mrb[16].mxu1 }
 0x11f   : > { %1033 = vst [vmem:[%s2095_s7 + $0x68] sm:$0xff] %v1654_v1  ;;  %v843_v9 = vpack.c.bf16 %v785_v32, %v781_v44  ;;  %v1656_v10 = vpack.c.bf16 %v785_v32, %v783_v50  ;;  %v1076_v14 = vunpack.c.l.bf16 %v840_v5  ;;  %v1080_v15 = vunpack.c.h.bf16 %v840_v5  ;;  %v678_v17 = vpop.f32.mrb[17].mxu0  ;;  %v791_v18 = vpop.f32.mrb[17].mxu1 }
 0x120   : > { %v1331_v13 = vadd.f32 %v1330_v4, %v1223_v0  ;;  %v1078_v16 = vunpack.c.l.bf16 %v842_v6  ;;  %v1082_v19 = vunpack.c.h.bf16 %v842_v6  ;;  %1034 = vst [vmem:[%s2095_s7 + $0x70] sm:$0xff] %v1655_v8  ;;  %v1077_v20 = vunpack.c.l.bf16 %v841_v7  ;;  %v680_v23 = vpop.f32.mrb[18].mxu0  ;;  %v793_v24 = vpop.f32.mrb[18].mxu1 }
 0x121   : > { %v1081_v21 = vunpack.c.h.bf16 %v841_v7  ;;  %1035 = vst [vmem:[%s2095_s7 + $0x78] sm:$0xff] %v1656_v10  ;;  %v1079_v22 = vunpack.c.l.bf16 %v843_v9  ;;  %v1121_v25 = vadd.f32 %v1120_v51, %v1076_v14  ;;  %v1224_v26 = vmul.f32 %v1076_v14, %v1076_v14  ;;  %v682_v30 = vpop.f32.mrb[19].mxu0  ;;  %v795_v31 = vpop.f32.mrb[19].mxu1 }
 0x122   : > { %v1228_v27 = vmul.f32 %v1080_v15, %v1080_v15  ;;  %v1163_v29 = vadd.f32 %v1162_v53, %v1078_v16  ;;  %v1226_v33 = vmul.f32 %v1078_v16, %v1078_v16  ;;  %v1230_v34 = vmul.f32 %v1082_v19, %v1082_v19 }
 0x123   : > { %v1142_v35 = vadd.f32 %v1141_v56, %v1077_v20  ;;  %v1225_v36 = vmul.f32 %v1077_v20, %v1077_v20  ;;  %v1122_v37 = vadd.f32 %v1121_v25, %v1080_v15  ;;  %v1269_v38 = vadd.f32 %v1268_v58, %v1224_v26 }
 0x124   : > { %v1164_v39 = vadd.f32 %v1163_v29, %v1082_v19  ;;  %v1229_v40 = vmul.f32 %v1081_v21, %v1081_v21  ;;  %v1311_v41 = vadd.f32 %v1310_v62, %v1226_v33  ;;  %v1083_v44 = vunpack.c.h.bf16 %v843_v9 }
 0x125   : > { %v1143_v42 = vadd.f32 %v1142_v35, %v1081_v21  ;;  %v1290_v43 = vadd.f32 %v1289_v63, %v1225_v36  ;;  %v1270_v45 = vadd.f32 %v1269_v38, %v1228_v27  ;;  %v1184_v46 = vadd.f32 %v1183_v3, %v1079_v22 }
 0x126   : > { %v1227_v47 = vmul.f32 %v1079_v22, %v1079_v22  ;;  %v1657_v48 = vpack.c.bf16 %v678_v17, %v676_v11  ;;  %v1312_v49 = vadd.f32 %v1311_v41, %v1230_v34  ;;  %v1231_v51 = vmul.f32 %v1083_v44, %v1083_v44  ;;  %v686_v53 = vpop.f32.mrb[20].mxu0  ;;  %v2113_v28 = vpop.f32.mrb[20].mxu1 }
 0x127   : > { %v1291_v50 = vadd.f32 %v1290_v43, %v1229_v40  ;;  %v1658_v52 = vpack.c.bf16 %v791_v18, %v789_v12  ;;  %v1185_v54 = vadd.f32 %v1184_v46, %v1083_v44  ;;  %v844_v55 = vpack.c.bf16 %v680_v23, %v676_v11  ;;  %v688_v2 = vpop.f32.mrb[21].mxu0  ;;  %v801_v57 = vpop.f32.mrb[21].mxu1 }
 0x128   : > { %v1332_v32 = vadd.f32 %v1331_v13, %v1227_v47  ;;  %1036 = vst [vmem:[%s2095_s7 + $0x80] sm:$0xff] %v1657_v48  ;;  %v846_v56 = vpack.c.bf16 %v793_v24, %v789_v12  ;;  %v845_v58 = vpack.c.bf16 %v682_v30, %v678_v17  ;;  %v1659_v59 = vpack.c.bf16 %v682_v30, %v680_v23  ;;  %v690_v62 = vpop.f32.mrb[22].mxu0  ;;  %v2117_v63 = vpop.f32.mrb[22].mxu1 }
 0x129   : > { %1037 = vst [vmem:[%s2095_s7 + $0x88] sm:$0xff] %v1658_v52  ;;  %v847_v60 = vpack.c.bf16 %v795_v31, %v791_v18  ;;  %v1660_v61 = vpack.c.bf16 %v795_v31, %v793_v24  ;;  %v1084_v1 = vunpack.c.l.bf16 %v844_v55  ;;  %v1088_v3 = vunpack.c.h.bf16 %v844_v55  ;;  %v692_v5 = vpop.f32.mrb[23].mxu0  ;;  %v805_v6 = vpop.f32.mrb[23].mxu1 }
 0x12a   : > { %v1333_v0 = vadd.f32 %v1332_v32, %v1231_v51  ;;  %v1086_v4 = vunpack.c.l.bf16 %v846_v56  ;;  %v1090_v7 = vunpack.c.h.bf16 %v846_v56  ;;  %1038 = vst [vmem:[%s2095_s7 + $0x90] sm:$0xff] %v1659_v59  ;;  %v1085_v8 = vunpack.c.l.bf16 %v845_v58 }
 0x12b   : > { %v1089_v9 = vunpack.c.h.bf16 %v845_v58  ;;  %1039 = vst [vmem:[%s2095_s7 + $0x98] sm:$0xff] %v1660_v61  ;;  %v1087_v10 = vunpack.c.l.bf16 %v847_v60  ;;  %v1123_v11 = vadd.f32 %v1122_v37, %v1084_v1  ;;  %v1232_v12 = vmul.f32 %v1084_v1, %v1084_v1 }
 0x12c   : > { %v1236_v13 = vmul.f32 %v1088_v3, %v1088_v3  ;;  %v1165_v14 = vadd.f32 %v1164_v39, %v1086_v4  ;;  %v1234_v15 = vmul.f32 %v1086_v4, %v1086_v4  ;;  %v1238_v16 = vmul.f32 %v1090_v7, %v1090_v7 }
 0x12d   : > { %v1144_v17 = vadd.f32 %v1143_v42, %v1085_v8  ;;  %v1233_v18 = vmul.f32 %v1085_v8, %v1085_v8  ;;  %v1124_v19 = vadd.f32 %v1123_v11, %v1088_v3  ;;  %v1271_v20 = vadd.f32 %v1270_v45, %v1232_v12 }
 0x12e   : > { %v1166_v21 = vadd.f32 %v1165_v14, %v1090_v7  ;;  %v1237_v22 = vmul.f32 %v1089_v9, %v1089_v9  ;;  %v1313_v23 = vadd.f32 %v1312_v49, %v1234_v15  ;;  %v1091_v26 = vunpack.c.h.bf16 %v847_v60  ;;  %v2121_v27 = vpop.f32.mrb[24].mxu0  ;;  %v2123_v29 = vpop.f32.mrb[24].mxu1 }
 0x12f   : > { %v1145_v24 = vadd.f32 %v1144_v17, %v1089_v9  ;;  %v1292_v25 = vadd.f32 %v1291_v50, %v1233_v18  ;;  %v1272_v30 = vadd.f32 %v1271_v20, %v1236_v13  ;;  %v1186_v31 = vadd.f32 %v1185_v54, %v1087_v10  ;;  %v2125_v35 = vpop.f32.mrb[25].mxu0  ;;  %v2127_v36 = vpop.f32.mrb[25].mxu1 }
 0x130   : > { %v1235_v33 = vmul.f32 %v1087_v10, %v1087_v10  ;;  %v1661_v34 = vpack.c.bf16 %v688_v2, %v686_v53  ;;  %v1314_v37 = vadd.f32 %v1313_v23, %v1238_v16  ;;  %v1239_v39 = vmul.f32 %v1091_v26, %v1091_v26  ;;  %v2130_v41 = vpop.f32.mrb[26].mxu0  ;;  %v2132_v42 = vpop.f32.mrb[26].mxu1 }
 0x131   : > { %v1293_v38 = vadd.f32 %v1292_v25, %v1237_v22  ;;  %v1662_v40 = vpack.c.bf16 %v801_v57, %v2113_v28  ;;  %v1187_v43 = vadd.f32 %v1186_v31, %v1091_v26  ;;  %v848_v45 = vpack.c.bf16 %v690_v62, %v686_v53  ;;  %v2137_v47 = vpop.f32.mrb[27].mxu0  ;;  %v2139_v48 = vpop.f32.mrb[27].mxu1 }
 0x132   : > { %v1334_v44 = vadd.f32 %v1333_v0, %v1235_v33  ;;  %1040 = vst [vmem:[%s2095_s7 + $0xa0] sm:$0xff] %v1661_v34  ;;  %v850_v46 = vpack.c.bf16 %v2117_v63, %v2113_v28  ;;  %v849_v49 = vpack.c.bf16 %v692_v5, %v688_v2  ;;  %v1663_v50 = vpack.c.bf16 %v692_v5, %v690_v62 }
 0x133   : > { %1041 = vst [vmem:[%s2095_s7 + $0xa8] sm:$0xff] %v1662_v40  ;;  %v851_v51 = vpack.c.bf16 %v805_v6, %v801_v57  ;;  %v1664_v52 = vpack.c.bf16 %v805_v6, %v2117_v63  ;;  %v1092_v32 = vunpack.c.l.bf16 %v848_v45  ;;  %v1096_v55 = vunpack.c.h.bf16 %v848_v45 }
 0x134   : > { %v1335_v54 = vadd.f32 %v1334_v44, %v1239_v39  ;;  %v1094_v56 = vunpack.c.l.bf16 %v850_v46  ;;  %v1098_v58 = vunpack.c.h.bf16 %v850_v46  ;;  %1042 = vst [vmem:[%s2095_s7 + $0xb0] sm:$0xff] %v1663_v50  ;;  %v1093_v53 = vunpack.c.l.bf16 %v849_v49 }
 0x135   : > { %v1097_v59 = vunpack.c.h.bf16 %v849_v49  ;;  %1043 = vst [vmem:[%s2095_s7 + $0xb8] sm:$0xff] %v1664_v52  ;;  %v1095_v28 = vunpack.c.l.bf16 %v851_v51  ;;  %v1125_v60 = vadd.f32 %v1124_v19, %v1092_v32  ;;  %v1240_v61 = vmul.f32 %v1092_v32, %v1092_v32 }
 0x136   : > { %v1244_v0 = vmul.f32 %v1096_v55, %v1096_v55  ;;  %v1167_v1 = vadd.f32 %v1166_v21, %v1094_v56  ;;  %v1242_v3 = vmul.f32 %v1094_v56, %v1094_v56  ;;  %v1246_v2 = vmul.f32 %v1098_v58, %v1098_v58  ;;  %v2145_v4 = vpop.f32.mrb[28].mxu0  ;;  %v2147_v63 = vpop.f32.mrb[28].mxu1 }
 0x137   : > { %v1146_v62 = vadd.f32 %v1145_v24, %v1093_v53  ;;  %v1241_v57 = vmul.f32 %v1093_v53, %v1093_v53  ;;  %v1126_v5 = vadd.f32 %v1125_v60, %v1096_v55  ;;  %v1273_v6 = vadd.f32 %v1272_v30, %v1240_v61  ;;  %v2149_v9 = vpop.f32.mrb[29].mxu0  ;;  %v2151_v10 = vpop.f32.mrb[29].mxu1 }
 0x138   : > { %v1168_v7 = vadd.f32 %v1167_v1, %v1098_v58  ;;  %v1245_v8 = vmul.f32 %v1097_v59, %v1097_v59  ;;  %v1315_v11 = vadd.f32 %v1314_v37, %v1242_v3  ;;  %v1099_v14 = vunpack.c.h.bf16 %v851_v51  ;;  %v2153_v15 = vpop.f32.mrb[30].mxu0  ;;  %v2155_v16 = vpop.f32.mrb[30].mxu1 }
 0x139   : > { %v1147_v12 = vadd.f32 %v1146_v62, %v1097_v59  ;;  %v1294_v13 = vadd.f32 %v1293_v38, %v1241_v57  ;;  %v1274_v17 = vadd.f32 %v1273_v6, %v1244_v0  ;;  %v1188_v18 = vadd.f32 %v1187_v43, %v1095_v28  ;;  %v2159_v21 = vpop.f32.mrb[31].mxu0  ;;  %v2161_v22 = vpop.f32.mrb[31].mxu1 }
 0x13a   : > { %v1243_v19 = vmul.f32 %v1095_v28, %v1095_v28  ;;  %v1665_v20 = vpack.c.bf16 %v2125_v35, %v2121_v27  ;;  %v1316_v23 = vadd.f32 %v1315_v11, %v1246_v2  ;;  %v1247_v25 = vmul.f32 %v1099_v14, %v1099_v14 }
 0x13b   : > { %v1295_v24 = vadd.f32 %v1294_v13, %v1245_v8  ;;  %v1666_v26 = vpack.c.bf16 %v2127_v36, %v2123_v29  ;;  %v1189_v30 = vadd.f32 %v1188_v18, %v1099_v14  ;;  %v852_v33 = vpack.c.bf16 %v2130_v41, %v2121_v27 }
 0x13c   : > { %v1336_v31 = vadd.f32 %v1335_v54, %v1243_v19  ;;  %1044 = vst [vmem:[%s2095_s7 + $0xc0] sm:$0xff] %v1665_v20  ;;  %v854_v34 = vpack.c.bf16 %v2132_v42, %v2123_v29  ;;  %v853_v37 = vpack.c.bf16 %v2137_v47, %v2125_v35  ;;  %v1667_v38 = vpack.c.bf16 %v2137_v47, %v2130_v41 }
 0x13d   : > { %1045 = vst [vmem:[%s2095_s7 + $0xc8] sm:$0xff] %v1666_v26  ;;  %v855_v39 = vpack.c.bf16 %v2139_v48, %v2127_v36  ;;  %v1668_v40 = vpack.c.bf16 %v2139_v48, %v2132_v42  ;;  %v1100_v44 = vunpack.c.l.bf16 %v852_v33  ;;  %v1104_v45 = vunpack.c.h.bf16 %v852_v33 }
 0x13e   : > { %v1337_v43 = vadd.f32 %v1336_v31, %v1247_v25  ;;  %v1102_v27 = vunpack.c.l.bf16 %v854_v34  ;;  %v1106_v46 = vunpack.c.h.bf16 %v854_v34  ;;  %1046 = vst [vmem:[%s2095_s7 + $0xd0] sm:$0xff] %v1667_v38  ;;  %v1101_v29 = vunpack.c.l.bf16 %v853_v37 }
 0x13f   : > { %v1105_v49 = vunpack.c.h.bf16 %v853_v37  ;;  %1047 = vst [vmem:[%s2095_s7 + $0xd8] sm:$0xff] %v1668_v40  ;;  %v1103_v50 = vunpack.c.l.bf16 %v855_v39  ;;  %v1127_v35 = vadd.f32 %v1126_v5, %v1100_v44  ;;  %v1248_v51 = vmul.f32 %v1100_v44, %v1100_v44 }
 0x140   : > { %v1252_v52 = vmul.f32 %v1104_v45, %v1104_v45  ;;  %v1169_v41 = vadd.f32 %v1168_v7, %v1102_v27  ;;  %v1250_v47 = vmul.f32 %v1102_v27, %v1102_v27  ;;  %v1254_v54 = vmul.f32 %v1106_v46, %v1106_v46 }
 0x141   : > { %v1148_v36 = vadd.f32 %v1147_v12, %v1101_v29  ;;  %v1249_v32 = vmul.f32 %v1101_v29, %v1101_v29  ;;  %v1128_v55 = vadd.f32 %v1127_v35, %v1104_v45  ;;  %v1275_v42 = vadd.f32 %v1274_v17, %v1248_v51 }
 0x142   : > { %v1170_v48 = vadd.f32 %v1169_v41, %v1106_v46  ;;  %v1253_v56 = vmul.f32 %v1105_v49, %v1105_v49  ;;  %v1317_v58 = vadd.f32 %v1316_v23, %v1250_v47  ;;  %v1107_v28 = vunpack.c.h.bf16 %v855_v39 }
 0x143   : > { %v1149_v53 = vadd.f32 %v1148_v36, %v1105_v49  ;;  %v1296_v59 = vadd.f32 %v1295_v24, %v1249_v32  ;;  %v1276_v60 = vadd.f32 %v1275_v42, %v1252_v52  ;;  %v1190_v61 = vadd.f32 %v1189_v30, %v1103_v50 }
 0x144   : > { %v1251_v0 = vmul.f32 %v1103_v50, %v1103_v50  ;;  %v1669_v1 = vpack.c.bf16 %v2149_v9, %v2145_v4  ;;  %v1318_v3 = vadd.f32 %v1317_v58, %v1254_v54  ;;  %v1255_v62 = vmul.f32 %v1107_v28, %v1107_v28 }
 0x145   : > { %v1297_v2 = vadd.f32 %v1296_v59, %v1253_v56  ;;  %v1670_v57 = vpack.c.bf16 %v2151_v10, %v2147_v63  ;;  %v1191_v5 = vadd.f32 %v1190_v61, %v1107_v28  ;;  %v856_v7 = vpack.c.bf16 %v2153_v15, %v2145_v4 }
 0x146   : > { %v1338_v6 = vadd.f32 %v1337_v43, %v1251_v0  ;;  %1048 = vst [vmem:[%s2095_s7 + $0xe0] sm:$0xff] %v1669_v1  ;;  %v858_v8 = vpack.c.bf16 %v2155_v16, %v2147_v63  ;;  %v857_v11 = vpack.c.bf16 %v2159_v21, %v2149_v9  ;;  %v1671_v12 = vpack.c.bf16 %v2159_v21, %v2153_v15 }
 0x147   : > { %1049 = vst [vmem:[%s2095_s7 + $0xe8] sm:$0xff] %v1670_v57  ;;  %v859_v13 = vpack.c.bf16 %v2161_v22, %v2151_v10  ;;  %v1672_v14 = vpack.c.bf16 %v2161_v22, %v2155_v16  ;;  %v1108_v18 = vunpack.c.l.bf16 %v856_v7  ;;  %v1112_v19 = vunpack.c.h.bf16 %v856_v7 }
 0x148   : > { %v1339_v17 = vadd.f32 %v1338_v6, %v1255_v62  ;;  %v1110_v4 = vunpack.c.l.bf16 %v858_v8  ;;  %v1114_v20 = vunpack.c.h.bf16 %v858_v8  ;;  %1050 = vst [vmem:[%s2095_s7 + $0xf0] sm:$0xff] %v1671_v12  ;;  %v1109_v63 = vunpack.c.l.bf16 %v857_v11 }
 0x149   : > { %v1113_v23 = vunpack.c.h.bf16 %v857_v11  ;;  %1051 = vst [vmem:[%s2095_s7 + $0xf8] sm:$0xff] %v1672_v14  ;;  %v1111_v24 = vunpack.c.l.bf16 %v859_v13  ;;  %v1129_v9 = vadd.f32 %v1128_v55, %v1108_v18  ;;  %v1256_v25 = vmul.f32 %v1108_v18, %v1108_v18 }
 0x14a   : > { %v1260_v26 = vmul.f32 %v1112_v19, %v1112_v19  ;;  %v1171_v15 = vadd.f32 %v1170_v48, %v1110_v4  ;;  %v1258_v21 = vmul.f32 %v1110_v4, %v1110_v4  ;;  %v1262_v30 = vmul.f32 %v1114_v20, %v1114_v20 }
 0x14b   : > { %v1150_v10 = vadd.f32 %v1149_v53, %v1109_v63  ;;  %v1257_v31 = vmul.f32 %v1109_v63, %v1109_v63  ;;  %v1130_v33 = vadd.f32 %v1129_v9, %v1112_v19  ;;  %v1277_v16 = vadd.f32 %v1276_v60, %v1256_v25 }
 0x14c   : > { %v1172_v22 = vadd.f32 %v1171_v15, %v1114_v20  ;;  %v1261_v34 = vmul.f32 %v1113_v23, %v1113_v23  ;;  %v1319_v37 = vadd.f32 %v1318_v3, %v1258_v21  ;;  %v1115_v40 = vunpack.c.h.bf16 %v859_v13 }
 0x14d   : > { %v1151_v38 = vadd.f32 %v1150_v10, %v1113_v23  ;;  %v1298_v39 = vadd.f32 %v1297_v2, %v1257_v31  ;;  %v1131_v43 = vrot.slane %v1130_v33, 4  ;;  %v1278_v44 = vadd.f32 %v1277_v16, %v1260_v26 }
 0x14e   : > { %v1173_v45 = vrot.slane %v1172_v22, 4  ;;  %v1192_v27 = vadd.f32 %v1191_v5, %v1111_v24  ;;  %v1320_v46 = vadd.f32 %v1319_v37, %v1262_v30  ;;  %v1259_v50 = vmul.f32 %v1111_v24, %v1111_v24 }
 0x14f   : > { %v1152_v29 = vrot.slane %v1151_v38, 4  ;;  %v1299_v49 = vadd.f32 %v1298_v39, %v1261_v34  ;;  %v1132_v35 = vadd.f32 %v1131_v43, %v1130_v33  ;;  %v1279_v51 = vrot.slane %v1278_v44, 4 }
 0x150   : > { %v1174_v52 = vadd.f32 %v1173_v45, %v1172_v22  ;;  %v1193_v41 = vadd.f32 %v1192_v27, %v1115_v40  ;;  %v1321_v47 = vrot.slane %v1320_v46, 4  ;;  %v1263_v32 = vmul.f32 %v1115_v40, %v1115_v40 }
 0x151   : > { %v1153_v54 = vadd.f32 %v1152_v29, %v1151_v38  ;;  %v1300_v36 = vrot.slane %v1299_v49, 4  ;;  %v1133_v55 = vrot.slane %v1132_v35, 2  ;;  %v1280_v42 = vadd.f32 %v1279_v51, %v1278_v44 }
 0x152   : > { %v1175_v48 = vrot.slane %v1174_v52, 2  ;;  %v1194_v56 = vrot.slane %v1193_v41, 4  ;;  %v1322_v58 = vadd.f32 %v1321_v47, %v1320_v46  ;;  %v1340_v28 = vadd.f32 %v1339_v17, %v1259_v50 }
 0x153   : > { %v1154_v53 = vrot.slane %v1153_v54, 2  ;;  %v1301_v59 = vadd.f32 %v1300_v36, %v1299_v49  ;;  %v1134_v60 = vadd.f32 %v1133_v55, %v1132_v35  ;;  %v1281_v61 = vrot.slane %v1280_v42, 2 }
 0x154   : > { %v1176_v0 = vadd.f32 %v1175_v48, %v1174_v52  ;;  %v1195_v1 = vadd.f32 %v1194_v56, %v1193_v41  ;;  %v1323_v3 = vrot.slane %v1322_v58, 2  ;;  %v1341_v57 = vadd.f32 %v1340_v28, %v1263_v32 }
 0x155   : > { %v1155_v2 = vadd.f32 %v1154_v53, %v1153_v54  ;;  %v1302_v62 = vrot.slane %v1301_v59, 2  ;;  %v1135_v5 = vrot.slane %v1134_v60, 1  ;;  %v1282_v6 = vadd.f32 %v1281_v61, %v1280_v42 }
 0x156   : > { %v1177_v7 = vrot.slane %v1176_v0, 1  ;;  %v1196_v8 = vrot.slane %v1195_v1, 2  ;;  %v1324_v11 = vadd.f32 %v1323_v3, %v1322_v58  ;;  %v1342_v14 = vrot.slane %v1341_v57, 4 }
 0x157   : > { %v1156_v12 = vrot.slane %v1155_v2, 1  ;;  %v1303_v13 = vadd.f32 %v1302_v62, %v1301_v59  ;;  %v1283_v18 = vrot.slane %v1282_v6, 1  ;;  %v1136_v63 = vadd.f32 %v1135_v5, %v1134_v60 }
 0x158   : > { %v1325_v19 = vrot.slane %v1324_v11, 1  ;;  %v1197_v4 = vadd.f32 %v1196_v8, %v1195_v1  ;;  %v1343_v20 = vadd.f32 %v1342_v14, %v1341_v57  ;;  %v1178_v24 = vadd.f32 %v1177_v7, %v1176_v0 }
 0x159   : > { %v1304_v17 = vrot.slane %v1303_v13, 1  ;;  %v1284_v23 = vadd.f32 %v1283_v18, %v1282_v6  ;;  %v1157_v25 = vadd.f32 %v1156_v12, %v1155_v2  ;;  %v1366_v38 = vlaneseq (!%p1636_p7) }
 0x15a   : > { %v1326_v9 = vadd.f32 %v1325_v19, %v1324_v11  ;;  %v1344_v15 = vrot.slane %v1343_v20, 2  ;;  %v1198_v31 = vrot.slane %v1197_v4, 1  ;;  %v1844_v39 = vmov (!%p1636_p7), 1983009808  }
 0x15b   : > { %v1305_v26 = vadd.f32 %v1304_v17, %v1303_v13  ;;  %v1349_v21 = vsel %vm1348_vm0, %v1136_v63, %v1284_v23  ;;  %v1364_v40 = vunpack.c.l.s4 (!%p1636_p7), %v1844_v39  ;;  %v1367_v43 = vshrl.u32 (!%p1636_p7), %v1366_v38, 7 }
 0x15c   : > { %v1351_v30 = vsel %vm1348_vm0, %v1178_v24, %v1326_v9  ;;  %v1345_v33 = vadd.f32 %v1344_v15, %v1343_v20  ;;  %v1199_v22 = vadd.f32 %v1198_v31, %v1197_v4  ;;  %1356 = sbr.rel (%p1636_p7) target bundleno = 362 (0x16a), region = 40 }
 0x15d   : > { %v1350_v10 = vsel %vm1348_vm0, %v1157_v25, %v1305_v26  ;;  %v1365_v27 = vunpack.c.0.s8 (!%p1636_p7), %v1364_v40 }
 0x15e   : > { %v1346_v16 = vrot.slane %v1345_v33, 1  ;;  %v1361_v44 = vcombine.low (!%p1636_p7), %v1349_v21, %v1350_v10 }
 0x15f   : > { %v1368_v46 = vsub.s32 (!%p1636_p7), %v1365_v27, %v1367_v43 }
 0x160   : > { %v1347_v34 = vadd.f32 %v1346_v16, %v1345_v33 }
 0x161   : > { %v1369_v29 = vrot.slane (!%p1636_p7), %v1361_v44, %v1368_v46 }
 0x162   : > { %v1352_v37 = vsel %vm1348_vm0, %v1199_v22, %v1347_v34 }
 0x163   : > { %v1362_v45 = vcombine.low %v1351_v30, %v1352_v37 }
 0x165   : > { %v1376_v49 = vrot.slane %v1362_v45, %v1368_v46 }
 0x167   : > { %v1377_v50 = vcombine.low %v1369_v29, %v1376_v49 }
 0x169   : > { %1379 = vst [vmem:[%s1953_s11] sm:$0xff] %v1377_v50 }
 0x16a PF: > { %p1637_p8 = scmp.eq.s32.totalorder %s1825_s18, 0 }
 0x16b   : > { %v1394_v35 = vlaneseq (!%p1637_p8)  ;;  %v1845_v51 = vmov (!%p1637_p8), 1983009808   ;;  %v1389_v47 = vcombine.low (!%p1637_p8), %v1349_v21, %v1350_v10  ;;  %v1390_v54 = vcombine.low (!%p1637_p8), %v1351_v30, %v1352_v37 }
 0x16c   : > { %1383 = sbr.rel (%p1637_p8) target bundleno = 377 (0x179), region = 44  ;;  %v1392_v52 = vunpack.c.l.s4 (!%p1637_p8), %v1845_v51 }
 0x16d   : > { %v1395_v41 = vshrl.u32 (!%p1637_p8), %v1394_v35, 7 }
 0x16e   : > { %v1393_v36 = vunpack.c.0.s8 (!%p1637_p8), %v1392_v52 }
 0x170   : > { %v1396_v32 = vsub.s32 (!%p1637_p8), %v1393_v36, %v1395_v41  ;;  %v1384_v48 = vld [vmem:[%s1953_s11] sm:$0xff] (!%p1637_p8) }
 0x172   : > { %v1397_v55 = vrot.slane (!%p1637_p8), %v1389_v47, %v1396_v32  ;;  %v1404_v42 = vrot.slane (!%p1637_p8), %v1390_v54, %v1396_v32 }
 0x174   : > { %v1405_v56 = vcombine.low %v1397_v55, %v1404_v42 }
 0x176   : > { %v1407_v58 = vadd.f32 %v1405_v56, %v1384_v48 }
 0x178   : > { %1408 = vst [vmem:[%s1953_s11] sm:$0xff] %v1407_v58 }
 0x179 PF: > { %s16_s22 = sadd.s32 1, %s1841_s22   ;;  %s2231_s18 = smov %s1833_s20 }
 0x17a   : > { %p13_p9 = scmp.ge.s32.totalorder %s16_s22, 6   ;;  %s2232_s19 = smov %s1837_s21 }
 0x17b   : > { %s2233_s20 = smov %s2236_s23  ;;  %s2234_s21 = smov %s2240_s24 }
 0x17c   :  { %15 = sbr.rel (!%p13_p9) target bundleno = 3 (0x3), region = 92 }

// kernel: bottleneck_forward.7
= control target key start
LH: loop header
LB: loop body
LE: loop exit
PB: predicated region body
PF: predicated region fallthrough
CT: control target
= control target key end

     0   :  { %9 = vsyncpa [#allocation3], 0  ;;  %s1853_s0 = inlined_call_operand.vmem [shape: f32[2,1,512], index: 0, kind: input, shape index: {}]   ;;  %s1854_s1 = inlined_call_operand.vmem [shape: f32[2,1,512], index: 1, kind: input, shape index: {}]   ;;  %s1855_s2 = inlined_call_operand.vmem [shape: bf16[2,256,512], index: 2, kind: input, shape index: {}]   ;;  %s1856_s3 = inlined_call_operand.vmem [shape: bf16[2,256,512], index: 3, kind: input, shape index: {}]   ;;  %s1857_s4 = inlined_call_operand.hbm [shape: bf16[2,256,512], index: 4, kind: output, shape index: {}]  }
   0x1   :  { %11 = vsyncpa [#allocation3 + $0x1], 0  ;;  %s1451_s15 = smov 0   ;;  %s1453_s16 = smov 0  }
   0x2   :  { %s1455_s17 = smov 0   ;;  %s1457_s18 = smov 0  }
   0x3   :  { %s1459_s19 = smov 0   ;;  %s1461_s20 = smov 0  }
   0x4   :  { %s1463_s21 = smov 0   ;;  %s1465_s22 = smov 0  }
   0x5 LB: > { %s1166_s23 = sadd.s32 4294967295, %s1421_s22   ;;  %s1167_s24 = sadd.s32 4294967294, %s1421_s22   ;;  %s1421_s22 = sphi %s1465_s22, %s17_s22   ;;  %s1417_s21 = sphi %s1463_s21, %s1872_s21   ;;  %s1413_s20 = sphi %s1461_s20, %s1871_s20   ;;  %s1409_s19 = sphi %s1459_s19, %s1870_s19   ;;  %s1405_s18 = sphi %s1457_s18, %s1869_s18   ;;  %s1401_s17 = sphi %s1455_s17, %s1868_s17   ;;  %s1397_s16 = sphi %s1453_s16, %s1867_s16   ;;  %s1393_s15 = sphi %s1451_s15, %s1866_s15  }
   0x6   : > { %s26_s25 = sadd.s32 1, %s1413_s20  ;;  %s29_s26 = sadd.s32 1, %s1417_s21 }
   0x7   : > { %p27_p0 = scmp.ge.s32.totalorder %s26_s25, 2  ;;  %p156_p1 = scmp.ne.s32.totalorder %s1401_s17, %s1397_s16 }
   0x8   : > { %p157_p2 = scmp.eq.s32.totalorder %s1166_s23, 3  ;;  %p162_p5 = scmp.ne.s32.totalorder %s1397_s16, %s1393_s15 }
   0x9   : > { %s1874_s25 = smov (%p27_p0, %s26_s25), 0  ;;  %s1876_s26 = smov (!%p27_p0, %s29_s26), %s1417_s21 }
   0xa   : > { %1860 = sst [smem:[#allocation5_spill]] %s1874_s25  ;;  %s142_s27 = ssub.s32 %s1413_s20, %s1874_s25 }
   0xb   : > { %p1502_p3 = por %p157_p2, %p156_p1  ;;  %p31_p4 = scmp.ge.s32.totalorder %s1876_s26, 2 }
   0xc   : > { %p163_p6 = scmp.eq.s32.totalorder %s1167_s24, 3  ;;  %p1170_p7 = scmp.ge.s32.totalorder %s1421_s22, 1 }
   0xd   : > { %s1878_s26 = smov (%p31_p4, %s1876_s26), 0  ;;  %p223_p9 = scmp.lt.s32.totalorder %s1421_s22, 5 }
   0xe   : > { %1862 = sst [smem:[#allocation6_spill]] %s1878_s26  ;;  %p1511_p8 = por %p163_p6, %p162_p5 }
   0xf   : > { %s141_s30 = ssub.s32 %s1417_s21, %s1878_s26  ;;  %s146_s5 = sadd.s32 1, %s1401_s17 }
  0x10   : > { %s143_s6 = sor.u32 %s142_s27, %s141_s30  ;;  %p224_p10 = pnand %p1170_p7, %p223_p9 }
  0x11   : > { %p144_p11 = scmp.eq.s32.totalorder %s143_s6, 0  ;;  %p272_p12 = scmp.lt.s32.totalorder (!%p224_p10), %s1409_s19, 1  ;;  %v401_v0 = vlaneseq (!%p224_p10) }
  0x12   : > { %227 = sbr.rel (%p224_p10) target bundleno = 159 (0x9f), region = 36  ;;  %s1174_s8 = sshll.u32 (!%p224_p10), %s1405_s18, 4 }
  0x13   : > { %s1520_s7 = scalar_select %p144_p11, %s1401_s17, %s146_s5  }
  0x14   : > { %p283_p13 = scmp.lt.s32.totalorder (!%p224_p10), %s1174_s8, 31  ;;  %v402_v1 = vshrl.u32 (!%p224_p10), %v401_v0, 7  ;;  %s269_s25 = sand.u32 (!%p224_p10), 1, %s1397_s16  }
  0x15   : > { %s1577_s26 = sshll.u32 (!%p224_p10), %s269_s25, 8 }
  0x16   : > { %v403_v2 = vsub.s32 (!%p224_p10), 0, %v402_v1  ;;  %v407_v3 = vsub.s32 (!%p224_p10), 1, %v402_v1  ;;  %v411_v4 = vsub.s32 (!%p224_p10), 2, %v402_v1  ;;  %v415_v7 = vsub.s32 (!%p224_p10), 3, %v402_v1 }
  0x19   : > { %s273_s9 = scalar_select %p272_p12, %s1409_s19, 1 }
  0x1a   : > { %s1880_s8 = smov (!%p283_p13, %s1174_s8), 31 }
  0x1b   : > { %s1172_s10 = sshll.u32 %s273_s9, 2  ;;  %s1176_s11 = sshll.u32 %s273_s9, 7 }
  0x1c   : > { %s275_s14 = scalar_lea.vmem %s1853_s0, %s1172_s10  ;;  %s279_s27 = scalar_lea.vmem %s1854_s1, %s1172_s10 }
  0x1d   : > { %s1175_s30 = sshll.u32 %s1880_s8, 2  ;;  %v399_v5 = vld [vmem:[%s275_s14] sm:$0xf]  ;;  %s1591_s8 = scalar_lea.vmem [#allocation2], %s1577_s26 }
  0x1e   : > { %v485_v6 = vld [vmem:[%s279_s27] sm:$0xf]  ;;  %s287_s5 = sadd.s32 %s1176_s11, %s1175_s30  ;;  %v1541_v8 = vrot.slane %v399_v5, %v403_v2  ;;  %v1543_v9 = vrot.slane %v399_v5, %v407_v3  ;;  %v1552_v15 = vrot.slane %v399_v5, %v411_v4  ;;  %v1554_v16 = vrot.slane %v399_v5, %v415_v7  ;;  %s1253_s11 = sshll.u32 %s1405_s18, 6 }
  0x1f   : > { %s1177_s6 = sshll.u32 %s287_s5, 2  ;;  %v1545_v10 = vrot.slane %v485_v6, %v403_v2  ;;  %v1547_v11 = vrot.slane %v485_v6, %v407_v3  ;;  %v1556_v17 = vrot.slane %v485_v6, %v411_v4  ;;  %v1558_v18 = vrot.slane %v485_v6, %v415_v7  ;;  %s1217_s14 = sshll.u32 %s1409_s19, 7 }
  0x20   : > { %s1534_s9 = scalar_lea.vmem %s1855_s2, %s1177_s6  ;;  %s1539_s10 = scalar_lea.vmem %s1856_s3, %s1177_s6 }
  0x21   : > { %v303_v12 = vld [vmem:[%s1534_s9] sm:$0xff]  ;;  %v304_v14 = vld [vmem:[%s1534_s9 + $0x8] sm:$0xff]  ;;  %v305_v24 = vld [vmem:[%s1534_s9 + $0x10] sm:$0xff]  ;;  %s1033_s23 = sadd.s32 %s1253_s11, %s1217_s14  ;;  %s1036_s19 = sshll.u32 %s1591_s8, 4  ;;  %s1796_s19 = int_to_ptr.vmem [resolvable:$true] %s1036_s19 }
  0x22   : > { %v571_v13 = vld [vmem:[%s1539_s10] sm:$0xff]  ;;  %v335_v19 = vunpack.c.l.bf16 %v303_v12  ;;  %v336_v20 = vunpack.c.h.bf16 %v303_v12  ;;  %v572_v23 = vld [vmem:[%s1539_s10 + $0x8] sm:$0xff]  ;;  %v573_v25 = vld [vmem:[%s1539_s10 + $0x10] sm:$0xff]  ;;  %v337_v26 = vunpack.c.l.bf16 %v304_v14  ;;  %v338_v27 = vunpack.c.h.bf16 %v304_v14  ;;  %s1218_s18 = sshll.u32 %s1033_s23, 6  ;;  %s1801_s5 = scalar_lea.sflag [#allocation3], %s269_s25 }
  0x23   : > { %v603_v21 = vunpack.c.l.bf16 %v571_v13  ;;  %v604_v22 = vunpack.c.h.bf16 %v571_v13  ;;  %v605_v28 = vunpack.c.l.bf16 %v572_v23  ;;  %v606_v29 = vunpack.c.h.bf16 %v572_v23  ;;  %v306_v34 = vld [vmem:[%s1534_s9 + $0x18] sm:$0xff]  ;;  %v307_v60 = vld [vmem:[%s1534_s9 + $0x20] sm:$0xff]  ;;  %v308_v6 = vld [vmem:[%s1534_s9 + $0x28] sm:$0xff]  ;;  %s1794_s30 = scalar_lea.hbm %s1857_s4, %s1218_s18  ;;  %s1327_s6 = scalar_lea.vmem %s1796_s19, 4096 }
  0x24   : > { %v421_v30 = vmul.f32 %v1541_v8, %v335_v19  ;;  %v422_v31 = vmul.f32 %v1543_v9, %v336_v20  ;;  %v339_v32 = vunpack.c.l.bf16 %v305_v24  ;;  %v340_v33 = vunpack.c.h.bf16 %v305_v24  ;;  %v574_v55 = vld [vmem:[%s1539_s10 + $0x18] sm:$0xff]  ;;  %v575_v1 = vld [vmem:[%s1539_s10 + $0x20] sm:$0xff]  ;;  %v576_v19 = vld [vmem:[%s1539_s10 + $0x28] sm:$0xff]  ;;  %p1328_p0 = scmp.ne.s32.totalorder %s1796_s19, %s1327_s6 }
  0x25   : > { %v423_v35 = vmul.f32 %v1552_v15, %v337_v26  ;;  %v424_v36 = vmul.f32 %v1554_v16, %v338_v27  ;;  %v607_v37 = vunpack.c.l.bf16 %v573_v25  ;;  %v608_v38 = vunpack.c.h.bf16 %v573_v25 }
  0x26   : > { %v507_v39 = vadd.f32 %v1545_v10, %v421_v30  ;;  %v508_v40 = vadd.f32 %v1547_v11, %v422_v31  ;;  %v425_v41 = vmul.f32 %v1541_v8, %v339_v32  ;;  %v426_v42 = vmul.f32 %v1543_v9, %v340_v33  ;;  %p1329_p1 = pnand %p1328_p0, %p1502_p3 }
  0x27   : > { %v509_v43 = vadd.f32 %v1556_v17, %v423_v35  ;;  %v510_v44 = vadd.f32 %v1558_v18, %v424_v36  ;;  %v341_v45 = vunpack.c.l.bf16 %v306_v34  ;;  %v342_v46 = vunpack.c.h.bf16 %v306_v34 }
  0x28   : > { %v667_v47 = vadd.f32 %v603_v21, %v507_v39  ;;  %v668_v48 = vadd.f32 %v604_v22, %v508_v40  ;;  %v511_v49 = vadd.f32 %v1545_v10, %v425_v41  ;;  %v512_v50 = vadd.f32 %v1547_v11, %v426_v42  ;;  %v310_v42 = vld [vmem:[%s1534_s9 + $0x38] sm:$0xff]  ;;  %p1330_p2 = pneg %p1329_p1 }
  0x29   : > { %v669_v51 = vadd.f32 %v605_v28, %v509_v43  ;;  %v670_v52 = vadd.f32 %v606_v29, %v510_v44  ;;  %v427_v53 = vmul.f32 %v1552_v15, %v341_v45  ;;  %v428_v54 = vmul.f32 %v1554_v16, %v342_v46  ;;  %v309_v28 = vld [vmem:[%s1534_s9 + $0x30] sm:$0xff] }
  0x2a   : > { %v731_v56 = vmax.f32 %v667_v47, 0.0  ;;  %v732_v57 = vmax.f32 %v668_v48, 0.0  ;;  %v671_v58 = vadd.f32 %v607_v37, %v511_v49  ;;  %v672_v59 = vadd.f32 %v608_v38, %v512_v50  ;;  %v577_v29 = vld [vmem:[%s1539_s10 + $0x30] sm:$0xff] }
  0x2b   : > { %v733_v61 = vmax.f32 %v669_v51, 0.0  ;;  %v734_v62 = vmax.f32 %v670_v52, 0.0  ;;  %v513_v63 = vadd.f32 %v1556_v17, %v427_v53  ;;  %v514_v0 = vadd.f32 %v1558_v18, %v428_v54  ;;  %v578_v51 = vld [vmem:[%s1539_s10 + $0x38] sm:$0xff] }
  0x2c   : > { %v1221_v2 = vpack.c.bf16 %v732_v57, %v731_v56  ;;  %v735_v3 = vmax.f32 %v671_v58, 0.0  ;;  %v736_v4 = vmax.f32 %v672_v59, 0.0  ;;  %v609_v5 = vunpack.c.l.bf16 %v574_v55 }
  0x2d   : > { %v1222_v7 = vpack.c.bf16 %v734_v62, %v733_v61  ;;  %v610_v12 = vunpack.c.h.bf16 %v574_v55  ;;  %v343_v13 = vunpack.c.l.bf16 %v307_v60  ;;  %v344_v14 = vunpack.c.h.bf16 %v307_v60  ;;  %v311_v60 = vld [vmem:[%s1534_s9 + $0x40] sm:$0xff] }
  0x2e   : > { %987 = vst [vmem:[%s1591_s8] sm:$0xff] %v1221_v2  ;;  %v1223_v20 = vpack.c.bf16 %v736_v4, %v735_v3  ;;  %v673_v21 = vadd.f32 %v609_v5, %v513_v63  ;;  %v611_v22 = vunpack.c.l.bf16 %v575_v1  ;;  %v612_v23 = vunpack.c.h.bf16 %v575_v1  ;;  %v579_v5 = vld [vmem:[%s1539_s10 + $0x40] sm:$0xff] }
  0x2f   : > { %988 = vst [vmem:[%s1591_s8 + $0x8] sm:$0xff] %v1222_v7  ;;  %v674_v24 = vadd.f32 %v610_v12, %v514_v0  ;;  %v429_v25 = vmul.f32 %v1541_v8, %v343_v13  ;;  %v430_v26 = vmul.f32 %v1543_v9, %v344_v14  ;;  %v345_v27 = vunpack.c.l.bf16 %v308_v6  ;;  %v312_v14 = vld [vmem:[%s1534_s9 + $0x48] sm:$0xff] }
  0x30   : > { %989 = vst [vmem:[%s1591_s8 + $0x10] sm:$0xff] %v1223_v20  ;;  %v737_v30 = vmax.f32 %v673_v21, 0.0  ;;  %v346_v31 = vunpack.c.h.bf16 %v308_v6  ;;  %v613_v32 = vunpack.c.l.bf16 %v576_v19  ;;  %v614_v33 = vunpack.c.h.bf16 %v576_v19 }
  0x31   : > { %v738_v34 = vmax.f32 %v674_v24, 0.0  ;;  %v515_v35 = vadd.f32 %v1545_v10, %v429_v25  ;;  %v516_v36 = vadd.f32 %v1547_v11, %v430_v26  ;;  %v431_v37 = vmul.f32 %v1552_v15, %v345_v27  ;;  %v580_v27 = vld [vmem:[%s1539_s10 + $0x48] sm:$0xff] }
  0x32   : > { %v432_v38 = vmul.f32 %v1554_v16, %v346_v31  ;;  %v347_v39 = vunpack.c.l.bf16 %v309_v28  ;;  %v348_v40 = vunpack.c.h.bf16 %v309_v28  ;;  %v615_v41 = vunpack.c.l.bf16 %v577_v29 }
  0x33   : > { %v1224_v43 = vpack.c.bf16 %v738_v34, %v737_v30  ;;  %v675_v44 = vadd.f32 %v611_v22, %v515_v35  ;;  %v676_v45 = vadd.f32 %v612_v23, %v516_v36  ;;  %v517_v46 = vadd.f32 %v1556_v17, %v431_v37  ;;  %v581_v37 = vld [vmem:[%s1539_s10 + $0x50] sm:$0xff] }
  0x34   : > { %v518_v47 = vadd.f32 %v1558_v18, %v432_v38  ;;  %v433_v48 = vmul.f32 %v1541_v8, %v347_v39  ;;  %v434_v49 = vmul.f32 %v1543_v9, %v348_v40  ;;  %v616_v50 = vunpack.c.h.bf16 %v577_v29 }
  0x35   : > { %990 = vst [vmem:[%s1591_s8 + $0x18] sm:$0xff] %v1224_v43  ;;  %v739_v52 = vmax.f32 %v675_v44, 0.0  ;;  %v740_v53 = vmax.f32 %v676_v45, 0.0  ;;  %v677_v54 = vadd.f32 %v613_v32, %v517_v46  ;;  %v349_v55 = vunpack.c.l.bf16 %v310_v42  ;;  %v313_v32 = vld [vmem:[%s1534_s9 + $0x50] sm:$0xff]  ;;  %v314_v46 = vld [vmem:[%s1534_s9 + $0x58] sm:$0xff] }
  0x36   : > { %v678_v56 = vadd.f32 %v614_v33, %v518_v47  ;;  %v519_v57 = vadd.f32 %v1545_v10, %v433_v48  ;;  %v520_v58 = vadd.f32 %v1547_v11, %v434_v49  ;;  %v350_v59 = vunpack.c.h.bf16 %v310_v42 }
  0x37   : > { %v1225_v61 = vpack.c.bf16 %v740_v53, %v739_v52  ;;  %v741_v62 = vmax.f32 %v677_v54, 0.0  ;;  %v435_v63 = vmul.f32 %v1552_v15, %v349_v55  ;;  %v617_v0 = vunpack.c.l.bf16 %v578_v51  ;;  %v582_v55 = vld [vmem:[%s1539_s10 + $0x58] sm:$0xff] }
  0x38   : > { %v742_v1 = vmax.f32 %v678_v56, 0.0  ;;  %v679_v2 = vadd.f32 %v615_v41, %v519_v57  ;;  %v680_v3 = vadd.f32 %v616_v50, %v520_v58  ;;  %v436_v4 = vmul.f32 %v1554_v16, %v350_v59 }
  0x39   : > { %991 = vst [vmem:[%s1591_s8 + $0x20] sm:$0xff] %v1225_v61  ;;  %v521_v6 = vadd.f32 %v1556_v17, %v435_v63  ;;  %v618_v7 = vunpack.c.h.bf16 %v578_v51  ;;  %v351_v12 = vunpack.c.l.bf16 %v311_v60  ;;  %v352_v13 = vunpack.c.h.bf16 %v311_v60 }
  0x3a   : > { %v1226_v19 = vpack.c.bf16 %v742_v1, %v741_v62  ;;  %v743_v20 = vmax.f32 %v679_v2, 0.0  ;;  %v744_v21 = vmax.f32 %v680_v3, 0.0  ;;  %v522_v22 = vadd.f32 %v1558_v18, %v436_v4 }
  0x3b   : > { %v681_v23 = vadd.f32 %v617_v0, %v521_v6  ;;  %v437_v24 = vmul.f32 %v1541_v8, %v351_v12  ;;  %v438_v25 = vmul.f32 %v1543_v9, %v352_v13  ;;  %v619_v26 = vunpack.c.l.bf16 %v579_v5  ;;  %v315_v0 = vld [vmem:[%s1534_s9 + $0x60] sm:$0xff] }
  0x3c   : > { %992 = vst [vmem:[%s1591_s8 + $0x28] sm:$0xff] %v1226_v19  ;;  %v1227_v28 = vpack.c.bf16 %v744_v21, %v743_v20  ;;  %v682_v29 = vadd.f32 %v618_v7, %v522_v22  ;;  %v620_v30 = vunpack.c.h.bf16 %v579_v5  ;;  %v353_v31 = vunpack.c.l.bf16 %v312_v14  ;;  %v583_v5 = vld [vmem:[%s1539_s10 + $0x60] sm:$0xff]  ;;  %v316_v22 = vld [vmem:[%s1534_s9 + $0x68] sm:$0xff] }
  0x3d   : > { %v745_v33 = vmax.f32 %v681_v23, 0.0  ;;  %v523_v34 = vadd.f32 %v1545_v10, %v437_v24  ;;  %v524_v35 = vadd.f32 %v1547_v11, %v438_v25  ;;  %v354_v36 = vunpack.c.h.bf16 %v312_v14 }
  0x3e   : > { %993 = vst [vmem:[%s1591_s8 + $0x30] sm:$0xff] %v1227_v28  ;;  %v746_v38 = vmax.f32 %v682_v29, 0.0  ;;  %v439_v39 = vmul.f32 %v1552_v15, %v353_v31  ;;  %v621_v40 = vunpack.c.l.bf16 %v580_v27  ;;  %v622_v41 = vunpack.c.h.bf16 %v580_v27  ;;  %v584_v31 = vld [vmem:[%s1539_s10 + $0x68] sm:$0xff] }
  0x3f   : > { %v683_v42 = vadd.f32 %v619_v26, %v523_v34  ;;  %v684_v43 = vadd.f32 %v620_v30, %v524_v35  ;;  %v440_v44 = vmul.f32 %v1554_v16, %v354_v36  ;;  %v355_v45 = vunpack.c.l.bf16 %v313_v32  ;;  %v317_v36 = vld [vmem:[%s1534_s9 + $0x70] sm:$0xff] }
  0x40   : > { %v1228_v47 = vpack.c.bf16 %v746_v38, %v745_v33  ;;  %v525_v48 = vadd.f32 %v1556_v17, %v439_v39  ;;  %v356_v49 = vunpack.c.h.bf16 %v313_v32  ;;  %v623_v50 = vunpack.c.l.bf16 %v581_v37 }
  0x41   : > { %v747_v51 = vmax.f32 %v683_v42, 0.0  ;;  %v748_v52 = vmax.f32 %v684_v43, 0.0  ;;  %v526_v53 = vadd.f32 %v1558_v18, %v440_v44  ;;  %v441_v54 = vmul.f32 %v1541_v8, %v355_v45  ;;  %v585_v45 = vld [vmem:[%s1539_s10 + $0x70] sm:$0xff] }
  0x42   : > { %994 = vst [vmem:[%s1591_s8 + $0x38] sm:$0xff] %v1228_v47  ;;  %v685_v56 = vadd.f32 %v621_v40, %v525_v48  ;;  %v442_v57 = vmul.f32 %v1543_v9, %v356_v49  ;;  %v624_v58 = vunpack.c.h.bf16 %v581_v37  ;;  %v357_v59 = vunpack.c.l.bf16 %v314_v46 }
  0x43   : > { %v1229_v60 = vpack.c.bf16 %v748_v52, %v747_v51  ;;  %v686_v61 = vadd.f32 %v622_v41, %v526_v53  ;;  %v527_v62 = vadd.f32 %v1545_v10, %v441_v54  ;;  %v358_v63 = vunpack.c.h.bf16 %v314_v46  ;;  %v318_v54 = vld [vmem:[%s1534_s9 + $0x78] sm:$0xff] }
  0x44   : > { %v749_v1 = vmax.f32 %v685_v56, 0.0  ;;  %v528_v2 = vadd.f32 %v1547_v11, %v442_v57  ;;  %v443_v3 = vmul.f32 %v1552_v15, %v357_v59  ;;  %v625_v4 = vunpack.c.l.bf16 %v582_v55  ;;  %v586_v59 = vld [vmem:[%s1539_s10 + $0x78] sm:$0xff] }
  0x45   : > { %995 = vst [vmem:[%s1591_s8 + $0x40] sm:$0xff] %v1229_v60  ;;  %v750_v6 = vmax.f32 %v686_v61, 0.0  ;;  %v687_v7 = vadd.f32 %v623_v50, %v527_v62  ;;  %v444_v12 = vmul.f32 %v1554_v16, %v358_v63  ;;  %v626_v13 = vunpack.c.h.bf16 %v582_v55 }
  0x46   : > { %v688_v14 = vadd.f32 %v624_v58, %v528_v2  ;;  %v529_v19 = vadd.f32 %v1556_v17, %v443_v3  ;;  %v359_v20 = vunpack.c.l.bf16 %v315_v0  ;;  %v360_v21 = vunpack.c.h.bf16 %v315_v0 }
  0x47   : > { %v1230_v23 = vpack.c.bf16 %v750_v6, %v749_v1  ;;  %v751_v24 = vmax.f32 %v687_v7, 0.0  ;;  %v530_v25 = vadd.f32 %v1558_v18, %v444_v12  ;;  %v627_v26 = vunpack.c.l.bf16 %v583_v5 }
  0x48   : > { %v752_v27 = vmax.f32 %v688_v14, 0.0  ;;  %v689_v28 = vadd.f32 %v625_v4, %v529_v19  ;;  %v445_v29 = vmul.f32 %v1541_v8, %v359_v20  ;;  %v446_v30 = vmul.f32 %v1543_v9, %v360_v21  ;;  %v319_v4 = vld [vmem:[%s1534_s9 + $0x80] sm:$0xff] }
  0x49   : > { %996 = vst [vmem:[%s1591_s8 + $0x48] sm:$0xff] %v1230_v23  ;;  %v690_v32 = vadd.f32 %v626_v13, %v530_v25  ;;  %v628_v33 = vunpack.c.h.bf16 %v583_v5  ;;  %v361_v34 = vunpack.c.l.bf16 %v316_v22  ;;  %v362_v35 = vunpack.c.h.bf16 %v316_v22  ;;  %v587_v13 = vld [vmem:[%s1539_s10 + $0x80] sm:$0xff] }
  0x4a   : > { %v1231_v37 = vpack.c.bf16 %v752_v27, %v751_v24  ;;  %v753_v38 = vmax.f32 %v689_v28, 0.0  ;;  %v531_v39 = vadd.f32 %v1545_v10, %v445_v29  ;;  %v532_v40 = vadd.f32 %v1547_v11, %v446_v30 }
  0x4b   : > { %v754_v41 = vmax.f32 %v690_v32, 0.0  ;;  %v447_v42 = vmul.f32 %v1552_v15, %v361_v34  ;;  %v448_v43 = vmul.f32 %v1554_v16, %v362_v35  ;;  %v629_v44 = vunpack.c.l.bf16 %v584_v31 }
  0x4c   : > { %997 = vst [vmem:[%s1591_s8 + $0x50] sm:$0xff] %v1231_v37  ;;  %v691_v46 = vadd.f32 %v627_v26, %v531_v39  ;;  %v692_v47 = vadd.f32 %v628_v33, %v532_v40  ;;  %v630_v48 = vunpack.c.h.bf16 %v584_v31  ;;  %v363_v49 = vunpack.c.l.bf16 %v317_v36  ;;  %v320_v26 = vld [vmem:[%s1534_s9 + $0x88] sm:$0xff]  ;;  %v321_v40 = vld [vmem:[%s1534_s9 + $0x90] sm:$0xff] }
  0x4d   : > { %v1232_v50 = vpack.c.bf16 %v754_v41, %v753_v38  ;;  %v533_v51 = vadd.f32 %v1556_v17, %v447_v42  ;;  %v534_v52 = vadd.f32 %v1558_v18, %v448_v43  ;;  %v364_v53 = vunpack.c.h.bf16 %v317_v36  ;;  %v588_v31 = vld [vmem:[%s1539_s10 + $0x88] sm:$0xff] }
  0x4e   : > { %v755_v55 = vmax.f32 %v691_v46, 0.0  ;;  %v756_v56 = vmax.f32 %v692_v47, 0.0  ;;  %v449_v57 = vmul.f32 %v1541_v8, %v363_v49  ;;  %v631_v58 = vunpack.c.l.bf16 %v585_v45  ;;  %v589_v49 = vld [vmem:[%s1539_s10 + $0x90] sm:$0xff] }
  0x4f   : > { %998 = vst [vmem:[%s1591_s8 + $0x58] sm:$0xff] %v1232_v50  ;;  %v693_v60 = vadd.f32 %v629_v44, %v533_v51  ;;  %v694_v61 = vadd.f32 %v630_v48, %v534_v52  ;;  %v450_v62 = vmul.f32 %v1543_v9, %v364_v53  ;;  %v632_v63 = vunpack.c.h.bf16 %v585_v45 }
  0x50   : > { %v1233_v0 = vpack.c.bf16 %v756_v56, %v755_v55  ;;  %v535_v1 = vadd.f32 %v1545_v10, %v449_v57  ;;  %v365_v2 = vunpack.c.l.bf16 %v318_v54  ;;  %v366_v3 = vunpack.c.h.bf16 %v318_v54 }
  0x51   : > { %v757_v5 = vmax.f32 %v693_v60, 0.0  ;;  %v758_v6 = vmax.f32 %v694_v61, 0.0  ;;  %v536_v7 = vadd.f32 %v1547_v11, %v450_v62  ;;  %v633_v12 = vunpack.c.l.bf16 %v586_v59 }
  0x52   : > { %999 = vst [vmem:[%s1591_s8 + $0x60] sm:$0xff] %v1233_v0  ;;  %v695_v14 = vadd.f32 %v631_v58, %v535_v1  ;;  %v451_v19 = vmul.f32 %v1552_v15, %v365_v2  ;;  %v452_v20 = vmul.f32 %v1554_v16, %v366_v3  ;;  %v634_v21 = vunpack.c.h.bf16 %v586_v59  ;;  %v322_v58 = vld [vmem:[%s1534_s9 + $0x98] sm:$0xff] }
  0x53   : > { %v1234_v22 = vpack.c.bf16 %v758_v6, %v757_v5  ;;  %v696_v23 = vadd.f32 %v632_v63, %v536_v7  ;;  %v367_v24 = vunpack.c.l.bf16 %v319_v4  ;;  %v368_v25 = vunpack.c.h.bf16 %v319_v4  ;;  %v590_v63 = vld [vmem:[%s1539_s10 + $0x98] sm:$0xff] }
  0x54   : > { %v759_v27 = vmax.f32 %v695_v14, 0.0  ;;  %v537_v28 = vadd.f32 %v1556_v17, %v451_v19  ;;  %v538_v29 = vadd.f32 %v1558_v18, %v452_v20  ;;  %v635_v30 = vunpack.c.l.bf16 %v587_v13 }
  0x55   : > { %1000 = vst [vmem:[%s1591_s8 + $0x68] sm:$0xff] %v1234_v22  ;;  %v760_v32 = vmax.f32 %v696_v23, 0.0  ;;  %v453_v33 = vmul.f32 %v1541_v8, %v367_v24  ;;  %v454_v34 = vmul.f32 %v1543_v9, %v368_v25  ;;  %v636_v35 = vunpack.c.h.bf16 %v587_v13 }
  0x56   : > { %v697_v36 = vadd.f32 %v633_v12, %v537_v28  ;;  %v698_v37 = vadd.f32 %v634_v21, %v538_v29  ;;  %v369_v38 = vunpack.c.l.bf16 %v320_v26  ;;  %v370_v39 = vunpack.c.h.bf16 %v320_v26  ;;  %v323_v12 = vld [vmem:[%s1534_s9 + $0xa0] sm:$0xff] }
  0x57   : > { %v1235_v41 = vpack.c.bf16 %v760_v32, %v759_v27  ;;  %v539_v42 = vadd.f32 %v1545_v10, %v453_v33  ;;  %v540_v43 = vadd.f32 %v1547_v11, %v454_v34  ;;  %v637_v44 = vunpack.c.l.bf16 %v588_v31  ;;  %v591_v21 = vld [vmem:[%s1539_s10 + $0xa0] sm:$0xff] }
  0x58   : > { %v761_v45 = vmax.f32 %v697_v36, 0.0  ;;  %v762_v46 = vmax.f32 %v698_v37, 0.0  ;;  %v455_v47 = vmul.f32 %v1552_v15, %v369_v38  ;;  %v456_v48 = vmul.f32 %v1554_v16, %v370_v39 }
  0x59   : > { %1001 = vst [vmem:[%s1591_s8 + $0x70] sm:$0xff] %v1235_v41  ;;  %v699_v50 = vadd.f32 %v635_v30, %v539_v42  ;;  %v700_v51 = vadd.f32 %v636_v35, %v540_v43  ;;  %v638_v52 = vunpack.c.h.bf16 %v588_v31  ;;  %v371_v53 = vunpack.c.l.bf16 %v321_v40  ;;  %v324_v30 = vld [vmem:[%s1534_s9 + $0xa8] sm:$0xff] }
  0x5a   : > { %v1236_v54 = vpack.c.bf16 %v762_v46, %v761_v45  ;;  %v541_v55 = vadd.f32 %v1556_v17, %v455_v47  ;;  %v542_v56 = vadd.f32 %v1558_v18, %v456_v48  ;;  %v372_v57 = vunpack.c.h.bf16 %v321_v40  ;;  %v592_v35 = vld [vmem:[%s1539_s10 + $0xa8] sm:$0xff] }
  0x5b   : > { %v763_v59 = vmax.f32 %v699_v50, 0.0  ;;  %v764_v60 = vmax.f32 %v700_v51, 0.0  ;;  %v457_v61 = vmul.f32 %v1541_v8, %v371_v53  ;;  %v639_v62 = vunpack.c.l.bf16 %v589_v49  ;;  %v593_v53 = vld [vmem:[%s1539_s10 + $0xb0] sm:$0xff] }
  0x5c   : > { %1002 = vst [vmem:[%s1591_s8 + $0x78] sm:$0xff] %v1236_v54  ;;  %v701_v0 = vadd.f32 %v637_v44, %v541_v55  ;;  %v702_v1 = vadd.f32 %v638_v52, %v542_v56  ;;  %v458_v2 = vmul.f32 %v1543_v9, %v372_v57  ;;  %v640_v3 = vunpack.c.h.bf16 %v589_v49  ;;  %v325_v44 = vld [vmem:[%s1534_s9 + $0xb0] sm:$0xff] }
  0x5d   : > { %v1237_v4 = vpack.c.bf16 %v764_v60, %v763_v59  ;;  %v543_v5 = vadd.f32 %v1545_v10, %v457_v61  ;;  %v373_v6 = vunpack.c.l.bf16 %v322_v58  ;;  %v374_v7 = vunpack.c.h.bf16 %v322_v58 }
  0x5e   : > { %v765_v13 = vmax.f32 %v701_v0, 0.0  ;;  %v766_v14 = vmax.f32 %v702_v1, 0.0  ;;  %v544_v19 = vadd.f32 %v1547_v11, %v458_v2  ;;  %v641_v20 = vunpack.c.l.bf16 %v590_v63 }
  0x5f   : > { %1003 = vst [vmem:[%s1591_s8 + $0x80] sm:$0xff] %v1237_v4  ;;  %v703_v22 = vadd.f32 %v639_v62, %v543_v5  ;;  %v459_v23 = vmul.f32 %v1552_v15, %v373_v6  ;;  %v460_v24 = vmul.f32 %v1554_v16, %v374_v7  ;;  %v642_v25 = vunpack.c.h.bf16 %v590_v63  ;;  %v326_v62 = vld [vmem:[%s1534_s9 + $0xb8] sm:$0xff] }
  0x60   : > { %v1238_v26 = vpack.c.bf16 %v766_v14, %v765_v13  ;;  %v704_v27 = vadd.f32 %v640_v3, %v544_v19  ;;  %v375_v28 = vunpack.c.l.bf16 %v323_v12  ;;  %v376_v29 = vunpack.c.h.bf16 %v323_v12  ;;  %v594_v3 = vld [vmem:[%s1539_s10 + $0xb8] sm:$0xff] }
  0x61   : > { %v767_v31 = vmax.f32 %v703_v22, 0.0  ;;  %v545_v32 = vadd.f32 %v1556_v17, %v459_v23  ;;  %v546_v33 = vadd.f32 %v1558_v18, %v460_v24  ;;  %v643_v34 = vunpack.c.l.bf16 %v591_v21 }
  0x62   : > { %1004 = vst [vmem:[%s1591_s8 + $0x88] sm:$0xff] %v1238_v26  ;;  %v768_v36 = vmax.f32 %v704_v27, 0.0  ;;  %v461_v37 = vmul.f32 %v1541_v8, %v375_v28  ;;  %v462_v38 = vmul.f32 %v1543_v9, %v376_v29  ;;  %v644_v39 = vunpack.c.h.bf16 %v591_v21 }
  0x63   : > { %v705_v40 = vadd.f32 %v641_v20, %v545_v32  ;;  %v706_v41 = vadd.f32 %v642_v25, %v546_v33  ;;  %v377_v42 = vunpack.c.l.bf16 %v324_v30  ;;  %v378_v43 = vunpack.c.h.bf16 %v324_v30  ;;  %v327_v20 = vld [vmem:[%s1534_s9 + $0xc0] sm:$0xff] }
  0x64   : > { %v1239_v45 = vpack.c.bf16 %v768_v36, %v767_v31  ;;  %v547_v46 = vadd.f32 %v1545_v10, %v461_v37  ;;  %v548_v47 = vadd.f32 %v1547_v11, %v462_v38  ;;  %v645_v48 = vunpack.c.l.bf16 %v592_v35  ;;  %v595_v25 = vld [vmem:[%s1539_s10 + $0xc0] sm:$0xff] }
  0x65   : > { %v769_v49 = vmax.f32 %v705_v40, 0.0  ;;  %v770_v50 = vmax.f32 %v706_v41, 0.0  ;;  %v463_v51 = vmul.f32 %v1552_v15, %v377_v42  ;;  %v464_v52 = vmul.f32 %v1554_v16, %v378_v43 }
  0x66   : > { %1005 = vst [vmem:[%s1591_s8 + $0x90] sm:$0xff] %v1239_v45  ;;  %v707_v54 = vadd.f32 %v643_v34, %v547_v46  ;;  %v708_v55 = vadd.f32 %v644_v39, %v548_v47  ;;  %v646_v56 = vunpack.c.h.bf16 %v592_v35  ;;  %v379_v57 = vunpack.c.l.bf16 %v325_v44  ;;  %v328_v34 = vld [vmem:[%s1534_s9 + $0xc8] sm:$0xff] }
  0x67   : > { %v1240_v58 = vpack.c.bf16 %v770_v50, %v769_v49  ;;  %v549_v59 = vadd.f32 %v1556_v17, %v463_v51  ;;  %v550_v60 = vadd.f32 %v1558_v18, %v464_v52  ;;  %v380_v61 = vunpack.c.h.bf16 %v325_v44  ;;  %v596_v39 = vld [vmem:[%s1539_s10 + $0xc8] sm:$0xff] }
  0x68   : > { %v771_v63 = vmax.f32 %v707_v54, 0.0  ;;  %v772_v0 = vmax.f32 %v708_v55, 0.0  ;;  %v465_v1 = vmul.f32 %v1541_v8, %v379_v57  ;;  %v647_v2 = vunpack.c.l.bf16 %v593_v53  ;;  %v597_v57 = vld [vmem:[%s1539_s10 + $0xd0] sm:$0xff] }
  0x69   : > { %1006 = vst [vmem:[%s1591_s8 + $0x98] sm:$0xff] %v1240_v58  ;;  %v709_v4 = vadd.f32 %v645_v48, %v549_v59  ;;  %v710_v5 = vadd.f32 %v646_v56, %v550_v60  ;;  %v466_v6 = vmul.f32 %v1543_v9, %v380_v61  ;;  %v648_v7 = vunpack.c.h.bf16 %v593_v53  ;;  %v329_v48 = vld [vmem:[%s1534_s9 + $0xd0] sm:$0xff] }
  0x6a   : > { %v1241_v12 = vpack.c.bf16 %v772_v0, %v771_v63  ;;  %v551_v13 = vadd.f32 %v1545_v10, %v465_v1  ;;  %v381_v14 = vunpack.c.l.bf16 %v326_v62  ;;  %v382_v19 = vunpack.c.h.bf16 %v326_v62 }
  0x6b   : > { %v773_v21 = vmax.f32 %v709_v4, 0.0  ;;  %v774_v22 = vmax.f32 %v710_v5, 0.0  ;;  %v552_v23 = vadd.f32 %v1547_v11, %v466_v6  ;;  %v649_v24 = vunpack.c.l.bf16 %v594_v3 }
  0x6c   : > { %1007 = vst [vmem:[%s1591_s8 + $0xa0] sm:$0xff] %v1241_v12  ;;  %v711_v26 = vadd.f32 %v647_v2, %v551_v13  ;;  %v467_v27 = vmul.f32 %v1552_v15, %v381_v14  ;;  %v468_v28 = vmul.f32 %v1554_v16, %v382_v19  ;;  %v650_v29 = vunpack.c.h.bf16 %v594_v3  ;;  %v330_v2 = vld [vmem:[%s1534_s9 + $0xd8] sm:$0xff] }
  0x6d   : > { %v1242_v30 = vpack.c.bf16 %v774_v22, %v773_v21  ;;  %v712_v31 = vadd.f32 %v648_v7, %v552_v23  ;;  %v383_v32 = vunpack.c.l.bf16 %v327_v20  ;;  %v384_v33 = vunpack.c.h.bf16 %v327_v20  ;;  %v598_v7 = vld [vmem:[%s1539_s10 + $0xd8] sm:$0xff] }
  0x6e   : > { %v775_v35 = vmax.f32 %v711_v26, 0.0  ;;  %v553_v36 = vadd.f32 %v1556_v17, %v467_v27  ;;  %v554_v37 = vadd.f32 %v1558_v18, %v468_v28  ;;  %v651_v38 = vunpack.c.l.bf16 %v595_v25 }
  0x6f   : > { %1008 = vst [vmem:[%s1591_s8 + $0xa8] sm:$0xff] %v1242_v30  ;;  %v776_v40 = vmax.f32 %v712_v31, 0.0  ;;  %v469_v41 = vmul.f32 %v1541_v8, %v383_v32  ;;  %v470_v42 = vmul.f32 %v1543_v9, %v384_v33  ;;  %v652_v43 = vunpack.c.h.bf16 %v595_v25 }
  0x70   : > { %v713_v44 = vadd.f32 %v649_v24, %v553_v36  ;;  %v714_v45 = vadd.f32 %v650_v29, %v554_v37  ;;  %v385_v46 = vunpack.c.l.bf16 %v328_v34  ;;  %v386_v47 = vunpack.c.h.bf16 %v328_v34  ;;  %v331_v24 = vld [vmem:[%s1534_s9 + $0xe0] sm:$0xff] }
  0x71   : > { %v1243_v49 = vpack.c.bf16 %v776_v40, %v775_v35  ;;  %v555_v50 = vadd.f32 %v1545_v10, %v469_v41  ;;  %v556_v51 = vadd.f32 %v1547_v11, %v470_v42  ;;  %v653_v52 = vunpack.c.l.bf16 %v596_v39  ;;  %v599_v29 = vld [vmem:[%s1539_s10 + $0xe0] sm:$0xff] }
  0x72   : > { %v777_v53 = vmax.f32 %v713_v44, 0.0  ;;  %v778_v54 = vmax.f32 %v714_v45, 0.0  ;;  %v471_v55 = vmul.f32 %v1552_v15, %v385_v46  ;;  %v472_v56 = vmul.f32 %v1554_v16, %v386_v47 }
  0x73   : > { %1009 = vst [vmem:[%s1591_s8 + $0xb0] sm:$0xff] %v1243_v49  ;;  %v715_v58 = vadd.f32 %v651_v38, %v555_v50  ;;  %v716_v59 = vadd.f32 %v652_v43, %v556_v51  ;;  %v654_v60 = vunpack.c.h.bf16 %v596_v39  ;;  %v387_v61 = vunpack.c.l.bf16 %v329_v48  ;;  %v332_v38 = vld [vmem:[%s1534_s9 + $0xe8] sm:$0xff] }
  0x74   : > { %v1244_v62 = vpack.c.bf16 %v778_v54, %v777_v53  ;;  %v557_v63 = vadd.f32 %v1556_v17, %v471_v55  ;;  %v558_v0 = vadd.f32 %v1558_v18, %v472_v56  ;;  %v388_v1 = vunpack.c.h.bf16 %v329_v48  ;;  %v600_v43 = vld [vmem:[%s1539_s10 + $0xe8] sm:$0xff] }
  0x75   : > { %v779_v3 = vmax.f32 %v715_v58, 0.0  ;;  %v780_v4 = vmax.f32 %v716_v59, 0.0  ;;  %v473_v5 = vmul.f32 %v1541_v8, %v387_v61  ;;  %v655_v6 = vunpack.c.l.bf16 %v597_v57  ;;  %v601_v61 = vld [vmem:[%s1539_s10 + $0xf0] sm:$0xff] }
  0x76   : > { %1010 = vst [vmem:[%s1591_s8 + $0xb8] sm:$0xff] %v1244_v62  ;;  %v717_v12 = vadd.f32 %v653_v52, %v557_v63  ;;  %v718_v13 = vadd.f32 %v654_v60, %v558_v0  ;;  %v474_v14 = vmul.f32 %v1543_v9, %v388_v1  ;;  %v656_v19 = vunpack.c.h.bf16 %v597_v57  ;;  %v333_v52 = vld [vmem:[%s1534_s9 + $0xf0] sm:$0xff] }
  0x77   : > { %v1245_v20 = vpack.c.bf16 %v780_v4, %v779_v3  ;;  %v559_v21 = vadd.f32 %v1545_v10, %v473_v5  ;;  %v389_v22 = vunpack.c.l.bf16 %v330_v2  ;;  %v390_v23 = vunpack.c.h.bf16 %v330_v2 }
  0x78   : > { %v781_v25 = vmax.f32 %v717_v12, 0.0  ;;  %v782_v26 = vmax.f32 %v718_v13, 0.0  ;;  %v560_v27 = vadd.f32 %v1547_v11, %v474_v14  ;;  %v657_v28 = vunpack.c.l.bf16 %v598_v7 }
  0x79   : > { %1011 = vst [vmem:[%s1591_s8 + $0xc0] sm:$0xff] %v1245_v20  ;;  %v719_v30 = vadd.f32 %v655_v6, %v559_v21  ;;  %v475_v31 = vmul.f32 %v1552_v15, %v389_v22  ;;  %v476_v32 = vmul.f32 %v1554_v16, %v390_v23  ;;  %v658_v33 = vunpack.c.h.bf16 %v598_v7  ;;  %v334_v6 = vld [vmem:[%s1534_s9 + $0xf8] sm:$0xff]  ;;  %s1423_s9 = smov [#allocation2]  }
  0x7a   : > { %v1246_v34 = vpack.c.bf16 %v782_v26, %v781_v25  ;;  %v720_v35 = vadd.f32 %v656_v19, %v560_v27  ;;  %v391_v36 = vunpack.c.l.bf16 %v331_v24  ;;  %v392_v37 = vunpack.c.h.bf16 %v331_v24  ;;  %v602_v19 = vld [vmem:[%s1539_s10 + $0xf8] sm:$0xff]  ;;  %s1331_s12 = sshll.u32 %s1423_s9, 4  ;;  %s1332_s12 = int_to_ptr.vmem [resolvable:$false] %s1331_s12 }
  0x7b   : > { %v783_v39 = vmax.f32 %v719_v30, 0.0  ;;  %v561_v40 = vadd.f32 %v1556_v17, %v475_v31  ;;  %v562_v41 = vadd.f32 %v1558_v18, %v476_v32  ;;  %v659_v42 = vunpack.c.l.bf16 %v599_v29  ;;  %s1333_s13 = scalar_lea.vmem %s1332_s12, 8192  ;;  %p1334_p4 = scmp.lt.s32.totalorder %s1796_s19, %s1332_s12 }
  0x7c   : > { %1012 = vst [vmem:[%s1591_s8 + $0xc8] sm:$0xff] %v1246_v34  ;;  %v784_v44 = vmax.f32 %v720_v35, 0.0  ;;  %v477_v45 = vmul.f32 %v1541_v8, %v391_v36  ;;  %v478_v46 = vmul.f32 %v1543_v9, %v392_v37  ;;  %v660_v47 = vunpack.c.h.bf16 %v599_v29  ;;  %p1335_p5 = scmp.lt.s32.totalorder %s1333_s13, %s1327_s6 }
  0x7d   : > { %v721_v48 = vadd.f32 %v657_v28, %v561_v40  ;;  %v722_v49 = vadd.f32 %v658_v33, %v562_v41  ;;  %v393_v50 = vunpack.c.l.bf16 %v332_v38  ;;  %v394_v51 = vunpack.c.h.bf16 %v332_v38 }
  0x7e   : > { %v1247_v53 = vpack.c.bf16 %v784_v44, %v783_v39  ;;  %v563_v54 = vadd.f32 %v1545_v10, %v477_v45  ;;  %v564_v55 = vadd.f32 %v1547_v11, %v478_v46  ;;  %v661_v56 = vunpack.c.l.bf16 %v600_v43  ;;  %p1336_p6 = por %p1335_p5, %p1334_p4 }
  0x7f   : > { %v785_v57 = vmax.f32 %v721_v48, 0.0  ;;  %v786_v58 = vmax.f32 %v722_v49, 0.0  ;;  %v479_v59 = vmul.f32 %v1552_v15, %v393_v50  ;;  %v480_v60 = vmul.f32 %v1554_v16, %v394_v51 }
  0x80   : > { %1013 = vst [vmem:[%s1591_s8 + $0xd0] sm:$0xff] %v1247_v53  ;;  %v723_v62 = vadd.f32 %v659_v42, %v563_v54  ;;  %v724_v63 = vadd.f32 %v660_v47, %v564_v55  ;;  %v662_v0 = vunpack.c.h.bf16 %v600_v43  ;;  %v395_v1 = vunpack.c.l.bf16 %v333_v52  ;;  %p1337_p7 = pnand %p1336_p6, %p1330_p2 }
  0x81   : > { %v1248_v2 = vpack.c.bf16 %v786_v58, %v785_v57  ;;  %v565_v3 = vadd.f32 %v1556_v17, %v479_v59  ;;  %v566_v4 = vadd.f32 %v1558_v18, %v480_v60  ;;  %v396_v5 = vunpack.c.h.bf16 %v333_v52 }
  0x82   : > { %v787_v7 = vmax.f32 %v723_v62, 0.0  ;;  %v788_v12 = vmax.f32 %v724_v63, 0.0  ;;  %v481_v13 = vmul.f32 %v1541_v8, %v395_v1  ;;  %v663_v14 = vunpack.c.l.bf16 %v601_v61 }
  0x83   : > { %1014 = vst [vmem:[%s1591_s8 + $0xd8] sm:$0xff] %v1248_v2  ;;  %v725_v20 = vadd.f32 %v661_v56, %v565_v3  ;;  %v726_v21 = vadd.f32 %v662_v0, %v566_v4  ;;  %v482_v22 = vmul.f32 %v1543_v9, %v396_v5  ;;  %v664_v23 = vunpack.c.h.bf16 %v601_v61 }
  0x84   : > { %v1249_v24 = vpack.c.bf16 %v788_v12, %v787_v7  ;;  %v567_v25 = vadd.f32 %v1545_v10, %v481_v13  ;;  %v397_v26 = vunpack.c.l.bf16 %v334_v6  ;;  %v398_v27 = vunpack.c.h.bf16 %v334_v6 }
  0x85   : > { %v789_v28 = vmax.f32 %v725_v20, 0.0  ;;  %v790_v29 = vmax.f32 %v726_v21, 0.0  ;;  %v568_v8 = vadd.f32 %v1547_v11, %v482_v22  ;;  %v665_v30 = vunpack.c.l.bf16 %v602_v19 }
  0x86   : > { %1015 = vst [vmem:[%s1591_s8 + $0xe0] sm:$0xff] %v1249_v24  ;;  %v727_v31 = vadd.f32 %v663_v14, %v567_v25  ;;  %v483_v32 = vmul.f32 %v1552_v15, %v397_v26  ;;  %v484_v9 = vmul.f32 %v1554_v16, %v398_v27  ;;  %v666_v33 = vunpack.c.h.bf16 %v602_v19 }
  0x87   : > { %v1250_v10 = vpack.c.bf16 %v790_v29, %v789_v28  ;;  %v728_v34 = vadd.f32 %v664_v23, %v568_v8 }
  0x88   : > { %v791_v35 = vmax.f32 %v727_v31, 0.0  ;;  %v569_v36 = vadd.f32 %v1556_v17, %v483_v32  ;;  %v570_v11 = vadd.f32 %v1558_v18, %v484_v9 }
  0x89   : > { %1016 = vst [vmem:[%s1591_s8 + $0xe8] sm:$0xff] %v1250_v10  ;;  %v792_v37 = vmax.f32 %v728_v34, 0.0 }
  0x8a   : > { %v729_v38 = vadd.f32 %v665_v30, %v569_v36  ;;  %v730_v39 = vadd.f32 %v666_v33, %v570_v11 }
  0x8b   : > { %v1251_v15 = vpack.c.bf16 %v792_v37, %v791_v35 }
  0x8c   : > { %v793_v16 = vmax.f32 %v729_v38, 0.0  ;;  %v794_v40 = vmax.f32 %v730_v39, 0.0 }
  0x8d   : > { %1017 = vst [vmem:[%s1591_s8 + $0xf0] sm:$0xff] %v1251_v15 }
  0x8e   : > { %v1252_v17 = vpack.c.bf16 %v794_v40, %v793_v16 }
  0x90   : > { %1018 = vst [vmem:[%s1591_s8 + $0xf8] sm:$0xff] %v1252_v17 }
  0x91   : > { %1340 = shalt.err (!%p1337_p7)
}
  0x92   : > { %s1341_s10 = scalar_lea.hbm %s1794_s30, 4096  ;;  %s1345_s8 = scalar_lea.hbm %s1857_s4, 16384 }
  0x93   : > { %p1342_p9 = scmp.ne.s32.totalorder %s1794_s30, %s1341_s10  ;;  %p1346_p12 = scmp.lt.u32.totalorder %s1794_s30, %s1857_s4 }
  0x94   : > { %p1347_p13 = scmp.lt.u32.totalorder %s1345_s8, %s1341_s10  ;;  %p1349_p1 = scmp.lt.u32.totalorder %s1341_s10, %s1794_s30 }
  0x95   : > { %p1343_p10 = pnand %p1342_p9, %p1502_p3 }
  0x96   : > { %p1348_p0 = por %p1347_p13, %p1346_p12 }
  0x97   : > { %p1344_p11 = pneg %p1343_p10 }
  0x98   : > { %p1350_p2 = por %p1349_p1, %p1348_p0 }
  0x9a   : > { %p1351_p4 = pnand %p1350_p2, %p1344_p11 }
  0x9c   : > { %1354 = shalt.err (!%p1351_p4)
}
  0x9d   : > { %s1424_s23 = smov 256   ;;  %s1425_s18 = smov 16  }
  0x9e   : > { %1254 = dma.vmem_to_hbm [thread:$0]  (%p1502_p3), %s1796_s19, 4096, %s1794_s30, %s1801_s5, %s1424_s23, %s1424_s23, %s1425_s18  }
  0x9f PF: > { %p1260_p5 = scmp.ge.s32.totalorder %s1421_s22, 2  ;;  %s1051_s24 = sand.u32 1, %s1393_s15  }
  0xa0   : > { %s1052_s27 = scalar_lea.sflag [#allocation3], %s1051_s24 }
  0xa1   : > { %p1257_p6 = pnand %p1260_p5, %p1511_p8 }
  0xa3   : > { %1388 = dma.done.wait (!%p1257_p6), %s1052_s27, 4096  }
  0xa4   : > { %1390 = vsyncadd (!%p1257_p6), %s1052_s27, 4294963200  ;;  %s17_s22 = sadd.s32 1, %s1421_s22   ;;  %s1864_s28 = sld [smem:[#allocation5_spill]] }
  0xa5   : > { %p14_p7 = scmp.ge.s32.totalorder %s17_s22, 6   ;;  %s1865_s30 = sld [smem:[#allocation6_spill]] }
  0xa6   : > { %s1866_s15 = smov %s1397_s16  ;;  %s1867_s16 = smov %s1401_s17 }
  0xa7   : > { %s1868_s17 = smov %s1520_s7  ;;  %s1869_s18 = smov %s1413_s20 }
  0xa8   : > { %s1870_s19 = smov %s1417_s21  ;;  %16 = sbr.rel (!%p14_p7) target bundleno = 5 (0x5), region = 80 }
  0xaa   : > { %s1871_s20 = smov %s1864_s28 }
  0xab   : > { %s1872_s21 = smov %s1865_s30 }
  0xaf   :  { %1057 = vsyncpa [#allocation3], 1 }
  0xb0   :  { %1059 = vsyncpa [#allocation3 + $0x1], 1 }

// kernel: bottleneck_forward.5
= control target key start
LH: loop header
LB: loop body
LE: loop exit
PB: predicated region body
PF: predicated region fallthrough
CT: control target
= control target key end

     0   :  { %s5003_s21 = smov 0   ;;  %s7571_s0 = inlined_call_operand.vmem [shape: f32[2,1,128], index: 0, kind: input, shape index: {}]   ;;  %s7572_s1 = inlined_call_operand.vmem [shape: f32[2,1,128], index: 1, kind: input, shape index: {}]   ;;  %s7573_s2 = inlined_call_operand.vmem [shape: bf16[2,256,128], index: 2, kind: input, shape index: {}]   ;;  %s7574_s3 = inlined_call_operand.vmem [shape: bf16[1152,128], index: 3, kind: input, shape index: {}]   ;;  %s7575_s4 = inlined_call_operand.vmem [shape: f32[256,8], index: 4, kind: input, shape index: {}]   ;;  %s7576_s5 = inlined_call_operand.vmem [shape: bf16[2,256,128], index: 5, kind: output, shape index: {0}]   ;;  %s7577_s6 = inlined_call_operand.vmem [shape: f32[2,2,128], index: 6, kind: output, shape index: {1}]  }
   0x1 LB: > { %s3872_s22 = sadd.s32 4294967295, %s4958_s21   ;;  %p3876_p0 = scmp.ge.s32.totalorder %s4958_s21, 1  ;;  %s4958_s21 = sphi %s5003_s21, %s17_s21  }
   0x2   : > { %p231_p1 = scmp.lt.s32.totalorder %s4958_s21, 3 }
   0x4   : > { %p232_p2 = pnand %p3876_p0, %p231_p1 }
   0x6   : > { %235 = sbr.rel (%p232_p2) target bundleno = 1027 (0x403), region = 40 }
   0xd   : > { %v5014_v0 = vld [vmem:[%s7575_s4 + $0x10] sm:$0xff]  ;;  %v5019_v1 = vld [vmem:[%s7575_s4] sm:$0xff]  ;;  %v4960_v2 = vmov 0   ;;  %v5026_v3 = vld [vmem:[%s7575_s4 + $0x18] sm:$0xff]  ;;  %p271_p3 = scmp.lt.s32.totalorder %s3872_s22, 1  ;;  %v546_v61 = vlaneseq  ;;  %vm3765_vm2 = vcmask 1040384  }
   0xe   : > { %4751 = vset.pattern.permute.xlu1 %v4960_v2  ;;  %4750 = vset.pattern.permute.xlu0 %v4960_v2  ;;  %v5031_v4 = vld [vmem:[%s7575_s4 + $0x8] sm:$0xff]  ;;  %v5043_v6 = vld [vmem:[%s7575_s4 + $0x20] sm:$0xff]  ;;  %v5050_v7 = vld [vmem:[%s7575_s4 + $0x38] sm:$0xff] }
   0xf   : > { %593 = vperm.xlu1 %4751, %v5014_v0   ;;  %583 = vperm.xlu0 %4750, %v5019_v1   ;;  %v5038_v5 = vld [vmem:[%s7575_s4 + $0x28] sm:$0xff]  ;;  %v5055_v8 = vld [vmem:[%s7575_s4 + $0x30] sm:$0xff]  ;;  %v5067_v10 = vld [vmem:[%s7575_s4 + $0x40] sm:$0xff]  ;;  %s8154_s22 = smov (!%p271_p3, %s3872_s22), 1 }
  0x10   : > { %v5060_v9 = vld [vmem:[%s7575_s4 + $0x48] sm:$0xff]  ;;  %v5074_v11 = vld [vmem:[%s7575_s4 + $0x58] sm:$0xff]  ;;  %v5079_v12 = vld [vmem:[%s7575_s4 + $0x50] sm:$0xff]  ;;  %s3990_s9 = sshll.u32 %s8154_s22, 7  ;;  %s5140_s23 = scalar_lea.vmem %s7571_s0, %s8154_s22 }
  0x11   : > { %v5088_v13 = vld [vmem:[%s7575_s4 + $0x68] sm:$0xff]  ;;  %v5093_v14 = vld [vmem:[%s7575_s4 + $0x60] sm:$0xff]  ;;  %v5098_v15 = vld [vmem:[%s7575_s4 + $0x78] sm:$0xff]  ;;  %s5129_s16 = scalar_lea.vmem %s7573_s2, %s3990_s9  ;;  %s5149_s26 = scalar_lea.vmem %s7572_s1, %s8154_s22 }
  0x12   : > { %v5109_v16 = vld [vmem:[%s7575_s4 + $0x70] sm:$0xff]  ;;  %v5117_v17 = vld [vmem:[%s7575_s4 + $0x88] sm:$0xff]  ;;  %v5122_v18 = vld [vmem:[%s7575_s4 + $0x80] sm:$0xff]  ;;  %s7493_s8 = scalar_lea.vmem %s7576_s5, %s3990_s9  ;;  %s3881_s9 = sshll.u32 %s8154_s22, 1 }
  0x13   : > { %598 = vperm.xlu1 %4751, %v5026_v3   ;;  %588 = vperm.xlu0 %4750, %v5031_v4   ;;  %v5134_v19 = vld [vmem:[%s7575_s4 + $0x98] sm:$0xff]  ;;  %v4175_v20 = vld [vmem:[%s5129_s16 + $0x40] sm:$0xff]   ;;  %v4176_v21 = vld [vmem:[%s5129_s16 + $0x48] sm:$0xff]   ;;  %s290_s12 = scalar_lea.vmem %s7577_s6, %s3881_s9 }
  0x14   : > { %v5155_v22 = vld [vmem:[%s7575_s4 + $0x90] sm:$0xff]  ;;  %v5158_v23 = vld [vmem:[%s5140_s23] ss:$0 sm:$0xff]  ;;  %v4058_v24 = vunpack.c.l.bf16 %v4175_v20  ;;  %v5163_v25 = vld [vmem:[%s7575_s4 + $0xa8] sm:$0xff]  ;;  %v4059_v29 = vunpack.c.h.bf16 %v4175_v20  ;;  %v4062_v30 = vunpack.c.l.bf16 %v4176_v21  ;;  %v4063_v33 = vunpack.c.h.bf16 %v4176_v21 }
  0x15   : > { %v5168_v26 = vld [vmem:[%s7575_s4 + $0xa0] sm:$0xff]  ;;  %v5174_v28 = vld [vmem:[%s5129_s16 + $0x70] sm:$0xff]   ;;  %v5206_v43 = vld [vmem:[%s7575_s4 + $0xb8] sm:$0xff] }
  0x16   : > { %v5171_v27 = vld [vmem:[%s5149_s26] ss:$0 sm:$0xff]  ;;  %v379_v31 = vmul.f32 %v4058_v24, %v5158_v23  ;;  %v5183_v34 = vld [vmem:[%s5129_s16 + $0x50] sm:$0xff]   ;;  %v380_v35 = vmul.f32 %v4059_v29, %v5158_v23  ;;  %v381_v37 = vmul.f32 %v4062_v30, %v5158_v23  ;;  %v382_v39 = vmul.f32 %v4063_v33, %v5158_v23  ;;  %v4821_v46 = vld [vmem:[%s7574_s3 + $0x48] sm:$0xff]  }
  0x17   : > { %608 = vperm.xlu1 %4751, %v5038_v5   ;;  %603 = vperm.xlu0 %4750, %v5043_v6   ;;  %v4819_v32 = vld [vmem:[%s7574_s3 + $0x40] sm:$0xff]   ;;  %v4066_v42 = vunpack.c.l.bf16 %v5183_v34  ;;  %v4083_v44 = vunpack.c.h.bf16 %v5174_v28  ;;  %v5218_v47 = vld [vmem:[%s7575_s4 + $0xb0] sm:$0xff]  ;;  %v4822_v48 = vld [vmem:[%s7574_s3 + $0x8] sm:$0xff]   ;;  %v4082_v62 = vunpack.c.l.bf16 %v5174_v28 }
  0x18   : > { %v4820_v36 = vld [vmem:[%s7574_s3] sm:$0xff]   ;;  %v5191_v38 = vadd.f32 %v5171_v27, %v379_v31  ;;  %4198 = vmatprep.subr.bf16.mxu0 %v4819_v32  ;;  %v5195_v40 = vadd.f32 %v5171_v27, %v380_v35  ;;  %v5198_v41 = vadd.f32 %v5171_v27, %v381_v37  ;;  %4718 = vmatprep.subr.bf16.mxu1 %v4819_v32  ;;  %v5227_v50 = vld [vmem:[%s7575_s4 + $0xc8] sm:$0xff]  ;;  %v4823_v54 = vld [vmem:[%s7574_s3 + $0x50] sm:$0xff]   ;;  %v5297_v31 = vshrl.u32 %v546_v61, 7 }
  0x19   : > { %4199 = vmatpush3.bf16.msra.mxu0 %v4820_v36  ;;  %v5210_v45 = vadd.f32 %v5171_v27, %v382_v39  ;;  %v383_v49 = vmul.f32 %v4066_v42, %v5158_v23  ;;  %4726 = vmatpush3.bf16.msra.mxu1 %v4820_v36  ;;  %v5237_v52 = vld [vmem:[%s7575_s4 + $0xc0] sm:$0xff]  ;;  %v392_v53 = vmul.f32 %v4083_v44, %v5158_v23  ;;  %v4824_v55 = vld [vmem:[%s7574_s3 + $0x10] sm:$0xff]   ;;  %v5249_v56 = vld [vmem:[%s7575_s4 + $0xd8] sm:$0xff] }
  0x1a   : > { %7765 = vst [vmem:[#allocation2_spill] sm:$0xff] %v5198_v41  ;;  %4200 = vmatprep.subr.bf16.mxu0 %v4821_v46  ;;  %4719 = vmatprep.subr.bf16.mxu1 %v4821_v46  ;;  %v5254_v57 = vld [vmem:[%s7575_s4 + $0xd0] sm:$0xff]  ;;  %v4825_v59 = vld [vmem:[%s7574_s3 + $0x58] sm:$0xff]   ;;  %v5271_v63 = vld [vmem:[%s7575_s4 + $0xe8] sm:$0xff]  ;;  %v391_v28 = vmul.f32 %v4082_v62, %v5158_v23  ;;  %vm548_vm0 = vcmp.lt.s32.totalorder %v5297_v31, 1  ;;  %vm997_vm1 = vcmp.lt.s32.totalorder %v5297_v31, 7 }
  0x1b   : > { %618 = vperm.xlu1 %4751, %v5050_v7   ;;  %613 = vperm.xlu0 %4750, %v5055_v8   ;;  %7766 = vst [vmem:[#allocation3_spill] sm:$0xff] %v5210_v45  ;;  %v5230_v51 = vadd.f32 %v5171_v27, %v383_v49  ;;  %v431_v58 = vadd.f32 %v5171_v27, %v392_v53  ;;  %v4826_v60 = vld [vmem:[%s7574_s3 + $0x18] sm:$0xff]   ;;  %v4827_v20 = vld [vmem:[%s7574_s3 + $0x60] sm:$0xff]   ;;  %v5295_v30 = vld [vmem:[%s7575_s4 + $0xf0] sm:$0xff] }
  0x1c   : > { %v5281_v21 = vld [vmem:[%s7575_s4 + $0xe0] sm:$0xff]  ;;  %v5290_v29 = vld [vmem:[%s7575_s4 + $0xf8] sm:$0xff]  ;;  %v430_v32 = vadd.f32 %v5171_v27, %v391_v28  ;;  %v4829_v35 = vld [vmem:[%s7574_s3 + $0x68] sm:$0xff]  }
  0x1d   : > { %4201 = vmatpush3.bf16.msra.mxu0 %v4822_v48  ;;  %7767 = vst [vmem:[#allocation4_spill] sm:$0xff] %v5230_v51  ;;  %4727 = vmatpush3.bf16.msra.mxu1 %v4822_v48  ;;  %v5273_v2 = vmax.f32 %v431_v58, 0.0  ;;  %v4828_v24 = vld [vmem:[%s7574_s3 + $0x20] sm:$0xff]   ;;  %v4830_v36 = vld [vmem:[%s7574_s3 + $0x28] sm:$0xff]   ;;  %v4831_v42 = vld [vmem:[%s7574_s3 + $0x70] sm:$0xff]   ;;  %v4961_v48 = vmov 1  }
  0x1e   : > { %4202 = vmatprep.subr.bf16.mxu0 %v4823_v54  ;;  %4720 = vmatprep.subr.bf16.mxu1 %v4823_v54  ;;  %v5309_v37 = vmax.f32 %v430_v32, 0.0  ;;  %v4832_v46 = vld [vmem:[%s7574_s3 + $0x30] sm:$0xff]   ;;  %v4833_v49 = vld [vmem:[%s7574_s3 + $0x78] sm:$0xff]   ;;  %v4962_v58 = vmov 2  }
  0x1f   : > { %628 = vperm.xlu1 %4751, %v5060_v9   ;;  %623 = vperm.xlu0 %4750, %v5067_v10   ;;  %7768 = vst [vmem:[#allocation5_spill] sm:$0xff] %v5273_v2  ;;  %v7579_v33 = vrot.slane %v5273_v2, 7  ;;  %v4834_v53 = vld [vmem:[%s7574_s3 + $0x38] sm:$0xff]  }
  0x20   : > { %7769 = vst [vmem:[#allocation6_spill] sm:$0xff] %v5309_v37  ;;  %v7578_v39 = vrot.slane %v5309_v37, 7 }
  0x21   : > { %4203 = vmatpush3.bf16.msra.mxu0 %v4824_v55  ;;  %4728 = vmatpush3.bf16.msra.mxu1 %v4824_v55 }
  0x22   : > { %4204 = vmatprep.subr.bf16.mxu0 %v4825_v59  ;;  %4721 = vmatprep.subr.bf16.mxu1 %v4825_v59  ;;  %v5324_v44 = vsel %vm548_vm0, %v7578_v39, %v7579_v33 }
  0x23   : > { %638 = vperm.xlu1 %4751, %v5074_v11   ;;  %633 = vperm.xlu0 %4750, %v5079_v12   ;;  %7770 = vst [vmem:[#allocation7_spill] sm:$0xff] %v5324_v44 }
  0x25   : > { %4205 = vmatpush3.bf16.msra.mxu0 %v4826_v60  ;;  %4729 = vmatpush3.bf16.msra.mxu1 %v4826_v60 }
  0x26   : > { %4206 = vmatprep.subr.bf16.mxu0 %v4827_v20  ;;  %4722 = vmatprep.subr.bf16.mxu1 %v4827_v20 }
  0x27   : > { %648 = vperm.xlu1 %4751, %v5088_v13   ;;  %643 = vperm.xlu0 %4750, %v5093_v14  }
  0x29   : > { %4207 = vmatpush3.bf16.msra.mxu0 %v4828_v24  ;;  %4730 = vmatpush3.bf16.msra.mxu1 %v4828_v24 }
  0x2a   : > { %4208 = vmatprep.subr.bf16.mxu0 %v4829_v35  ;;  %4723 = vmatprep.subr.bf16.mxu1 %v4829_v35 }
  0x2b   : > { %658 = vperm.xlu1 %4751, %v5098_v15   ;;  %653 = vperm.xlu0 %4750, %v5109_v16  }
  0x2d   : > { %4209 = vmatpush3.bf16.msra.mxu0 %v4830_v36  ;;  %4731 = vmatpush3.bf16.msra.mxu1 %v4830_v36 }
  0x2e   : > { %4210 = vmatprep.subr.bf16.mxu0 %v4831_v42  ;;  %4724 = vmatprep.subr.bf16.mxu1 %v4831_v42 }
  0x2f   : > { %668 = vperm.xlu1 %4751, %v5117_v17   ;;  %663 = vperm.xlu0 %4750, %v5122_v18  }
  0x31   : > { %4211 = vmatpush3.bf16.msra.mxu0 %v4832_v46  ;;  %4732 = vmatpush3.bf16.msra.mxu1 %v4832_v46 }
  0x32   : > { %4212 = vmatprep.subr.bf16.mxu0 %v4833_v49  ;;  %4725 = vmatprep.subr.bf16.mxu1 %v4833_v49 }
  0x33   : > { %678 = vperm.xlu1 %4751, %v5134_v19   ;;  %673 = vperm.xlu0 %4750, %v5155_v22  }
  0x35   : > { %4213 = vmatpush3.bf16.msra.mxu0 %v4834_v53  ;;  %4733 = vmatpush3.bf16.msra.mxu1 %v4834_v53 }
  0x37   : > { %688 = vperm.xlu1 %4751, %v5163_v25   ;;  %683 = vperm.xlu0 %4750, %v5168_v26  }
  0x3b   : > { %698 = vperm.xlu1 %4751, %v5206_v43   ;;  %693 = vperm.xlu0 %4750, %v5218_v47  }
  0x3f   : > { %708 = vperm.xlu1 %4751, %v5227_v50   ;;  %703 = vperm.xlu0 %4750, %v5237_v52  }
  0x43   : > { %718 = vperm.xlu1 %4751, %v5249_v56   ;;  %713 = vperm.xlu0 %4750, %v5254_v57  }
  0x47   : > { %728 = vperm.xlu1 %4751, %v5271_v63   ;;  %723 = vperm.xlu0 %4750, %v5281_v21  }
  0x4b   : > { %738 = vperm.xlu1 %4751, %v5290_v29   ;;  %733 = vperm.xlu0 %4750, %v5295_v30  }
  0x4f   : > { %4753 = vset.pattern.permute.xlu1 %v4961_v48  ;;  %4752 = vset.pattern.permute.xlu0 %v4961_v48 }
  0x50   : > { %794 = vperm.xlu1 %4753, %v5031_v4   ;;  %790 = vperm.xlu0 %4752, %v5019_v1  }
  0x54   : > { %798 = vperm.xlu1 %4753, %v5014_v0   ;;  %802 = vperm.xlu0 %4752, %v5026_v3  }
  0x58   : > { %806 = vperm.xlu1 %4753, %v5043_v6   ;;  %810 = vperm.xlu0 %4752, %v5038_v5  }
  0x5c   : > { %814 = vperm.xlu1 %4753, %v5055_v8   ;;  %818 = vperm.xlu0 %4752, %v5050_v7  }
  0x60   : > { %822 = vperm.xlu1 %4753, %v5067_v10   ;;  %826 = vperm.xlu0 %4752, %v5060_v9  }
  0x64   : > { %830 = vperm.xlu1 %4753, %v5079_v12   ;;  %834 = vperm.xlu0 %4752, %v5074_v11  }
  0x68   : > { %838 = vperm.xlu1 %4753, %v5093_v14   ;;  %842 = vperm.xlu0 %4752, %v5088_v13  }
  0x6c   : > { %846 = vperm.xlu1 %4753, %v5109_v16   ;;  %850 = vperm.xlu0 %4752, %v5098_v15  }
  0x70   : > { %854 = vperm.xlu1 %4753, %v5122_v18   ;;  %858 = vperm.xlu0 %4752, %v5117_v17  }
  0x74   : > { %862 = vperm.xlu1 %4753, %v5155_v22   ;;  %866 = vperm.xlu0 %4752, %v5134_v19  }
  0x78   : > { %870 = vperm.xlu1 %4753, %v5168_v26   ;;  %874 = vperm.xlu0 %4752, %v5163_v25  }
  0x7c   : > { %878 = vperm.xlu1 %4753, %v5218_v47   ;;  %882 = vperm.xlu0 %4752, %v5206_v43  }
  0x80   : > { %886 = vperm.xlu1 %4753, %v5237_v52   ;;  %890 = vperm.xlu0 %4752, %v5227_v50  }
  0x84   : > { %894 = vperm.xlu1 %4753, %v5254_v57   ;;  %898 = vperm.xlu0 %4752, %v5249_v56  }
  0x88   : > { %902 = vperm.xlu1 %4753, %v5281_v21   ;;  %906 = vperm.xlu0 %4752, %v5271_v63  }
  0x8c   : > { %910 = vperm.xlu1 %4753, %v5295_v30   ;;  %914 = vperm.xlu0 %4752, %v5290_v29  }
  0x8e   : > { %v5367_v54 = vpop.permute.xlu1 %593  ;;  %v5369_v55 = vpop.permute.xlu0 %583 }
  0x90   : > { %4754 = vset.pattern.permute.xlu1 %v4962_v58  ;;  %4755 = vset.pattern.permute.xlu0 %v4962_v58 }
  0x91   : > { %1031 = vperm.xlu1 %4754, %v5019_v1   ;;  %1035 = vperm.xlu0 %4755, %v5031_v4  }
  0x92   : > { %v5373_v59 = vpop.permute.xlu1 %598  ;;  %v5375_v60 = vpop.permute.xlu0 %588 }
  0x95   : > { %1039 = vperm.xlu1 %4754, %v5014_v0   ;;  %1047 = vperm.xlu0 %4755, %v5043_v6  }
  0x96   : > { %v5379_v61 = vpop.permute.xlu1 %608  ;;  %v5381_v62 = vpop.permute.xlu0 %603 }
  0x99   : > { %1043 = vperm.xlu1 %4754, %v5026_v3   ;;  %1055 = vperm.xlu0 %4755, %v5055_v8  }
  0x9a   : > { %v5385_v20 = vpop.permute.xlu1 %618  ;;  %v5387_v24 = vpop.permute.xlu0 %613 }
  0x9d   : > { %1051 = vperm.xlu1 %4754, %v5038_v5   ;;  %1063 = vperm.xlu0 %4755, %v5067_v10  }
  0x9e   : > { %v5391_v28 = vpop.permute.xlu1 %628  ;;  %v5393_v32 = vpop.permute.xlu0 %623 }
  0xa1   : > { %1059 = vperm.xlu1 %4754, %v5050_v7   ;;  %1071 = vperm.xlu0 %4755, %v5079_v12  }
  0xa2   : > { %v5397_v35 = vpop.permute.xlu1 %638  ;;  %v5399_v36 = vpop.permute.xlu0 %633 }
  0xa5   : > { %1067 = vperm.xlu1 %4754, %v5060_v9   ;;  %1079 = vperm.xlu0 %4755, %v5093_v14  }
  0xa6   : > { %v5403_v42 = vpop.permute.xlu1 %648  ;;  %v5405_v46 = vpop.permute.xlu0 %643 }
  0xa9   : > { %1075 = vperm.xlu1 %4754, %v5074_v11   ;;  %1087 = vperm.xlu0 %4755, %v5109_v16   ;;  %v4182_v16 = vld [vmem:[%s5129_s16 + $0x78] sm:$0xff]  }
  0xaa   : > { %v5409_v48 = vpop.permute.xlu1 %658  ;;  %v5411_v12 = vpop.permute.xlu0 %653  ;;  %v4086_v39 = vunpack.c.l.bf16 %v4182_v16  ;;  %v4087_v51 = vunpack.c.h.bf16 %v4182_v16  ;;  %v4025_v16 = vld [vmem:[%s5129_s16] sm:$0xff]  }
  0xad   : > { %1083 = vperm.xlu1 %4754, %v5088_v13   ;;  %1095 = vperm.xlu0 %4755, %v5122_v18  }
  0xae   : > { %v5415_v49 = vpop.permute.xlu1 %668  ;;  %v5417_v53 = vpop.permute.xlu0 %663 }
  0xaf   : > { %7771 = vst [vmem:[#allocation8_spill] sm:$0xff] %v5415_v49  ;;  %7772 = vst [vmem:[#allocation9_spill] sm:$0xff] %v5417_v53 }
  0xb1   : > { %1091 = vperm.xlu1 %4754, %v5098_v15   ;;  %1103 = vperm.xlu0 %4755, %v5155_v22   ;;  %v393_v22 = vmul.f32 %v4086_v39, %v5158_v23 }
  0xb2   : > { %v5421_v14 = vpop.permute.xlu1 %678  ;;  %v5423_v58 = vpop.permute.xlu0 %673 }
  0xb3   : > { %7773 = vst [vmem:[#allocation10_spill] sm:$0xff] %v5421_v14  ;;  %7774 = vst [vmem:[#allocation11_spill] sm:$0xff] %v5423_v58  ;;  %v4168_v14 = vld [vmem:[%s5129_s16 + $0x8] sm:$0xff]  }
  0xb4   : > { %v4030_v45 = vunpack.c.l.bf16 %v4168_v14  ;;  %v4031_v41 = vunpack.c.h.bf16 %v4168_v14 }
  0xb5   : > { %1099 = vperm.xlu1 %4754, %v5117_v17   ;;  %1111 = vperm.xlu0 %4755, %v5168_v26   ;;  %v4835_v26 = vld [vmem:[%s7574_s3 + $0xc0] sm:$0xff]  }
  0xb6   : > { %v5428_v33 = vpop.permute.xlu1 %688  ;;  %v5430_v18 = vpop.permute.xlu0 %683  ;;  %4310 = vmatprep.subr.bf16.mxu1 %v4835_v26 }
  0xb7   : > { %7775 = vst [vmem:[#allocation12_spill] sm:$0xff] %v5428_v33  ;;  %7776 = vst [vmem:[#allocation13_spill] sm:$0xff] %v5430_v18  ;;  %v394_v33 = vmul.f32 %v4087_v51, %v5158_v23  ;;  %v4026_v51 = vunpack.c.l.bf16 %v4025_v16 }
  0xb9   : > { %1107 = vperm.xlu1 %4754, %v5134_v19   ;;  %1119 = vperm.xlu0 %4755, %v5218_v47   ;;  %v432_v19 = vadd.f32 %v5171_v27, %v393_v22 }
  0xba   : > { %v5435_v44 = vpop.permute.xlu1 %698  ;;  %v5437_v58 = vpop.permute.xlu0 %693 }
  0xbb   : > { %7777 = vst [vmem:[#allocation14_spill] sm:$0xff] %v5435_v44  ;;  %7778 = vst [vmem:[#allocation15_spill] sm:$0xff] %v5437_v58  ;;  %v433_v58 = vadd.f32 %v5171_v27, %v394_v33  ;;  %v4027_v44 = vunpack.c.h.bf16 %v4025_v16  ;;  %v5454_v26 = vmax.f32 %v432_v19, 0.0  ;;  %v363_v33 = vmul.f32 %v4026_v51, %v5158_v23 }
  0xbd   : > { %1115 = vperm.xlu1 %4754, %v5163_v25   ;;  %1127 = vperm.xlu0 %4755, %v5237_v52   ;;  %7779 = vst [vmem:[#allocation16_spill] sm:$0xff] %v5454_v26  ;;  %v5460_v22 = vmax.f32 %v433_v58, 0.0  ;;  %v364_v18 = vmul.f32 %v4027_v44, %v5158_v23 }
  0xbe   : > { %v5446_v47 = vpop.permute.xlu1 %708  ;;  %v5448_v39 = vpop.permute.xlu0 %703 }
  0xbf   : > { %7780 = vst [vmem:[#allocation17_spill] sm:$0xff] %v5460_v22  ;;  %v545_v58 = vrot.slane %v5460_v22, 7  ;;  %v403_v44 = vadd.f32 %v5171_v27, %v364_v18  ;;  %v4169_v18 = vld [vmem:[%s5129_s16 + $0x10] sm:$0xff]  }
  0xc0   : > { %v4035_v53 = vunpack.c.h.bf16 %v4169_v18 }
  0xc1   : > { %1123 = vperm.xlu1 %4754, %v5206_v43   ;;  %1135 = vperm.xlu0 %4755, %v5254_v57   ;;  %v544_v57 = vrot.slane %v5454_v26, 7 }
  0xc2   : > { %v5456_v25 = vpop.permute.xlu1 %718  ;;  %v5458_v52 = vpop.permute.xlu0 %713 }
  0xc3   : > { %v5485_v37 = vsel %vm548_vm0, %v544_v57, %v545_v58 }
  0xc4   : > { %7785 = vst [vmem:[#allocation21_spill] sm:$0xff] %v5485_v37 }
  0xc5   : > { %1131 = vperm.xlu1 %4754, %v5227_v50   ;;  %1143 = vperm.xlu0 %4755, %v5281_v21   ;;  %v402_v50 = vadd.f32 %v5171_v27, %v363_v33  ;;  %v7783_v21 = vrot.slane %v5273_v2, 7  ;;  %v5494_v33 = vmax.f32 %v403_v44, 0.0 }
  0xc6   : > { %v5468_v19 = vpop.permute.xlu1 %728  ;;  %v5470_v16 = vpop.permute.xlu0 %723 }
  0xc7   : > { %7781 = vst [vmem:[#allocation18_spill] sm:$0xff] %v5468_v19  ;;  %7782 = vst [vmem:[#allocation19_spill] sm:$0xff] %v5470_v16  ;;  %v5481_v51 = vsel %vm548_vm0, %v7783_v21, %v544_v57  ;;  %v742_v21 = vmul.f32 %v5375_v60, %v5485_v37  ;;  %v4963_v57 = vmov 3   ;;  %v7589_v60 = vrot.slane %v5273_v2, 1 }
  0xc8   : > { %7784 = vst [vmem:[#allocation20_spill] sm:$0xff] %v5481_v51  ;;  %7788 = vst [vmem:[#allocation24_spill] sm:$0xff] %v5494_v33  ;;  %v741_v19 = vmul.f32 %v5369_v55, %v5481_v51  ;;  %v7590_v55 = vrot.slane %v5454_v26, 1  ;;  %v515_v51 = vrot.slane %v5494_v33, 7 }
  0xc9   : > { %1139 = vperm.xlu1 %4754, %v5249_v56   ;;  %1151 = vperm.xlu0 %4755, %v5295_v30   ;;  %v365_v56 = vmul.f32 %v4030_v45, %v5158_v23  ;;  %v366_v30 = vmul.f32 %v4031_v41, %v5158_v23 }
  0xca   : > { %v5487_v14 = vpop.permute.xlu1 %738  ;;  %v5489_v16 = vpop.permute.xlu0 %733 }
  0xcb   : > { %7786 = vst [vmem:[#allocation22_spill] sm:$0xff] %v5487_v14  ;;  %7787 = vst [vmem:[#allocation23_spill] sm:$0xff] %v5489_v16  ;;  %v5501_v14 = vmax.f32 %v402_v50, 0.0  ;;  %v4034_v16 = vunpack.c.l.bf16 %v4169_v18  ;;  %v404_v41 = vadd.f32 %v5171_v27, %v365_v56  ;;  %v405_v45 = vadd.f32 %v5171_v27, %v366_v30 }
  0xcc   : > { %v773_v18 = vpack.c.bf16 %v742_v21, %v741_v19 }
  0xcd   : > { %1147 = vperm.xlu1 %4754, %v5271_v63   ;;  %4756 = vset.pattern.permute.xlu0 %v4963_v57  ;;  %7789 = vst [vmem:[#allocation25_spill] sm:$0xff] %v5501_v14  ;;  %v514_v56 = vrot.slane %v5501_v14, 7  ;;  %v367_v19 = vmul.f32 %v4034_v16, %v5158_v23 }
  0xce   : > { %1207 = vperm.xlu0 %4756, %v5019_v1   ;;  %v5519_v1 = vsel %vm997_vm1, %v7589_v60, %v7590_v55  ;;  %v368_v60 = vmul.f32 %v4035_v53, %v5158_v23 }
  0xcf   : > { %v795_v44 = vpop.permute.xlu1 %794  ;;  %v791_v49 = vpop.permute.xlu0 %790  ;;  %7790 = vst [vmem:[#allocation26_spill] sm:$0xff] %v5519_v1 }
  0xd0   : > { %v918_v37 = vmul.f32 %v795_v44, %v5460_v22  ;;  %v917_v50 = vmul.f32 %v791_v49, %v5454_v26  ;;  %v5523_v49 = vmax.f32 %v404_v41, 0.0  ;;  %v5525_v44 = vmax.f32 %v405_v45, 0.0 }
  0xd1   : > { %1155 = vperm.xlu1 %4754, %v5290_v29   ;;  %v5530_v26 = vsel %vm548_vm0, %v514_v56, %v515_v51  ;;  %v406_v45 = vadd.f32 %v5171_v27, %v367_v19 }
  0xd2   : > { %1219 = vperm.xlu0 %4756, %v5026_v3   ;;  %v949_v30 = vpack.c.bf16 %v918_v37, %v917_v50  ;;  %7791 = vst [vmem:[#allocation27_spill] sm:$0xff] %v5523_v49  ;;  %7792 = vst [vmem:[#allocation28_spill] sm:$0xff] %v5525_v44  ;;  %v4170_v3 = vld [vmem:[%s5129_s16 + $0x18] sm:$0xff]   ;;  %v5538_v37 = vsel %vm548_vm0, %v545_v58, %v514_v56  ;;  %v744_v53 = vmul.f32 %v5373_v59, %v5530_v26 }
  0xd3   : > { %v799_v29 = vpop.permute.xlu1 %798  ;;  %v803_v21 = vpop.permute.xlu0 %802  ;;  %7793 = vst [vmem:[#allocation29_spill] sm:$0xff] %v5530_v26  ;;  %7794 = vst [vmem:[#allocation30_spill] sm:$0xff] %v5538_v37  ;;  %v516_v41 = vrot.slane %v5523_v49, 7  ;;  %v4038_v58 = vunpack.c.l.bf16 %v4170_v3  ;;  %v4039_v56 = vunpack.c.h.bf16 %v4170_v3 }
  0xd4   : > { %v919_v55 = vmul.f32 %v799_v29, %v5501_v14  ;;  %v920_v1 = vmul.f32 %v803_v21, %v5494_v33  ;;  %2694 = vmatprep.mubr.bf16.mxu0 %v949_v30 }
  0xd5   : > { %4757 = vset.pattern.permute.xlu1 %v4963_v57  ;;  %2695 = vmatmul.mubr.bf16.vlgmr.msra.gmra.mrb[0].mxu0 %v773_v18  ;;  %v517_v57 = vrot.slane %v5525_v44, 7  ;;  %v407_v18 = vadd.f32 %v5171_v27, %v368_v60  ;;  %v5558_v60 = vmax.f32 %v406_v45, 0.0  ;;  %v369_v3 = vmul.f32 %v4038_v58, %v5158_v23 }
  0xd6   : > { %v950_v16 = vpack.c.bf16 %v920_v1, %v919_v55  ;;  %1211 = vperm.xlu1 %4757, %v5031_v4   ;;  %1227 = vperm.xlu0 %4756, %v5038_v5   ;;  %v743_v4 = vmul.f32 %v5367_v54, %v5538_v37  ;;  %v5556_v1 = vsel %vm548_vm0, %v515_v51, %v516_v41 }
  0xd7   : > { %v807_v50 = vpop.permute.xlu1 %806  ;;  %v811_v30 = vpop.permute.xlu0 %810  ;;  %7795 = vst [vmem:[#allocation31_spill] sm:$0xff] %v5556_v1  ;;  %7796 = vst [vmem:[#allocation32_spill] sm:$0xff] %v5558_v60  ;;  %v5562_v54 = vsel %vm548_vm0, %v516_v41, %v517_v57  ;;  %v5564_v21 = vmax.f32 %v407_v18, 0.0  ;;  %v518_v18 = vrot.slane %v5558_v60, 7 }
  0xd8   : > { %2702 = vmatprep.mubr.bf16.mxu0 %v950_v16  ;;  %v921_v5 = vmul.f32 %v807_v50, %v5523_v49  ;;  %v922_v59 = vmul.f32 %v811_v30, %v5525_v44  ;;  %v774_v55 = vpack.c.bf16 %v744_v53, %v743_v4  ;;  %7797 = vst [vmem:[#allocation33_spill] sm:$0xff] %v5562_v54  ;;  %v4172_v4 = vld [vmem:[%s5129_s16 + $0x28] sm:$0xff]  }
  0xd9   : > { %7798 = vst [vmem:[#allocation34_spill] sm:$0xff] %v5564_v21  ;;  %v746_v51 = vmul.f32 %v5379_v61, %v5562_v54  ;;  %v745_v53 = vmul.f32 %v5381_v62, %v5556_v1  ;;  %v519_v58 = vrot.slane %v5564_v21, 7 }
  0xda   : > { %1215 = vperm.xlu1 %4757, %v5014_v0   ;;  %1235 = vperm.xlu0 %4756, %v5050_v7   ;;  %v370_v0 = vmul.f32 %v4039_v56, %v5158_v23  ;;  %v4171_v7 = vld [vmem:[%s5129_s16 + $0x20] sm:$0xff]   ;;  %v951_v16 = vpack.c.bf16 %v922_v59, %v921_v5  ;;  %v408_v56 = vadd.f32 %v5171_v27, %v369_v3 }
  0xdb   : > { %v815_v19 = vpop.permute.xlu1 %814  ;;  %v819_v29 = vpop.permute.xlu0 %818  ;;  %v4042_v41 = vunpack.c.l.bf16 %v4171_v7  ;;  %v4043_v45 = vunpack.c.h.bf16 %v4171_v7  ;;  %v775_v62 = vpack.c.bf16 %v746_v51, %v745_v53  ;;  %v4178_v7 = vld [vmem:[%s5129_s16 + $0x58] sm:$0xff]   ;;  %v4047_v51 = vunpack.c.h.bf16 %v4172_v4 }
  0xdc   : > { %v924_v61 = vmul.f32 %v819_v29, %v5564_v21  ;;  %v5596_v29 = vsel %vm548_vm0, %v517_v57, %v518_v18 }
  0xdd   : > { %2703 = vmatmul.mubr.bf16.gmra.mrb[4].mxu0 %v774_v55  ;;  %v371_v5 = vmul.f32 %v4042_v41, %v5158_v23  ;;  %v372_v59 = vmul.f32 %v4043_v45, %v5158_v23  ;;  %7800 = vst [vmem:[#allocation36_spill] sm:$0xff] %v5596_v29  ;;  %v747_v57 = vmul.f32 %v5387_v24, %v5596_v29 }
  0xde   : > { %1223 = vperm.xlu1 %4757, %v5043_v6   ;;  %1243 = vperm.xlu0 %4756, %v5060_v9   ;;  %v409_v6 = vadd.f32 %v5171_v27, %v370_v0  ;;  %v923_v9 = vmul.f32 %v815_v19, %v5558_v60  ;;  %v5592_v19 = vsel %vm548_vm0, %v518_v18, %v519_v58  ;;  %v4046_v0 = vunpack.c.l.bf16 %v4172_v4  ;;  %v4173_v18 = vld [vmem:[%s5129_s16 + $0x30] sm:$0xff]  }
  0xdf   : > { %2710 = vmatprep.mubr.bf16.mxu0 %v951_v16  ;;  %v823_v50 = vpop.permute.xlu1 %822  ;;  %v827_v30 = vpop.permute.xlu0 %826  ;;  %7799 = vst [vmem:[#allocation35_spill] sm:$0xff] %v5592_v19  ;;  %v748_v53 = vmul.f32 %v5385_v20, %v5592_v19  ;;  %v410_v41 = vadd.f32 %v5171_v27, %v371_v5  ;;  %v411_v45 = vadd.f32 %v5171_v27, %v372_v59  ;;  %v4050_v5 = vunpack.c.l.bf16 %v4173_v18 }
  0xe0   : > { %v952_v16 = vpack.c.bf16 %v924_v61, %v923_v9  ;;  %v4070_v9 = vunpack.c.l.bf16 %v4178_v7  ;;  %v4071_v61 = vunpack.c.h.bf16 %v4178_v7  ;;  %v373_v20 = vmul.f32 %v4046_v0, %v5158_v23 }
  0xe1   : > { %v4067_v59 = vunpack.c.h.bf16 %v5183_v34  ;;  %v776_v0 = vpack.c.bf16 %v748_v53, %v747_v57  ;;  %v5630_v7 = vmax.f32 %v410_v41, 0.0  ;;  %v4179_v57 = vld [vmem:[%s5129_s16 + $0x60] sm:$0xff]   ;;  %v4051_v21 = vunpack.c.h.bf16 %v4173_v18 }
  0xe2   : > { %1231 = vperm.xlu1 %4757, %v5055_v8   ;;  %1251 = vperm.xlu0 %4756, %v5074_v11   ;;  %v5598_v8 = vmax.f32 %v408_v56, 0.0  ;;  %v5600_v11 = vmax.f32 %v409_v6, 0.0  ;;  %v412_v53 = vadd.f32 %v5171_v27, %v373_v20  ;;  %v375_v29 = vmul.f32 %v4050_v5, %v5158_v23 }
  0xe3   : > { %v5586_v55 = vpop.permute.xlu1 %830  ;;  %v5588_v3 = vpop.permute.xlu0 %834  ;;  %7803 = vst [vmem:[#allocation39_spill] sm:$0xff] %v5630_v7  ;;  %v384_v19 = vmul.f32 %v4067_v59, %v5158_v23  ;;  %v4075_v5 = vunpack.c.h.bf16 %v4179_v57 }
  0xe4   : > { %7801 = vst [vmem:[#allocation37_spill] sm:$0xff] %v5598_v8  ;;  %7802 = vst [vmem:[#allocation38_spill] sm:$0xff] %v5600_v11  ;;  %v925_v24 = vmul.f32 %v823_v50, %v5598_v8  ;;  %v926_v4 = vmul.f32 %v827_v30, %v5600_v11  ;;  %v5632_v50 = vmax.f32 %v411_v45, 0.0 }
  0xe5   : > { %2711 = vmatmul.mubr.bf16.gmra.mrb[8].mxu0 %v775_v62  ;;  %v374_v62 = vmul.f32 %v4047_v51, %v5158_v23 }
  0xe6   : > { %1239 = vperm.xlu1 %4757, %v5067_v10   ;;  %1259 = vperm.xlu0 %4756, %v5088_v13   ;;  %v520_v10 = vrot.slane %v5598_v8, 7  ;;  %v521_v13 = vrot.slane %v5600_v11, 7  ;;  %v385_v8 = vmul.f32 %v4070_v9, %v5158_v23  ;;  %v953_v41 = vpack.c.bf16 %v926_v4, %v925_v24 }
  0xe7   : > { %2718 = vmatprep.mubr.bf16.mxu0 %v952_v16  ;;  %v5612_v56 = vpop.permute.xlu1 %838  ;;  %v5614_v6 = vpop.permute.xlu0 %842  ;;  %v5626_v16 = vld [vmem:[%s7575_s4 + $0x50] sm:$0xff]  ;;  %v413_v45 = vadd.f32 %v5171_v27, %v374_v62  ;;  %v522_v9 = vrot.slane %v5630_v7, 7  ;;  %v4074_v62 = vunpack.c.l.bf16 %v4179_v57  ;;  %v928_v59 = vmul.f32 %v5588_v3, %v5632_v50 }
  0xe8   : > { %v5640_v34 = vsel %vm548_vm0, %v520_v10, %v521_v13  ;;  %v5644_v11 = vsel %vm548_vm0, %v519_v58, %v520_v10  ;;  %v5656_v58 = vld [vmem:[%s7575_s4 + $0x60] sm:$0xff]  ;;  %v424_v4 = vadd.f32 %v5171_v27, %v385_v8  ;;  %v423_v8 = vadd.f32 %v5171_v27, %v384_v19 }
  0xe9   : > { %7804 = vst [vmem:[#allocation40_spill] sm:$0xff] %v5640_v34  ;;  %7805 = vst [vmem:[#allocation41_spill] sm:$0xff] %v5644_v11  ;;  %v750_v10 = vmul.f32 %v5391_v28, %v5640_v34  ;;  %v749_v18 = vmul.f32 %v5393_v32, %v5644_v11  ;;  %v5672_v28 = vmax.f32 %v412_v53, 0.0  ;;  %v927_v32 = vmul.f32 %v5586_v55, %v5630_v7  ;;  %v5692_v55 = vld [vmem:[%s7575_s4 + $0x98] sm:$0xff] }
  0xea   : > { %1247 = vperm.xlu1 %4757, %v5626_v16   ;;  %1267 = vperm.xlu0 %4756, %v5098_v15   ;;  %v386_v15 = vmul.f32 %v4071_v61, %v5158_v23  ;;  %v4174_v61 = vld [vmem:[%s5129_s16 + $0x38] sm:$0xff]   ;;  %v5703_v53 = vsel %vm548_vm0, %v521_v13, %v522_v9  ;;  %v414_v57 = vadd.f32 %v5171_v27, %v375_v29  ;;  %v5711_v34 = vmax.f32 %v424_v4, 0.0 }
  0xeb   : > { %v5634_v30 = vpop.permute.xlu1 %846  ;;  %v5636_v51 = vpop.permute.xlu0 %850  ;;  %7806 = vst [vmem:[#allocation42_spill] sm:$0xff] %v5672_v28  ;;  %v777_v3 = vpack.c.bf16 %v750_v10, %v749_v18  ;;  %7810 = vst [vmem:[#allocation45_spill] sm:$0xff] %v5703_v53  ;;  %v387_v18 = vmul.f32 %v4074_v62, %v5158_v23  ;;  %v524_v60 = vrot.slane %v5672_v28, 7  ;;  %v4054_v44 = vunpack.c.l.bf16 %v4174_v61 }
  0xec   : > { %7811 = vst [vmem:[#allocation46_spill] sm:$0xff] %v5711_v34  ;;  %v4055_v13 = vunpack.c.h.bf16 %v4174_v61  ;;  %v5719_v1 = vmax.f32 %v423_v8, 0.0  ;;  %v751_v61 = vmul.f32 %v5399_v36, %v5703_v53  ;;  %v929_v36 = vmul.f32 %v5612_v56, %v5672_v28 }
  0xed   : > { %2719 = vmatmul.mubr.bf16.gmra.mrb[12].mxu0 %v776_v0  ;;  %v5678_v0 = vmax.f32 %v413_v45, 0.0  ;;  %v4180_v45 = vld [vmem:[%s5129_s16 + $0x68] sm:$0xff]  }
  0xee   : > { %1255 = vperm.xlu1 %4757, %v5656_v58   ;;  %1275 = vperm.xlu0 %4756, %v5117_v17   ;;  %v425_v17 = vadd.f32 %v5171_v27, %v386_v15  ;;  %v5686_v15 = vld [vmem:[%s7575_s4 + $0x70] sm:$0xff]  ;;  %7813 = vst [vmem:[#allocation48_spill] sm:$0xff] %v5719_v1  ;;  %v4078_v54 = vunpack.c.l.bf16 %v4180_v45  ;;  %v4079_v4 = vunpack.c.h.bf16 %v4180_v45  ;;  %v7632_v53 = vrot.slane %v5719_v1, 7 }
  0xef   : > { %2726 = vmatprep.mubr.bf16.mxu0 %v953_v41  ;;  %v5666_v20 = vpop.permute.xlu1 %854  ;;  %v5668_v24 = vpop.permute.xlu0 %858  ;;  %7807 = vst [vmem:[#allocation43_spill] sm:$0xff] %v5678_v0  ;;  %v376_v41 = vmul.f32 %v4051_v21, %v5158_v23  ;;  %v7808_v21 = vrot.slane %v5632_v50, 7  ;;  %v525_v62 = vrot.slane %v5678_v0, 7 }
  0xf0   : > { %v5713_v10 = vmax.f32 %v425_v17, 0.0  ;;  %v5724_v17 = vld [vmem:[%s7575_s4 + $0x80] sm:$0xff] }
  0xf1   : > { %v5699_v19 = vsel %vm548_vm0, %v522_v9, %v7808_v21  ;;  %v388_v21 = vmul.f32 %v4075_v5, %v5158_v23  ;;  %v954_v9 = vpack.c.bf16 %v928_v59, %v927_v32  ;;  %v415_v29 = vadd.f32 %v5171_v27, %v376_v41  ;;  %v5730_v23 = vld [vmem:[%s7575_s4 + $0xa8] sm:$0xff] }
  0xf2   : > { %1263 = vperm.xlu1 %4757, %v5686_v15   ;;  %1283 = vperm.xlu0 %4756, %v5692_v55   ;;  %7809 = vst [vmem:[#allocation44_spill] sm:$0xff] %v5699_v19  ;;  %7812 = vst [vmem:[#allocation47_spill] sm:$0xff] %v5713_v10  ;;  %v752_v27 = vmul.f32 %v5397_v35, %v5699_v19  ;;  %v5738_v5 = vmax.f32 %v414_v57, 0.0  ;;  %v536_v41 = vrot.slane %v5711_v34, 7  ;;  %v7629_v8 = vrot.slane %v5713_v10, 7 }
  0xf3   : > { %v5707_v7 = vpop.permute.xlu1 %862  ;;  %v5709_v11 = vpop.permute.xlu0 %866  ;;  %7814 = vst [vmem:[#allocation49_spill] sm:$0xff] %v5730_v23  ;;  %v4898_v35 = vld [vmem:[%s5140_s23] ss:$0 sm:$0xff]  ;;  %v930_v57 = vmul.f32 %v5614_v6, %v5678_v0  ;;  %v5764_v56 = vsel %vm548_vm0, %v524_v60, %v525_v62  ;;  %v7817_v6 = vrot.slane %v5632_v50, 7 }
  0xf4   : > { %v377_v19 = vmul.f32 %v4898_v35, %v4054_v44  ;;  %v378_v33 = vmul.f32 %v4898_v35, %v4055_v13  ;;  %v389_v26 = vmul.f32 %v4898_v35, %v4078_v54  ;;  %v390_v49 = vmul.f32 %v4898_v35, %v4079_v4  ;;  %7816 = vst [vmem:[#allocation51_spill] sm:$0xff] %v5764_v56 }
  0xf5   : > { %2727 = vmatmul.mubr.bf16.gmra.mrb[16].mxu0 %v777_v3  ;;  %v4897_v3 = vld [vmem:[%s5149_s26] ss:$0 sm:$0xff]  ;;  %v778_v44 = vpack.c.bf16 %v752_v27, %v751_v61  ;;  %v5770_v54 = vsel %vm548_vm0, %v7817_v6, %v524_v60  ;;  %v5789_v60 = vsel %vm548_vm0, %v7632_v53, %v536_v41  ;;  %v526_v35 = vrot.slane %v5738_v5, 7 }
  0xf6   : > { %1271 = vperm.xlu1 %4757, %v5724_v17   ;;  %1291 = vperm.xlu0 %4756, %v5730_v23   ;;  %v426_v45 = vadd.f32 %v4897_v3, %v387_v18  ;;  %v427_v23 = vadd.f32 %v4897_v3, %v388_v21  ;;  %v5758_v18 = vld [vmem:[%s7575_s4 + $0x90] sm:$0xff]  ;;  %7818 = vst [vmem:[#allocation52_spill] sm:$0xff] %v5770_v54  ;;  %7820 = vst [vmem:[#allocation54_spill] sm:$0xff] %v5789_v60  ;;  %v4852_v61 = vld [vmem:[%s7574_s3 + $0x100] sm:$0xff]  }
  0xf7   : > { %2734 = vmatprep.mubr.bf16.mxu0 %v954_v9  ;;  %v5740_v32 = vpop.permute.xlu1 %870  ;;  %v5742_v59 = vpop.permute.xlu0 %874  ;;  %v5752_v9 = vmax.f32 %v415_v29, 0.0  ;;  %v4851_v29 = vld [vmem:[%s7574_s3 + $0x140] sm:$0xff]   ;;  %v416_v6 = vadd.f32 %v4897_v3, %v377_v19  ;;  %v417_v0 = vadd.f32 %v4897_v3, %v378_v33  ;;  %v754_v28 = vmul.f32 %v5403_v42, %v5764_v56  ;;  %v5811_v33 = vld [vmem:[%s7575_s4 + $0xc8] sm:$0xff] }
  0xf8   : > { %v5791_v4 = vmax.f32 %v426_v45, 0.0  ;;  %v5793_v27 = vmax.f32 %v427_v23, 0.0  ;;  %4422 = vmatprep.subr.bf16.mxu0 %v4851_v29  ;;  %v428_v45 = vadd.f32 %v4897_v3, %v389_v26  ;;  %v429_v53 = vadd.f32 %v4897_v3, %v390_v49  ;;  %v5805_v23 = vld [vmem:[%s7575_s4 + $0xa0] sm:$0xff]  ;;  %7823 = vst [vmem:[#allocation57_spill] sm:$0xff] %v5811_v33 }
  0xf9   : > { %7815 = vst [vmem:[#allocation50_spill] sm:$0xff] %v5752_v9  ;;  %v753_v42 = vmul.f32 %v5405_v46, %v5770_v54  ;;  %v765_v49 = vmul.f32 %v5448_v39, %v5789_v60  ;;  %4423 = vmatpush3.bf16.msra.mxu0 %v4852_v61  ;;  %v5832_v39 = vsel %vm548_vm0, %v525_v62, %v526_v35  ;;  %v5851_v62 = vld [vmem:[%s7575_s4 + $0xb0] sm:$0xff] }
  0xfa   : > { %1279 = vperm.xlu1 %4757, %v5758_v18   ;;  %1299 = vperm.xlu0 %4756, %v5206_v43   ;;  %v5783_v43 = vsel %vm548_vm0, %v536_v41, %v7629_v8  ;;  %7821 = vst [vmem:[#allocation55_spill] sm:$0xff] %v5791_v4  ;;  %7822 = vst [vmem:[#allocation56_spill] sm:$0xff] %v5793_v27  ;;  %v955_v8 = vpack.c.bf16 %v930_v57, %v929_v36  ;;  %v7633_v41 = vrot.slane %v5752_v9, 7  ;;  %v4853_v36 = vld [vmem:[%s7574_s3 + $0x148] sm:$0xff]  }
  0xfb   : > { %v5772_v21 = vpop.permute.xlu1 %878  ;;  %v5774_v13 = vpop.permute.xlu0 %882  ;;  %7819 = vst [vmem:[#allocation53_spill] sm:$0xff] %v5783_v43  ;;  %v766_v26 = vmul.f32 %v5446_v47, %v5783_v43  ;;  %v538_v57 = vrot.slane %v5791_v4, 7  ;;  %v4854_v47 = vld [vmem:[%s7574_s3 + $0x108] sm:$0xff]   ;;  %7824 = vst [vmem:[#allocation58_spill] sm:$0xff] %v5832_v39  ;;  %v932_v61 = vmul.f32 %v5636_v51, %v5752_v9  ;;  %4424 = vmatprep.subr.bf16.mxu0 %v4853_v36  ;;  %v5860_v36 = vmax.f32 %v428_v45, 0.0  ;;  %v4836_v43 = vld [vmem:[%s7574_s3 + $0x80] sm:$0xff]  }
  0xfd   : > { %2735 = vmatmul.mubr.bf16.gmra.mrb[20].mxu0 %v778_v44  ;;  %v5846_v44 = vmax.f32 %v417_v0, 0.0  ;;  %7829 = vst [vmem:[#allocation63_spill] sm:$0xff] %v5860_v36  ;;  %v5862_v0 = vmax.f32 %v429_v53, 0.0 }
  0xfe   : > { %1287 = vperm.xlu1 %4757, %v5805_v23   ;;  %1307 = vperm.xlu0 %4756, %v5811_v33  }
  0xff   : > { %2742 = vmatprep.mubr.bf16.mxu0 %v955_v8  ;;  %v887_v19 = vpop.permute.xlu1 %886  ;;  %v891_v3 = vpop.permute.xlu0 %890  ;;  %v931_v8 = vmul.f32 %v5634_v30, %v5738_v5  ;;  %7827 = vst [vmem:[#allocation61_spill] sm:$0xff] %v5846_v44  ;;  %v5857_v30 = vld [vmem:[%s7575_s4 + $0xd8] sm:$0xff]  ;;  %7830 = vst [vmem:[#allocation64_spill] sm:$0xff] %v5862_v0  ;;  %4425 = vmatpush3.bf16.msra.mxu0 %v4854_v47 }
 0x100   : > { %v941_v46 = vmul.f32 %v887_v19, %v5711_v34  ;;  %v942_v29 = vmul.f32 %v891_v3, %v5713_v10  ;;  %v5842_v19 = vsel %vm548_vm0, %v526_v35, %v7633_v41  ;;  %v5844_v3 = vmax.f32 %v416_v6, 0.0  ;;  %7828 = vst [vmem:[#allocation62_spill] sm:$0xff] %v5857_v30 }
 0x101   : > { %7825 = vst [vmem:[#allocation59_spill] sm:$0xff] %v5842_v19  ;;  %v779_v35 = vpack.c.bf16 %v754_v28, %v753_v42  ;;  %v785_v6 = vpack.c.bf16 %v766_v26, %v765_v49  ;;  %v7831_v34 = vrot.slane %v5793_v27, 7  ;;  %v7833_v28 = vrot.slane %v5713_v10, 7  ;;  %v4837_v26 = vld [vmem:[%s7574_s3 + $0xc8] sm:$0xff]  }
 0x102   : > { %7826 = vst [vmem:[#allocation60_spill] sm:$0xff] %v5844_v3  ;;  %1295 = vperm.xlu1 %4757, %v5851_v62   ;;  %1315 = vperm.xlu0 %4756, %v5857_v30   ;;  %v961_v51 = vpack.c.bf16 %v942_v29, %v941_v46  ;;  %v956_v49 = vpack.c.bf16 %v932_v61, %v931_v8  ;;  %v4838_v61 = vld [vmem:[%s7574_s3 + $0x88] sm:$0xff]   ;;  %v4848_v30 = vld [vmem:[%s7574_s3 + $0xb0] sm:$0xff]  }
 0x103   : > { %v895_v41 = vpop.permute.xlu1 %894  ;;  %v899_v60 = vpop.permute.xlu0 %898  ;;  %v5871_v33 = vsel %vm548_vm0, %v538_v57, %v7831_v34  ;;  %v5877_v45 = vsel %vm548_vm0, %v7833_v28, %v538_v57  ;;  %v4855_v34 = vld [vmem:[%s7574_s3 + $0x150] sm:$0xff]   ;;  %v756_v57 = vmul.f32 %v5409_v48, %v5842_v19  ;;  %v934_v28 = vmul.f32 %v5668_v24, %v5846_v44 }
 0x104   : > { %7832 = vst [vmem:[#allocation65_spill] sm:$0xff] %v5871_v33  ;;  %7834 = vst [vmem:[#allocation66_spill] sm:$0xff] %v5877_v45  ;;  %v943_v53 = vmul.f32 %v895_v41, %v5791_v4  ;;  %v944_v42 = vmul.f32 %v899_v60, %v5793_v27  ;;  %2790 = vmatprep.mubr.bf16.mxu1 %v961_v51  ;;  %v5892_v60 = vld [vmem:[%s7575_s4 + $0xc0] sm:$0xff]  ;;  %v755_v41 = vmul.f32 %v5411_v12, %v5832_v39  ;;  %v7867_v4 = vld [vmem:[#allocation23_spill] sm:$0xff] }
 0x105   : > { %2743 = vmatmul.mubr.bf16.gmra.mrb[24].mxu0 %v779_v35  ;;  %2791 = vmatmul.mubr.bf16.vlgmr.msra.gmra.mrb[0].mxu1 %v785_v6  ;;  %v768_v29 = vmul.f32 %v5456_v25, %v5871_v33  ;;  %v767_v47 = vmul.f32 %v5458_v52, %v5877_v45  ;;  %v528_v12 = vrot.slane %v5844_v3, 7  ;;  %v7643_v51 = vrot.slane %v5846_v44, 7  ;;  %v4857_v35 = vld [vmem:[%s7574_s3 + $0x158] sm:$0xff]  }
 0x106   : > { %v962_v46 = vpack.c.bf16 %v944_v42, %v943_v53  ;;  %1303 = vperm.xlu1 %4757, %v5892_v60   ;;  %1323 = vperm.xlu0 %4756, %v5271_v63   ;;  %v4856_v63 = vld [vmem:[%s7574_s3 + $0x110] sm:$0xff]   ;;  %v540_v25 = vrot.slane %v5860_v36, 7  ;;  %v933_v6 = vmul.f32 %v5666_v20, %v5844_v3  ;;  %v780_v20 = vpack.c.bf16 %v756_v57, %v755_v41 }
 0x107   : > { %2750 = vmatprep.mubr.bf16.mxu0 %v956_v49  ;;  %v903_v48 = vpop.permute.xlu1 %902  ;;  %v907_v8 = vpop.permute.xlu0 %906  ;;  %4311 = vmatpush3.bf16.msra.mxu1 %v4836_v43  ;;  %v4839_v43 = vld [vmem:[%s7574_s3 + $0xd0] sm:$0xff]   ;;  %v4906_v49 = vld [vmem:[%s7575_s4 + $0xf8] sm:$0xff]  ;;  %v5934_v24 = vmax.f32 %v5191_v38, 0.0  ;;  %v7838_v52 = vrot.slane %v5752_v9, 7  ;;  %v5949_v38 = vmax.f32 %v5195_v40, 0.0  ;;  %v7841_v57 = vrot.slane %v5793_v27, 7 }
 0x108   : > { %2798 = vmatprep.mubr.bf16.mxu1 %v962_v46  ;;  %4312 = vmatprep.subr.bf16.mxu1 %v4837_v26  ;;  %v945_v53 = vmul.f32 %v903_v48, %v5860_v36  ;;  %v946_v42 = vmul.f32 %v907_v8, %v5862_v0  ;;  %v5927_v26 = vld [vmem:[%s7575_s4 + $0xd0] sm:$0xff]  ;;  %v786_v46 = vpack.c.bf16 %v768_v29, %v767_v47  ;;  %v7843_v47 = vrot.slane %v5862_v0, 7 }
 0x109   : > { %4426 = vmatprep.subr.bf16.mxu0 %v4855_v34  ;;  %7835 = vst [vmem:[#allocation67_spill] sm:$0xff] %v5927_v26  ;;  %7836 = vst [vmem:[#allocation68_spill] sm:$0xff] %v5934_v24  ;;  %v5940_v34 = vsel %vm548_vm0, %v528_v12, %v7643_v51  ;;  %v5955_v41 = vsel %vm548_vm0, %v7841_v57, %v540_v25  ;;  %v4840_v29 = vld [vmem:[%s7574_s3 + $0x90] sm:$0xff]   ;;  %v957_v40 = vpack.c.bf16 %v934_v28, %v933_v6  ;;  %v7848_v57 = vld [vmem:[#allocation18_spill] sm:$0xff] }
 0x10a   : > { %1311 = vperm.xlu1 %4757, %v5927_v26   ;;  %1331 = vperm.xlu0 %4756, %v4906_v49   ;;  %7837 = vst [vmem:[#allocation69_spill] sm:$0xff] %v5940_v34  ;;  %v5946_v49 = vsel %vm548_vm0, %v7838_v52, %v528_v12  ;;  %7840 = vst [vmem:[#allocation71_spill] sm:$0xff] %v5949_v38  ;;  %v4841_v12 = vld [vmem:[%s7574_s3 + $0xd8] sm:$0xff]   ;;  %v7846_v6 = vld [vmem:[#allocation8_spill] sm:$0xff]  ;;  %v935_v36 = vmul.f32 %v5707_v7, %v5934_v24 }
 0x10b   : > { %v911_v48 = vpop.permute.xlu1 %910  ;;  %v915_v8 = vpop.permute.xlu0 %914  ;;  %4313 = vmatpush3.bf16.msra.mxu1 %v4838_v61  ;;  %4427 = vmatpush3.bf16.msra.mxu0 %v4856_v63  ;;  %7839 = vst [vmem:[#allocation70_spill] sm:$0xff] %v5946_v49  ;;  %7842 = vst [vmem:[#allocation72_spill] sm:$0xff] %v5955_v41  ;;  %v5964_v61 = vsel %vm548_vm0, %v540_v25, %v7843_v47  ;;  %v963_v63 = vpack.c.bf16 %v946_v42, %v945_v53  ;;  %v4858_v52 = vld [vmem:[%s7574_s3 + $0x118] sm:$0xff]   ;;  %v7641_v25 = vmov 6   ;;  %v7850_v7 = vld [vmem:[#allocation6_spill] sm:$0xff] }
 0x10c   : > { %4314 = vmatprep.subr.bf16.mxu1 %v4839_v43  ;;  %4428 = vmatprep.subr.bf16.mxu0 %v4857_v35  ;;  %7844 = vst [vmem:[#allocation73_spill] sm:$0xff] %v5964_v61  ;;  %v5975_v43 = vld [vmem:[%s7575_s4 + $0xe0] sm:$0xff]  ;;  %v758_v28 = vmul.f32 %v7846_v6, %v5940_v34  ;;  %v7847_v53 = vld [vmem:[#allocation9_spill] sm:$0xff]  ;;  %v770_v47 = vmul.f32 %v7848_v57, %v5964_v61  ;;  %v7860_v45 = vrot.slane %v7850_v7, 7 }
 0x10d   : > { %2751 = vmatmul.mubr.bf16.gmra.mrb[28].mxu0 %v780_v20  ;;  %2799 = vmatmul.mubr.bf16.gmra.mrb[4].mxu1 %v786_v46  ;;  %7845 = vst [vmem:[#allocation74_spill] sm:$0xff] %v5975_v43  ;;  %v4859_v35 = vld [vmem:[%s7574_s3 + $0x160] sm:$0xff]   ;;  %v757_v42 = vmul.f32 %v7847_v53, %v5946_v49  ;;  %v530_v20 = vrot.slane %v5934_v24, 7  ;;  %v4842_v53 = vld [vmem:[%s7574_s3 + $0x98] sm:$0xff]   ;;  %v947_v57 = vmul.f32 %v911_v48, %v7850_v7  ;;  %v7865_v7 = vld [vmem:[#allocation7_spill] sm:$0xff] }
 0x10e   : > { %1319 = vperm.xlu1 %4757, %v5975_v43   ;;  %4759 = vset.pattern.permute.xlu0 %v7641_v25  ;;  %v7849_v25 = vld [vmem:[#allocation19_spill] sm:$0xff]  ;;  %v5997_v6 = vld [vmem:[%s7575_s4] sm:$0xff]  ;;  %v948_v46 = vmul.f32 %v915_v8, %v5273_v2  ;;  %v7856_v8 = vrot.slane %v5846_v44, 7  ;;  %v7908_v44 = vld [vmem:[#allocation33_spill] sm:$0xff] }
 0x10f   : > { %2758 = vmatprep.mubr.bf16.mxu0 %v957_v40  ;;  %2806 = vmatprep.mubr.bf16.mxu1 %v963_v63  ;;  %v769_v51 = vmul.f32 %v7849_v25, %v5955_v41  ;;  %v936_v25 = vmul.f32 %v5709_v11, %v5949_v38  ;;  %v6014_v41 = vld [vmem:[%s7575_s4 + $0xf0] sm:$0xff]  ;;  %v7852_v61 = vld [vmem:[#allocation2_spill] sm:$0xff]  ;;  %v7854_v11 = vrot.slane %v5949_v38, 7 }
 0x110   : > { %1735 = vperm.xlu0 %4759, %v5997_v6   ;;  %v6000_v40 = vpop.permute.xlu1 %1031  ;;  %v6002_v63 = vpop.permute.xlu0 %1035  ;;  %4315 = vmatpush3.bf16.msra.mxu1 %v4840_v29  ;;  %7851 = vst [vmem:[#allocation8_spill] sm:$0xff] %v6014_v41  ;;  %v781_v29 = vpack.c.bf16 %v758_v28, %v757_v42  ;;  %v6018_v27 = vmax.f32 %v7852_v61, 0.0  ;;  %v7659_v28 = vmov 4  }
 0x111   : > { %4316 = vmatprep.subr.bf16.mxu1 %v4841_v12  ;;  %4429 = vmatpush3.bf16.msra.mxu0 %v4858_v52  ;;  %v6024_v48 = vsel %vm548_vm0, %v530_v20, %v7854_v11  ;;  %v6030_v12 = vsel %vm548_vm0, %v7856_v8, %v530_v20  ;;  %v7858_v52 = vld [vmem:[#allocation3_spill] sm:$0xff]  ;;  %v4843_v11 = vld [vmem:[%s7574_s3 + $0xe0] sm:$0xff]   ;;  %v7861_v20 = vrot.slane %v5862_v0, 7 }
 0x112   : > { %1327 = vperm.xlu1 %4757, %v6014_v41   ;;  %4430 = vmatprep.subr.bf16.mxu0 %v4859_v35  ;;  %7853 = vst [vmem:[#allocation9_spill] sm:$0xff] %v6018_v27  ;;  %7855 = vst [vmem:[#allocation18_spill] sm:$0xff] %v6024_v48  ;;  %v6033_v2 = vmax.f32 %v7858_v52, 0.0  ;;  %v787_v35 = vpack.c.bf16 %v770_v47, %v769_v51  ;;  %v958_v51 = vpack.c.bf16 %v936_v25, %v935_v36  ;;  %v6054_v52 = vld [vmem:[%s7575_s4 + $0x8] sm:$0xff] }
 0x113   : > { %7857 = vst [vmem:[#allocation19_spill] sm:$0xff] %v6030_v12  ;;  %v6049_v8 = vsel %vm548_vm0, %v7861_v20, %v7860_v45  ;;  %v964_v47 = vpack.c.bf16 %v948_v46, %v947_v57  ;;  %v4845_v36 = vld [vmem:[%s7574_s3 + $0xe8] sm:$0xff]   ;;  %v4860_v45 = vld [vmem:[%s7574_s3 + $0x120] sm:$0xff]   ;;  %v532_v20 = vrot.slane %v6018_v27, 7 }
 0x114   : > { %7859 = vst [vmem:[#allocation2_spill] sm:$0xff] %v6033_v2  ;;  %4760 = vset.pattern.permute.xlu0 %v7659_v28  ;;  %v6036_v61 = vpop.permute.xlu1 %1039  ;;  %v6038_v42 = vpop.permute.xlu0 %1047  ;;  %4317 = vmatpush3.bf16.msra.mxu1 %v4842_v53  ;;  %7862 = vst [vmem:[#allocation3_spill] sm:$0xff] %v6049_v8  ;;  %v4844_v53 = vld [vmem:[%s7574_s3 + $0xa0] sm:$0xff]   ;;  %v7864_v57 = vld [vmem:[#allocation11_spill] sm:$0xff]  ;;  %v533_v33 = vrot.slane %v6033_v2, 7  ;;  %v771_v10 = vmul.f32 %v7867_v4, %v6049_v8 }
 0x115   : > { %1387 = vperm.xlu0 %4760, %v6054_v52   ;;  %2759 = vmatmul.mubr.bf16.gmra.mrb[32].mxu0 %v781_v29  ;;  %v7863_v46 = vld [vmem:[#allocation10_spill] sm:$0xff]  ;;  %v759_v29 = vmul.f32 %v7864_v57, %v6030_v12  ;;  %v938_v57 = vmul.f32 %v5742_v59, %v6033_v2  ;;  %v7868_v59 = vrot.slane %v5949_v38, 7  ;;  %v4862_v8 = vld [vmem:[%s7574_s3 + $0x128] sm:$0xff]  }
 0x116   : > { %2807 = vmatmul.mubr.bf16.gmra.mrb[8].mxu1 %v787_v35  ;;  %4758 = vset.pattern.permute.xlu1 %v7659_v28  ;;  %v760_v25 = vmul.f32 %v7863_v46, %v6024_v48  ;;  %v7866_v35 = vld [vmem:[#allocation22_spill] sm:$0xff]  ;;  %v4861_v28 = vld [vmem:[%s7574_s3 + $0x168] sm:$0xff]   ;;  %v937_v46 = vmul.f32 %v5740_v32, %v6018_v27  ;;  %v7905_v48 = vld [vmem:[#allocation29_spill] sm:$0xff] }
 0x117   : > { %v772_v0 = vmul.f32 %v7866_v35, %v7865_v7  ;;  %2766 = vmatprep.mubr.bf16.mxu0 %v958_v51  ;;  %2814 = vmatprep.mubr.bf16.mxu1 %v964_v47  ;;  %v6092_v47 = vld [vmem:[%s7575_s4 + $0x20] sm:$0xff]  ;;  %v6099_v4 = vsel %vm548_vm0, %v7868_v59, %v532_v20  ;;  %v6117_v59 = vld [vmem:[%s7575_s4 + $0x10] sm:$0xff] }
 0x118   : > { %1383 = vperm.xlu1 %4758, %v5997_v6   ;;  %v6085_v35 = vpop.permute.xlu1 %1043  ;;  %v6087_v51 = vpop.permute.xlu0 %1055  ;;  %4318 = vmatprep.subr.bf16.mxu1 %v4843_v11  ;;  %v782_v32 = vpack.c.bf16 %v760_v25, %v759_v29  ;;  %7869 = vst [vmem:[#allocation10_spill] sm:$0xff] %v6099_v4  ;;  %v4846_v11 = vld [vmem:[%s7574_s3 + $0xa8] sm:$0xff]   ;;  %v959_v29 = vpack.c.bf16 %v938_v57, %v937_v46  ;;  %v7873_v46 = vld [vmem:[#allocation12_spill] sm:$0xff] }
 0x119   : > { %1399 = vperm.xlu0 %4760, %v6092_v47   ;;  %4319 = vmatpush3.bf16.msra.mxu1 %v4844_v53  ;;  %v6109_v53 = vsel %vm548_vm0, %v532_v20, %v533_v33  ;;  %v788_v25 = vpack.c.bf16 %v772_v0, %v771_v10  ;;  %v4847_v20 = vld [vmem:[%s7574_s3 + $0xf0] sm:$0xff]  }
 0x11a   : > { %4320 = vmatprep.subr.bf16.mxu1 %v4845_v36  ;;  %4431 = vmatpush3.bf16.msra.mxu0 %v4860_v45  ;;  %7870 = vst [vmem:[#allocation11_spill] sm:$0xff] %v6109_v53  ;;  %v7871_v36 = vld [vmem:[#allocation4_spill] sm:$0xff]  ;;  %v762_v57 = vmul.f32 %v7873_v46, %v6109_v53  ;;  %v7875_v53 = vrot.slane %v5719_v1, 7 }
 0x11b   : > { %4432 = vmatprep.subr.bf16.mxu0 %v4861_v28  ;;  %v6112_v45 = vmax.f32 %v7871_v36, 0.0  ;;  %v6130_v10 = vld [vmem:[%s7575_s4 + $0x30] sm:$0xff]  ;;  %v7874_v36 = vld [vmem:[#allocation13_spill] sm:$0xff] }
 0x11c   : > { %1391 = vperm.xlu1 %4758, %v6117_v59   ;;  %v6120_v28 = vpop.permute.xlu1 %1051  ;;  %v6122_v7 = vpop.permute.xlu0 %1063  ;;  %v4863_v0 = vld [vmem:[%s7574_s3 + $0x170] sm:$0xff]   ;;  %v761_v2 = vmul.f32 %v7874_v36, %v6099_v4  ;;  %v4849_v36 = vld [vmem:[%s7574_s3 + $0xf8] sm:$0xff]  }
 0x11d   : > { %7872 = vst [vmem:[#allocation22_spill] sm:$0xff] %v6112_v45  ;;  %1407 = vperm.xlu0 %4760, %v6130_v10   ;;  %2767 = vmatmul.mubr.bf16.gmra.mrb[36].mxu0 %v782_v32  ;;  %v4864_v32 = vld [vmem:[%s7574_s3 + $0x130] sm:$0xff]   ;;  %v534_v27 = vrot.slane %v6112_v45, 7  ;;  %v4866_v4 = vld [vmem:[%s7574_s3 + $0x138] sm:$0xff]  }
 0x11e   : > { %2815 = vmatmul.mubr.bf16.gmra.mrb[12].mxu1 %v788_v25  ;;  %2774 = vmatprep.mubr.bf16.mxu0 %v959_v29  ;;  %v939_v25 = vmul.f32 %v5772_v21, %v6112_v45  ;;  %v940_v29 = vmul.f32 %v5774_v13, %v5719_v1  ;;  %v6167_v21 = vld [vmem:[%s7575_s4 + $0x40] sm:$0xff]  ;;  %v4865_v13 = vld [vmem:[%s7574_s3 + $0x178] sm:$0xff]   ;;  %v783_v45 = vpack.c.bf16 %v762_v57, %v761_v2 }
 0x11f   : > { %4321 = vmatpush3.bf16.msra.mxu1 %v4846_v11  ;;  %4433 = vmatpush3.bf16.msra.mxu0 %v4862_v8  ;;  %v6154_v11 = vld [vmem:[%s7575_s4 + $0x18] sm:$0xff]  ;;  %v6187_v38 = vsel %vm548_vm0, %v533_v33, %v534_v27 }
 0x120   : > { %1395 = vperm.xlu1 %4758, %v6154_v11   ;;  %v6157_v8 = vpop.permute.xlu1 %1059  ;;  %v6159_v46 = vpop.permute.xlu0 %1071  ;;  %4322 = vmatprep.subr.bf16.mxu1 %v4847_v20  ;;  %v4850_v20 = vld [vmem:[%s7574_s3 + $0xb8] sm:$0xff]   ;;  %7877 = vst [vmem:[#allocation4_spill] sm:$0xff] %v6187_v38  ;;  %v960_v2 = vpack.c.bf16 %v940_v29, %v939_v25 }
 0x121   : > { %1415 = vperm.xlu0 %4760, %v6167_v21   ;;  %4434 = vmatprep.subr.bf16.mxu0 %v4863_v0  ;;  %v6183_v0 = vsel %vm548_vm0, %v534_v27, %v7875_v53  ;;  %v7878_v27 = vld [vmem:[#allocation14_spill] sm:$0xff]  ;;  %v7879_v53 = vld [vmem:[#allocation15_spill] sm:$0xff]  ;;  %v6207_v29 = vld [vmem:[%s7575_s4 + $0x38] sm:$0xff] }
 0x122   : > { %7876 = vst [vmem:[#allocation23_spill] sm:$0xff] %v6183_v0  ;;  %v764_v33 = vmul.f32 %v7878_v27, %v6183_v0  ;;  %v763_v25 = vmul.f32 %v7879_v53, %v6187_v38  ;;  %v4867_v38 = vld [vmem:[%s7574_s3 + $0x1c0] sm:$0xff]  }
 0x123   : > { %4323 = vmatpush3.bf16.msra.mxu1 %v4848_v30  ;;  %4435 = vmatpush3.bf16.msra.mxu0 %v4864_v32  ;;  %v6192_v30 = vld [vmem:[%s7575_s4 + $0x28] sm:$0xff] }
 0x124   : > { %1403 = vperm.xlu1 %4758, %v6192_v30   ;;  %v6195_v57 = vpop.permute.xlu1 %1067  ;;  %v6197_v32 = vpop.permute.xlu0 %1079  ;;  %4324 = vmatprep.subr.bf16.mxu1 %v4849_v36 }
 0x125   : > { %1423 = vperm.xlu0 %4760, %v5626_v16   ;;  %2775 = vmatmul.mubr.bf16.gmra.mrb[40].mxu0 %v783_v45  ;;  %v784_v45 = vpack.c.bf16 %v764_v33, %v763_v25  ;;  %v6240_v33 = vld [vmem:[%s7575_s4 + $0x68] sm:$0xff]  ;;  %v6251_v25 = vld [vmem:[%s7575_s4 + $0x78] sm:$0xff] }
 0x126   : > { %2782 = vmatprep.mubr.bf16.mxu0 %v960_v2  ;;  %4436 = vmatprep.subr.bf16.mxu0 %v4865_v13  ;;  %v6218_v13 = vld [vmem:[%s7575_s4 + $0x48] sm:$0xff]  ;;  %v6229_v2 = vld [vmem:[%s7575_s4 + $0x58] sm:$0xff]  ;;  %7882 = vst [vmem:[#allocation14_spill] sm:$0xff] %v6240_v33  ;;  %7885 = vst [vmem:[#allocation76_spill] sm:$0xff] %v6251_v25 }
 0x127   : > { %4325 = vmatpush3.bf16.msra.mxu1 %v4850_v20  ;;  %4437 = vmatpush3.bf16.msra.mxu0 %v4866_v4 }
 0x128   : > { %1411 = vperm.xlu1 %4758, %v6207_v29   ;;  %v6210_v36 = vpop.permute.xlu1 %1075  ;;  %v6212_v16 = vpop.permute.xlu0 %1087  ;;  %4534 = vmatprep.subr.bf16.mxu1 %v4867_v38 }
 0x129   : > { %1431 = vperm.xlu0 %4760, %v5656_v58  }
 0x12c   : > { %1419 = vperm.xlu1 %4758, %v6218_v13   ;;  %v6221_v4 = vpop.permute.xlu1 %1083  ;;  %v6223_v20 = vpop.permute.xlu0 %1095 }
 0x12d   : > { %7880 = vst [vmem:[#allocation12_spill] sm:$0xff] %v6223_v20  ;;  %1439 = vperm.xlu0 %4760, %v5686_v15   ;;  %2783 = vmatmul.mubr.bf16.gmra.mrb[44].mxu0 %v784_v45 }
 0x130   : > { %1427 = vperm.xlu1 %4758, %v6229_v2   ;;  %v6232_v58 = vpop.permute.xlu1 %1091  ;;  %v6234_v27 = vpop.permute.xlu0 %1103 }
 0x131   : > { %7881 = vst [vmem:[#allocation13_spill] sm:$0xff] %v6234_v27  ;;  %1447 = vperm.xlu0 %4760, %v5724_v17  }
 0x134   : > { %1435 = vperm.xlu1 %4758, %v6240_v33   ;;  %v6243_v15 = vpop.permute.xlu1 %1099  ;;  %v6245_v53 = vpop.permute.xlu0 %1111 }
 0x135   : > { %7883 = vst [vmem:[#allocation15_spill] sm:$0xff] %v6243_v15  ;;  %7884 = vst [vmem:[#allocation75_spill] sm:$0xff] %v6245_v53  ;;  %1455 = vperm.xlu0 %4760, %v5758_v18   ;;  %v6265_v53 = vld [vmem:[%s7575_s4 + $0x88] sm:$0xff]  ;;  %v7893_v15 = vmov 6  }
 0x136   : > { %7888 = vst [vmem:[#allocation79_spill] sm:$0xff] %v6265_v53 }
 0x138   : > { %1443 = vperm.xlu1 %4758, %v6251_v25   ;;  %v6254_v45 = vpop.permute.xlu1 %1107  ;;  %v6256_v1 = vpop.permute.xlu0 %1119 }
 0x139   : > { %7886 = vst [vmem:[#allocation77_spill] sm:$0xff] %v6254_v45  ;;  %7887 = vst [vmem:[#allocation78_spill] sm:$0xff] %v6256_v1  ;;  %1463 = vperm.xlu0 %4760, %v5805_v23  }
 0x13c   : > { %1451 = vperm.xlu1 %4758, %v6265_v53   ;;  %v6268_v0 = vpop.permute.xlu1 %1115  ;;  %v6270_v27 = vpop.permute.xlu0 %1127 }
 0x13d   : > { %7889 = vst [vmem:[#allocation80_spill] sm:$0xff] %v6268_v0  ;;  %7890 = vst [vmem:[#allocation81_spill] sm:$0xff] %v6270_v27  ;;  %1471 = vperm.xlu0 %4760, %v5851_v62   ;;  %v7900_v0 = vld [vmem:[#allocation16_spill] sm:$0xff] }
 0x140   : > { %1459 = vperm.xlu1 %4758, %v5692_v55   ;;  %v6274_v1 = vpop.permute.xlu1 %1123  ;;  %v6276_v45 = vpop.permute.xlu0 %1135  ;;  %v7690_v55 = vmov 5  }
 0x141   : > { %7891 = vst [vmem:[#allocation82_spill] sm:$0xff] %v6274_v1  ;;  %7892 = vst [vmem:[#allocation83_spill] sm:$0xff] %v6276_v45  ;;  %1479 = vperm.xlu0 %4760, %v5892_v60   ;;  %v965_v1 = vrot.slane %v5501_v14, 1 }
 0x144   : > { %4761 = vset.pattern.permute.xlu1 %v7893_v15  ;;  %v6280_v20 = vpop.permute.xlu1 %1131  ;;  %v6282_v12 = vpop.permute.xlu0 %1143 }
 0x145   : > { %7894 = vst [vmem:[#allocation84_spill] sm:$0xff] %v6280_v20  ;;  %7895 = vst [vmem:[#allocation85_spill] sm:$0xff] %v6282_v12  ;;  %1739 = vperm.xlu1 %4761, %v6054_v52   ;;  %1487 = vperm.xlu0 %4760, %v5927_v26   ;;  %v996_v20 = vrot.slane %v5460_v22, 1 }
 0x147   : > { %v6311_v22 = vsel %vm997_vm1, %v996_v20, %v965_v1 }
 0x148   : > { %v6286_v38 = vpop.permute.xlu1 %1139  ;;  %v6288_v27 = vpop.permute.xlu0 %1151  ;;  %7903 = vst [vmem:[#allocation91_spill] sm:$0xff] %v6311_v22 }
 0x149   : > { %7896 = vst [vmem:[#allocation86_spill] sm:$0xff] %v6286_v38  ;;  %7897 = vst [vmem:[#allocation87_spill] sm:$0xff] %v6288_v27  ;;  %4762 = vset.pattern.permute.xlu1 %v7690_v55  ;;  %1495 = vperm.xlu0 %4760, %v5975_v43   ;;  %v7695_v55 = vmov 7   ;;  %v7901_v43 = vrot.slane %v7900_v0, 1  ;;  %v1159_v0 = vmul.f32 %v6002_v63, %v6311_v22  ;;  %v4868_v63 = vld [vmem:[%s7574_s3 + $0x180] sm:$0xff]  }
 0x14a   : > { %1559 = vperm.xlu1 %4762, %v5997_v6  }
 0x14c   : > { %v6293_v45 = vpop.permute.xlu1 %1147 }
 0x14d   : > { %7898 = vst [vmem:[#allocation88_spill] sm:$0xff] %v6293_v45  ;;  %1503 = vperm.xlu0 %4760, %v6014_v41   ;;  %v1208_v12 = vpop.permute.xlu0 %1207  ;;  %v6307_v45 = vsel %vm997_vm1, %v7901_v43, %v996_v20  ;;  %v7904_v43 = vld [vmem:[#allocation27_spill] sm:$0xff]  ;;  %v7906_v20 = vmov 5  }
 0x14e   : > { %4763 = vset.pattern.permute.xlu1 %v7893_v15  ;;  %7902 = vst [vmem:[#allocation90_spill] sm:$0xff] %v6307_v45  ;;  %v967_v26 = vrot.slane %v7904_v43, 1  ;;  %v7917_v43 = vld [vmem:[#allocation36_spill] sm:$0xff] }
 0x14f   : > { %1743 = vperm.xlu1 %4763, %v6117_v59  }
 0x150   : > { %v6300_v27 = vpop.permute.xlu1 %1155 }
 0x151   : > { %7899 = vst [vmem:[#allocation89_spill] sm:$0xff] %v6300_v27  ;;  %4784 = vset.pattern.permute.xlu0 %v7695_v55  ;;  %v1220_v38 = vpop.permute.xlu0 %1219  ;;  %v1334_v27 = vmul.f32 %v1208_v12, %v5538_v37  ;;  %v1158_v55 = vmul.f32 %v6000_v40, %v6307_v45 }
 0x152   : > { %1911 = vperm.xlu0 %4784, %v5997_v6   ;;  %v7907_v6 = vld [vmem:[#allocation24_spill] sm:$0xff]  ;;  %v1337_v40 = vmul.f32 %v1220_v38, %v7908_v44  ;;  %v7912_v38 = vmov 4  }
 0x153   : > { %1747 = vperm.xlu1 %4763, %v6154_v11   ;;  %v966_v12 = vrot.slane %v7907_v6, 1  ;;  %v1190_v22 = vpack.c.bf16 %v1159_v0, %v1158_v55  ;;  %v4870_v55 = vld [vmem:[%s7574_s3 + $0x188] sm:$0xff]  }
 0x155   : > { %v1212_v41 = vpop.permute.xlu1 %1211  ;;  %v1228_v14 = vpop.permute.xlu0 %1227 }
 0x156   : > { %v1335_v24 = vmul.f32 %v1212_v41, %v7905_v48  ;;  %4785 = vset.pattern.permute.xlu0 %v7906_v20  ;;  %v4869_v48 = vld [vmem:[%s7574_s3 + $0x1c8] sm:$0xff]  }
 0x157   : > { %4764 = vset.pattern.permute.xlu1 %v7906_v20  ;;  %1563 = vperm.xlu0 %4785, %v6054_v52   ;;  %v6336_v52 = vsel %vm997_vm1, %v966_v12, %v967_v26 }
 0x158   : > { %v1366_v37 = vpack.c.bf16 %v1335_v24, %v1334_v27  ;;  %1571 = vperm.xlu1 %4764, %v6154_v11   ;;  %7909 = vst [vmem:[#allocation92_spill] sm:$0xff] %v6336_v52  ;;  %v7910_v24 = vld [vmem:[#allocation31_spill] sm:$0xff]  ;;  %v6342_v11 = vsel %vm997_vm1, %v965_v1, %v966_v12  ;;  %v1161_v44 = vmul.f32 %v6085_v35, %v6336_v52  ;;  %v7914_v1 = vld [vmem:[#allocation28_spill] sm:$0xff] }
 0x159   : > { %v1216_v45 = vpop.permute.xlu1 %1215  ;;  %v1236_v41 = vpop.permute.xlu0 %1235  ;;  %7911 = vst [vmem:[#allocation93_spill] sm:$0xff] %v6342_v11  ;;  %v968_v12 = vrot.slane %v7914_v1, 1  ;;  %v1160_v35 = vmul.f32 %v6036_v61, %v6342_v11 }
 0x15a   : > { %v1336_v27 = vmul.f32 %v1216_v45, %v7910_v24  ;;  %2855 = vmatprep.mubr.bf16.mxu1 %v1366_v37  ;;  %v7913_v45 = vld [vmem:[#allocation49_spill] sm:$0xff] }
 0x15b   : > { %1567 = vperm.xlu0 %4785, %v6117_v59   ;;  %2856 = vmatmul.mubr.bf16.vlgmr.msra.gmra.mrb[16].mxu1 %v1190_v22  ;;  %v4871_v22 = vld [vmem:[%s7574_s3 + $0x1d0] sm:$0xff]  }
 0x15c   : > { %v1367_v0 = vpack.c.bf16 %v1337_v40, %v1336_v27  ;;  %4765 = vset.pattern.permute.xlu1 %v7912_v38  ;;  %4535 = vmatpush3.bf16.msra.mxu1 %v4868_v63  ;;  %v7915_v40 = vld [vmem:[#allocation32_spill] sm:$0xff]  ;;  %v7916_v27 = vld [vmem:[#allocation35_spill] sm:$0xff] }
 0x15d   : > { %1467 = vperm.xlu1 %4765, %v7913_v45   ;;  %v1224_v37 = vpop.permute.xlu1 %1223  ;;  %v6351_v59 = vpop.permute.xlu0 %1243  ;;  %4536 = vmatprep.subr.bf16.mxu1 %v4869_v48  ;;  %v969_v63 = vrot.slane %v7915_v40, 1  ;;  %v1339_v24 = vmul.f32 %v1228_v14, %v7916_v27  ;;  %v1191_v48 = vpack.c.bf16 %v1161_v44, %v1160_v35  ;;  %v4872_v14 = vld [vmem:[%s7574_s3 + $0x190] sm:$0xff]   ;;  %v4873_v44 = vld [vmem:[%s7574_s3 + $0x1d8] sm:$0xff]  }
 0x15e   : > { %v1338_v6 = vmul.f32 %v1224_v37, %v7917_v43  ;;  %2863 = vmatprep.mubr.bf16.mxu1 %v1367_v0  ;;  %v6371_v0 = vsel %vm997_vm1, %v967_v26, %v968_v12  ;;  %v7922_v43 = vld [vmem:[#allocation40_spill] sm:$0xff] }
 0x15f   : > { %1627 = vperm.xlu0 %4785, %v6265_v53   ;;  %7918 = vst [vmem:[#allocation49_spill] sm:$0xff] %v6371_v0  ;;  %v6375_v61 = vsel %vm997_vm1, %v968_v12, %v969_v63  ;;  %v1162_v26 = vmul.f32 %v6038_v42, %v6371_v0  ;;  %v7920_v12 = vld [vmem:[#allocation34_spill] sm:$0xff]  ;;  %v7923_v53 = vld [vmem:[#allocation41_spill] sm:$0xff] }
 0x160   : > { %4537 = vmatpush3.bf16.msra.mxu1 %v4870_v55  ;;  %7919 = vst [vmem:[#allocation28_spill] sm:$0xff] %v6375_v61  ;;  %v1368_v55 = vpack.c.bf16 %v1339_v24, %v1338_v6  ;;  %v1163_v37 = vmul.f32 %v6120_v28, %v6375_v61  ;;  %v4874_v24 = vld [vmem:[%s7574_s3 + $0x198] sm:$0xff]   ;;  %v970_v35 = vrot.slane %v7920_v12, 1  ;;  %v4875_v42 = vld [vmem:[%s7574_s3 + $0x1e0] sm:$0xff]  }
 0x161   : > { %4766 = vset.pattern.permute.xlu1 %v7893_v15  ;;  %v1232_v45 = vpop.permute.xlu1 %1231  ;;  %v6364_v52 = vpop.permute.xlu0 %1251  ;;  %4538 = vmatprep.subr.bf16.mxu1 %v4871_v22 }
 0x162   : > { %1751 = vperm.xlu1 %4766, %v6092_v47   ;;  %v1340_v40 = vmul.f32 %v1232_v45, %v7923_v53  ;;  %v1192_v28 = vpack.c.bf16 %v1163_v37, %v1162_v26  ;;  %v6409_v45 = vsel %vm997_vm1, %v969_v63, %v970_v35  ;;  %v4877_v26 = vld [vmem:[%s7574_s3 + $0x1e8] sm:$0xff]  }
 0x163   : > { %4788 = vset.pattern.permute.xlu0 %v7893_v15  ;;  %2864 = vmatmul.mubr.bf16.gmra.mrb[20].mxu1 %v1191_v48  ;;  %v7921_v48 = vld [vmem:[#allocation37_spill] sm:$0xff]  ;;  %7924 = vst [vmem:[#allocation94_spill] sm:$0xff] %v6409_v45  ;;  %v1164_v63 = vmul.f32 %v6087_v51, %v6409_v45 }
 0x164   : > { %1755 = vperm.xlu0 %4788, %v6192_v30   ;;  %2871 = vmatprep.mubr.bf16.mxu1 %v1368_v55  ;;  %v971_v27 = vrot.slane %v7921_v48, 1  ;;  %v1341_v55 = vmul.f32 %v1236_v41, %v7922_v43  ;;  %v4876_v41 = vld [vmem:[%s7574_s3 + $0x1a0] sm:$0xff]   ;;  %v7928_v43 = vld [vmem:[#allocation44_spill] sm:$0xff]  ;;  %v7929_v48 = vld [vmem:[#allocation45_spill] sm:$0xff] }
 0x165   : > { %v1240_v22 = vpop.permute.xlu1 %1239  ;;  %v6387_v6 = vpop.permute.xlu0 %1259  ;;  %4539 = vmatpush3.bf16.msra.mxu1 %v4872_v14  ;;  %v1343_v53 = vmul.f32 %v6351_v59, %v7928_v43 }
 0x166   : > { %4767 = vset.pattern.permute.xlu1 %v7906_v20  ;;  %4540 = vmatprep.subr.bf16.mxu1 %v4873_v44  ;;  %v6413_v44 = vsel %vm997_vm1, %v970_v35, %v971_v27  ;;  %v1342_v51 = vmul.f32 %v1240_v22, %v7929_v48 }
 0x167   : > { %1575 = vperm.xlu1 %4767, %v6092_v47   ;;  %7925 = vst [vmem:[#allocation95_spill] sm:$0xff] %v6413_v44  ;;  %v1369_v47 = vpack.c.bf16 %v1341_v55, %v1340_v40  ;;  %v1165_v37 = vmul.f32 %v6157_v8, %v6413_v44  ;;  %v4878_v40 = vld [vmem:[%s7574_s3 + $0x1a8] sm:$0xff]   ;;  %v7926_v55 = vld [vmem:[#allocation38_spill] sm:$0xff]  ;;  %v4879_v8 = vld [vmem:[%s7574_s3 + $0x1f0] sm:$0xff]  }
 0x168   : > { %1763 = vperm.xlu0 %4788, %v6207_v29   ;;  %v1370_v43 = vpack.c.bf16 %v1343_v53, %v1342_v51 }
 0x169   : > { %v1248_v14 = vpop.permute.xlu1 %1247  ;;  %v6402_v12 = vpop.permute.xlu0 %1267  ;;  %4541 = vmatpush3.bf16.msra.mxu1 %v4874_v24 }
 0x16a   : > { %4542 = vmatprep.subr.bf16.mxu1 %v4875_v42  ;;  %v972_v42 = vrot.slane %v7926_v55, 1 }
 0x16b   : > { %1579 = vperm.xlu1 %4767, %v6192_v30   ;;  %2872 = vmatmul.mubr.bf16.gmra.mrb[24].mxu1 %v1192_v28  ;;  %v7927_v28 = vld [vmem:[#allocation39_spill] sm:$0xff] }
 0x16c   : > { %2879 = vmatprep.mubr.bf16.mxu1 %v1369_v47  ;;  %1771 = vperm.xlu0 %4788, %v6218_v13   ;;  %v973_v47 = vrot.slane %v7927_v28, 1  ;;  %v1193_v28 = vpack.c.bf16 %v1165_v37, %v1164_v63  ;;  %v6448_v22 = vsel %vm997_vm1, %v971_v27, %v972_v42  ;;  %v4881_v63 = vld [vmem:[%s7574_s3 + $0x1f8] sm:$0xff]  }
 0x16d   : > { %v1256_v24 = vpop.permute.xlu1 %1255  ;;  %v6424_v35 = vpop.permute.xlu0 %1275  ;;  %4543 = vmatpush3.bf16.msra.mxu1 %v4876_v41  ;;  %v4923_v41 = vld [vmem:[%s7575_s4 + $0xb8] sm:$0xff]  ;;  %7930 = vst [vmem:[#allocation96_spill] sm:$0xff] %v6448_v22  ;;  %v1166_v27 = vmul.f32 %v6122_v7, %v6448_v22  ;;  %v1344_v7 = vmul.f32 %v1248_v14, %v5770_v54 }
 0x16e   : > { %4544 = vmatprep.subr.bf16.mxu1 %v4877_v26  ;;  %v6452_v26 = vsel %vm997_vm1, %v972_v42, %v973_v47  ;;  %v974_v42 = vrot.slane %v5632_v50, 1 }
 0x16f   : > { %4768 = vset.pattern.permute.xlu1 %v7912_v38  ;;  %7931 = vst [vmem:[#allocation97_spill] sm:$0xff] %v6452_v26  ;;  %v1167_v37 = vmul.f32 %v6195_v57, %v6452_v26  ;;  %v4882_v57 = vld [vmem:[%s7574_s3 + $0x1b8] sm:$0xff]  }
 0x170   : > { %1475 = vperm.xlu1 %4768, %v4923_v41   ;;  %1779 = vperm.xlu0 %4788, %v6229_v2   ;;  %v4880_v41 = vld [vmem:[%s7574_s3 + $0x1b0] sm:$0xff]  }
 0x171   : > { %v6442_v55 = vpop.permute.xlu1 %1263  ;;  %v6444_v59 = vpop.permute.xlu0 %1283  ;;  %4545 = vmatpush3.bf16.msra.mxu1 %v4878_v40 }
 0x172   : > { %4546 = vmatprep.subr.bf16.mxu1 %v4879_v8  ;;  %v1194_v8 = vpack.c.bf16 %v1167_v37, %v1166_v27 }
 0x173   : > { %2880 = vmatmul.mubr.bf16.gmra.mrb[28].mxu1 %v1193_v28  ;;  %v7932_v28 = vld [vmem:[#allocation42_spill] sm:$0xff] }
 0x174   : > { %4769 = vset.pattern.permute.xlu1 %v7893_v15  ;;  %2887 = vmatprep.mubr.bf16.mxu1 %v1370_v43  ;;  %v975_v51 = vrot.slane %v7932_v28, 1  ;;  %v1345_v43 = vmul.f32 %v6364_v52, %v5764_v56  ;;  %v6487_v52 = vsel %vm997_vm1, %v973_v47, %v974_v42 }
 0x175   : > { %1759 = vperm.xlu1 %4769, %v6130_v10   ;;  %v6466_v53 = vpop.permute.xlu1 %1271  ;;  %v6468_v40 = vpop.permute.xlu0 %1291  ;;  %1787 = vperm.xlu0 %4788, %v6240_v33   ;;  %7933 = vst [vmem:[#allocation98_spill] sm:$0xff] %v6487_v52 }
 0x176   : > { %4547 = vmatpush3.bf16.msra.mxu1 %v4880_v41  ;;  %v6491_v14 = vsel %vm997_vm1, %v974_v42, %v975_v51  ;;  %v1371_v41 = vpack.c.bf16 %v1345_v43, %v1344_v7  ;;  %v7935_v42 = vld [vmem:[#allocation43_spill] sm:$0xff]  ;;  %v977_v43 = vrot.slane %v5738_v5, 1  ;;  %v1347_v7 = vmul.f32 %v6387_v6, %v5842_v19 }
 0x177   : > { %4548 = vmatprep.subr.bf16.mxu1 %v4881_v63  ;;  %7934 = vst [vmem:[#allocation99_spill] sm:$0xff] %v6491_v14  ;;  %v1168_v63 = vmul.f32 %v6159_v46, %v6487_v52  ;;  %v1169_v27 = vmul.f32 %v6210_v36, %v6491_v14  ;;  %v976_v56 = vrot.slane %v7935_v42, 1  ;;  %v7951_v19 = vld [vmem:[#allocation71_spill] sm:$0xff] }
 0x179   : > { %4770 = vset.pattern.permute.xlu1 %v7906_v20  ;;  %v6480_v48 = vpop.permute.xlu1 %1279  ;;  %v6482_v33 = vpop.permute.xlu0 %1299  ;;  %1795 = vperm.xlu0 %4788, %v6251_v25   ;;  %v1195_v46 = vpack.c.bf16 %v1169_v27, %v1168_v63  ;;  %v979_v27 = vrot.slane %v5844_v3, 1  ;;  %v7959_v25 = vld [vmem:[#allocation24_spill] sm:$0xff] }
 0x17a   : > { %1583 = vperm.xlu1 %4770, %v6130_v10   ;;  %4549 = vmatpush3.bf16.msra.mxu1 %v4882_v57  ;;  %v1346_v57 = vmul.f32 %v1256_v24, %v5832_v39  ;;  %v7938_v24 = vld [vmem:[#allocation57_spill] sm:$0xff] }
 0x17b   : > { %2888 = vmatmul.mubr.bf16.gmra.mrb[32].mxu1 %v1194_v8  ;;  %v7953_v39 = vld [vmem:[#allocation9_spill] sm:$0xff] }
 0x17c   : > { %2895 = vmatprep.mubr.bf16.mxu1 %v1371_v41  ;;  %v6520_v41 = vsel %vm997_vm1, %v976_v56, %v977_v43  ;;  %v1372_v6 = vpack.c.bf16 %v1347_v7, %v1346_v57  ;;  %v1349_v7 = vmul.f32 %v6402_v12, %v5940_v34  ;;  %v1348_v57 = vmul.f32 %v6442_v55, %v5946_v49 }
 0x17d   : > { %v6498_v37 = vpop.permute.xlu1 %1287  ;;  %v6500_v47 = vpop.permute.xlu0 %1307  ;;  %1799 = vperm.xlu0 %4788, %v5724_v17   ;;  %v6516_v17 = vsel %vm997_vm1, %v975_v51, %v976_v56  ;;  %7937 = vst [vmem:[#allocation101_spill] sm:$0xff] %v6520_v41  ;;  %v978_v56 = vrot.slane %v5752_v9, 1  ;;  %v983_v54 = vrot.slane %v7953_v39, 1  ;;  %v7960_v9 = vld [vmem:[#allocation8_spill] sm:$0xff] }
 0x17e   : > { %1587 = vperm.xlu1 %4770, %v6207_v29   ;;  %7936 = vst [vmem:[#allocation100_spill] sm:$0xff] %v6516_v17  ;;  %v1170_v29 = vmul.f32 %v6197_v32, %v6516_v17  ;;  %v1373_v55 = vpack.c.bf16 %v1349_v7, %v1348_v57  ;;  %v7943_v7 = vld [vmem:[#allocation18_spill] sm:$0xff] }
 0x17f   : > { %v6552_v12 = vsel %vm997_vm1, %v978_v56, %v979_v27  ;;  %v1351_v57 = vmul.f32 %v6424_v35, %v7943_v7  ;;  %v7950_v7 = vld [vmem:[#allocation15_spill] sm:$0xff] }
 0x180   : > { %7940 = vst [vmem:[#allocation102_spill] sm:$0xff] %v6552_v12 }
 0x181   : > { %v6509_v8 = vpop.permute.xlu1 %1295  ;;  %v6511_v36 = vpop.permute.xlu0 %1315  ;;  %1807 = vperm.xlu0 %4788, %v5758_v18   ;;  %v1171_v18 = vmul.f32 %v6221_v4, %v6520_v41 }
 0x182   : > { %4771 = vset.pattern.permute.xlu1 %v7912_v38 }
 0x183   : > { %1483 = vperm.xlu1 %4771, %v7938_v24   ;;  %2896 = vmatmul.mubr.bf16.gmra.mrb[36].mxu1 %v1195_v46  ;;  %v1196_v32 = vpack.c.bf16 %v1171_v18, %v1170_v29  ;;  %v1173_v24 = vmul.f32 %v6232_v58, %v6552_v12  ;;  %v7942_v18 = vld [vmem:[#allocation68_spill] sm:$0xff]  ;;  %v7946_v58 = vld [vmem:[#allocation67_spill] sm:$0xff] }
 0x184   : > { %2903 = vmatprep.mubr.bf16.mxu1 %v1372_v6 }
 0x185   : > { %v6528_v63 = vpop.permute.xlu1 %1303  ;;  %v6530_v51 = vpop.permute.xlu0 %1323  ;;  %1815 = vperm.xlu0 %4788, %v5805_v23   ;;  %v6548_v23 = vsel %vm997_vm1, %v977_v43, %v978_v56  ;;  %v7941_v43 = vld [vmem:[#allocation61_spill] sm:$0xff]  ;;  %v981_v56 = vrot.slane %v7942_v18, 1 }
 0x186   : > { %7939 = vst [vmem:[#allocation57_spill] sm:$0xff] %v6548_v23  ;;  %v1172_v6 = vmul.f32 %v6212_v16, %v6548_v23  ;;  %v980_v29 = vrot.slane %v7941_v43, 1 }
 0x187   : > { %4772 = vset.pattern.permute.xlu1 %v7893_v15 }
 0x188   : > { %1767 = vperm.xlu1 %4772, %v6167_v21   ;;  %v1197_v34 = vpack.c.bf16 %v1173_v24, %v1172_v6  ;;  %v6581_v49 = vsel %vm997_vm1, %v980_v29, %v981_v56  ;;  %v7949_v6 = vld [vmem:[#allocation12_spill] sm:$0xff] }
 0x189   : > { %v6541_v4 = vpop.permute.xlu1 %1311  ;;  %v6543_v46 = vpop.permute.xlu0 %1331  ;;  %1823 = vperm.xlu0 %4788, %v5851_v62   ;;  %7948 = vst [vmem:[#allocation104_spill] sm:$0xff] %v6581_v49 }
 0x18b   : > { %2904 = vmatmul.mubr.bf16.gmra.mrb[40].mxu1 %v1196_v32  ;;  %v7944_v32 = vld [vmem:[#allocation19_spill] sm:$0xff] }
 0x18c   : > { %4773 = vset.pattern.permute.xlu1 %v7906_v20  ;;  %2911 = vmatprep.mubr.bf16.mxu1 %v1373_v55  ;;  %v1350_v55 = vmul.f32 %v6466_v53, %v7944_v32  ;;  %v1175_v32 = vmul.f32 %v7950_v7, %v6581_v49 }
 0x18d   : > { %1591 = vperm.xlu1 %4773, %v6167_v21   ;;  %v6560_v62 = vpop.permute.xlu1 %1319  ;;  %1831 = vperm.xlu0 %4788, %v5892_v60   ;;  %v6577_v60 = vsel %vm997_vm1, %v979_v27, %v980_v29  ;;  %v7952_v27 = vld [vmem:[#allocation74_spill] sm:$0xff]  ;;  %v7954_v29 = vld [vmem:[#allocation11_spill] sm:$0xff] }
 0x18e   : > { %7947 = vst [vmem:[#allocation67_spill] sm:$0xff] %v6577_v60  ;;  %v1374_v35 = vpack.c.bf16 %v1351_v57, %v1350_v55  ;;  %v1174_v24 = vmul.f32 %v7949_v6, %v6577_v60  ;;  %v1353_v57 = vmul.f32 %v6444_v59, %v7954_v29  ;;  %v7957_v6 = vld [vmem:[#allocation92_spill] sm:$0xff]  ;;  %v7970_v29 = vld [vmem:[#allocation27_spill] sm:$0xff] }
 0x18f   : > { %v6569_v16 = vpop.permute.xlu0 %1735 }
 0x190   : > { %7945 = vst [vmem:[#allocation103_spill] sm:$0xff] %v6569_v16  ;;  %v1198_v3 = vpack.c.bf16 %v1175_v32, %v1174_v24  ;;  %v7958_v16 = vld [vmem:[#allocation25_spill] sm:$0xff] }
 0x191   : > { %1595 = vperm.xlu1 %4773, %v6218_v13   ;;  %v6572_v21 = vpop.permute.xlu1 %1327  ;;  %1839 = vperm.xlu0 %4788, %v7946_v58   ;;  %v982_v58 = vrot.slane %v7951_v19, 1 }
 0x193   : > { %2912 = vmatmul.mubr.bf16.gmra.mrb[44].mxu1 %v1197_v34  ;;  %v7955_v34 = vld [vmem:[#allocation10_spill] sm:$0xff]  ;;  %v6603_v59 = vsel %vm997_vm1, %v981_v56, %v982_v58  ;;  %v7963_v56 = vld [vmem:[#allocation13_spill] sm:$0xff] }
 0x194   : > { %2919 = vmatprep.mubr.bf16.mxu1 %v1374_v35  ;;  %v1388_v53 = vpop.permute.xlu0 %1387  ;;  %v1352_v55 = vmul.f32 %v6480_v48, %v7955_v34  ;;  %v7956_v35 = vld [vmem:[#allocation62_spill] sm:$0xff]  ;;  %7961 = vst [vmem:[#allocation12_spill] sm:$0xff] %v6603_v59  ;;  %v6607_v48 = vsel %vm997_vm1, %v982_v58, %v983_v54  ;;  %v1176_v24 = vmul.f32 %v7963_v56, %v6603_v59  ;;  %v7964_v58 = vld [vmem:[#allocation77_spill] sm:$0xff] }
 0x195   : > { %4774 = vset.pattern.permute.xlu1 %v7912_v38  ;;  %1847 = vperm.xlu0 %4788, %v7952_v27   ;;  %v1511_v18 = vmul.f32 %v1388_v53, %v7957_v6  ;;  %v466_v27 = vpack.c.bf16 %v7959_v25, %v7958_v16  ;;  %7962 = vst [vmem:[#allocation15_spill] sm:$0xff] %v6607_v48  ;;  %v7968_v25 = vld [vmem:[#allocation23_spill] sm:$0xff] }
 0x196   : > { %1491 = vperm.xlu1 %4774, %v7956_v35   ;;  %v1375_v35 = vpack.c.bf16 %v1353_v57, %v1352_v55  ;;  %v1177_v6 = vmul.f32 %v7964_v58, %v6607_v48  ;;  %v7966_v57 = vld [vmem:[#allocation2_spill] sm:$0xff] }
 0x197   : > { %v1384_v43 = vpop.permute.xlu1 %1383  ;;  %v984_v55 = vrot.slane %v7966_v57, 1 }
 0x198   : > { %v1510_v7 = vmul.f32 %v1384_v43, %v6342_v11  ;;  %v1400_v19 = vpop.permute.xlu0 %1399  ;;  %v4924_v43 = vld [vmem:[%s7575_s4 + $0x50] sm:$0xff]  ;;  %v1199_v34 = vpack.c.bf16 %v1177_v6, %v1176_v24 }
 0x199   : > { %1855 = vperm.xlu0 %4788, %v7960_v9  }
 0x19a   : > { %v1542_v53 = vpack.c.bf16 %v1511_v18, %v1510_v7  ;;  %4775 = vset.pattern.permute.xlu1 %v7893_v15  ;;  %v7965_v18 = vmov 7   ;;  %v7967_v7 = vld [vmem:[#allocation22_spill] sm:$0xff] }
 0x19b   : > { %1775 = vperm.xlu1 %4775, %v4924_v43   ;;  %v1392_v32 = vpop.permute.xlu1 %1391  ;;  %2920 = vmatmul.mubr.bf16.gmra.mrb[48].mxu1 %v1198_v3  ;;  %v985_v11 = vrot.slane %v7967_v7, 1  ;;  %v1355_v3 = vmul.f32 %v6468_v40, %v7968_v25  ;;  %v6634_v40 = vsel %vm997_vm1, %v983_v54, %v984_v55  ;;  %v1514_v25 = vmul.f32 %v1400_v19, %v6409_v45  ;;  %v7973_v54 = vld [vmem:[#allocation75_spill] sm:$0xff]  ;;  %v7975_v19 = vld [vmem:[#allocation48_spill] sm:$0xff] }
 0x19c   : > { %3016 = vmatprep.mubr.bf16.mxu0 %v1542_v53  ;;  %2927 = vmatprep.mubr.bf16.mxu1 %v1375_v35  ;;  %v1408_v9 = vpop.permute.xlu0 %1407  ;;  %v7969_v35 = vld [vmem:[#allocation4_spill] sm:$0xff]  ;;  %v1512_v58 = vmul.f32 %v1392_v32, %v6371_v0  ;;  %7971 = vst [vmem:[#allocation74_spill] sm:$0xff] %v6634_v40 }
 0x19d   : > { %3017 = vmatmul.mubr.bf16.vlgmr.msra.gmra.mrb[48].mxu0 %v466_v27  ;;  %4814 = vset.pattern.permute.xlu0 %v7965_v18  ;;  %v1354_v53 = vmul.f32 %v6498_v37, %v7969_v35  ;;  %v6638_v37 = vsel %vm997_vm1, %v984_v55, %v985_v11  ;;  %v7974_v55 = vld [vmem:[#allocation80_spill] sm:$0xff] }
 0x19e   : > { %1931 = vperm.xlu0 %4814, %v6192_v30   ;;  %v467_v30 = vpack.c.bf16 %v7914_v1, %v7970_v29  ;;  %7972 = vst [vmem:[#allocation9_spill] sm:$0xff] %v6638_v37  ;;  %v1179_v0 = vmul.f32 %v7974_v55, %v6638_v37 }
 0x19f   : > { %4776 = vset.pattern.permute.xlu1 %v7906_v20  ;;  %v1396_v56 = vpop.permute.xlu1 %1395 }
 0x1a0   : > { %v1513_v27 = vmul.f32 %v1396_v56, %v6375_v61  ;;  %1599 = vperm.xlu1 %4776, %v4924_v43   ;;  %v6628_v16 = vpop.permute.xlu0 %1415  ;;  %v1376_v56 = vpack.c.bf16 %v1355_v3, %v1354_v53  ;;  %v1178_v61 = vmul.f32 %v7973_v54, %v6634_v40  ;;  %v7978_v53 = vld [vmem:[#allocation54_spill] sm:$0xff]  ;;  %v1516_v54 = vmul.f32 %v1408_v9, %v6448_v22 }
 0x1a2   : > { %v1543_v32 = vpack.c.bf16 %v1513_v27, %v1512_v58  ;;  %1935 = vperm.xlu0 %4814, %v6130_v10   ;;  %v986_v58 = vrot.slane %v7975_v19, 1  ;;  %v7976_v10 = vld [vmem:[#allocation46_spill] sm:$0xff] }
 0x1a3   : > { %v1404_v35 = vpop.permute.xlu1 %1403  ;;  %2928 = vmatmul.mubr.bf16.gmra.mrb[52].mxu1 %v1199_v34  ;;  %v987_v3 = vrot.slane %v7976_v10, 1  ;;  %v7977_v34 = vld [vmem:[#allocation53_spill] sm:$0xff] }
 0x1a4   : > { %v1515_v6 = vmul.f32 %v1404_v35, %v6413_v44  ;;  %1603 = vperm.xlu1 %4776, %v6229_v2   ;;  %3024 = vmatprep.mubr.bf16.mxu0 %v1543_v32  ;;  %v6644_v24 = vpop.permute.xlu0 %1423  ;;  %v1357_v35 = vmul.f32 %v6482_v33, %v7977_v34  ;;  %v1356_v2 = vmul.f32 %v6509_v8, %v7978_v53  ;;  %v6665_v33 = vld [vmem:[%s7575_s4 + $0xe8] sm:$0xff] }
 0x1a5   : > { %2935 = vmatprep.mubr.bf16.mxu1 %v1376_v56  ;;  %3025 = vmatmul.mubr.bf16.gmra.mrb[52].mxu0 %v467_v30  ;;  %v1200_v44 = vpack.c.bf16 %v1179_v0, %v1178_v61 }
 0x1a6   : > { %v1544_v27 = vpack.c.bf16 %v1515_v6, %v1514_v25  ;;  %1947 = vperm.xlu0 %4814, %v6218_v13   ;;  %v7979_v13 = vld [vmem:[#allocation32_spill] sm:$0xff]  ;;  %v7980_v25 = vld [vmem:[#allocation34_spill] sm:$0xff]  ;;  %v6672_v6 = vsel %vm997_vm1, %v985_v11, %v986_v58  ;;  %v1377_v0 = vpack.c.bf16 %v1357_v35, %v1356_v2  ;;  %v7987_v35 = vld [vmem:[#allocation47_spill] sm:$0xff] }
 0x1a7   : > { %v1412_v32 = vpop.permute.xlu1 %1411  ;;  %v468_v8 = vpack.c.bf16 %v7980_v25, %v7979_v13  ;;  %7981 = vst [vmem:[#allocation62_spill] sm:$0xff] %v6672_v6  ;;  %v7985_v11 = vld [vmem:[#allocation78_spill] sm:$0xff]  ;;  %v7988_v2 = vld [vmem:[#allocation55_spill] sm:$0xff] }
 0x1a8   : > { %v1517_v55 = vmul.f32 %v1412_v32, %v6452_v26  ;;  %4777 = vset.pattern.permute.xlu1 %v7912_v38  ;;  %3032 = vmatprep.mubr.bf16.mxu0 %v1544_v27  ;;  %v6660_v30 = vpop.permute.xlu0 %1431  ;;  %v4214_v56 = vpop.f32.mrb[0].mxu0  ;;  %v6676_v27 = vsel %vm997_vm1, %v986_v58, %v987_v3  ;;  %v1180_v10 = vmul.f32 %v7985_v11, %v6672_v6  ;;  %v7986_v58 = vld [vmem:[#allocation82_spill] sm:$0xff] }
 0x1a9   : > { %1499 = vperm.xlu1 %4777, %v6665_v33   ;;  %v4215_v9 = vpop.f32.mrb[1].mxu0  ;;  %7982 = vst [vmem:[#allocation8_spill] sm:$0xff] %v6676_v27  ;;  %v1181_v19 = vmul.f32 %v7986_v58, %v6676_v27 }
 0x1aa   : > { %v6678_v61 = vadd.f32 %v4215_v9, %v4214_v56  ;;  %v4217_v32 = vpop.f32.mrb[2].mxu0  ;;  %1951 = vperm.xlu0 %4814, %v4924_v43   ;;  %v1545_v22 = vpack.c.bf16 %v1517_v55, %v1516_v54  ;;  %v988_v43 = vrot.slane %v7987_v35, 1  ;;  %v7989_v56 = vld [vmem:[#allocation65_spill] sm:$0xff]  ;;  %v7990_v55 = vld [vmem:[#allocation66_spill] sm:$0xff] }
 0x1ab   : > { %v1420_v34 = vpop.permute.xlu1 %1419  ;;  %2936 = vmatmul.mubr.bf16.gmra.mrb[56].mxu1 %v1200_v44  ;;  %v4218_v53 = vpop.f32.mrb[3].mxu0  ;;  %v989_v44 = vrot.slane %v7988_v2, 1  ;;  %v1359_v54 = vmul.f32 %v6500_v47, %v7989_v56  ;;  %v6698_v9 = vld [vmem:[%s7575_s4 + $0x60] sm:$0xff] }
 0x1ac   : > { %7983 = vst [vmem:[#allocation13_spill] sm:$0xff] %v6678_v61  ;;  %2943 = vmatprep.mubr.bf16.mxu1 %v1377_v0  ;;  %v6680_v26 = vpop.permute.xlu0 %1439  ;;  %v6682_v45 = vadd.f32 %v4218_v53, %v4217_v32  ;;  %v1358_v53 = vmul.f32 %v6528_v63, %v7990_v55  ;;  %7991 = vst [vmem:[#allocation2_spill] sm:$0xff] %v6698_v9  ;;  %v1518_v32 = vmul.f32 %v6628_v16, %v6487_v52  ;;  %v7993_v55 = vld [vmem:[#allocation37_spill] sm:$0xff] }
 0x1ad   : > { %4778 = vset.pattern.permute.xlu1 %v7893_v15  ;;  %3033 = vmatmul.mubr.bf16.gmra.mrb[56].mxu0 %v468_v8  ;;  %v7992_v8 = vld [vmem:[#allocation14_spill] sm:$0xff]  ;;  %v1519_v11 = vmul.f32 %v1420_v34, %v6491_v14  ;;  %v1201_v63 = vpack.c.bf16 %v1181_v19, %v1180_v10  ;;  %v6711_v2 = vsel %vm997_vm1, %v987_v3, %v988_v43 }
 0x1ae   : > { %7984 = vst [vmem:[#allocation77_spill] sm:$0xff] %v6682_v45  ;;  %1783 = vperm.xlu1 %4778, %v6698_v9   ;;  %3040 = vmatprep.mubr.bf16.mxu0 %v1545_v22  ;;  %v7994_v45 = vld [vmem:[#allocation38_spill] sm:$0xff]  ;;  %7995 = vst [vmem:[#allocation22_spill] sm:$0xff] %v6711_v2  ;;  %v6715_v22 = vsel %vm997_vm1, %v988_v43, %v989_v44  ;;  %v1378_v35 = vpack.c.bf16 %v1359_v54, %v1358_v53  ;;  %v6728_v43 = vld [vmem:[%s7575_s4 + $0x70] sm:$0xff] }
 0x1af   : > { %v1428_v0 = vpop.permute.xlu1 %1427  ;;  %1963 = vperm.xlu0 %4814, %v7992_v8   ;;  %v469_v61 = vpack.c.bf16 %v7994_v45, %v7993_v55  ;;  %7996 = vst [vmem:[#allocation27_spill] sm:$0xff] %v6715_v22  ;;  %v1546_v14 = vpack.c.bf16 %v1519_v11, %v1518_v32  ;;  %v8000_v53 = vld [vmem:[#allocation84_spill] sm:$0xff] }
 0x1b0   : > { %v4220_v47 = vpop.f32.mrb[4].mxu0  ;;  %v6705_v58 = vpop.permute.xlu0 %1447  ;;  %v8001_v32 = vld [vmem:[#allocation56_spill] sm:$0xff] }
 0x1b1   : > { %v4221_v56 = vpop.f32.mrb[5].mxu0  ;;  %v990_v11 = vrot.slane %v8001_v32, 1 }
 0x1b2   : > { %4779 = vset.pattern.permute.xlu1 %v7906_v20  ;;  %v6718_v16 = vadd.f32 %v4221_v56, %v4220_v47  ;;  %v4223_v34 = vpop.f32.mrb[6].mxu0  ;;  %v7999_v56 = vld [vmem:[#allocation81_spill] sm:$0xff]  ;;  %v1183_v47 = vmul.f32 %v8000_v53, %v6715_v22 }
 0x1b3   : > { %1607 = vperm.xlu1 %4779, %v6698_v9   ;;  %v1436_v19 = vpop.permute.xlu1 %1435  ;;  %v4224_v10 = vpop.f32.mrb[7].mxu0  ;;  %2944 = vmatmul.mubr.bf16.gmra.mrb[60].mxu1 %v1201_v63  ;;  %v1182_v54 = vmul.f32 %v7999_v56, %v6711_v2  ;;  %v8002_v63 = vld [vmem:[#allocation63_spill] sm:$0xff]  ;;  %v1520_v56 = vmul.f32 %v6644_v24, %v6516_v17 }
 0x1b4   : > { %7997 = vst [vmem:[#allocation75_spill] sm:$0xff] %v6718_v16  ;;  %v6721_v52 = vadd.f32 %v4224_v10, %v4223_v34  ;;  %2951 = vmatprep.mubr.bf16.mxu1 %v1378_v35  ;;  %v6723_v3 = vpop.permute.xlu0 %1455  ;;  %1967 = vperm.xlu0 %4814, %v6728_v43   ;;  %v991_v35 = vrot.slane %v8002_v63, 1  ;;  %v8003_v34 = vld [vmem:[#allocation73_spill] sm:$0xff]  ;;  %v8005_v63 = vld [vmem:[#allocation79_spill] sm:$0xff] }
 0x1b5   : > { %3041 = vmatmul.mubr.bf16.gmra.mrb[60].mxu0 %v469_v61  ;;  %v1361_v10 = vmul.f32 %v6511_v36, %v8003_v34  ;;  %v1521_v61 = vmul.f32 %v1428_v0, %v6520_v41  ;;  %v1202_v22 = vpack.c.bf16 %v1183_v47, %v1182_v54  ;;  %v8006_v34 = vld [vmem:[#allocation39_spill] sm:$0xff] }
 0x1b6   : > { %7998 = vst [vmem:[#allocation80_spill] sm:$0xff] %v6721_v52  ;;  %v8004_v52 = vld [vmem:[#allocation72_spill] sm:$0xff]  ;;  %3048 = vmatprep.mubr.bf16.mxu0 %v1546_v14  ;;  %v6754_v14 = vsel %vm997_vm1, %v989_v44, %v990_v11  ;;  %v6768_v44 = vld [vmem:[%s7575_s4 + $0xf8] sm:$0xff] }
 0x1b7   : > { %v1360_v16 = vmul.f32 %v6541_v4, %v8004_v52  ;;  %1611 = vperm.xlu1 %4779, %v7992_v8   ;;  %v6742_v9 = vpop.permute.xlu1 %1443  ;;  %v470_v4 = vpack.c.bf16 %v5632_v50, %v8006_v34  ;;  %8007 = vst [vmem:[#allocation32_spill] sm:$0xff] %v6754_v14  ;;  %v6758_v8 = vsel %vm997_vm1, %v990_v11, %v991_v35  ;;  %8010 = vst [vmem:[#allocation82_spill] sm:$0xff] %v6768_v44 }
 0x1b8   : > { %v4226_v53 = vpop.f32.mrb[8].mxu0  ;;  %v6747_v32 = vpop.permute.xlu0 %1463  ;;  %1979 = vperm.xlu0 %4814, %v8005_v63   ;;  %8008 = vst [vmem:[#allocation34_spill] sm:$0xff] %v6758_v8  ;;  %v1547_v47 = vpack.c.bf16 %v1521_v61, %v1520_v56  ;;  %v8014_v56 = vld [vmem:[#allocation64_spill] sm:$0xff]  ;;  %v8015_v61 = vld [vmem:[#allocation6_spill] sm:$0xff] }
 0x1b9   : > { %v4227_v36 = vpop.f32.mrb[9].mxu0  ;;  %v1379_v24 = vpack.c.bf16 %v1361_v10, %v1360_v16  ;;  %v8012_v10 = vld [vmem:[#allocation83_spill] sm:$0xff] }
 0x1ba   : > { %v6760_v0 = vadd.f32 %v4227_v36, %v4226_v53  ;;  %v4229_v52 = vpop.f32.mrb[10].mxu0  ;;  %v8013_v53 = vld [vmem:[#allocation86_spill] sm:$0xff] }
 0x1bb   : > { %4780 = vset.pattern.permute.xlu1 %v7912_v38  ;;  %v6763_v17 = vpop.permute.xlu1 %1451  ;;  %v4230_v54 = vpop.f32.mrb[11].mxu0  ;;  %2952 = vmatmul.mubr.bf16.gmra.mrb[64].mxu1 %v1202_v22  ;;  %v1184_v38 = vmul.f32 %v8012_v10, %v6754_v14  ;;  %v1185_v36 = vmul.f32 %v8013_v53, %v6758_v8  ;;  %v6782_v22 = vld [vmem:[%s7575_s4 + $0x90] sm:$0xff] }
 0x1bc   : > { %8009 = vst [vmem:[#allocation78_spill] sm:$0xff] %v6760_v0  ;;  %1507 = vperm.xlu1 %4780, %v6768_v44   ;;  %v6771_v11 = vadd.f32 %v4230_v54, %v4229_v52  ;;  %2959 = vmatprep.mubr.bf16.mxu1 %v1379_v24  ;;  %v6773_v16 = vpop.permute.xlu0 %1471  ;;  %v992_v52 = vrot.slane %v8014_v56, 1  ;;  %v993_v24 = vrot.slane %v8015_v61, 1  ;;  %v8016_v54 = vld [vmem:[#allocation7_spill] sm:$0xff] }
 0x1bd   : > { %3049 = vmatmul.mubr.bf16.gmra.mrb[64].mxu0 %v470_v4  ;;  %1983 = vperm.xlu0 %4814, %v6782_v22   ;;  %v1363_v41 = vmul.f32 %v6530_v51, %v8016_v54  ;;  %v8017_v44 = vld [vmem:[#allocation3_spill] sm:$0xff]  ;;  %v1522_v4 = vmul.f32 %v6660_v30, %v6548_v23  ;;  %v1203_v61 = vpack.c.bf16 %v1185_v36, %v1184_v38 }
 0x1be   : > { %8011 = vst [vmem:[#allocation14_spill] sm:$0xff] %v6771_v11  ;;  %v1362_v10 = vmul.f32 %v6560_v62, %v8017_v44  ;;  %3056 = vmatprep.mubr.bf16.mxu0 %v1547_v47  ;;  %v1523_v11 = vmul.f32 %v1436_v19, %v6552_v12  ;;  %v471_v62 = vpack.c.bf16 %v7935_v42, %v7932_v28  ;;  %v6805_v47 = vld [vmem:[%s7575_s4 + $0xa8] sm:$0xff] }
 0x1bf   : > { %v6791_v53 = vpop.permute.xlu1 %1459  ;;  %v6810_v30 = vsel %vm997_vm1, %v991_v35, %v992_v52  ;;  %v6814_v19 = vsel %vm997_vm1, %v992_v52, %v993_v24  ;;  %v4883_v35 = vld [vmem:[%s7574_s3 + $0x200] sm:$0xff]   ;;  %v8021_v52 = vld [vmem:[#allocation85_spill] sm:$0xff] }
 0x1c0   : > { %4781 = vset.pattern.permute.xlu1 %v7893_v15  ;;  %v4232_v0 = vpop.f32.mrb[12].mxu0  ;;  %v6797_v56 = vpop.permute.xlu0 %1479  ;;  %8018 = vst [vmem:[#allocation37_spill] sm:$0xff] %v6810_v30  ;;  %8019 = vst [vmem:[#allocation38_spill] sm:$0xff] %v6814_v19  ;;  %v1380_v38 = vpack.c.bf16 %v1363_v41, %v1362_v10  ;;  %v1548_v12 = vpack.c.bf16 %v1523_v11, %v1522_v4  ;;  %v1186_v8 = vmul.f32 %v8021_v52, %v6810_v30  ;;  %v8022_v41 = vld [vmem:[#allocation88_spill] sm:$0xff]  ;;  %v8023_v11 = vld [vmem:[#allocation21_spill] sm:$0xff] }
 0x1c1   : > { %1791 = vperm.xlu1 %4781, %v6728_v43   ;;  %v4233_v51 = vpop.f32.mrb[13].mxu0  ;;  %1995 = vperm.xlu0 %4814, %v6805_v47   ;;  %v6838_v10 = vld [vmem:[%s7575_s4 + $0xb0] sm:$0xff]  ;;  %v1524_v4 = vmul.f32 %v6680_v26, %v6577_v60  ;;  %v8025_v52 = vld [vmem:[#allocation50_spill] sm:$0xff] }
 0x1c2   : > { %v6816_v36 = vadd.f32 %v4233_v51, %v4232_v0  ;;  %v4235_v54 = vpop.f32.mrb[14].mxu0  ;;  %v1187_v0 = vmul.f32 %v8022_v41, %v6814_v19  ;;  %4670 = vmatprep.subr.bf16.mxu0 %v4883_v35  ;;  %v472_v41 = vpack.c.bf16 %v8025_v52, %v5738_v5  ;;  %v8029_v60 = vld [vmem:[#allocation76_spill] sm:$0xff] }
 0x1c3   : > { %v4236_v44 = vpop.f32.mrb[15].mxu0  ;;  %2960 = vmatmul.mubr.bf16.gmra.mrb[68].mxu1 %v1203_v61  ;;  %v8024_v61 = vld [vmem:[#allocation20_spill] sm:$0xff]  ;;  %4671 = vmatpush3.bf16.msra.mxu0 %v4883_v35 }
 0x1c4   : > { %v1740_v23 = vpop.permute.xlu1 %1739  ;;  %v6818_v28 = vadd.f32 %v4236_v44, %v4235_v54  ;;  %2967 = vmatprep.mubr.bf16.mxu1 %v1380_v38  ;;  %v6820_v42 = vpop.permute.xlu0 %1487  ;;  %v1365_v44 = vmul.f32 %v6543_v46, %v8023_v11  ;;  %v1364_v54 = vmul.f32 %v6572_v21, %v8024_v61  ;;  %v1525_v46 = vmul.f32 %v6742_v9, %v6581_v49  ;;  %v8026_v11 = vld [vmem:[#allocation5_spill] sm:$0xff] }
 0x1c5   : > { %4782 = vset.pattern.permute.xlu1 %v7906_v20  ;;  %3057 = vmatmul.mubr.bf16.gmra.mrb[68].mxu0 %v471_v62  ;;  %v1204_v21 = vpack.c.bf16 %v1187_v0, %v1186_v8  ;;  %v8027_v61 = vrot.slane %v8026_v11, 1  ;;  %v6864_v8 = vld [vmem:[%s7575_s4 + $0xc8] sm:$0xff] }
 0x1c6   : > { %8020 = vst [vmem:[#allocation81_spill] sm:$0xff] %v6818_v28  ;;  %1615 = vperm.xlu1 %4782, %v6728_v43   ;;  %3064 = vmatprep.mubr.bf16.mxu0 %v1548_v12  ;;  %v4884_v12 = vld [vmem:[%s7574_s3 + $0x208] sm:$0xff]   ;;  %v1381_v9 = vpack.c.bf16 %v1365_v44, %v1364_v54  ;;  %v1549_v0 = vpack.c.bf16 %v1525_v46, %v1524_v4  ;;  %v8033_v54 = vld [vmem:[#allocation26_spill] sm:$0xff]  ;;  %v6886_v46 = vld [vmem:[%s7575_s4 + $0xd0] sm:$0xff] }
 0x1c7   : > { %1999 = vperm.xlu0 %4814, %v6838_v10   ;;  %v6856_v26 = vsel %vm997_vm1, %v993_v24, %v8027_v61  ;;  %4672 = vmatprep.subr.bf16.mxu0 %v4884_v12  ;;  %v8032_v44 = vld [vmem:[#allocation87_spill] sm:$0xff] }
 0x1c8   : > { %v4238_v51 = vpop.f32.mrb[16].mxu0  ;;  %v6845_v62 = vpop.permute.xlu0 %1495  ;;  %8028 = vst [vmem:[#allocation84_spill] sm:$0xff] %v6856_v26  ;;  %4673 = vmatpush3.bf16.msra.mxu0 %v4884_v12  ;;  %v1188_v61 = vmul.f32 %v8032_v44, %v6856_v26  ;;  %v1526_v12 = vmul.f32 %v6705_v58, %v6603_v59  ;;  %v8037_v44 = vld [vmem:[#allocation61_spill] sm:$0xff] }
 0x1c9   : > { %v1560_v43 = vpop.permute.xlu1 %1559  ;;  %v4239_v38 = vpop.f32.mrb[17].mxu0 }
 0x1ca   : > { %1619 = vperm.xlu1 %4782, %v8029_v60   ;;  %v6859_v35 = vadd.f32 %v4239_v38, %v4238_v51  ;;  %v4241_v49 = vpop.f32.mrb[18].mxu0  ;;  %v4885_v60 = vld [vmem:[%s7574_s3 + $0x210] sm:$0xff]   ;;  %v8034_v51 = vld [vmem:[#allocation89_spill] sm:$0xff]  ;;  %v8035_v38 = vld [vmem:[#allocation103_spill] sm:$0xff] }
 0x1cb   : > { %v4242_v28 = vpop.f32.mrb[19].mxu0  ;;  %2968 = vmatmul.mubr.bf16.gmra.mrb[72].mxu1 %v1204_v21  ;;  %2011 = vperm.xlu0 %4814, %v6864_v8   ;;  %v1189_v21 = vmul.f32 %v8034_v51, %v8033_v54  ;;  %v1862_v4 = vmul.f32 %v8035_v38, %v7970_v29  ;;  %v1527_v29 = vmul.f32 %v6763_v17, %v6607_v48 }
 0x1cc   : > { %8030 = vst [vmem:[#allocation79_spill] sm:$0xff] %v6859_v35  ;;  %v6867_v31 = vadd.f32 %v4242_v28, %v4241_v49  ;;  %2975 = vmatprep.mubr.bf16.mxu1 %v1381_v9  ;;  %v6869_v24 = vpop.permute.xlu0 %1503  ;;  %v1863_v49 = vmul.f32 %v1740_v23, %v7914_v1  ;;  %4674 = vmatprep.subr.bf16.mxu0 %v4885_v60  ;;  %v4886_v23 = vld [vmem:[%s7574_s3 + $0x218] sm:$0xff]  }
 0x1cd   : > { %3065 = vmatmul.mubr.bf16.gmra.mrb[72].mxu0 %v472_v41  ;;  %v1550_v48 = vpack.c.bf16 %v1527_v29, %v1526_v12  ;;  %v8040_v12 = vld [vmem:[#allocation31_spill] sm:$0xff] }
 0x1ce   : > { %8031 = vst [vmem:[#allocation39_spill] sm:$0xff] %v6867_v31  ;;  %4783 = vset.pattern.permute.xlu1 %v7893_v15  ;;  %v1744_v28 = vpop.permute.xlu1 %1743  ;;  %3072 = vmatprep.mubr.bf16.mxu0 %v1549_v0  ;;  %v8036_v0 = vld [vmem:[#allocation60_spill] sm:$0xff]  ;;  %v1894_v38 = vpack.c.bf16 %v1863_v49, %v1862_v4  ;;  %v1686_v29 = vmul.f32 %v1560_v43, %v8040_v12 }
 0x1cf   : > { %1803 = vperm.xlu1 %4783, %v8005_v63   ;;  %2015 = vperm.xlu0 %4814, %v6886_v46   ;;  %v1205_v63 = vpack.c.bf16 %v1189_v21, %v1188_v61  ;;  %v473_v51 = vpack.c.bf16 %v8037_v44, %v8036_v0  ;;  %v4934_v61 = vld [vmem:[%s7575_s4 + $0x8] sm:$0xff] }
 0x1d0   : > { %v4244_v1 = vpop.f32.mrb[20].mxu0  ;;  %4675 = vmatpush3.bf16.msra.mxu0 %v4885_v60  ;;  %v4887_v60 = vld [vmem:[%s7574_s3 + $0x220] sm:$0xff]  }
 0x1d1   : > { %v6896_v41 = vpop.permute.xlu0 %1911  ;;  %v4245_v9 = vpop.f32.mrb[21].mxu0  ;;  %4676 = vmatprep.subr.bf16.mxu0 %v4886_v23 }
 0x1d2   : > { %v1748_v31 = vpop.permute.xlu1 %1747  ;;  %v6900_v58 = vadd.f32 %v4245_v9, %v4244_v1  ;;  %v4247_v59 = vpop.f32.mrb[22].mxu0  ;;  %v8041_v1 = vld [vmem:[#allocation33_spill] sm:$0xff] }
 0x1d3   : > { %4786 = vset.pattern.permute.xlu1 %v7965_v18  ;;  %v4248_v17 = vpop.f32.mrb[23].mxu0  ;;  %2976 = vmatmul.mubr.bf16.gmra.mrb[76].mxu1 %v1205_v63  ;;  %v1865_v4 = vmul.f32 %v1748_v31, %v7980_v25  ;;  %v6927_v31 = vld [vmem:[%s7575_s4 + $0x80] sm:$0xff] }
 0x1d4   : > { %8038 = vst [vmem:[#allocation83_spill] sm:$0xff] %v6900_v58  ;;  %1915 = vperm.xlu1 %4786, %v4934_v61   ;;  %v6906_v21 = vadd.f32 %v4248_v17, %v4247_v59  ;;  %3177 = vmatprep.mubr.bf16.mxu1 %v1894_v38  ;;  %v1528_v59 = vmul.f32 %v6723_v3, %v6634_v40  ;;  %v6935_v17 = vld [vmem:[%s7575_s4 + $0xf0] sm:$0xff] }
 0x1d5   : > { %3073 = vmatmul.mubr.bf16.gmra.mrb[76].mxu0 %v473_v51  ;;  %2027 = vperm.xlu0 %4814, %v6665_v33   ;;  %v1529_v38 = vmul.f32 %v6791_v53, %v6638_v37  ;;  %v1864_v51 = vmul.f32 %v1744_v28, %v7979_v13  ;;  %v8043_v13 = vld [vmem:[#allocation71_spill] sm:$0xff] }
 0x1d6   : > { %8039 = vst [vmem:[#allocation86_spill] sm:$0xff] %v6906_v21  ;;  %v1564_v49 = vpop.permute.xlu0 %1563  ;;  %3080 = vmatprep.mubr.bf16.mxu0 %v1550_v48  ;;  %4677 = vmatpush3.bf16.msra.mxu0 %v4886_v23  ;;  %v4888_v48 = vld [vmem:[%s7574_s3 + $0x228] sm:$0xff]   ;;  %v8042_v23 = vld [vmem:[#allocation68_spill] sm:$0xff] }
 0x1d7   : > { %v1687_v63 = vmul.f32 %v1564_v49, %v8041_v1  ;;  %v1572_v9 = vpop.permute.xlu1 %1571  ;;  %4678 = vmatprep.subr.bf16.mxu0 %v4887_v60  ;;  %v474_v28 = vpack.c.bf16 %v8043_v13, %v8042_v23  ;;  %v1895_v61 = vpack.c.bf16 %v1865_v4, %v1864_v51  ;;  %v1551_v37 = vpack.c.bf16 %v1529_v38, %v1528_v59  ;;  %v4889_v4 = vld [vmem:[%s7574_s3 + $0x230] sm:$0xff]   ;;  %v8046_v59 = vld [vmem:[#allocation35_spill] sm:$0xff] }
 0x1d8   : > { %4787 = vset.pattern.permute.xlu1 %v7906_v20  ;;  %v4250_v33 = vpop.f32.mrb[24].mxu0  ;;  %v4286_v25 = vpop.f32.mrb[0].mxu1  ;;  %v8044_v51 = vld [vmem:[#allocation36_spill] sm:$0xff]  ;;  %v1689_v38 = vmul.f32 %v1572_v9, %v8046_v59  ;;  %v4938_v9 = vld [vmem:[%s7575_s4 + $0x18] sm:$0xff] }
 0x1d9   : > { %v1718_v43 = vpack.c.bf16 %v1687_v63, %v1686_v29  ;;  %1623 = vperm.xlu1 %4787, %v6927_v31   ;;  %v4251_v3 = vpop.f32.mrb[25].mxu0  ;;  %v4287_v53 = vpop.f32.mrb[1].mxu1  ;;  %2031 = vperm.xlu0 %4814, %v6935_v17  }
 0x1da   : > { %v1568_v49 = vpop.permute.xlu0 %1567  ;;  %v6938_v12 = vadd.f32 %v4251_v3, %v4250_v33  ;;  %v6940_v29 = vadd.f32 %v4287_v53, %v4286_v25  ;;  %v4253_v1 = vpop.f32.mrb[26].mxu0  ;;  %4679 = vmatpush3.bf16.msra.mxu0 %v4887_v60  ;;  %v4937_v60 = vld [vmem:[%s7575_s4 + $0x10] sm:$0xff] }
 0x1db   : > { %v4289_v63 = vpop.f32.mrb[2].mxu1  ;;  %v4254_v40 = vpop.f32.mrb[27].mxu0  ;;  %3178 = vmatmul.mubr.bf16.vlgmr.msra.gmra.mrb[80].mxu1 %v1718_v43  ;;  %4680 = vmatprep.subr.bf16.mxu0 %v4888_v48  ;;  %v1688_v33 = vmul.f32 %v1568_v49, %v8044_v51  ;;  %v1530_v43 = vmul.f32 %v6747_v32, %v6672_v6 }
 0x1dc   : > { %v1468_v21 = vpop.permute.xlu1 %1467  ;;  %v6942_v58 = vadd.f32 %v4254_v40, %v4253_v1  ;;  %v4290_v35 = vpop.f32.mrb[3].mxu1  ;;  %3185 = vmatprep.mubr.bf16.mxu1 %v1895_v61  ;;  %v475_v1 = vpack.c.bf16 %v7966_v57, %v7953_v39 }
 0x1dd   : > { %v6948_v25 = vadd.f32 %v4290_v35, %v4289_v63  ;;  %4789 = vset.pattern.permute.xlu1 %v7965_v18  ;;  %3081 = vmatmul.mubr.bf16.gmra.mrb[80].mxu0 %v474_v28  ;;  %v1531_v35 = vmul.f32 %v1468_v21, %v6676_v27  ;;  %v4890_v28 = vld [vmem:[%s7574_s3 + $0x238] sm:$0xff]   ;;  %v1719_v61 = vpack.c.bf16 %v1689_v38, %v1688_v33 }
 0x1de   : > { %1919 = vperm.xlu1 %4789, %v4937_v60   ;;  %3088 = vmatprep.mubr.bf16.mxu0 %v1551_v37  ;;  %v6954_v40 = vpop.permute.xlu0 %1627 }
 0x1df   : > { %8045 = vst [vmem:[#allocation85_spill] sm:$0xff] %v6948_v25  ;;  %4681 = vmatpush3.bf16.msra.mxu0 %v4888_v48  ;;  %v1552_v33 = vpack.c.bf16 %v1531_v35, %v1530_v43 }
 0x1e0   : > { %v4256_v3 = vpop.f32.mrb[28].mxu0  ;;  %v4292_v53 = vpop.f32.mrb[4].mxu1  ;;  %4682 = vmatprep.subr.bf16.mxu0 %v4889_v4 }
 0x1e1   : > { %v1752_v49 = vpop.permute.xlu1 %1751  ;;  %v4257_v37 = vpop.f32.mrb[29].mxu0 }
 0x1e2   : > { %1923 = vperm.xlu1 %4789, %v4938_v9   ;;  %v6968_v32 = vadd.f32 %v4257_v37, %v4256_v3  ;;  %v4293_v21 = vpop.f32.mrb[5].mxu1  ;;  %v4259_v48 = vpop.f32.mrb[30].mxu0  ;;  %v1866_v59 = vmul.f32 %v1752_v49, %v7993_v55 }
 0x1e3   : > { %v6970_v63 = vadd.f32 %v4293_v21, %v4292_v53  ;;  %v1756_v51 = vpop.permute.xlu0 %1755  ;;  %v4295_v60 = vpop.f32.mrb[6].mxu1  ;;  %3186 = vmatmul.mubr.bf16.gmra.mrb[84].mxu1 %v1719_v61  ;;  %4683 = vmatpush3.bf16.msra.mxu0 %v4889_v4  ;;  %v6982_v4 = vld [vmem:[%s7575_s4 + $0x98] sm:$0xff]  ;;  %v8051_v21 = vld [vmem:[#allocation40_spill] sm:$0xff] }
 0x1e4   : > { %v1867_v38 = vmul.f32 %v1756_v51, %v7994_v45  ;;  %v4260_v27 = vpop.f32.mrb[31].mxu0  ;;  %v4296_v6 = vpop.f32.mrb[7].mxu1  ;;  %4684 = vmatprep.subr.bf16.mxu0 %v4890_v28 }
 0x1e5   : > { %8047 = vst [vmem:[#allocation88_spill] sm:$0xff] %v6970_v63  ;;  %v6974_v25 = vadd.f32 %v4260_v27, %v4259_v48  ;;  %v6976_v3 = vadd.f32 %v4296_v6, %v4295_v60  ;;  %3089 = vmatmul.mubr.bf16.gmra.mrb[84].mxu0 %v475_v1  ;;  %v8049_v6 = vld [vmem:[#allocation48_spill] sm:$0xff]  ;;  %v8050_v1 = vld [vmem:[#allocation41_spill] sm:$0xff] }
 0x1e6   : > { %v1896_v37 = vpack.c.bf16 %v1867_v38, %v1866_v59  ;;  %4790 = vset.pattern.permute.xlu1 %v7893_v15  ;;  %v1576_v53 = vpop.permute.xlu1 %1575  ;;  %3096 = vmatprep.mubr.bf16.mxu0 %v1552_v33  ;;  %v476_v43 = vpack.c.bf16 %v8049_v6, %v7967_v7  ;;  %v4940_v33 = vld [vmem:[%s7575_s4 + $0x20] sm:$0xff] }
 0x1e7   : > { %8048 = vst [vmem:[#allocation50_spill] sm:$0xff] %v6976_v3  ;;  %1811 = vperm.xlu1 %4790, %v6982_v4   ;;  %4685 = vmatpush3.bf16.msra.mxu0 %v4890_v28  ;;  %v1690_v9 = vmul.f32 %v1576_v53, %v8050_v1  ;;  %v1532_v53 = vmul.f32 %v6773_v16, %v6711_v2 }
 0x1e8   : > { %3193 = vmatprep.mubr.bf16.mxu1 %v1896_v37  ;;  %v4262_v45 = vpop.f32.mrb[32].mxu0 }
 0x1e9   : > { %v4298_v27 = vpop.f32.mrb[8].mxu1  ;;  %v4263_v55 = vpop.f32.mrb[33].mxu0 }
 0x1ea   : > { %v1580_v35 = vpop.permute.xlu1 %1579  ;;  %v6987_v61 = vadd.f32 %v4263_v55, %v4262_v45  ;;  %v4299_v49 = vpop.f32.mrb[9].mxu1 }
 0x1eb   : > { %v1691_v48 = vmul.f32 %v1580_v35, %v8051_v21  ;;  %v6991_v51 = vadd.f32 %v4299_v49, %v4298_v27  ;;  %4791 = vset.pattern.permute.xlu1 %v7965_v18  ;;  %v4265_v28 = vpop.f32.mrb[34].mxu0  ;;  %v4301_v60 = vpop.f32.mrb[10].mxu1  ;;  %v8054_v35 = vld [vmem:[#allocation27_spill] sm:$0xff] }
 0x1ec   : > { %1927 = vperm.xlu1 %4791, %v4940_v33   ;;  %v4266_v59 = vpop.f32.mrb[35].mxu0  ;;  %v4302_v38 = vpop.f32.mrb[11].mxu1 }
 0x1ed   : > { %8052 = vst [vmem:[#allocation76_spill] sm:$0xff] %v6991_v51  ;;  %v1720_v37 = vpack.c.bf16 %v1691_v48, %v1690_v9  ;;  %v6997_v45 = vadd.f32 %v4266_v59, %v4265_v28  ;;  %v6999_v55 = vadd.f32 %v4302_v38, %v4301_v60  ;;  %3097 = vmatmul.mubr.bf16.gmra.mrb[88].mxu0 %v476_v43  ;;  %v1764_v21 = vpop.permute.xlu0 %1763  ;;  %v8055_v48 = vld [vmem:[#allocation46_spill] sm:$0xff]  ;;  %v8056_v28 = vld [vmem:[#allocation47_spill] sm:$0xff] }
 0x1ee   : > { %v477_v60 = vpack.c.bf16 %v8056_v28, %v8055_v48 }
 0x1ef   : > { %8053 = vst [vmem:[#allocation87_spill] sm:$0xff] %v6999_v55  ;;  %v1476_v27 = vpop.permute.xlu1 %1475  ;;  %3194 = vmatmul.mubr.bf16.gmra.mrb[88].mxu1 %v1720_v37 }
 0x1f0   : > { %v1533_v49 = vmul.f32 %v1476_v27, %v8054_v35  ;;  %4792 = vset.pattern.permute.xlu1 %v7906_v20  ;;  %v4268_v1 = vpop.f32.mrb[36].mxu0  ;;  %v1869_v27 = vmul.f32 %v1764_v21, %v5632_v50 }
 0x1f1   : > { %1631 = vperm.xlu1 %4792, %v6782_v22   ;;  %v4304_v33 = vpop.f32.mrb[12].mxu1  ;;  %v4269_v9 = vpop.f32.mrb[37].mxu0 }
 0x1f2   : > { %v1553_v59 = vpack.c.bf16 %v1533_v49, %v1532_v53  ;;  %v7008_v43 = vadd.f32 %v4269_v9, %v4268_v1  ;;  %v4305_v38 = vpop.f32.mrb[13].mxu1  ;;  %v4271_v16 = vpop.f32.mrb[38].mxu0 }
 0x1f3   : > { %v7010_v2 = vadd.f32 %v4305_v38, %v4304_v33  ;;  %v4307_v37 = vpop.f32.mrb[14].mxu1  ;;  %v4272_v35 = vpop.f32.mrb[39].mxu0 }
 0x1f4   : > { %v1760_v55 = vpop.permute.xlu1 %1759  ;;  %v7013_v51 = vadd.f32 %v4272_v35, %v4271_v16  ;;  %v4308_v22 = vpop.f32.mrb[15].mxu1  ;;  %3104 = vmatprep.mubr.bf16.mxu0 %v1553_v59  ;;  %v4941_v35 = vld [vmem:[%s7575_s4 + $0x38] sm:$0xff]  ;;  %v8058_v59 = vld [vmem:[#allocation44_spill] sm:$0xff] }
 0x1f5   : > { %v1868_v3 = vmul.f32 %v1760_v55, %v8006_v34  ;;  %v7016_v63 = vadd.f32 %v4308_v22, %v4307_v37  ;;  %1635 = vperm.xlu1 %4792, %v6982_v4   ;;  %3105 = vmatmul.mubr.bf16.gmra.mrb[92].mxu0 %v477_v60  ;;  %v8057_v60 = vld [vmem:[#allocation45_spill] sm:$0xff] }
 0x1f7   : > { %v1897_v53 = vpack.c.bf16 %v1869_v27, %v1868_v3  ;;  %v1534_v27 = vmul.f32 %v6797_v56, %v6754_v14  ;;  %v8060_v56 = vld [vmem:[#allocation55_spill] sm:$0xff]  ;;  %v7050_v14 = vld [vmem:[%s7575_s4 + $0xa0] sm:$0xff] }
 0x1f8   : > { %v4274_v49 = vpop.f32.mrb[40].mxu0 }
 0x1f9   : > { %4793 = vset.pattern.permute.xlu1 %v7965_v18  ;;  %v1584_v1 = vpop.permute.xlu1 %1583  ;;  %3201 = vmatprep.mubr.bf16.mxu1 %v1897_v53  ;;  %v4275_v50 = vpop.f32.mrb[41].mxu0 }
 0x1fa   : > { %1939 = vperm.xlu1 %4793, %v4941_v35   ;;  %v7023_v21 = vadd.f32 %v4275_v50, %v4274_v49  ;;  %v4277_v34 = vpop.f32.mrb[42].mxu0  ;;  %v1692_v3 = vmul.f32 %v1584_v1, %v8057_v60  ;;  %v8059_v35 = vld [vmem:[#allocation34_spill] sm:$0xff] }
 0x1fb   : > { %v4278_v55 = vpop.f32.mrb[43].mxu0 }
 0x1fc   : > { %v7025_v33 = vadd.f32 %v4278_v55, %v4277_v34  ;;  %v1772_v55 = vpop.permute.xlu0 %1771 }
 0x1fd   : > { %v1588_v9 = vpop.permute.xlu1 %1587 }
 0x1fe   : > { %v1693_v38 = vmul.f32 %v1588_v9, %v8058_v59  ;;  %4794 = vset.pattern.permute.xlu1 %v7893_v15  ;;  %v4942_v9 = vld [vmem:[%s7575_s4 + $0x40] sm:$0xff] }
 0x1ff   : > { %1819 = vperm.xlu1 %4794, %v6805_v47  }
 0x200   : > { %v1721_v16 = vpack.c.bf16 %v1693_v38, %v1692_v3  ;;  %v4280_v37 = vpop.f32.mrb[44].mxu0  ;;  %v8061_v3 = vld [vmem:[#allocation56_spill] sm:$0xff] }
 0x201   : > { %v4281_v22 = vpop.f32.mrb[45].mxu0  ;;  %v478_v59 = vpack.c.bf16 %v8061_v3, %v8060_v56 }
 0x202   : > { %v1484_v53 = vpop.permute.xlu1 %1483  ;;  %v7033_v49 = vadd.f32 %v4281_v22, %v4280_v37  ;;  %3202 = vmatmul.mubr.bf16.gmra.mrb[92].mxu1 %v1721_v16  ;;  %v4283_v50 = vpop.f32.mrb[46].mxu0  ;;  %v8062_v37 = vld [vmem:[#allocation43_spill] sm:$0xff] }
 0x203   : > { %v1535_v34 = vmul.f32 %v1484_v53, %v8059_v35  ;;  %4795 = vset.pattern.permute.xlu1 %v7965_v18  ;;  %v4284_v1 = vpop.f32.mrb[47].mxu0  ;;  %v1871_v16 = vmul.f32 %v1772_v55, %v8062_v37  ;;  %v8063_v53 = vld [vmem:[#allocation42_spill] sm:$0xff] }
 0x204   : > { %1943 = vperm.xlu1 %4795, %v4942_v9   ;;  %v7040_v60 = vadd.f32 %v4284_v1, %v4283_v50  ;;  %v8065_v9 = vld [vmem:[#allocation51_spill] sm:$0xff] }
 0x205   : > { %v1554_v38 = vpack.c.bf16 %v1535_v34, %v1534_v27  ;;  %v8064_v34 = vld [vmem:[#allocation52_spill] sm:$0xff] }
 0x207   : > { %v1768_v22 = vpop.permute.xlu1 %1767  ;;  %3112 = vmatprep.mubr.bf16.mxu0 %v1554_v38 }
 0x208   : > { %v1870_v35 = vmul.f32 %v1768_v22, %v8063_v53  ;;  %4796 = vset.pattern.permute.xlu1 %v7906_v20  ;;  %3113 = vmatmul.mubr.bf16.gmra.mrb[96].mxu0 %v478_v59  ;;  %v4944_v59 = vld [vmem:[%s7575_s4 + $0x58] sm:$0xff]  ;;  %v1780_v22 = vpop.permute.xlu0 %1779 }
 0x209   : > { %1639 = vperm.xlu1 %4796, %v7050_v14   ;;  %v7067_v53 = vld [vmem:[%s7575_s4 + $0xb8] sm:$0xff] }
 0x20a   : > { %v1898_v50 = vpack.c.bf16 %v1871_v16, %v1870_v35  ;;  %v1536_v35 = vmul.f32 %v6820_v42, %v6810_v30  ;;  %v1873_v42 = vmul.f32 %v1780_v22, %v8025_v52  ;;  %v8070_v52 = vld [vmem:[#allocation59_spill] sm:$0xff]  ;;  %v8080_v30 = vld [vmem:[#allocation16_spill] sm:$0xff] }
 0x20c   : > { %v1592_v1 = vpop.permute.xlu1 %1591  ;;  %3209 = vmatprep.mubr.bf16.mxu1 %v1898_v50  ;;  %v8066_v50 = vld [vmem:[#allocation63_spill] sm:$0xff] }
 0x20d   : > { %1643 = vperm.xlu1 %4796, %v6805_v47   ;;  %v1694_v55 = vmul.f32 %v1592_v1, %v8064_v34  ;;  %v8067_v1 = vld [vmem:[#allocation64_spill] sm:$0xff] }
 0x210   : > { %v1596_v27 = vpop.permute.xlu1 %1595 }
 0x211   : > { %v1695_v38 = vmul.f32 %v1596_v27, %v8065_v9  ;;  %4797 = vset.pattern.permute.xlu1 %v7965_v18  ;;  %v479_v27 = vpack.c.bf16 %v8067_v1, %v8066_v50 }
 0x212   : > { %1955 = vperm.xlu1 %4797, %v4944_v59  }
 0x213   : > { %v1722_v37 = vpack.c.bf16 %v1695_v38, %v1694_v55  ;;  %v8068_v38 = vld [vmem:[#allocation2_spill] sm:$0xff] }
 0x215   : > { %v1492_v16 = vpop.permute.xlu1 %1491  ;;  %3210 = vmatmul.mubr.bf16.gmra.mrb[96].mxu1 %v1722_v37 }
 0x216   : > { %v1537_v47 = vmul.f32 %v1492_v16, %v6814_v19  ;;  %4798 = vset.pattern.permute.xlu1 %v7893_v15  ;;  %v8081_v19 = vld [vmem:[#allocation17_spill] sm:$0xff] }
 0x217   : > { %1827 = vperm.xlu1 %4798, %v7067_v53  }
 0x218   : > { %v1555_v34 = vpack.c.bf16 %v1537_v47, %v1536_v35  ;;  %v8069_v35 = vld [vmem:[#allocation58_spill] sm:$0xff] }
 0x21a   : > { %v1776_v55 = vpop.permute.xlu1 %1775  ;;  %3120 = vmatprep.mubr.bf16.mxu0 %v1555_v34 }
 0x21b   : > { %v1872_v9 = vmul.f32 %v1776_v55, %v5738_v5  ;;  %4799 = vset.pattern.permute.xlu1 %v7965_v18  ;;  %3121 = vmatmul.mubr.bf16.gmra.mrb[100].mxu0 %v479_v27  ;;  %v1538_v27 = vmul.f32 %v6845_v62, %v6856_v26  ;;  %v1788_v55 = vpop.permute.xlu0 %1787 }
 0x21c   : > { %1959 = vperm.xlu1 %4799, %v8068_v38  }
 0x21d   : > { %v1899_v59 = vpack.c.bf16 %v1873_v42, %v1872_v9  ;;  %v8071_v9 = vld [vmem:[#allocation6_spill] sm:$0xff] }
 0x21e   : > { %v480_v38 = vpack.c.bf16 %v8026_v11, %v8071_v9  ;;  %v481_v11 = vpack.c.bf16 %v8081_v19, %v8080_v30 }
 0x21f   : > { %v1600_v37 = vpop.permute.xlu1 %1599  ;;  %3217 = vmatprep.mubr.bf16.mxu1 %v1899_v59 }
 0x220   : > { %4800 = vset.pattern.permute.xlu1 %v7906_v20  ;;  %v1696_v47 = vmul.f32 %v1600_v37, %v8069_v35  ;;  %v1875_v37 = vmul.f32 %v1788_v55, %v8037_v44 }
 0x221   : > { %1647 = vperm.xlu1 %4800, %v6838_v10   ;;  %v4946_v10 = vld [vmem:[%s7575_s4 + $0x78] sm:$0xff] }
 0x223   : > { %v1604_v16 = vpop.permute.xlu1 %1603 }
 0x224   : > { %v1697_v22 = vmul.f32 %v1604_v16, %v8070_v52 }
 0x225   : > { %1651 = vperm.xlu1 %4800, %v7067_v53  }
 0x226   : > { %v1723_v5 = vpack.c.bf16 %v1697_v22, %v1696_v47 }
 0x228   : > { %v1500_v34 = vpop.permute.xlu1 %1499  ;;  %3218 = vmatmul.mubr.bf16.gmra.mrb[100].mxu1 %v1723_v5 }
 0x229   : > { %v1539_v42 = vmul.f32 %v1500_v34, %v8033_v54  ;;  %4801 = vset.pattern.permute.xlu1 %v7965_v18  ;;  %v8072_v54 = vld [vmem:[#allocation13_spill] sm:$0xff] }
 0x22a   : > { %1971 = vperm.xlu1 %4801, %v4946_v10   ;;  %v1796_v10 = vpop.permute.xlu0 %1795 }
 0x22b   : > { %v1556_v59 = vpack.c.bf16 %v1539_v42, %v1538_v27 }
 0x22d   : > { %v1784_v16 = vpop.permute.xlu1 %1783  ;;  %3128 = vmatprep.mubr.bf16.mxu0 %v1556_v59 }
 0x22e   : > { %v1874_v62 = vmul.f32 %v1784_v16, %v8036_v0  ;;  %4802 = vset.pattern.permute.xlu1 %v7893_v15  ;;  %3129 = vmatmul.mubr.bf16.gmra.mrb[104].mxu0 %v480_v38  ;;  %v4326_v35 = vpop.f32.mrb[16].mxu1  ;;  %v8073_v0 = vld [vmem:[#allocation77_spill] sm:$0xff]  ;;  %v1800_v38 = vpop.permute.xlu0 %1799  ;;  %v8074_v16 = vld [vmem:[#allocation70_spill] sm:$0xff] }
 0x22f   : > { %1835 = vperm.xlu1 %4802, %v6864_v8   ;;  %v4327_v47 = vpop.f32.mrb[17].mxu1 }
 0x230   : > { %v1900_v52 = vpack.c.bf16 %v1875_v37, %v1874_v62  ;;  %v4328_v22 = vadd.f32 %v4327_v47, %v4326_v35  ;;  %v4329_v5 = vpop.f32.mrb[18].mxu1  ;;  %v8075_v35 = vld [vmem:[#allocation69_spill] sm:$0xff] }
 0x231   : > { %v4330_v34 = vpop.f32.mrb[19].mxu1 }
 0x232   : > { %v7095_v27 = vadd.f32 %v4328_v22, %v8072_v54  ;;  %v1608_v44 = vpop.permute.xlu1 %1607  ;;  %v4331_v42 = vadd.f32 %v4330_v34, %v4329_v5  ;;  %3225 = vmatprep.mubr.bf16.mxu1 %v1900_v52  ;;  %v7108_v5 = vld [vmem:[%s7575_s4 + $0xc0] sm:$0xff] }
 0x233   : > { %4803 = vset.pattern.permute.xlu1 %v7965_v18  ;;  %v1698_v62 = vmul.f32 %v1608_v44, %v8074_v16  ;;  %v8076_v34 = vld [vmem:[#allocation90_spill] sm:$0xff]  ;;  %v8077_v44 = vld [vmem:[#allocation75_spill] sm:$0xff] }
 0x234   : > { %v7099_v55 = vadd.f32 %v4331_v42, %v8073_v0  ;;  %1975 = vperm.xlu1 %4803, %v6927_v31   ;;  %v1540_v42 = vmul.f32 %v6869_v24, %v8076_v34 }
 0x236   : > { %v1612_v59 = vpop.permute.xlu1 %1611  ;;  %v4332_v37 = vpop.f32.mrb[20].mxu1 }
 0x237   : > { %v1699_v47 = vmul.f32 %v1612_v59, %v8075_v35  ;;  %v4333_v26 = vpop.f32.mrb[21].mxu1  ;;  %v8079_v35 = vld [vmem:[#allocation91_spill] sm:$0xff] }
 0x238   : > { %4804 = vset.pattern.permute.xlu1 %v7906_v20  ;;  %v4334_v54 = vadd.f32 %v4333_v26, %v4332_v37  ;;  %v4335_v22 = vpop.f32.mrb[22].mxu1  ;;  %v7116_v26 = vpop.permute.xlu0 %1807  ;;  %v8078_v37 = vld [vmem:[#allocation80_spill] sm:$0xff] }
 0x239   : > { %v1724_v52 = vpack.c.bf16 %v1699_v47, %v1698_v62  ;;  %1655 = vperm.xlu1 %4804, %v7108_v5   ;;  %v4336_v31 = vpop.f32.mrb[23].mxu1 }
 0x23a   : > { %v7114_v0 = vadd.f32 %v4334_v54, %v8077_v44  ;;  %v4337_v59 = vadd.f32 %v4336_v31, %v4335_v22  ;;  %v1877_v54 = vmul.f32 %v1796_v10, %v8043_v13  ;;  %v8083_v10 = vld [vmem:[#allocation14_spill] sm:$0xff] }
 0x23b   : > { %v1508_v16 = vpop.permute.xlu1 %1507  ;;  %3226 = vmatmul.mubr.bf16.gmra.mrb[104].mxu1 %v1724_v52 }
 0x23c   : > { %v7119_v62 = vadd.f32 %v4337_v59, %v8078_v37  ;;  %v1541_v47 = vmul.f32 %v1508_v16, %v8079_v35  ;;  %v7128_v16 = vpop.permute.xlu0 %1815  ;;  %v8086_v35 = vld [vmem:[#allocation81_spill] sm:$0xff] }
 0x23d   : > { %1659 = vperm.xlu1 %4804, %v6864_v8   ;;  %v8082_v8 = vld [vmem:[#allocation78_spill] sm:$0xff] }
 0x23e   : > { %v1557_v9 = vpack.c.bf16 %v1541_v47, %v1540_v42  ;;  %v4338_v24 = vpop.f32.mrb[24].mxu1 }
 0x23f   : > { %v4339_v44 = vpop.f32.mrb[25].mxu1 }
 0x240   : > { %v1792_v22 = vpop.permute.xlu1 %1791  ;;  %v4340_v31 = vadd.f32 %v4339_v44, %v4338_v24  ;;  %3136 = vmatprep.mubr.bf16.mxu0 %v1557_v9  ;;  %v4341_v52 = vpop.f32.mrb[26].mxu1 }
 0x241   : > { %v1876_v34 = vmul.f32 %v1792_v22, %v8042_v23  ;;  %4805 = vset.pattern.permute.xlu1 %v7965_v18  ;;  %3137 = vmatmul.mubr.bf16.gmra.mrb[108].mxu0 %v481_v11  ;;  %v4342_v59 = vpop.f32.mrb[27].mxu1  ;;  %v7141_v11 = vld [vmem:[%s7575_s4 + $0xd8] sm:$0xff]  ;;  %v7144_v44 = vpop.permute.xlu0 %1823 }
 0x242   : > { %v7131_v37 = vadd.f32 %v4340_v31, %v8082_v8  ;;  %1987 = vperm.xlu1 %4805, %v6982_v4   ;;  %v4343_v42 = vadd.f32 %v4342_v59, %v4341_v52  ;;  %v8084_v31 = vld [vmem:[#allocation19_spill] sm:$0xff]  ;;  %v8085_v8 = vld [vmem:[#allocation18_spill] sm:$0xff] }
 0x243   : > { %v1901_v13 = vpack.c.bf16 %v1877_v54, %v1876_v34 }
 0x244   : > { %v7135_v47 = vadd.f32 %v4343_v42, %v8083_v10 }
 0x245   : > { %v1616_v9 = vpop.permute.xlu1 %1615  ;;  %3233 = vmatprep.mubr.bf16.mxu1 %v1901_v13 }
 0x246   : > { %4806 = vset.pattern.permute.xlu1 %v7893_v15  ;;  %v4344_v23 = vpop.f32.mrb[28].mxu1  ;;  %v1700_v52 = vmul.f32 %v1616_v9, %v8084_v31  ;;  %v8087_v31 = vld [vmem:[#allocation49_spill] sm:$0xff] }
 0x247   : > { %1843 = vperm.xlu1 %4806, %v7141_v11   ;;  %v4345_v24 = vpop.f32.mrb[29].mxu1 }
 0x248   : > { %v4346_v4 = vadd.f32 %v4345_v24, %v4344_v23  ;;  %v4347_v34 = vpop.f32.mrb[30].mxu1  ;;  %v1878_v23 = vmul.f32 %v1800_v38, %v7953_v39  ;;  %v7157_v24 = vpop.permute.xlu0 %1831  ;;  %v8088_v39 = vld [vmem:[#allocation79_spill] sm:$0xff] }
 0x249   : > { %v1620_v54 = vpop.permute.xlu1 %1619  ;;  %v4348_v22 = vpop.f32.mrb[31].mxu1 }
 0x24a   : > { %v7148_v59 = vadd.f32 %v4346_v4, %v6816_v36  ;;  %v1701_v42 = vmul.f32 %v1620_v54, %v8085_v8  ;;  %v4349_v13 = vadd.f32 %v4348_v22, %v4347_v34 }
 0x24b   : > { %4807 = vset.pattern.permute.xlu1 %v7965_v18 }
 0x24c   : > { %v1725_v10 = vpack.c.bf16 %v1701_v42, %v1700_v52  ;;  %v7153_v19 = vadd.f32 %v4349_v13, %v8086_v35  ;;  %1991 = vperm.xlu1 %4807, %v7050_v14   ;;  %v2038_v14 = vmul.f32 %v6896_v41, %v8087_v31  ;;  %v8089_v42 = vld [vmem:[#allocation39_spill] sm:$0xff] }
 0x24e   : > { %v1804_v30 = vpop.permute.xlu1 %1803  ;;  %3234 = vmatmul.mubr.bf16.gmra.mrb[108].mxu1 %v1725_v10  ;;  %v4350_v9 = vpop.f32.mrb[32].mxu1 }
 0x24f   : > { %v1879_v36 = vmul.f32 %v1804_v30, %v7966_v57  ;;  %v4351_v4 = vpop.f32.mrb[33].mxu1  ;;  %v8090_v30 = vld [vmem:[#allocation28_spill] sm:$0xff]  ;;  %v7171_v10 = vpop.permute.xlu0 %1839 }
 0x250   : > { %4808 = vset.pattern.permute.xlu1 %v7906_v20  ;;  %v4352_v34 = vadd.f32 %v4351_v4, %v4350_v9  ;;  %v4353_v54 = vpop.f32.mrb[34].mxu1  ;;  %v8091_v9 = vld [vmem:[#allocation11_spill] sm:$0xff] }
 0x251   : > { %v1902_v22 = vpack.c.bf16 %v1879_v36, %v1878_v23  ;;  %1663 = vperm.xlu1 %4808, %v6886_v46   ;;  %v4354_v35 = vpop.f32.mrb[35].mxu1  ;;  %v1703_v41 = vmul.f32 %v6954_v40, %v8091_v9  ;;  %v8094_v40 = vld [vmem:[#allocation86_spill] sm:$0xff] }
 0x252   : > { %v7165_v38 = vadd.f32 %v4352_v34, %v8088_v39  ;;  %v4355_v52 = vadd.f32 %v4354_v35, %v4353_v54  ;;  %v8093_v39 = vld [vmem:[#allocation83_spill] sm:$0xff] }
 0x253   : > { %v1916_v8 = vpop.permute.xlu1 %1915  ;;  %3241 = vmatprep.mubr.bf16.mxu1 %v1902_v22  ;;  %v8092_v22 = vld [vmem:[#allocation10_spill] sm:$0xff] }
 0x254   : > { %v7168_v57 = vadd.f32 %v4355_v52, %v8089_v42  ;;  %v2039_v13 = vmul.f32 %v1916_v8, %v8090_v30  ;;  %v7182_v8 = vpop.permute.xlu0 %1847 }
 0x255   : > { %1667 = vperm.xlu1 %4808, %v7141_v11  }
 0x256   : > { %v2070_v46 = vpack.c.bf16 %v2039_v13, %v2038_v14  ;;  %v4356_v23 = vpop.f32.mrb[36].mxu1 }
 0x257   : > { %v4357_v36 = vpop.f32.mrb[37].mxu1 }
 0x258   : > { %v1624_v4 = vpop.permute.xlu1 %1623  ;;  %v4358_v34 = vadd.f32 %v4357_v36, %v4356_v23  ;;  %4686 = vmatprep.mubr.bf16.mxu0 %v2070_v46  ;;  %v4359_v54 = vpop.f32.mrb[38].mxu1  ;;  %v4949_v23 = vld [vmem:[%s7575_s4 + $0xe8] sm:$0xff] }
 0x259   : > { %v1702_v35 = vmul.f32 %v1624_v4, %v8092_v22  ;;  %4809 = vset.pattern.permute.xlu1 %v7965_v18  ;;  %v4360_v31 = vpop.f32.mrb[39].mxu1  ;;  %v7191_v4 = vpop.permute.xlu0 %1855 }
 0x25a   : > { %v7179_v52 = vadd.f32 %v4358_v34, %v8093_v39  ;;  %2003 = vperm.xlu1 %4809, %v7067_v53   ;;  %v4361_v14 = vadd.f32 %v4360_v31, %v4359_v54  ;;  %8095 = vst [vmem:[#allocation89_spill] sm:$0xff] %v7191_v4  ;;  %v8096_v54 = vld [vmem:[#allocation94_spill] sm:$0xff]  ;;  %v8097_v31 = vld [vmem:[#allocation95_spill] sm:$0xff] }
 0x25b   : > { %v1726_v42 = vpack.c.bf16 %v1703_v41, %v1702_v35 }
 0x25c   : > { %v7185_v30 = vadd.f32 %v4361_v14, %v8094_v40 }
 0x25d   : > { %v1920_v13 = vpop.permute.xlu1 %1919  ;;  %3242 = vmatmul.mubr.bf16.gmra.mrb[112].mxu1 %v1726_v42 }
 0x25e   : > { %4810 = vset.pattern.permute.xlu1 %v7893_v15  ;;  %v4362_v46 = vpop.f32.mrb[40].mxu1  ;;  %v2040_v22 = vmul.f32 %v1920_v13, %v8096_v54  ;;  %v1932_v54 = vpop.permute.xlu0 %1931 }
 0x25f   : > { %1851 = vperm.xlu1 %4810, %v4949_v23   ;;  %v4363_v9 = vpop.f32.mrb[41].mxu1 }
 0x260   : > { %v4364_v36 = vadd.f32 %v4363_v9, %v4362_v46  ;;  %v4365_v53 = vpop.f32.mrb[42].mxu1  ;;  %v1880_v46 = vmul.f32 %v7116_v26, %v7967_v7 }
 0x261   : > { %v1924_v34 = vpop.permute.xlu1 %1923  ;;  %v4366_v41 = vpop.f32.mrb[43].mxu1 }
 0x262   : > { %v7195_v35 = vadd.f32 %v4364_v36, %v6938_v12  ;;  %v2041_v39 = vmul.f32 %v1924_v34, %v8097_v31  ;;  %v4367_v14 = vadd.f32 %v4366_v41, %v4365_v53 }
 0x263   : > { %4811 = vset.pattern.permute.xlu1 %v7965_v18 }
 0x264   : > { %v2071_v42 = vpack.c.bf16 %v2041_v39, %v2040_v22  ;;  %v7200_v40 = vadd.f32 %v4367_v14, %v6942_v58  ;;  %2007 = vperm.xlu1 %4811, %v7108_v5   ;;  %v4950_v58 = vld [vmem:[%s7575_s4 + $0xe0] sm:$0xff]  ;;  %v8098_v22 = vld [vmem:[#allocation97_spill] sm:$0xff]  ;;  %v8099_v14 = vld [vmem:[#allocation96_spill] sm:$0xff] }
 0x265   : > { %v2043_v31 = vmul.f32 %v1932_v54, %v8098_v22 }
 0x266   : > { %v1812_v9 = vpop.permute.xlu1 %1811  ;;  %4687 = vmatmul.mubr.bf16.vlgmr.msra.gmra.mrb[112].mxu0 %v2071_v42  ;;  %v4368_v13 = vpop.f32.mrb[44].mxu1 }
 0x267   : > { %v1881_v12 = vmul.f32 %v1812_v9, %v8049_v6  ;;  %v4369_v36 = vpop.f32.mrb[45].mxu1 }
 0x268   : > { %4812 = vset.pattern.permute.xlu1 %v7906_v20  ;;  %v4370_v53 = vadd.f32 %v4369_v36, %v4368_v13  ;;  %v4371_v34 = vpop.f32.mrb[46].mxu1 }
 0x269   : > { %v1903_v41 = vpack.c.bf16 %v1881_v12, %v1880_v46  ;;  %1671 = vperm.xlu1 %4812, %v4950_v58   ;;  %v4372_v5 = vpop.f32.mrb[47].mxu1 }
 0x26a   : > { %v7211_v7 = vadd.f32 %v4370_v53, %v6968_v32  ;;  %v4373_v26 = vadd.f32 %v4372_v5, %v4371_v34 }
 0x26b   : > { %v1928_v6 = vpop.permute.xlu1 %1927  ;;  %3249 = vmatprep.mubr.bf16.mxu1 %v1903_v41 }
 0x26c   : > { %v7215_v39 = vadd.f32 %v4373_v26, %v6974_v25  ;;  %v2042_v42 = vmul.f32 %v1928_v6, %v8099_v14  ;;  %v8100_v6 = vld [vmem:[#allocation4_spill] sm:$0xff] }
 0x26d   : > { %1675 = vperm.xlu1 %4812, %v4949_v23  }
 0x26e   : > { %v2072_v46 = vpack.c.bf16 %v2043_v31, %v2042_v42  ;;  %v4374_v9 = vpop.f32.mrb[48].mxu1 }
 0x26f   : > { %v4375_v13 = vpop.f32.mrb[49].mxu1 }
 0x270   : > { %v1632_v12 = vpop.permute.xlu1 %1631  ;;  %v4376_v36 = vadd.f32 %v4375_v13, %v4374_v9  ;;  %v4438_v4 = vpop.f32.mrb[48].mxu0  ;;  %4690 = vmatprep.mubr.bf16.mxu0 %v2072_v46  ;;  %v8101_v46 = vld [vmem:[#allocation23_spill] sm:$0xff] }
 0x271   : > { %4813 = vset.pattern.permute.xlu1 %v7965_v18  ;;  %v4377_v32 = vpop.f32.mrb[50].mxu1  ;;  %v4439_v53 = vpop.f32.mrb[49].mxu0  ;;  %v1704_v14 = vmul.f32 %v1632_v12, %v8100_v6 }
 0x272   : > { %v7220_v54 = vadd.f32 %v4376_v36, %v6987_v61  ;;  %v4440_v34 = vadd.f32 %v4439_v53, %v4438_v4  ;;  %2019 = vperm.xlu1 %4813, %v7141_v11   ;;  %v4378_v25 = vpop.f32.mrb[51].mxu1  ;;  %v4441_v41 = vpop.f32.mrb[50].mxu0  ;;  %v8102_v36 = vld [vmem:[#allocation82_spill] sm:$0xff] }
 0x273   : > { %v4379_v23 = vadd.f32 %v4378_v25, %v4377_v32  ;;  %v4442_v5 = vpop.f32.mrb[51].mxu0  ;;  %v1936_v9 = vpop.permute.xlu0 %1935 }
 0x274   : > { %v7224_v26 = vadd.f32 %v4440_v34, %v7095_v27  ;;  %v4443_v22 = vadd.f32 %v4442_v5, %v4441_v41  ;;  %v1636_v31 = vpop.permute.xlu1 %1635  ;;  %v8103_v34 = vld [vmem:[#allocation98_spill] sm:$0xff] }
 0x275   : > { %v7228_v42 = vadd.f32 %v4379_v23, %v6997_v45  ;;  %v1705_v61 = vmul.f32 %v1636_v31, %v8101_v46  ;;  %v2044_v12 = vmul.f32 %v1936_v9, %v8103_v34 }
 0x276   : > { %v7232_v4 = vadd.f32 %v4443_v22, %v7099_v55  ;;  %4815 = vset.pattern.permute.xlu1 %v7893_v15  ;;  %v4380_v11 = vpop.f32.mrb[52].mxu1  ;;  %v8104_v55 = vld [vmem:[#allocation99_spill] sm:$0xff] }
 0x277   : > { %v1727_v13 = vpack.c.bf16 %v1705_v61, %v1704_v14  ;;  %1859 = vperm.xlu1 %4815, %v8102_v36   ;;  %v4381_v27 = vpop.f32.mrb[53].mxu1  ;;  %v1948_v34 = vpop.permute.xlu0 %1947 }
 0x278   : > { %v4382_v32 = vadd.f32 %v4381_v27, %v4380_v11  ;;  %v4444_v53 = vpop.f32.mrb[52].mxu0  ;;  %v4383_v25 = vpop.f32.mrb[54].mxu1  ;;  %v1882_v11 = vmul.f32 %v7128_v16, %v8055_v48 }
 0x279   : > { %v1940_v45 = vpop.permute.xlu1 %1939  ;;  %v4445_v41 = vpop.f32.mrb[53].mxu0  ;;  %3250 = vmatmul.mubr.bf16.gmra.mrb[116].mxu1 %v1727_v13 }
 0x27a   : > { %v7238_v23 = vadd.f32 %v4382_v32, %v7008_v43  ;;  %v2045_v5 = vmul.f32 %v1940_v45, %v8104_v55  ;;  %v4446_v22 = vadd.f32 %v4445_v41, %v4444_v53  ;;  %v4384_v15 = vpop.f32.mrb[55].mxu1  ;;  %v4447_v31 = vpop.f32.mrb[54].mxu0  ;;  %v8105_v55 = vld [vmem:[#allocation101_spill] sm:$0xff] }
 0x27b   : > { %v4385_v6 = vadd.f32 %v4384_v15, %v4383_v25  ;;  %4816 = vset.pattern.permute.xlu1 %v7965_v18  ;;  %v4448_v14 = vpop.f32.mrb[55].mxu0 }
 0x27c   : > { %v2073_v46 = vpack.c.bf16 %v2045_v5, %v2044_v12  ;;  %v7243_v61 = vadd.f32 %v4446_v22, %v7114_v0  ;;  %v4449_v9 = vadd.f32 %v4448_v14, %v4447_v31  ;;  %2023 = vperm.xlu1 %4816, %v4950_v58  }
 0x27d   : > { %v7248_v43 = vadd.f32 %v4385_v6, %v7013_v51 }
 0x27e   : > { %v7251_v13 = vadd.f32 %v4449_v9, %v7119_v62  ;;  %v1820_v36 = vpop.permute.xlu1 %1819  ;;  %4691 = vmatmul.mubr.bf16.gmra.mrb[116].mxu0 %v2073_v46  ;;  %v4386_v27 = vpop.f32.mrb[56].mxu1 }
 0x27f   : > { %v1883_v32 = vmul.f32 %v1820_v36, %v8056_v28  ;;  %v4387_v53 = vpop.f32.mrb[57].mxu1  ;;  %v2047_v28 = vmul.f32 %v1948_v34, %v8105_v55 }
 0x280   : > { %4817 = vset.pattern.permute.xlu1 %v7906_v20  ;;  %v4388_v0 = vadd.f32 %v4387_v53, %v4386_v27  ;;  %v4450_v58 = vpop.f32.mrb[56].mxu0  ;;  %v4389_v12 = vpop.f32.mrb[58].mxu1 }
 0x281   : > { %v1904_v25 = vpack.c.bf16 %v1883_v32, %v1882_v11  ;;  %1679 = vperm.xlu1 %4817, %v6935_v17   ;;  %v4451_v51 = vpop.f32.mrb[57].mxu0  ;;  %v4390_v48 = vpop.f32.mrb[59].mxu1  ;;  %v8106_v17 = vld [vmem:[#allocation100_spill] sm:$0xff] }
 0x282   : > { %v7257_v62 = vadd.f32 %v4388_v0, %v7023_v21  ;;  %v4452_v16 = vadd.f32 %v4451_v51, %v4450_v58  ;;  %v4391_v45 = vadd.f32 %v4390_v48, %v4389_v12  ;;  %v4453_v41 = vpop.f32.mrb[58].mxu0  ;;  %v4951_v21 = vld [vmem:[%s7575_s4 + $0xf8] sm:$0xff] }
 0x283   : > { %v1944_v5 = vpop.permute.xlu1 %1943  ;;  %v4454_v22 = vpop.f32.mrb[59].mxu0  ;;  %3257 = vmatprep.mubr.bf16.mxu1 %v1904_v25 }
 0x284   : > { %v7261_v20 = vadd.f32 %v4452_v16, %v7131_v37  ;;  %v7264_v15 = vadd.f32 %v4391_v45, %v7025_v33  ;;  %v2046_v31 = vmul.f32 %v1944_v5, %v8106_v17  ;;  %v4455_v6 = vadd.f32 %v4454_v22, %v4453_v41  ;;  %v8107_v16 = vld [vmem:[#allocation54_spill] sm:$0xff]  ;;  %v8108_v41 = vld [vmem:[#allocation53_spill] sm:$0xff] }
 0x285   : > { %1683 = vperm.xlu1 %4817, %v4951_v21  }
 0x286   : > { %v2074_v14 = vpack.c.bf16 %v2047_v28, %v2046_v31  ;;  %v7271_v46 = vadd.f32 %v4455_v6, %v7135_v47  ;;  %v4392_v9 = vpop.f32.mrb[60].mxu1 }
 0x287   : > { %v4393_v11 = vpop.f32.mrb[61].mxu1 }
 0x288   : > { %v1640_v36 = vpop.permute.xlu1 %1639  ;;  %v4394_v37 = vadd.f32 %v4393_v11, %v4392_v9  ;;  %v4456_v27 = vpop.f32.mrb[60].mxu0  ;;  %4694 = vmatprep.mubr.bf16.mxu0 %v2074_v14 }
 0x289   : > { %4818 = vset.pattern.permute.xlu1 %v7965_v18  ;;  %v4395_v33 = vpop.f32.mrb[62].mxu1  ;;  %v4457_v32 = vpop.f32.mrb[61].mxu0  ;;  %v1706_v45 = vmul.f32 %v1640_v36, %v8107_v16  ;;  %v8110_v36 = vld [vmem:[#allocation102_spill] sm:$0xff] }
 0x28a   : > { %v7275_v53 = vadd.f32 %v4394_v37, %v7033_v49  ;;  %v4458_v34 = vadd.f32 %v4457_v32, %v4456_v27  ;;  %2035 = vperm.xlu1 %4818, %v4951_v21   ;;  %v4396_v0 = vpop.f32.mrb[63].mxu1  ;;  %v4459_v58 = vpop.f32.mrb[62].mxu0 }
 0x28b   : > { %v4397_v12 = vadd.f32 %v4396_v0, %v4395_v33  ;;  %v4460_v47 = vpop.f32.mrb[63].mxu0  ;;  %v1952_v49 = vpop.permute.xlu0 %1951 }
 0x28c   : > { %v7278_v25 = vadd.f32 %v4458_v34, %v7148_v59  ;;  %v4461_v51 = vadd.f32 %v4460_v47, %v4459_v58  ;;  %v1644_v48 = vpop.permute.xlu1 %1643  ;;  %v8109_v59 = vld [vmem:[#allocation57_spill] sm:$0xff]  ;;  %v1884_v47 = vmul.f32 %v7144_v44, %v8060_v56  ;;  %v8112_v56 = vld [vmem:[#allocation88_spill] sm:$0xff] }
 0x28d   : > { %v7282_v18 = vadd.f32 %v4397_v12, %v7040_v60  ;;  %v1707_v55 = vmul.f32 %v1644_v48, %v8108_v41  ;;  %v2048_v21 = vmul.f32 %v1952_v49, %v8109_v59 }
 0x28e   : > { %v7286_v28 = vadd.f32 %v4461_v51, %v7153_v19  ;;  %v4398_v5 = vpop.f32.mrb[64].mxu1  ;;  %v8111_v51 = vld [vmem:[#allocation85_spill] sm:$0xff] }
 0x28f   : > { %v1728_v22 = vpack.c.bf16 %v1707_v55, %v1706_v45  ;;  %v4399_v17 = vpop.f32.mrb[65].mxu1  ;;  %v1964_v49 = vpop.permute.xlu0 %1963 }
 0x290   : > { %v4400_v31 = vadd.f32 %v4399_v17, %v4398_v5  ;;  %v4462_v6 = vpop.f32.mrb[64].mxu0  ;;  %v4401_v14 = vpop.f32.mrb[66].mxu1 }
 0x291   : > { %v1956_v9 = vpop.permute.xlu1 %1955  ;;  %v4463_v11 = vpop.f32.mrb[65].mxu0  ;;  %3258 = vmatmul.mubr.bf16.gmra.mrb[120].mxu1 %v1728_v22 }
 0x292   : > { %v7290_v60 = vadd.f32 %v4400_v31, %v6940_v29  ;;  %v2049_v37 = vmul.f32 %v1956_v9, %v8110_v36  ;;  %v4464_v27 = vadd.f32 %v4463_v11, %v4462_v6  ;;  %v4402_v33 = vpop.f32.mrb[67].mxu1  ;;  %v4465_v19 = vpop.f32.mrb[66].mxu0 }
 0x293   : > { %v4403_v32 = vadd.f32 %v4402_v33, %v4401_v14  ;;  %v4466_v34 = vpop.f32.mrb[67].mxu0  ;;  %v8113_v14 = vld [vmem:[#allocation104_spill] sm:$0xff]  ;;  %v8115_v33 = vld [vmem:[#allocation67_spill] sm:$0xff] }
 0x294   : > { %v2075_v0 = vpack.c.bf16 %v2049_v37, %v2048_v21  ;;  %v7294_v58 = vadd.f32 %v4464_v27, %v7165_v38  ;;  %v4467_v12 = vadd.f32 %v4466_v34, %v4465_v19  ;;  %v2051_v9 = vmul.f32 %v1964_v49, %v8113_v14  ;;  %v8114_v37 = vld [vmem:[#allocation50_spill] sm:$0xff] }
 0x295   : > { %v7299_v48 = vadd.f32 %v4403_v32, %v8111_v51 }
 0x296   : > { %v7302_v29 = vadd.f32 %v4467_v12, %v7168_v57  ;;  %v1828_v16 = vpop.permute.xlu1 %1827  ;;  %4695 = vmatmul.mubr.bf16.gmra.mrb[120].mxu0 %v2075_v0  ;;  %v4404_v45 = vpop.f32.mrb[68].mxu1 }
 0x297   : > { %v1885_v41 = vmul.f32 %v1828_v16, %v8061_v3  ;;  %v4405_v55 = vpop.f32.mrb[69].mxu1 }
 0x298   : > { %v4406_v5 = vadd.f32 %v4405_v55, %v4404_v45  ;;  %v4468_v38 = vpop.f32.mrb[68].mxu0  ;;  %v4407_v22 = vpop.f32.mrb[70].mxu1 }
 0x299   : > { %v1905_v17 = vpack.c.bf16 %v1885_v41, %v1884_v47  ;;  %v4469_v31 = vpop.f32.mrb[69].mxu0  ;;  %v4408_v6 = vpop.f32.mrb[71].mxu1 }
 0x29a   : > { %v7306_v44 = vadd.f32 %v4406_v5, %v8112_v56  ;;  %v4470_v59 = vadd.f32 %v4469_v31, %v4468_v38  ;;  %v4409_v21 = vadd.f32 %v4408_v6, %v4407_v22  ;;  %v4471_v57 = vpop.f32.mrb[70].mxu0 }
 0x29b   : > { %v1960_v11 = vpop.permute.xlu1 %1959  ;;  %v4472_v36 = vpop.f32.mrb[71].mxu0  ;;  %3265 = vmatprep.mubr.bf16.mxu1 %v1905_v17 }
 0x29c   : > { %v7310_v3 = vadd.f32 %v4470_v59, %v7179_v52  ;;  %v7313_v27 = vadd.f32 %v4409_v21, %v8114_v37  ;;  %v2050_v19 = vmul.f32 %v1960_v11, %v8115_v33  ;;  %v4473_v32 = vadd.f32 %v4472_v36, %v4471_v57  ;;  %v8116_v52 = vld [vmem:[#allocation76_spill] sm:$0xff]  ;;  %v8117_v59 = vld [vmem:[#allocation66_spill] sm:$0xff]  ;;  %v8118_v57 = vld [vmem:[#allocation87_spill] sm:$0xff]  ;;  %v1968_v36 = vpop.permute.xlu0 %1967 }
 0x29e   : > { %v2076_v34 = vpack.c.bf16 %v2051_v9, %v2050_v19  ;;  %v7317_v0 = vadd.f32 %v4473_v32, %v7185_v30  ;;  %v4410_v12 = vpop.f32.mrb[72].mxu1  ;;  %v8119_v9 = vld [vmem:[#allocation65_spill] sm:$0xff] }
 0x29f   : > { %v4411_v47 = vpop.f32.mrb[73].mxu1 }
 0x2a0   : > { %v1648_v51 = vpop.permute.xlu1 %1647  ;;  %v4412_v16 = vadd.f32 %v4411_v47, %v4410_v12  ;;  %v4474_v45 = vpop.f32.mrb[72].mxu0  ;;  %4698 = vmatprep.mubr.bf16.mxu0 %v2076_v34 }
 0x2a1   : > { %v4413_v41 = vpop.f32.mrb[74].mxu1  ;;  %v4475_v55 = vpop.f32.mrb[73].mxu0  ;;  %v1708_v21 = vmul.f32 %v1648_v51, %v8117_v59 }
 0x2a2   : > { %v7320_v49 = vadd.f32 %v4412_v16, %v8116_v52  ;;  %v4476_v5 = vadd.f32 %v4475_v55, %v4474_v45  ;;  %v4414_v38 = vpop.f32.mrb[75].mxu1  ;;  %v4477_v22 = vpop.f32.mrb[74].mxu0  ;;  %v8121_v55 = vld [vmem:[#allocation15_spill] sm:$0xff] }
 0x2a3   : > { %v4415_v17 = vadd.f32 %v4414_v38, %v4413_v41  ;;  %v4478_v31 = vpop.f32.mrb[75].mxu0 }
 0x2a4   : > { %v7323_v6 = vadd.f32 %v4476_v5, %v7195_v35  ;;  %v4479_v30 = vadd.f32 %v4478_v31, %v4477_v22  ;;  %v1652_v56 = vpop.permute.xlu1 %1651  ;;  %v8120_v35 = vld [vmem:[#allocation12_spill] sm:$0xff] }
 0x2a5   : > { %v7327_v14 = vadd.f32 %v4415_v17, %v8118_v57  ;;  %v1709_v11 = vmul.f32 %v1652_v56, %v8119_v9  ;;  %v2052_v47 = vmul.f32 %v1968_v36, %v8120_v35  ;;  %v1886_v9 = vmul.f32 %v7157_v24, %v8066_v50  ;;  %v8123_v24 = vld [vmem:[#allocation74_spill] sm:$0xff] }
 0x2a6   : > { %v7331_v37 = vadd.f32 %v4479_v30, %v7200_v40  ;;  %v4416_v33 = vpop.f32.mrb[76].mxu1 }
 0x2a7   : > { %v1729_v19 = vpack.c.bf16 %v1709_v11, %v1708_v21  ;;  %v4417_v32 = vpop.f32.mrb[77].mxu1 }
 0x2a8   : > { %v4418_v34 = vadd.f32 %v4417_v32, %v4416_v33  ;;  %v4480_v12 = vpop.f32.mrb[76].mxu0  ;;  %v4419_v16 = vpop.f32.mrb[78].mxu1 }
 0x2a9   : > { %v1972_v45 = vpop.permute.xlu1 %1971  ;;  %v4481_v41 = vpop.f32.mrb[77].mxu0  ;;  %3266 = vmatmul.mubr.bf16.gmra.mrb[124].mxu1 %v1729_v19 }
 0x2aa   : > { %v7335_v51 = vadd.f32 %v4418_v34, %v7010_v2  ;;  %v2053_v52 = vmul.f32 %v1972_v45, %v8121_v55  ;;  %v4482_v5 = vadd.f32 %v4481_v41, %v4480_v12  ;;  %v4420_v38 = vpop.f32.mrb[79].mxu1  ;;  %v4483_v40 = vpop.f32.mrb[78].mxu0 }
 0x2ab   : > { %v4421_v22 = vadd.f32 %v4420_v38, %v4419_v16  ;;  %v4484_v17 = vpop.f32.mrb[79].mxu0  ;;  %v1980_v33 = vpop.permute.xlu0 %1979  ;;  %v8122_v16 = vld [vmem:[#allocation9_spill] sm:$0xff] }
 0x2ac   : > { %v2077_v31 = vpack.c.bf16 %v2053_v52, %v2052_v47  ;;  %v7339_v30 = vadd.f32 %v4482_v5, %v7211_v7  ;;  %v4485_v56 = vadd.f32 %v4484_v17, %v4483_v40  ;;  %v2055_v45 = vmul.f32 %v1980_v33, %v8122_v16 }
 0x2ad   : > { %v7342_v59 = vadd.f32 %v4421_v22, %v7016_v63 }
 0x2ae   : > { %v7345_v21 = vadd.f32 %v4485_v56, %v7215_v39  ;;  %v1836_v2 = vpop.permute.xlu1 %1835  ;;  %4699 = vmatmul.mubr.bf16.gmra.mrb[124].mxu0 %v2077_v31  ;;  %v4550_v57 = vpop.f32.mrb[80].mxu1 }
 0x2af   : > { %v1887_v11 = vmul.f32 %v1836_v2, %v8067_v1  ;;  %v4551_v36 = vpop.f32.mrb[81].mxu1 }
 0x2b0   : > { %v4486_v19 = vpop.f32.mrb[80].mxu0  ;;  %v4552_v7 = vadd.f32 %v4551_v36, %v4550_v57  ;;  %v4553_v32 = vpop.f32.mrb[82].mxu1 }
 0x2b1   : > { %v1906_v34 = vpack.c.bf16 %v1887_v11, %v1886_v9  ;;  %v4487_v12 = vpop.f32.mrb[81].mxu0  ;;  %v4554_v63 = vpop.f32.mrb[83].mxu1 }
 0x2b2   : > { %v4488_v35 = vadd.f32 %v4487_v12, %v4486_v19  ;;  %v4489_v47 = vpop.f32.mrb[82].mxu0  ;;  %v4555_v39 = vadd.f32 %v4554_v63, %v4553_v32  ;;  %v7352_v41 = vadd.f32 %v4552_v7, %v7224_v26  ;;  %v8125_v63 = vld [vmem:[#allocation73_spill] sm:$0xff] }
 0x2b3   : > { %v1976_v55 = vpop.permute.xlu1 %1975  ;;  %v4490_v50 = vpop.f32.mrb[83].mxu0  ;;  %3273 = vmatprep.mubr.bf16.mxu1 %v1906_v34  ;;  %v8124_v34 = vld [vmem:[#allocation72_spill] sm:$0xff] }
 0x2b4   : > { %v7355_v1 = vadd.f32 %v4488_v35, %v7220_v54  ;;  %v2054_v52 = vmul.f32 %v1976_v55, %v8123_v24  ;;  %v4491_v5 = vadd.f32 %v4490_v50, %v4489_v47  ;;  %v7359_v38 = vadd.f32 %v4555_v39, %v7232_v4 }
 0x2b6   : > { %v2078_v40 = vpack.c.bf16 %v2055_v45, %v2054_v52  ;;  %v7362_v22 = vadd.f32 %v4491_v5, %v7228_v42  ;;  %v4556_v17 = vpop.f32.mrb[84].mxu1  ;;  %v8126_v45 = vld [vmem:[#allocation62_spill] sm:$0xff]  ;;  %v8127_v52 = vld [vmem:[#allocation8_spill] sm:$0xff] }
 0x2b7   : > { %v4557_v31 = vpop.f32.mrb[85].mxu1 }
 0x2b8   : > { %v1656_v26 = vpop.permute.xlu1 %1655  ;;  %v4492_v56 = vpop.f32.mrb[84].mxu0  ;;  %v4558_v2 = vadd.f32 %v4557_v31, %v4556_v17  ;;  %4702 = vmatprep.mubr.bf16.mxu0 %v2078_v40 }
 0x2b9   : > { %v4493_v57 = vpop.f32.mrb[85].mxu0  ;;  %v4559_v9 = vpop.f32.mrb[86].mxu1  ;;  %v1710_v12 = vmul.f32 %v1656_v26, %v8124_v34  ;;  %v8129_v34 = vld [vmem:[#allocation5_spill] sm:$0xff] }
 0x2ba   : > { %v4494_v54 = vadd.f32 %v4493_v57, %v4492_v56  ;;  %v4495_v11 = vpop.f32.mrb[86].mxu0  ;;  %v4560_v36 = vpop.f32.mrb[87].mxu1  ;;  %v7365_v33 = vadd.f32 %v4558_v2, %v7243_v61 }
 0x2bb   : > { %v4561_v4 = vadd.f32 %v4560_v36, %v4559_v9  ;;  %v4496_v19 = vpop.f32.mrb[87].mxu0  ;;  %v1984_v61 = vpop.permute.xlu0 %1983 }
 0x2bc   : > { %v7368_v7 = vadd.f32 %v4494_v54, %v7238_v23  ;;  %v4497_v42 = vadd.f32 %v4496_v19, %v4495_v11  ;;  %v1660_v32 = vpop.permute.xlu1 %1659  ;;  %v2056_v55 = vmul.f32 %v1984_v61, %v8126_v45 }
 0x2bd   : > { %v1711_v35 = vmul.f32 %v1660_v32, %v8125_v63  ;;  %v7373_v47 = vadd.f32 %v4561_v4, %v7251_v13 }
 0x2be   : > { %v7376_v39 = vadd.f32 %v4497_v42, %v7248_v43  ;;  %v8128_v42 = vld [vmem:[#allocation6_spill] sm:$0xff] }
 0x2bf   : > { %v1730_v16 = vpack.c.bf16 %v1711_v35, %v1710_v12  ;;  %v1888_v32 = vmul.f32 %v7171_v10, %v8128_v42  ;;  %v1996_v35 = vpop.permute.xlu0 %1995  ;;  %v8131_v10 = vld [vmem:[#allocation22_spill] sm:$0xff] }
 0x2c0   : > { %v4498_v50 = vpop.f32.mrb[88].mxu0 }
 0x2c1   : > { %v1988_v24 = vpop.permute.xlu1 %1987  ;;  %v4499_v23 = vpop.f32.mrb[89].mxu0  ;;  %3274 = vmatmul.mubr.bf16.gmra.mrb[128].mxu1 %v1730_v16 }
 0x2c2   : > { %v2057_v5 = vmul.f32 %v1988_v24, %v8127_v52  ;;  %v4500_v40 = vadd.f32 %v4499_v23, %v4498_v50  ;;  %v4501_v17 = vpop.f32.mrb[90].mxu0  ;;  %v4562_v31 = vpop.f32.mrb[88].mxu1 }
 0x2c3   : > { %v4502_v26 = vpop.f32.mrb[91].mxu0  ;;  %v4563_v56 = vpop.f32.mrb[89].mxu1 }
 0x2c4   : > { %v2079_v13 = vpack.c.bf16 %v2057_v5, %v2056_v55  ;;  %v7381_v2 = vadd.f32 %v4500_v40, %v7257_v62  ;;  %v4503_v43 = vadd.f32 %v4502_v26, %v4501_v17  ;;  %v4564_v57 = vadd.f32 %v4563_v56, %v4562_v31  ;;  %v4565_v9 = vpop.f32.mrb[90].mxu1  ;;  %v8132_v26 = vld [vmem:[#allocation3_spill] sm:$0xff]  ;;  %v2000_v42 = vpop.permute.xlu0 %1999 }
 0x2c5   : > { %v4566_v54 = vpop.f32.mrb[91].mxu1 }
 0x2c6   : > { %v7384_v11 = vadd.f32 %v4503_v43, %v7264_v15  ;;  %v4567_v36 = vadd.f32 %v4566_v54, %v4565_v9  ;;  %v1844_v4 = vpop.permute.xlu1 %1843  ;;  %4703 = vmatmul.mubr.bf16.gmra.mrb[128].mxu0 %v2079_v13  ;;  %v7387_v19 = vadd.f32 %v4564_v57, %v7261_v20  ;;  %v8130_v15 = vld [vmem:[#allocation27_spill] sm:$0xff] }
 0x2c7   : > { %v1889_v12 = vmul.f32 %v1844_v4, %v8129_v34  ;;  %v2059_v45 = vmul.f32 %v1996_v35, %v8130_v15  ;;  %v8133_v13 = vld [vmem:[#allocation7_spill] sm:$0xff]  ;;  %v8135_v35 = vld [vmem:[#allocation34_spill] sm:$0xff] }
 0x2c8   : > { %v4504_v62 = vpop.f32.mrb[92].mxu0  ;;  %v7393_v63 = vadd.f32 %v4567_v36, %v7271_v46 }
 0x2c9   : > { %v1907_v16 = vpack.c.bf16 %v1889_v12, %v1888_v32  ;;  %v4505_v61 = vpop.f32.mrb[93].mxu0  ;;  %v8134_v12 = vld [vmem:[#allocation32_spill] sm:$0xff] }
 0x2ca   : > { %v4506_v55 = vadd.f32 %v4505_v61, %v4504_v62  ;;  %v4507_v50 = vpop.f32.mrb[94].mxu0  ;;  %v2060_v62 = vmul.f32 %v2000_v42, %v8134_v12 }
 0x2cb   : > { %v1992_v24 = vpop.permute.xlu1 %1991  ;;  %v4508_v23 = vpop.f32.mrb[95].mxu0  ;;  %3281 = vmatprep.mubr.bf16.mxu1 %v1907_v16 }
 0x2cc   : > { %v7397_v20 = vadd.f32 %v4506_v55, %v7275_v53  ;;  %v2058_v52 = vmul.f32 %v1992_v24, %v8131_v10  ;;  %v4509_v5 = vadd.f32 %v4508_v23, %v4507_v50 }
 0x2ce   : > { %v2080_v40 = vpack.c.bf16 %v2059_v45, %v2058_v52  ;;  %v7401_v46 = vadd.f32 %v4509_v5, %v7282_v18  ;;  %v8136_v52 = vld [vmem:[#allocation16_spill] sm:$0xff] }
 0x2cf   : > { %v1890_v5 = vmul.f32 %v7182_v8, %v8136_v52 }
 0x2d0   : > { %v1664_v17 = vpop.permute.xlu1 %1663  ;;  %4706 = vmatprep.mubr.bf16.mxu0 %v2080_v40  ;;  %v8137_v40 = vld [vmem:[#allocation17_spill] sm:$0xff] }
 0x2d1   : > { %v1712_v56 = vmul.f32 %v1664_v17, %v8132_v26 }
 0x2d4   : > { %v1668_v31 = vpop.permute.xlu1 %1667 }
 0x2d5   : > { %v1713_v43 = vmul.f32 %v1668_v31, %v8133_v13  ;;  %v4568_v57 = vpop.f32.mrb[92].mxu1 }
 0x2d6   : > { %v4569_v9 = vpop.f32.mrb[93].mxu1 }
 0x2d7   : > { %v1731_v54 = vpack.c.bf16 %v1713_v43, %v1712_v56  ;;  %v4570_v36 = vadd.f32 %v4569_v9, %v4568_v57  ;;  %v4571_v53 = vpop.f32.mrb[94].mxu1  ;;  %v2012_v56 = vpop.permute.xlu0 %2011  ;;  %v8138_v43 = vld [vmem:[#allocation38_spill] sm:$0xff]  ;;  %v8139_v9 = vld [vmem:[#allocation37_spill] sm:$0xff] }
 0x2d8   : > { %v4572_v4 = vpop.f32.mrb[95].mxu1  ;;  %v2063_v57 = vmul.f32 %v2012_v56, %v8138_v43 }
 0x2d9   : > { %v4573_v32 = vadd.f32 %v4572_v4, %v4571_v53  ;;  %v2004_v34 = vpop.permute.xlu1 %2003  ;;  %3282 = vmatmul.mubr.bf16.gmra.mrb[132].mxu1 %v1731_v54  ;;  %v7406_v18 = vadd.f32 %v4570_v36, %v7278_v25 }
 0x2da   : > { %v2061_v16 = vmul.f32 %v2004_v34, %v8135_v35 }
 0x2db   : > { %v4510_v61 = vpop.f32.mrb[96].mxu0  ;;  %v7411_v15 = vadd.f32 %v4573_v32, %v7286_v28 }
 0x2dc   : > { %v2081_v45 = vpack.c.bf16 %v2061_v16, %v2060_v62  ;;  %v4511_v55 = vpop.f32.mrb[97].mxu0  ;;  %v8140_v62 = vld [vmem:[#allocation20_spill] sm:$0xff]  ;;  %v8141_v16 = vld [vmem:[#allocation21_spill] sm:$0xff] }
 0x2dd   : > { %v4512_v50 = vadd.f32 %v4511_v55, %v4510_v61  ;;  %v4513_v24 = vpop.f32.mrb[98].mxu0 }
 0x2de   : > { %v1852_v23 = vpop.permute.xlu1 %1851  ;;  %v4514_v10 = vpop.f32.mrb[99].mxu0  ;;  %4707 = vmatmul.mubr.bf16.gmra.mrb[132].mxu0 %v2081_v45 }
 0x2df   : > { %v7416_v25 = vadd.f32 %v4512_v50, %v7290_v60  ;;  %v1891_v17 = vmul.f32 %v1852_v23, %v8137_v40  ;;  %v4515_v31 = vadd.f32 %v4514_v10, %v4513_v24  ;;  %v2016_v23 = vpop.permute.xlu0 %2015 }
 0x2e1   : > { %v1908_v26 = vpack.c.bf16 %v1891_v17, %v1890_v5  ;;  %v7420_v28 = vadd.f32 %v4515_v31, %v7299_v48  ;;  %v8142_v17 = vld [vmem:[#allocation84_spill] sm:$0xff] }
 0x2e2   : > { %v2064_v31 = vmul.f32 %v2016_v23, %v8142_v17 }
 0x2e3   : > { %v2008_v13 = vpop.permute.xlu1 %2007  ;;  %3289 = vmatprep.mubr.bf16.mxu1 %v1908_v26  ;;  %v8143_v26 = vld [vmem:[#allocation26_spill] sm:$0xff] }
 0x2e4   : > { %v2062_v54 = vmul.f32 %v2008_v13, %v8139_v9  ;;  %v8144_v9 = vld [vmem:[#allocation25_spill] sm:$0xff] }
 0x2e6   : > { %v2082_v36 = vpack.c.bf16 %v2063_v57, %v2062_v54  ;;  %v8145_v54 = vld [vmem:[#allocation89_spill] sm:$0xff] }
 0x2e8   : > { %v1672_v53 = vpop.permute.xlu1 %1671  ;;  %v4574_v8 = vpop.f32.mrb[96].mxu1  ;;  %4710 = vmatprep.mubr.bf16.mxu0 %v2082_v36  ;;  %v1892_v36 = vmul.f32 %v8145_v54, %v8144_v9 }
 0x2e9   : > { %v4575_v60 = vpop.f32.mrb[97].mxu1  ;;  %v1714_v35 = vmul.f32 %v1672_v53, %v8140_v62  ;;  %v8146_v53 = vld [vmem:[#allocation24_spill] sm:$0xff] }
 0x2ea   : > { %v4576_v4 = vadd.f32 %v4575_v60, %v4574_v8  ;;  %v4577_v42 = vpop.f32.mrb[98].mxu1 }
 0x2eb   : > { %v4578_v32 = vpop.f32.mrb[99].mxu1 }
 0x2ec   : > { %v4579_v34 = vadd.f32 %v4578_v32, %v4577_v42  ;;  %v1676_v12 = vpop.permute.xlu1 %1675  ;;  %v7425_v48 = vadd.f32 %v4576_v4, %v7294_v58  ;;  %v2028_v4 = vpop.permute.xlu0 %2027 }
 0x2ed   : > { %v1715_v61 = vmul.f32 %v1676_v12, %v8141_v16  ;;  %v8148_v12 = vld [vmem:[#allocation90_spill] sm:$0xff] }
 0x2ee   : > { %v4516_v45 = vpop.f32.mrb[100].mxu0  ;;  %v7430_v55 = vadd.f32 %v4579_v34, %v7302_v29 }
 0x2ef   : > { %v1732_v50 = vpack.c.bf16 %v1715_v61, %v1714_v35  ;;  %v4517_v24 = vpop.f32.mrb[101].mxu0 }
 0x2f0   : > { %v4518_v10 = vadd.f32 %v4517_v24, %v4516_v45  ;;  %v4519_v52 = vpop.f32.mrb[102].mxu0  ;;  %v2032_v54 = vpop.permute.xlu0 %2031 }
 0x2f1   : > { %v2020_v5 = vpop.permute.xlu1 %2019  ;;  %v4520_v40 = vpop.f32.mrb[103].mxu0  ;;  %3290 = vmatmul.mubr.bf16.gmra.mrb[136].mxu1 %v1732_v50 }
 0x2f2   : > { %v7434_v58 = vadd.f32 %v4518_v10, %v7306_v44  ;;  %v2065_v56 = vmul.f32 %v2020_v5, %v8143_v26  ;;  %v4521_v13 = vadd.f32 %v4520_v40, %v4519_v52  ;;  %v8147_v44 = vld [vmem:[#allocation91_spill] sm:$0xff] }
 0x2f3   : > { %v2067_v34 = vmul.f32 %v2028_v4, %v8147_v44  ;;  %v8152_v4 = vld [vmem:[#allocation92_spill] sm:$0xff] }
 0x2f4   : > { %v2083_v43 = vpack.c.bf16 %v2065_v56, %v2064_v31  ;;  %v7438_v29 = vadd.f32 %v4521_v13, %v7313_v27  ;;  %v8149_v56 = vld [vmem:[#allocation30_spill] sm:$0xff] }
 0x2f6   : > { %v1860_v57 = vpop.permute.xlu1 %1859  ;;  %4711 = vmatmul.mubr.bf16.gmra.mrb[136].mxu0 %v2083_v43 }
 0x2f7   : > { %v1893_v8 = vmul.f32 %v1860_v57, %v8146_v53  ;;  %v8150_v57 = vld [vmem:[#allocation29_spill] sm:$0xff] }
 0x2f9   : > { %v1909_v60 = vpack.c.bf16 %v1893_v8, %v1892_v36  ;;  %v8151_v8 = vld [vmem:[#allocation93_spill] sm:$0xff] }
 0x2fb   : > { %v2024_v42 = vpop.permute.xlu1 %2023  ;;  %v4580_v32 = vpop.f32.mrb[100].mxu1  ;;  %3297 = vmatprep.mubr.bf16.mxu1 %v1909_v60  ;;  %v2068_v60 = vmul.f32 %v2032_v54, %v8151_v8 }
 0x2fc   : > { %v2066_v62 = vmul.f32 %v2024_v42, %v8148_v12  ;;  %v4581_v35 = vpop.f32.mrb[101].mxu1 }
 0x2fd   : > { %v4582_v16 = vadd.f32 %v4581_v35, %v4580_v32  ;;  %v4583_v27 = vpop.f32.mrb[102].mxu1 }
 0x2fe   : > { %v2084_v61 = vpack.c.bf16 %v2067_v34, %v2066_v62  ;;  %v4584_v45 = vpop.f32.mrb[103].mxu1 }
 0x2ff   : > { %v4585_v50 = vadd.f32 %v4584_v45, %v4583_v27  ;;  %v7446_v24 = vadd.f32 %v4582_v16, %v7310_v3 }
 0x300   : > { %v1680_v23 = vpop.permute.xlu1 %1679  ;;  %4714 = vmatprep.mubr.bf16.mxu0 %v2084_v61 }
 0x301   : > { %v4522_v10 = vpop.f32.mrb[104].mxu0  ;;  %v7449_v52 = vadd.f32 %v4585_v50, %v7317_v0  ;;  %v1716_v13 = vmul.f32 %v1680_v23, %v8149_v56 }
 0x302   : > { %v4523_v5 = vpop.f32.mrb[105].mxu0 }
 0x303   : > { %v4524_v40 = vadd.f32 %v4523_v5, %v4522_v10  ;;  %v4525_v17 = vpop.f32.mrb[106].mxu0 }
 0x304   : > { %v1684_v31 = vpop.permute.xlu1 %1683  ;;  %v4526_v26 = vpop.f32.mrb[107].mxu0 }
 0x305   : > { %v7453_v43 = vadd.f32 %v4524_v40, %v7320_v49  ;;  %v1717_v9 = vmul.f32 %v1684_v31, %v8150_v57  ;;  %v4527_v3 = vadd.f32 %v4526_v26, %v4525_v17 }
 0x307   : > { %v1733_v36 = vpack.c.bf16 %v1717_v9, %v1716_v13  ;;  %v7457_v53 = vadd.f32 %v4527_v3, %v7327_v14 }
 0x309   : > { %v2036_v0 = vpop.permute.xlu1 %2035  ;;  %3298 = vmatmul.mubr.bf16.gmra.mrb[140].mxu1 %v1733_v36 }
 0x30a   : > { %v2069_v42 = vmul.f32 %v2036_v0, %v8152_v4 }
 0x30c   : > { %v2085_v32 = vpack.c.bf16 %v2069_v42, %v2068_v60 }
 0x30e   : > { %v4586_v44 = vpop.f32.mrb[104].mxu1  ;;  %4715 = vmatmul.mubr.bf16.gmra.mrb[140].mxu0 %v2085_v32 }
 0x30f   : > { %v4587_v34 = vpop.f32.mrb[105].mxu1 }
 0x310   : > { %v4588_v49 = vadd.f32 %v4587_v34, %v4586_v44  ;;  %v4589_v12 = vpop.f32.mrb[106].mxu1 }
 0x311   : > { %v4590_v62 = vpop.f32.mrb[107].mxu1 }
 0x312   : > { %v4591_v35 = vadd.f32 %v4590_v62, %v4589_v12  ;;  %v7462_v16 = vadd.f32 %v4588_v49, %v7323_v6 }
 0x314   : > { %v4528_v27 = vpop.f32.mrb[108].mxu0  ;;  %v7465_v14 = vadd.f32 %v4591_v35, %v7331_v37 }
 0x315   : > { %v4529_v61 = vpop.f32.mrb[109].mxu0 }
 0x316   : > { %v4530_v45 = vadd.f32 %v4529_v61, %v4528_v27  ;;  %v4531_v50 = vpop.f32.mrb[110].mxu0 }
 0x317   : > { %v4532_v23 = vpop.f32.mrb[111].mxu0 }
 0x318   : > { %v7468_v10 = vadd.f32 %v4530_v45, %v7335_v51  ;;  %v4533_v5 = vadd.f32 %v4532_v23, %v4531_v50 }
 0x31a   : > { %v7471_v40 = vadd.f32 %v4533_v5, %v7342_v59 }
 0x321   : > { %v4592_v17 = vpop.f32.mrb[108].mxu1 }
 0x322   : > { %v4593_v31 = vpop.f32.mrb[109].mxu1 }
 0x323   : > { %v4594_v26 = vadd.f32 %v4593_v31, %v4592_v17  ;;  %v4595_v6 = vpop.f32.mrb[110].mxu1 }
 0x324   : > { %v4596_v56 = vpop.f32.mrb[111].mxu1 }
 0x325   : > { %v4597_v13 = vadd.f32 %v4596_v56, %v4595_v6  ;;  %v7474_v37 = vadd.f32 %v4594_v26, %v7339_v30 }
 0x327   : > { %v7477_v57 = vadd.f32 %v4597_v13, %v7345_v21 }
 0x330   : > { %v4598_v9 = vpop.f32.mrb[112].mxu1 }
 0x331   : > { %v4599_v51 = vpop.f32.mrb[113].mxu1 }
 0x332   : > { %v4600_v3 = vadd.f32 %v4599_v51, %v4598_v9  ;;  %v4601_v54 = vpop.f32.mrb[114].mxu1 }
 0x333   : > { %v4602_v36 = vpop.f32.mrb[115].mxu1 }
 0x334   : > { %v4603_v59 = vadd.f32 %v4602_v36, %v4601_v54  ;;  %v7480_v0 = vadd.f32 %v4600_v3, %v7355_v1 }
 0x336   : > { %v7483_v8 = vadd.f32 %v4603_v59, %v7362_v22 }
 0x339   : > { %v4688_v60 = vpop.f32.mrb[112].mxu0 }
 0x33a   : > { %v3349_v30 = vadd.f32 %v4688_v60, %v7365_v33  ;;  %v3340_v4 = vpop.f32.mrb[113].mxu0 }
 0x33b   : > { %v3341_v21 = vadd.f32 %v3340_v4, %v7352_v41  ;;  %v4689_v42 = vpop.f32.mrb[114].mxu0 }
 0x33c   : > { %v3352_v32 = vadd.f32 %v4689_v42, %v7373_v47  ;;  %v3343_v44 = vpop.f32.mrb[115].mxu0 }
 0x33d   : > { %v3344_v1 = vadd.f32 %v3343_v44, %v7359_v38 }
 0x33e   : > { %v3468_v22 = vpack.c.bf16 %v3352_v32, %v3349_v30 }
 0x33f   : > { %v3467_v34 = vpack.c.bf16 %v3344_v1, %v3341_v21 }
 0x340   : > { %4183 = vst [vmem:[%s7493_s8 + $0x8] sm:$0xff] %v3468_v22   ;;  %v3629_v33 = vunpack.c.l.bf16 %v3468_v22  ;;  %v3630_v12 = vunpack.c.h.bf16 %v3468_v22 }
 0x341   : > { %4092 = vst [vmem:[%s7493_s8] sm:$0xff] %v3467_v34   ;;  %v3627_v41 = vunpack.c.l.bf16 %v3467_v34  ;;  %v3628_v49 = vunpack.c.h.bf16 %v3467_v34 }
 0x342   : > { %v3698_v27 = vmul.f32 %v3629_v33, %v3629_v33  ;;  %v3699_v50 = vmul.f32 %v3630_v12, %v3630_v12 }
 0x343   : > { %v3659_v47 = vadd.f32 %v3628_v49, %v3627_v41  ;;  %v3696_v62 = vmul.f32 %v3627_v41, %v3627_v41  ;;  %v3697_v35 = vmul.f32 %v3628_v49, %v3628_v49 }
 0x345   : > { %v3660_v61 = vadd.f32 %v3659_v47, %v3629_v33  ;;  %v3728_v45 = vadd.f32 %v3697_v35, %v3696_v62 }
 0x347   : > { %v3729_v23 = vadd.f32 %v3728_v45, %v3698_v27  ;;  %v3661_v5 = vadd.f32 %v3660_v61, %v3630_v12 }
 0x349   : > { %v3730_v17 = vadd.f32 %v3729_v23, %v3699_v50 }
 0x34c   : > { %v4604_v31 = vpop.f32.mrb[116].mxu1 }
 0x34d   : > { %v4605_v38 = vpop.f32.mrb[117].mxu1 }
 0x34e   : > { %v4606_v26 = vadd.f32 %v4605_v38, %v4604_v31  ;;  %v4607_v6 = vpop.f32.mrb[118].mxu1 }
 0x34f   : > { %v4608_v56 = vpop.f32.mrb[119].mxu1 }
 0x350   : > { %v4609_v13 = vadd.f32 %v4608_v56, %v4607_v6  ;;  %v7499_v9 = vadd.f32 %v4606_v26, %v7368_v7 }
 0x351   : > { %v4692_v51 = vpop.f32.mrb[116].mxu0 }
 0x352   : > { %v3365_v3 = vadd.f32 %v4692_v51, %v7406_v18  ;;  %v3356_v54 = vpop.f32.mrb[117].mxu0  ;;  %v7503_v36 = vadd.f32 %v4609_v13, %v7376_v39 }
 0x353   : > { %v3357_v59 = vadd.f32 %v3356_v54, %v7387_v19  ;;  %v4693_v60 = vpop.f32.mrb[118].mxu0 }
 0x354   : > { %v3368_v30 = vadd.f32 %v4693_v60, %v7411_v15  ;;  %v3359_v4 = vpop.f32.mrb[119].mxu0 }
 0x355   : > { %v3360_v21 = vadd.f32 %v3359_v4, %v7393_v63 }
 0x356   : > { %v3470_v42 = vpack.c.bf16 %v3368_v30, %v3365_v3 }
 0x357   : > { %v3469_v32 = vpack.c.bf16 %v3360_v21, %v3357_v59 }
 0x358   : > { %4185 = vst [vmem:[%s7493_s8 + $0x18] sm:$0xff] %v3470_v42   ;;  %v3633_v1 = vunpack.c.l.bf16 %v3470_v42  ;;  %v3634_v34 = vunpack.c.h.bf16 %v3470_v42 }
 0x359   : > { %4184 = vst [vmem:[%s7493_s8 + $0x10] sm:$0xff] %v3469_v32   ;;  %v3631_v7 = vunpack.c.l.bf16 %v3469_v32  ;;  %v3632_v44 = vunpack.c.h.bf16 %v3469_v32 }
 0x35a   : > { %v3702_v19 = vmul.f32 %v3633_v1, %v3633_v1  ;;  %v3703_v15 = vmul.f32 %v3634_v34, %v3634_v34 }
 0x35b   : > { %v3662_v18 = vadd.f32 %v3661_v5, %v3631_v7  ;;  %v3700_v22 = vmul.f32 %v3631_v7, %v3631_v7  ;;  %v3701_v33 = vmul.f32 %v3632_v44, %v3632_v44 }
 0x35d   : > { %v3663_v39 = vadd.f32 %v3662_v18, %v3632_v44  ;;  %v3731_v41 = vadd.f32 %v3730_v17, %v3700_v22 }
 0x35f   : > { %v3664_v49 = vadd.f32 %v3663_v39, %v3633_v1  ;;  %v3732_v12 = vadd.f32 %v3731_v41, %v3701_v33 }
 0x361   : > { %v3733_v47 = vadd.f32 %v3732_v12, %v3702_v19  ;;  %v3665_v62 = vadd.f32 %v3664_v49, %v3634_v34 }
 0x363   : > { %v3734_v63 = vadd.f32 %v3733_v47, %v3703_v15 }
 0x364   : > { %v4610_v35 = vpop.f32.mrb[120].mxu1 }
 0x365   : > { %v4611_v27 = vpop.f32.mrb[121].mxu1 }
 0x366   : > { %v4612_v61 = vadd.f32 %v4611_v27, %v4610_v35  ;;  %v4613_v45 = vpop.f32.mrb[122].mxu1 }
 0x367   : > { %v4614_v50 = vpop.f32.mrb[123].mxu1 }
 0x368   : > { %v4615_v23 = vadd.f32 %v4614_v50, %v4613_v45  ;;  %v7511_v5 = vadd.f32 %v4612_v61, %v7381_v2 }
 0x369   : > { %v4696_v31 = vpop.f32.mrb[120].mxu0 }
 0x36a   : > { %v3381_v17 = vadd.f32 %v4696_v31, %v7446_v24  ;;  %v3372_v38 = vpop.f32.mrb[121].mxu0  ;;  %v7515_v26 = vadd.f32 %v4615_v23, %v7384_v11 }
 0x36b   : > { %v3373_v6 = vadd.f32 %v3372_v38, %v7425_v48  ;;  %v4697_v56 = vpop.f32.mrb[122].mxu0 }
 0x36c   : > { %v3384_v13 = vadd.f32 %v4697_v56, %v7449_v52  ;;  %v3375_v51 = vpop.f32.mrb[123].mxu0 }
 0x36d   : > { %v3376_v3 = vadd.f32 %v3375_v51, %v7430_v55 }
 0x36e   : > { %v3472_v54 = vpack.c.bf16 %v3384_v13, %v3381_v17 }
 0x36f   : > { %v3471_v59 = vpack.c.bf16 %v3376_v3, %v3373_v6 }
 0x370   : > { %4187 = vst [vmem:[%s7493_s8 + $0x28] sm:$0xff] %v3472_v54   ;;  %v3637_v30 = vunpack.c.l.bf16 %v3472_v54  ;;  %v3638_v21 = vunpack.c.h.bf16 %v3472_v54 }
 0x371   : > { %4186 = vst [vmem:[%s7493_s8 + $0x20] sm:$0xff] %v3471_v59   ;;  %v3635_v2 = vunpack.c.l.bf16 %v3471_v59  ;;  %v3636_v60 = vunpack.c.h.bf16 %v3471_v59 }
 0x372   : > { %v3706_v48 = vmul.f32 %v3637_v30, %v3637_v30  ;;  %v3707_v52 = vmul.f32 %v3638_v21, %v3638_v21 }
 0x373   : > { %v3666_v24 = vadd.f32 %v3665_v62, %v3635_v2  ;;  %v3704_v4 = vmul.f32 %v3635_v2, %v3635_v2  ;;  %v3705_v42 = vmul.f32 %v3636_v60, %v3636_v60 }
 0x375   : > { %v3667_v11 = vadd.f32 %v3666_v24, %v3636_v60  ;;  %v3735_v32 = vadd.f32 %v3734_v63, %v3704_v4 }
 0x377   : > { %v3668_v7 = vadd.f32 %v3667_v11, %v3637_v30  ;;  %v3736_v44 = vadd.f32 %v3735_v32, %v3705_v42 }
 0x379   : > { %v3737_v1 = vadd.f32 %v3736_v44, %v3706_v48  ;;  %v3669_v18 = vadd.f32 %v3668_v7, %v3638_v21 }
 0x37b   : > { %v3738_v55 = vadd.f32 %v3737_v1, %v3707_v52 }
 0x37c   : > { %v4616_v22 = vpop.f32.mrb[124].mxu1 }
 0x37d   : > { %v4617_v34 = vpop.f32.mrb[125].mxu1 }
 0x37e   : > { %v4618_v39 = vadd.f32 %v4617_v34, %v4616_v22  ;;  %v4619_v33 = vpop.f32.mrb[126].mxu1 }
 0x37f   : > { %v4620_v41 = vpop.f32.mrb[127].mxu1 }
 0x380   : > { %v4621_v19 = vadd.f32 %v4620_v41, %v4619_v33  ;;  %v7523_v49 = vadd.f32 %v4618_v39, %v7397_v20 }
 0x381   : > { %v4700_v12 = vpop.f32.mrb[124].mxu0 }
 0x382   : > { %v3397_v15 = vadd.f32 %v4700_v12, %v7474_v37  ;;  %v3388_v47 = vpop.f32.mrb[125].mxu0  ;;  %v7527_v62 = vadd.f32 %v4621_v19, %v7401_v46 }
 0x383   : > { %v3389_v63 = vadd.f32 %v3388_v47, %v7462_v16  ;;  %v4701_v35 = vpop.f32.mrb[126].mxu0 }
 0x384   : > { %v3400_v27 = vadd.f32 %v4701_v35, %v7477_v57  ;;  %v3391_v61 = vpop.f32.mrb[127].mxu0 }
 0x385   : > { %v3392_v45 = vadd.f32 %v3391_v61, %v7465_v14 }
 0x386   : > { %v3474_v50 = vpack.c.bf16 %v3400_v27, %v3397_v15 }
 0x387   : > { %v3473_v23 = vpack.c.bf16 %v3392_v45, %v3389_v63 }
 0x388   : > { %4189 = vst [vmem:[%s7493_s8 + $0x38] sm:$0xff] %v3474_v50   ;;  %v3641_v17 = vunpack.c.l.bf16 %v3474_v50  ;;  %v3642_v6 = vunpack.c.h.bf16 %v3474_v50 }
 0x389   : > { %4188 = vst [vmem:[%s7493_s8 + $0x30] sm:$0xff] %v3473_v23   ;;  %v3639_v20 = vunpack.c.l.bf16 %v3473_v23  ;;  %v3640_v31 = vunpack.c.h.bf16 %v3473_v23 }
 0x38a   : > { %v3710_v16 = vmul.f32 %v3641_v17, %v3641_v17  ;;  %v3711_v57 = vmul.f32 %v3642_v6, %v3642_v6 }
 0x38b   : > { %v3670_v37 = vadd.f32 %v3669_v18, %v3639_v20  ;;  %v3708_v38 = vmul.f32 %v3639_v20, %v3639_v20  ;;  %v3709_v56 = vmul.f32 %v3640_v31, %v3640_v31 }
 0x38d   : > { %v3671_v46 = vadd.f32 %v3670_v37, %v3640_v31  ;;  %v3739_v13 = vadd.f32 %v3738_v55, %v3708_v38 }
 0x38f   : > { %v3672_v51 = vadd.f32 %v3671_v46, %v3641_v17  ;;  %v3740_v3 = vadd.f32 %v3739_v13, %v3709_v56 }
 0x391   : > { %v3741_v54 = vadd.f32 %v3740_v3, %v3710_v16  ;;  %v3673_v59 = vadd.f32 %v3672_v51, %v3642_v6 }
 0x393   : > { %v3742_v14 = vadd.f32 %v3741_v54, %v3711_v57 }
 0x394   : > { %v4622_v2 = vpop.f32.mrb[128].mxu1 }
 0x395   : > { %v4623_v60 = vpop.f32.mrb[129].mxu1 }
 0x396   : > { %v4624_v30 = vadd.f32 %v4623_v60, %v4622_v2  ;;  %v4625_v24 = vpop.f32.mrb[130].mxu1 }
 0x397   : > { %v4626_v4 = vpop.f32.mrb[131].mxu1 }
 0x398   : > { %v4627_v21 = vadd.f32 %v4626_v4, %v4625_v24  ;;  %v7535_v11 = vadd.f32 %v4624_v30, %v7416_v25 }
 0x399   : > { %v4704_v42 = vpop.f32.mrb[128].mxu0 }
 0x39a   : > { %v3413_v32 = vadd.f32 %v4704_v42, %v7499_v9  ;;  %v3404_v48 = vpop.f32.mrb[129].mxu0  ;;  %v7539_v7 = vadd.f32 %v4627_v21, %v7420_v28 }
 0x39b   : > { %v3405_v44 = vadd.f32 %v3404_v48, %v7480_v0  ;;  %v4705_v52 = vpop.f32.mrb[130].mxu0 }
 0x39c   : > { %v3416_v1 = vadd.f32 %v4705_v52, %v7503_v36  ;;  %v3407_v18 = vpop.f32.mrb[131].mxu0 }
 0x39d   : > { %v3408_v55 = vadd.f32 %v3407_v18, %v7483_v8 }
 0x39e   : > { %v3476_v22 = vpack.c.bf16 %v3416_v1, %v3413_v32 }
 0x39f   : > { %v3475_v34 = vpack.c.bf16 %v3408_v55, %v3405_v44 }
 0x3a0   : > { %4191 = vst [vmem:[%s7493_s8 + $0x48] sm:$0xff] %v3476_v22   ;;  %v3645_v33 = vunpack.c.l.bf16 %v3476_v22  ;;  %v3646_v19 = vunpack.c.h.bf16 %v3476_v22 }
 0x3a1   : > { %4190 = vst [vmem:[%s7493_s8 + $0x40] sm:$0xff] %v3475_v34   ;;  %v3643_v25 = vunpack.c.l.bf16 %v3475_v34  ;;  %v3644_v39 = vunpack.c.h.bf16 %v3475_v34 }
 0x3a2   : > { %v3714_v0 = vmul.f32 %v3645_v33, %v3645_v33  ;;  %v3715_v36 = vmul.f32 %v3646_v19, %v3646_v19 }
 0x3a3   : > { %v3674_v9 = vadd.f32 %v3673_v59, %v3643_v25  ;;  %v3712_v41 = vmul.f32 %v3643_v25, %v3643_v25  ;;  %v3713_v12 = vmul.f32 %v3644_v39, %v3644_v39 }
 0x3a5   : > { %v3675_v28 = vadd.f32 %v3674_v9, %v3644_v39  ;;  %v3743_v15 = vadd.f32 %v3742_v14, %v3712_v41 }
 0x3a7   : > { %v3676_v47 = vadd.f32 %v3675_v28, %v3645_v33  ;;  %v3744_v63 = vadd.f32 %v3743_v15, %v3713_v12 }
 0x3a9   : > { %v3745_v35 = vadd.f32 %v3744_v63, %v3714_v0  ;;  %v3677_v27 = vadd.f32 %v3676_v47, %v3646_v19 }
 0x3ab   : > { %v3746_v8 = vadd.f32 %v3745_v35, %v3715_v36 }
 0x3ac   : > { %v4628_v61 = vpop.f32.mrb[132].mxu1 }
 0x3ad   : > { %v4629_v45 = vpop.f32.mrb[133].mxu1 }
 0x3ae   : > { %v4630_v50 = vadd.f32 %v4629_v45, %v4628_v61  ;;  %v4631_v23 = vpop.f32.mrb[134].mxu1 }
 0x3af   : > { %v4632_v20 = vpop.f32.mrb[135].mxu1 }
 0x3b0   : > { %v4633_v31 = vadd.f32 %v4632_v20, %v4631_v23  ;;  %v3284_v17 = vadd.f32 %v4630_v50, %v7434_v58 }
 0x3b1   : > { %v4708_v37 = vpop.f32.mrb[132].mxu0 }
 0x3b2   : > { %v3429_v38 = vadd.f32 %v4708_v37, %v7523_v49  ;;  %v3420_v6 = vpop.f32.mrb[133].mxu0  ;;  %v3287_v46 = vadd.f32 %v4633_v31, %v7438_v29 }
 0x3b3   : > { %v3421_v56 = vadd.f32 %v3420_v6, %v7511_v5  ;;  %v4709_v13 = vpop.f32.mrb[134].mxu0 }
 0x3b4   : > { %v3432_v16 = vadd.f32 %v4709_v13, %v7527_v62  ;;  %v3423_v51 = vpop.f32.mrb[135].mxu0 }
 0x3b5   : > { %v3424_v3 = vadd.f32 %v3423_v51, %v7515_v26 }
 0x3b6   : > { %v3478_v57 = vpack.c.bf16 %v3432_v16, %v3429_v38 }
 0x3b7   : > { %v3477_v54 = vpack.c.bf16 %v3424_v3, %v3421_v56 }
 0x3b8   : > { %4193 = vst [vmem:[%s7493_s8 + $0x58] sm:$0xff] %v3478_v57   ;;  %v3649_v14 = vunpack.c.l.bf16 %v3478_v57  ;;  %v3650_v60 = vunpack.c.h.bf16 %v3478_v57 }
 0x3b9   : > { %4192 = vst [vmem:[%s7493_s8 + $0x50] sm:$0xff] %v3477_v54   ;;  %v3647_v59 = vunpack.c.l.bf16 %v3477_v54  ;;  %v3648_v58 = vunpack.c.h.bf16 %v3477_v54 }
 0x3ba   : > { %v3718_v5 = vmul.f32 %v3649_v14, %v3649_v14  ;;  %v3719_v62 = vmul.f32 %v3650_v60, %v3650_v60 }
 0x3bb   : > { %v3678_v2 = vadd.f32 %v3677_v27, %v3647_v59  ;;  %v3716_v49 = vmul.f32 %v3647_v59, %v3647_v59  ;;  %v3717_v29 = vmul.f32 %v3648_v58, %v3648_v58 }
 0x3bd   : > { %v3679_v30 = vadd.f32 %v3678_v2, %v3648_v58  ;;  %v3747_v24 = vadd.f32 %v3746_v8, %v3716_v49 }
 0x3bf   : > { %v3680_v4 = vadd.f32 %v3679_v30, %v3649_v14  ;;  %v3748_v21 = vadd.f32 %v3747_v24, %v3717_v29 }
 0x3c1   : > { %v3749_v42 = vadd.f32 %v3748_v21, %v3718_v5  ;;  %v3681_v32 = vadd.f32 %v3680_v4, %v3650_v60 }
 0x3c3   : > { %v3750_v26 = vadd.f32 %v3749_v42, %v3719_v62 }
 0x3c4   : > { %v4634_v48 = vpop.f32.mrb[136].mxu1 }
 0x3c5   : > { %v4635_v44 = vpop.f32.mrb[137].mxu1 }
 0x3c6   : > { %v4636_v52 = vadd.f32 %v4635_v44, %v4634_v48  ;;  %v4637_v1 = vpop.f32.mrb[138].mxu1 }
 0x3c7   : > { %v4638_v18 = vpop.f32.mrb[139].mxu1 }
 0x3c8   : > { %v4639_v55 = vadd.f32 %v4638_v18, %v4637_v1  ;;  %v3292_v22 = vadd.f32 %v4636_v52, %v7453_v43 }
 0x3c9   : > { %v4712_v34 = vpop.f32.mrb[136].mxu0 }
 0x3ca   : > { %v3445_v25 = vadd.f32 %v4712_v34, %v3284_v17  ;;  %v3436_v39 = vpop.f32.mrb[137].mxu0  ;;  %v3295_v33 = vadd.f32 %v4639_v55, %v7457_v53 }
 0x3cb   : > { %v3437_v9 = vadd.f32 %v3436_v39, %v7535_v11  ;;  %v4713_v41 = vpop.f32.mrb[138].mxu0 }
 0x3cc   : > { %v3448_v19 = vadd.f32 %v4713_v41, %v3287_v46  ;;  %v3439_v28 = vpop.f32.mrb[139].mxu0 }
 0x3cd   : > { %v3440_v12 = vadd.f32 %v3439_v28, %v7539_v7 }
 0x3ce   : > { %v3480_v15 = vpack.c.bf16 %v3448_v19, %v3445_v25 }
 0x3cf   : > { %v3479_v0 = vpack.c.bf16 %v3440_v12, %v3437_v9 }
 0x3d0   : > { %4195 = vst [vmem:[%s7493_s8 + $0x68] sm:$0xff] %v3480_v15   ;;  %v3653_v36 = vunpack.c.l.bf16 %v3480_v15  ;;  %v3654_v27 = vunpack.c.h.bf16 %v3480_v15 }
 0x3d1   : > { %4194 = vst [vmem:[%s7493_s8 + $0x60] sm:$0xff] %v3479_v0   ;;  %v3651_v47 = vunpack.c.l.bf16 %v3479_v0  ;;  %v3652_v63 = vunpack.c.h.bf16 %v3479_v0 }
 0x3d2   : > { %v3722_v45 = vmul.f32 %v3653_v36, %v3653_v36  ;;  %v3723_v23 = vmul.f32 %v3654_v27, %v3654_v27 }
 0x3d3   : > { %v3682_v43 = vadd.f32 %v3681_v32, %v3651_v47  ;;  %v3720_v35 = vmul.f32 %v3651_v47, %v3651_v47  ;;  %v3721_v61 = vmul.f32 %v3652_v63, %v3652_v63 }
 0x3d5   : > { %v3683_v8 = vadd.f32 %v3682_v43, %v3652_v63  ;;  %v3751_v53 = vadd.f32 %v3750_v26, %v3720_v35 }
 0x3d7   : > { %v3684_v11 = vadd.f32 %v3683_v8, %v3653_v36  ;;  %v3752_v50 = vadd.f32 %v3751_v53, %v3721_v61 }
 0x3d9   : > { %v3753_v20 = vadd.f32 %v3752_v50, %v3722_v45  ;;  %v3685_v31 = vadd.f32 %v3684_v11, %v3654_v27 }
 0x3db   : > { %v3754_v7 = vadd.f32 %v3753_v20, %v3723_v23 }
 0x3dc   : > { %v4640_v17 = vpop.f32.mrb[140].mxu1 }
 0x3dd   : > { %v4641_v37 = vpop.f32.mrb[141].mxu1 }
 0x3de   : > { %v4642_v38 = vadd.f32 %v4641_v37, %v4640_v17  ;;  %v4643_v6 = vpop.f32.mrb[142].mxu1 }
 0x3df   : > { %v4644_v46 = vpop.f32.mrb[143].mxu1 }
 0x3e0   : > { %v4645_v56 = vadd.f32 %v4644_v46, %v4643_v6  ;;  %v3300_v13 = vadd.f32 %v4642_v38, %v7468_v10 }
 0x3e1   : > { %v4716_v16 = vpop.f32.mrb[140].mxu0 }
 0x3e2   : > { %v3461_v51 = vadd.f32 %v4716_v16, %v3300_v13  ;;  %v3452_v3 = vpop.f32.mrb[141].mxu0  ;;  %v3303_v57 = vadd.f32 %v4645_v56, %v7471_v40 }
 0x3e3   : > { %v3453_v54 = vadd.f32 %v3452_v3, %v3292_v22  ;;  %v4717_v59 = vpop.f32.mrb[142].mxu0 }
 0x3e4   : > { %v3464_v58 = vadd.f32 %v4717_v59, %v3303_v57  ;;  %v3455_v14 = vpop.f32.mrb[143].mxu0 }
 0x3e5   : > { %v3456_v2 = vadd.f32 %v3455_v14, %v3295_v33 }
 0x3e6   : > { %v3482_v49 = vpack.c.bf16 %v3464_v58, %v3461_v51 }
 0x3e7   : > { %v3481_v60 = vpack.c.bf16 %v3456_v2, %v3453_v54 }
 0x3e8   : > { %4197 = vst [vmem:[%s7493_s8 + $0x78] sm:$0xff] %v3482_v49   ;;  %v3657_v24 = vunpack.c.l.bf16 %v3482_v49  ;;  %v3658_v10 = vunpack.c.h.bf16 %v3482_v49 }
 0x3e9   : > { %4196 = vst [vmem:[%s7493_s8 + $0x70] sm:$0xff] %v3481_v60   ;;  %v3655_v30 = vunpack.c.l.bf16 %v3481_v60  ;;  %v3656_v29 = vunpack.c.h.bf16 %v3481_v60 }
 0x3ea   : > { %v3726_v32 = vmul.f32 %v3657_v24, %v3657_v24  ;;  %v3727_v48 = vmul.f32 %v3658_v10, %v3658_v10 }
 0x3eb   : > { %v3686_v5 = vadd.f32 %v3685_v31, %v3655_v30  ;;  %v3724_v4 = vmul.f32 %v3655_v30, %v3655_v30  ;;  %v3725_v62 = vmul.f32 %v3656_v29, %v3656_v29 }
 0x3ed   : > { %v3687_v21 = vadd.f32 %v3686_v5, %v3656_v29  ;;  %v3755_v42 = vadd.f32 %v3754_v7, %v3724_v4 }
 0x3ef   : > { %v3688_v40 = vadd.f32 %v3687_v21, %v3657_v24  ;;  %v3756_v26 = vadd.f32 %v3755_v42, %v3725_v62 }
 0x3f1   : > { %v3689_v44 = vadd.f32 %v3688_v40, %v3658_v10  ;;  %v3757_v52 = vadd.f32 %v3756_v26, %v3726_v32 }
 0x3f3   : > { %v3690_v1 = vrot.slane %v3689_v44, 4  ;;  %v3758_v18 = vadd.f32 %v3757_v52, %v3727_v48 }
 0x3f5   : > { %v3691_v55 = vadd.f32 %v3690_v1, %v3689_v44  ;;  %v3759_v22 = vrot.slane %v3758_v18, 4 }
 0x3f7   : > { %v3692_v34 = vrot.slane %v3691_v55, 2  ;;  %v3760_v25 = vadd.f32 %v3759_v22, %v3758_v18 }
 0x3f9   : > { %v3693_v39 = vadd.f32 %v3692_v34, %v3691_v55  ;;  %v3761_v33 = vrot.slane %v3760_v25, 2 }
 0x3fb   : > { %v3694_v9 = vrot.slane %v3693_v39, 1  ;;  %v3762_v41 = vadd.f32 %v3761_v33, %v3760_v25 }
 0x3fd   : > { %v3763_v19 = vrot.slane %v3762_v41, 1  ;;  %v3695_v28 = vadd.f32 %v3694_v9, %v3693_v39 }
 0x3ff   : > { %v3764_v12 = vadd.f32 %v3763_v19, %v3762_v41 }
 0x401   : > { %v3766_v15 = vsel %vm3765_vm2, %v3695_v28, %v3764_v12 }
 0x402   : > { %3767 = vst [vmem:[%s290_s12] sm:$0x3] %v3766_v15 }
 0x403 PF: > { %s17_s21 = sadd.s32 1, %s4958_s21  }
 0x404   : > { %p14_p4 = scmp.ge.s32.totalorder %s17_s21, 4  }
 0x406   :  { %16 = sbr.rel (!%p14_p4) target bundleno = 1 (0x1), region = 88 }

</bundles_post_ra>
